<compile_context>
chip_gen: v7x
topology: tpu7x:2x2x1
jax: 0.10.0
libtpu: 0.0.40
codegen_flags: <defaults>
</compile_context>

<pallas_src>
import functools

import jax
import jax.numpy as jnp
from jax.experimental import pallas as pl
from jax.experimental.pallas import tpu as pltpu

EPS = 1e-5  # PyTorch InstanceNorm2d default eps


def _round_up(x, m):
    return ((x + m - 1) // m) * m


def _pick_tile(dim, candidates):
    for c in candidates:
        if dim % c == 0:
            return c
    return 128


# ----------------------------------------------------------------------------
# Pass 1: tiled matmul (+optional bias) (+optional per-(n,c) sum / sumsq stats)
# Grid: (batch, Cout_tiles, M_tiles, K_tiles); K innermost reduction axis.
# ----------------------------------------------------------------------------
def _matmul_kernel(has_bias, want_stats, *refs):
    p_ref, w_ref = refs[0], refs[1]
    idx = 2
    if has_bias:
        b_ref = refs[idx]
        idx += 1
    y_ref = refs[idx]
    idx += 1
    if want_stats:
        ssum_ref, ssq_ref = refs[idx], refs[idx + 1]
        idx += 2
    acc_ref = refs[-1]

    k = pl.program_id(3)
    nk = pl.num_programs(3)
    mt = pl.program_id(2)

    @pl.when(k == 0)
    def _():
        acc_ref[...] = jnp.zeros_like(acc_ref)

    acc_ref[...] += jnp.dot(p_ref[...], w_ref[...],
                            preferred_element_type=jnp.float32)

    if want_stats:
        # Stats block (n, cout-tile) stays VMEM-resident across the whole (M, K) loop.
        @pl.when(jnp.logical_and(k == nk - 1, mt == 0))
        def _():
            ssum_ref[...] = jnp.zeros_like(ssum_ref)
            ssq_ref[...] = jnp.zeros_like(ssq_ref)

    @pl.when(k == nk - 1)
    def _():
        y = acc_ref[...]
        if has_bias:
            y = y + b_ref[...]
        y_ref[...] = y.astype(y_ref.dtype)
        if want_stats:
            ssum_ref[...] += jnp.sum(y, axis=0, keepdims=True)
            ssq_ref[...] += jnp.sum(y * y, axis=0, keepdims=True)


def _matmul_pass(P, w_mat, bias, *, norm, y_dtype):
    """P: (N, M, K) float.  w_mat: (K, Cout).  Returns padded y (+ stats) and tiles."""
    n, m, k = P.shape
    cout = w_mat.shape[1]
    tm = 512 if m >= 512 else _round_up(m, 16)
    m_pad = _round_up(m, tm)
    k_pad = _round_up(k, 128)
    tk = _pick_tile(k_pad, (512, 256, 128))
    c_pad = _round_up(cout, 128)
    tc = _pick_tile(c_pad, (256, 128))

    Pp = jnp.pad(P.astype(jnp.bfloat16), ((0, 0), (0, m_pad - m), (0, k_pad - k)))
    Wp = jnp.pad(w_mat.astype(jnp.bfloat16), ((0, k_pad - k), (0, c_pad - cout)))

    grid = (n, c_pad // tc, m_pad // tm, k_pad // tk)

    in_specs = [
        pl.BlockSpec((None, tm, tk), lambda b, c, mm, kk: (b, mm, kk)),
        pl.BlockSpec((tk, tc), lambda b, c, mm, kk: (kk, c)),
    ]
    inputs = [Pp, Wp]
    has_bias = bias is not None
    if has_bias:
        bp = jnp.pad(bias.astype(jnp.float32).reshape(1, cout),
                     ((0, 0), (0, c_pad - cout)))
        in_specs.append(pl.BlockSpec((1, tc), lambda b, c, mm, kk: (0, c)))
        inputs.append(bp)

    out_shapes = [jax.ShapeDtypeStruct((n, m_pad, c_pad), y_dtype)]
    out_specs = [pl.BlockSpec((None, tm, tc), lambda b, c, mm, kk: (b, mm, c))]
    if norm:
        stat_shape = jax.ShapeDtypeStruct((n, 1, c_pad), jnp.float32)
        stat_spec = pl.BlockSpec((None, 1, tc), lambda b, c, mm, kk: (b, 0, c))
        out_shapes += [stat_shape, stat_shape]
        out_specs += [stat_spec, stat_spec]

    outs = pl.pallas_call(
        functools.partial(_matmul_kernel, has_bias, norm),
        out_shape=tuple(out_shapes),
        grid_spec=pltpu.PrefetchScalarGridSpec(
            num_scalar_prefetch=0,
            grid=grid,
            in_specs=in_specs,
            out_specs=tuple(out_specs),
            scratch_shapes=[pltpu.VMEM((tm, tc), jnp.float32)],
        ),
        compiler_params=pltpu.CompilerParams(
            dimension_semantics=("parallel", "parallel", "arbitrary", "arbitrary"),
            vmem_limit_bytes=32 * 1024 * 1024,
        ),
    )(*inputs)

    y_pad = outs[0]
    ssum = outs[1] if norm else None
    ssq = outs[2] if norm else None
    return y_pad, ssum, ssq, (tm, tc)


# ----------------------------------------------------------------------------
# Pass 2: InstanceNorm (from sum / sumsq stats) + residual add + ReLU.
# Grid: (batch, Cout_tiles, M_tiles), all parallel.
# ----------------------------------------------------------------------------
def _norm_kernel(inv_count, do_relu, has_res, *refs):
    if has_res:
        y_ref, sum_ref, sq_ref, r_ref, o_ref = refs
    else:
        y_ref, sum_ref, sq_ref, o_ref = refs
    y = y_ref[...].astype(jnp.float32)
    mean = sum_ref[...] * inv_count                                  # (1, TC)
    var = jnp.maximum(sq_ref[...] * inv_count - mean * mean, 0.0)
    y = (y - mean) * jax.lax.rsqrt(var + EPS)
    if has_res:
        y = y + r_ref[...].astype(jnp.float32)
    if do_relu:
        y = jnp.maximum(y, 0.0)
    o_ref[...] = y.astype(o_ref.dtype)


def _norm_pass(y_pad, ssum, ssq, res_pad, *, inv_count, relu, out_dtype, tm, tc):
    n, m_pad, c_pad = y_pad.shape
    grid = (n, c_pad // tc, m_pad // tm)
    tile_spec = pl.BlockSpec((None, tm, tc), lambda b, c, mm: (b, mm, c))
    stat_spec = pl.BlockSpec((None, 1, tc), lambda b, c, mm: (b, 0, c))
    in_specs = [tile_spec, stat_spec, stat_spec]
    inputs = [y_pad, ssum, ssq]
    has_res = res_pad is not None
    if has_res:
        in_specs.append(tile_spec)
        inputs.append(res_pad)
    return pl.pallas_call(
        functools.partial(_norm_kernel, float(inv_count), relu, has_res),
        out_shape=jax.ShapeDtypeStruct((n, m_pad, c_pad), out_dtype),
        grid_spec=pltpu.PrefetchScalarGridSpec(
            num_scalar_prefetch=0,
            grid=grid,
            in_specs=in_specs,
            out_specs=tile_spec,
        ),
        compiler_params=pltpu.CompilerParams(
            dimension_semantics=("parallel", "parallel", "parallel"),
            vmem_limit_bytes=32 * 1024 * 1024,
        ),
    )(*inputs)


# ----------------------------------------------------------------------------
# JAX-side layout glue: padding and im2col extraction
# ----------------------------------------------------------------------------
def _im2col(x, khs, kws, stride):
    """x: already-padded (N, Hp, Wp, Cin).  Columns ordered (kh, kw, cin)."""
    n, hp, wp, cin = x.shape
    ho = (hp - khs) // stride + 1
    wo = (wp - kws) // stride + 1
    cols = []
    for kh in range(khs):
        for kw in range(kws):
            p = x[:, kh:kh + stride * (ho - 1) + 1:stride,
                     kw:kw + stride * (wo - 1) + 1:stride, :]
            cols.append(p.reshape(n, ho * wo, cin))
    return jnp.concatenate(cols, axis=2), ho, wo


def conv2d_block(x, w_hwio, b, *, stride, pad, pad_mode, norm, relu,
                 residual=None, out_dtype=jnp.bfloat16):
    """x: (N, H, W, Cin) NHWC.  w_hwio: (KH, KW, Cin, Cout)."""
    n, _, _, cin = x.shape
    khs, kws, _, cout = w_hwio.shape
    if pad > 0:
        mode = "reflect" if pad_mode == "reflect" else "constant"
        x = jnp.pad(x, ((0, 0), (pad, pad), (pad, pad), (0, 0)), mode=mode)
    P, ho, wo = _im2col(x, khs, kws, stride)
    w_mat = w_hwio.reshape(khs * kws * cin, cout)
    m = ho * wo

    if norm:
        # Bias dropped: InstanceNorm's mean subtraction cancels it exactly.
        y_pad, ssum, ssq, (tm, tc) = _matmul_pass(P, w_mat, None, norm=True,
                                                  y_dtype=jnp.bfloat16)
        m_pad, c_pad = y_pad.shape[1], y_pad.shape[2]
        res_pad = None
        if residual is not None:
            r = residual.reshape(n, m, cout).astype(jnp.bfloat16)
            res_pad = jnp.pad(r, ((0, 0), (0, m_pad - m), (0, c_pad - cout)))
        out_pad = _norm_pass(y_pad, ssum, ssq, res_pad, inv_count=1.0 / m,
                             relu=relu, out_dtype=out_dtype, tm=tm, tc=tc)
    else:
        # Only the final 7x7 conv hits this path (bias, no norm, no activation).
        out_pad, _, _, _ = _matmul_pass(P, w_mat, b, norm=False, y_dtype=out_dtype)
        if relu:
            out_pad = jnp.maximum(out_pad, 0)
    return out_pad[:, :m, :cout].reshape(n, ho, wo, cout)


def conv_transpose2d_block(x, w_ct, b, *, relu=True, out_dtype=jnp.bfloat16):
    """ConvTranspose2d(k=3, s=2, p=1, op=1) + InstanceNorm + ReLU via 4 stride phases
    packed into one matmul.  x: (N, H, W, Cin) NHWC; w_ct: PyTorch (Cin, Cout, 3, 3)."""
    del b  # bias cancelled by InstanceNorm
    cin, cout, _, _ = w_ct.shape
    n, h, w, _ = x.shape
    m = h * w

    # 2x2 "im2col" of x with a bottom/right zero halo; column block q = da*2 + db.
    xp = jnp.pad(x, ((0, 0), (0, 1), (0, 1), (0, 0)))
    cols = [xp[:, da:da + h, db:db + w, :].reshape(n, m, cin)
            for da in range(2) for db in range(2)]
    P = jnp.concatenate(cols, axis=2)                       # (N, M, 4*Cin)

    # Block weight: Wbig[q*cin:(q+1)*cin, p*cout:(p+1)*cout] = tap for output phase
    # p = (pa, pb) coming from input offset q = (da, db).  out[2a+pa, 2b+pb].
    wt = w_ct
    zero = jnp.zeros((cin, cout), wt.dtype)
    tap = lambda kh, kw: wt[:, :, kh, kw]
    phase_taps = [
        [tap(1, 1), zero,      zero,      zero],            # p = (0, 0)
        [tap(1, 2), tap(1, 0), zero,      zero],            # p = (0, 1)
        [tap(2, 1), zero,      tap(0, 1), zero],            # p = (1, 0)
        [tap(2, 2), tap(2, 0), tap(0, 2), tap(0, 0)],       # p = (1, 1)
    ]
    w_big = jnp.concatenate(
        [jnp.concatenate([phase_taps[p][q] for p in range(4)], axis=1)
         for q in range(4)], axis=0)                        # (4*Cin, 4*Cout)

    y_pad, ssum, ssq, (tm, tc) = _matmul_pass(P, w_big, None, norm=True,
                                              y_dtype=jnp.bfloat16)
    c_pad = y_pad.shape[2]

    # InstanceNorm statistics must be pooled over the 4 output phases of each channel.
    def _phase_merge(st):
        t = st[:, :, :4 * cout].reshape(n, 1, 4, cout).sum(axis=2)
        t = jnp.tile(t, (1, 1, 4))
        return jnp.pad(t, ((0, 0), (0, 0), (0, c_pad - 4 * cout)))

    out_pad = _norm_pass(y_pad, _phase_merge(ssum), _phase_merge(ssq), None,
                         inv_count=1.0 / (4 * m), relu=relu,
                         out_dtype=out_dtype, tm=tm, tc=tc)

    # Interleave the 4 phases back into the (2H, 2W) output.
    y4 = out_pad[:, :m, :4 * cout].reshape(n, h, w, 2, 2, cout)
    return jnp.transpose(y4, (0, 1, 3, 2, 4, 5)).reshape(n, 2 * h, 2 * w, cout)


# ----------------------------------------------------------------------------
# Deterministic parameter initialization (synthetic; matches module shapes)
# ----------------------------------------------------------------------------
def _init_conv(key, cin, cout, k):
    kw, kb = jax.random.split(key)
    w = jax.random.normal(kw, (cout, cin, k, k), jnp.float32) / jnp.sqrt(cin * k * k)
    b = 0.01 * jax.random.normal(kb, (cout,), jnp.float32)
    return jnp.transpose(w, (2, 3, 1, 0)), b               # OIHW -> HWIO


def _init_convT(key, cin, cout, k):
    kw, kb = jax.random.split(key)
    w = jax.random.normal(kw, (cin, cout, k, k), jnp.float32) / jnp.sqrt(cin * k * k)
    b = 0.01 * jax.random.normal(kb, (cout,), jnp.float32)
    return w, b                                            # PyTorch ConvTranspose layout


def init_generator_params(key, input_dim, num_filter, output_dim):
    keys = iter(jax.random.split(key, 64))
    params = {}
    n_gf = num_filter
    params["init"] = _init_conv(next(keys), input_dim, n_gf, 7)
    down = []
    for _ in range(4):
        down.append(_init_conv(next(keys), n_gf, 2 * n_gf, 3))
        n_gf *= 2
    params["down"] = down
    params["res"] = [(_init_conv(next(keys), n_gf, n_gf, 3),
                      _init_conv(next(keys), n_gf, n_gf, 3)) for _ in range(9)]
    up = []
    for _ in range(4):
        up.append(_init_convT(next(keys), n_gf, n_gf // 2, 3))
        n_gf //= 2
    params["up"] = up
    params["final"] = _init_conv(next(keys), n_gf, output_dim, 7)
    return params


# ----------------------------------------------------------------------------
# Generator_HD forward
# ----------------------------------------------------------------------------
def generator_hd_forward(params, x_nchw):
    x = jnp.transpose(x_nchw, (0, 2, 3, 1)).astype(jnp.bfloat16)   # NCHW -> NHWC, bf16

    # ReflectionPad2d(3) + Conv2d(k=7) + InstanceNorm + ReLU
    w, b = params["init"]
    x = conv2d_block(x, w, b, stride=1, pad=3, pad_mode="reflect", norm=True, relu=True)

    # 4x downsampling: Conv2d(k=3, s=2, p=1 zero) + InstanceNorm + ReLU
    for (w, b) in params["down"]:
        x = conv2d_block(x, w, b, stride=2, pad=1, pad_mode="zero", norm=True, relu=True)

    # 9 residual blocks: [reflpad1+conv3+IN+ReLU, reflpad1+conv3+IN] + skip
    for (w1, b1), (w2, b2) in params["res"]:
        h = conv2d_block(x, w1, b1, stride=1, pad=1, pad_mode="reflect",
                         norm=True, relu=True)
        x = conv2d_block(h, w2, b2, stride=1, pad=1, pad_mode="reflect",
                         norm=True, relu=False, residual=x)

    # 4x upsampling: ConvTranspose2d(k=3, s=2, p=1, op=1) + InstanceNorm + ReLU
    for (w, b) in params["up"]:
        x = conv_transpose2d_block(x, w, b, relu=True)

    # ReflectionPad2d(3) + Conv2d(k=7) (bias, no norm / no activation), f32 output
    w, b = params["final"]
    x = conv2d_block(x, w, b, stride=1, pad=3, pad_mode="reflect",
                     norm=False, relu=False, out_dtype=jnp.float32)

    return jnp.transpose(x, (0, 3, 1, 2))                          # NHWC -> NCHW


if __name__ == "__main__":
    key = jax.random.PRNGKey(0)
    pkey, xkey = jax.random.split(key)

    # Small but valid shapes: 4 stride-2 downsamples need spatial >= 32 so the
    # bottleneck (2x2) still admits ReflectionPad2d(1) inside the residual blocks.
    input_dim, num_filter, output_dim = 4, 8, 3
    batch, spatial = 2, 32

    params = init_generator_params(pkey, input_dim, num_filter, output_dim)
    x = jax.random.normal(xkey, (batch, input_dim, spatial, spatial), jnp.float32)

    fwd = jax.jit(generator_hd_forward)
    y = fwd(params, x)
    jax.block_until_ready(y)

    assert y.shape == (batch, output_dim, spatial, spatial), y.shape
    assert bool(jnp.all(jnp.isfinite(y)))
    print("KERNEL_OK")
</pallas_src>

<mosaic_0001>
module attributes {stable_mosaic.version = 11 : i64} {
  func.func @_matmul_kernel(%arg0: i32, %arg1: i32, %arg2: i32, %arg3: i32, %arg4: memref<1x512x256xbf16, #tpu.memory_space<vmem>>, %arg5: memref<256x128xbf16, #tpu.memory_space<vmem>>, %arg6: memref<1x512x128xbf16, #tpu.memory_space<vmem>>, %arg7: memref<1x1x128xf32, #tpu.memory_space<vmem>>, %arg8: memref<1x1x128xf32, #tpu.memory_space<vmem>>, %arg9: memref<512x128xf32, #tpu.memory_space<vmem>>) attributes {dimension_semantics = [#tpu.dimension_semantics<parallel>, #tpu.dimension_semantics<parallel>, #tpu.dimension_semantics<arbitrary>, #tpu.dimension_semantics<arbitrary>], iteration_bounds = array<i64: 2, 1, 2, 1>, scalar_prefetch = 0 : i64, scratch_operands = 1 : i64, tpu.core_type = #tpu.core_type<tc>, window_params = [{transform_indices = @transform_0, window_bounds = array<i64: 1, 512, 256>}, {transform_indices = @transform_1, window_bounds = array<i64: 256, 128>}, {transform_indices = @transform_2, window_bounds = array<i64: 1, 512, 128>}, {transform_indices = @transform_3, window_bounds = array<i64: 1, 1, 128>}, {transform_indices = @transform_4, window_bounds = array<i64: 1, 1, 128>}]} {
    %c0_i32 = arith.constant 0 : i32
    %0 = arith.cmpi eq, %arg3, %c0_i32 : i32
    %1 = arith.extui %0 : i1 to i32
    %c0_i32_0 = arith.constant 0 : i32
    %2 = arith.cmpi ne, %1, %c0_i32_0 : i32
    scf.if %2 {
      %cst_14 = arith.constant 0.000000e+00 : f32
      %18 = vector.broadcast %cst_14 : f32 to vector<512x128xf32>
      %c0_15 = arith.constant 0 : index
      %c0_16 = arith.constant 0 : index
      %19 = vector.load %arg9[%c0_15, %c0_16] : memref<512x128xf32, #tpu.memory_space<vmem>>, vector<512x128xf32>
      tpu.vector_store %arg9[%c0_15, %c0_16], %18 {strides = array<i32>} : memref<512x128xf32, #tpu.memory_space<vmem>>, vector<512x128xf32>,
    } else {
    }
    %c0 = arith.constant 0 : index
    %c0_1 = arith.constant 0 : index
    %3 = vector.load %arg9[%c0, %c0_1] : memref<512x128xf32, #tpu.memory_space<vmem>>, vector<512x128xf32>
    %c0_2 = arith.constant 0 : index
    %c0_3 = arith.constant 0 : index
    %c0_4 = arith.constant 0 : index
    %4 = vector.load %arg4[%c0_2, %c0_3, %c0_4] : memref<1x512x256xbf16, #tpu.memory_space<vmem>>, vector<1x512x256xbf16>
    %5 = vector.shape_cast %4 : vector<1x512x256xbf16> to vector<512x256xbf16>
    %c0_5 = arith.constant 0 : index
    %c0_6 = arith.constant 0 : index
    %6 = vector.load %arg5[%c0_5, %c0_6] : memref<256x128xbf16, #tpu.memory_space<vmem>>, vector<256x128xbf16>
    %cst = arith.constant dense<0.000000e+00> : vector<512x128xf32>
    %7 = tpu.matmul %5, %6, %cst {dimension_numbers = #tpu.dot_dimension_numbers<[1], [0], [0], [1], [0, 0, 1, 1], [], []>} : vector<512x256xbf16>, vector<256x128xbf16>, vector<512x128xf32> -> vector<512x128xf32>
    %8 = arith.addf %3, %7 : vector<512x128xf32>
    %c0_7 = arith.constant 0 : index
    %c0_8 = arith.constant 0 : index
    %9 = vector.load %arg9[%c0_7, %c0_8] : memref<512x128xf32, #tpu.memory_space<vmem>>, vector<512x128xf32>
    tpu.vector_store %arg9[%c0_7, %c0_8], %8 {strides = array<i32>} : memref<512x128xf32, #tpu.memory_space<vmem>>, vector<512x128xf32>,
    %c0_i32_9 = arith.constant 0 : i32
    %10 = arith.cmpi eq, %arg3, %c0_i32_9 : i32
    %c0_i32_10 = arith.constant 0 : i32
    %11 = arith.cmpi eq, %arg2, %c0_i32_10 : i32
    %12 = arith.andi %10, %11 : i1
    %13 = arith.extui %12 : i1 to i32
    %c0_i32_11 = arith.constant 0 : i32
    %14 = arith.cmpi ne, %13, %c0_i32_11 : i32
    scf.if %14 {
      %cst_14 = arith.constant 0.000000e+00 : f32
      %18 = vector.broadcast %cst_14 : f32 to vector<1x128xf32>
      %c0_15 = arith.constant 0 : index
      %c0_16 = arith.constant 0 : index
      %c0_17 = arith.constant 0 : index
      %19 = vector.load %arg7[%c0_15, %c0_16, %c0_17] : memref<1x1x128xf32, #tpu.memory_space<vmem>>, vector<1x1x128xf32>
      %20 = vector.shape_cast %19 : vector<1x1x128xf32> to vector<1x128xf32>
      %21 = vector.shape_cast %18 : vector<1x128xf32> to vector<1x1x128xf32>
      tpu.vector_store %arg7[%c0_15, %c0_16, %c0_17], %21 {strides = array<i32>} : memref<1x1x128xf32, #tpu.memory_space<vmem>>, vector<1x1x128xf32>,
      %cst_18 = arith.constant 0.000000e+00 : f32
      %22 = vector.broadcast %cst_18 : f32 to vector<1x128xf32>
      %c0_19 = arith.constant 0 : index
      %c0_20 = arith.constant 0 : index
      %c0_21 = arith.constant 0 : index
      %23 = vector.load %arg8[%c0_19, %c0_20, %c0_21] : memref<1x1x128xf32, #tpu.memory_space<vmem>>, vector<1x1x128xf32>
      %24 = vector.shape_cast %23 : vector<1x1x128xf32> to vector<1x128xf32>
      %25 = vector.shape_cast %22 : vector<1x128xf32> to vector<1x1x128xf32>
      tpu.vector_store %arg8[%c0_19, %c0_20, %c0_21], %25 {strides = array<i32>} : memref<1x1x128xf32, #tpu.memory_space<vmem>>, vector<1x1x128xf32>,
    } else {
    }
    %c0_i32_12 = arith.constant 0 : i32
    %15 = arith.cmpi eq, %arg3, %c0_i32_12 : i32
    %16 = arith.extui %15 : i1 to i32
    %c0_i32_13 = arith.constant 0 : i32
    %17 = arith.cmpi ne, %16, %c0_i32_13 : i32
    scf.if %17 {
      %c0_14 = arith.constant 0 : index
      %c0_15 = arith.constant 0 : index
      %18 = vector.load %arg9[%c0_14, %c0_15] : memref<512x128xf32, #tpu.memory_space<vmem>>, vector<512x128xf32>
      %19 = arith.truncf %18 : vector<512x128xf32> to vector<512x128xbf16>
      %c0_16 = arith.constant 0 : index
      %c0_17 = arith.constant 0 : index
      %c0_18 = arith.constant 0 : index
      %20 = vector.load %arg6[%c0_16, %c0_17, %c0_18] : memref<1x512x128xbf16, #tpu.memory_space<vmem>>, vector<1x512x128xbf16>
      %21 = vector.shape_cast %20 : vector<1x512x128xbf16> to vector<512x128xbf16>
      %22 = vector.shape_cast %19 : vector<512x128xbf16> to vector<1x512x128xbf16>
      tpu.vector_store %arg6[%c0_16, %c0_17, %c0_18], %22 {strides = array<i32>} : memref<1x512x128xbf16, #tpu.memory_space<vmem>>, vector<1x512x128xbf16>,
      %c0_19 = arith.constant 0 : index
      %c0_20 = arith.constant 0 : index
      %c0_21 = arith.constant 0 : index
      %23 = vector.load %arg7[%c0_19, %c0_20, %c0_21] : memref<1x1x128xf32, #tpu.memory_space<vmem>>, vector<1x1x128xf32>
      %24 = vector.shape_cast %23 : vector<1x1x128xf32> to vector<1x128xf32>
      %cst_22 = arith.constant dense<0.000000e+00> : vector<128xf32>
      %25 = vector.multi_reduction <add>, %18, %cst_22 [0] : vector<512x128xf32> to vector<128xf32>
      %26 = vector.shape_cast %25 : vector<128xf32> to vector<1x128xf32>
      %27 = arith.addf %24, %26 : vector<1x128xf32>
      %c0_23 = arith.constant 0 : index
      %c0_24 = arith.constant 0 : index
      %c0_25 = arith.constant 0 : index
      %28 = vector.load %arg7[%c0_23, %c0_24, %c0_25] : memref<1x1x128xf32, #tpu.memory_space<vmem>>, vector<1x1x128xf32>
      %29 = vector.shape_cast %28 : vector<1x1x128xf32> to vector<1x128xf32>
      %30 = vector.shape_cast %27 : vector<1x128xf32> to vector<1x1x128xf32>
      tpu.vector_store %arg7[%c0_23, %c0_24, %c0_25], %30 {strides = array<i32>} : memref<1x1x128xf32, #tpu.memory_space<vmem>>, vector<1x1x128xf32>,
      %c0_26 = arith.constant 0 : index
      %c0_27 = arith.constant 0 : index
      %c0_28 = arith.constant 0 : index
      %31 = vector.load %arg8[%c0_26, %c0_27, %c0_28] : memref<1x1x128xf32, #tpu.memory_space<vmem>>, vector<1x1x128xf32>
      %32 = vector.shape_cast %31 : vector<1x1x128xf32> to vector<1x128xf32>
      %33 = arith.mulf %18, %18 : vector<512x128xf32>
      %cst_29 = arith.constant dense<0.000000e+00> : vector<128xf32>
      %34 = vector.multi_reduction <add>, %33, %cst_29 [0] : vector<512x128xf32> to vector<128xf32>
      %35 = vector.shape_cast %34 : vector<128xf32> to vector<1x128xf32>
      %36 = arith.addf %32, %35 : vector<1x128xf32>
      %c0_30 = arith.constant 0 : index
      %c0_31 = arith.constant 0 : index
      %c0_32 = arith.constant 0 : index
      %37 = vector.load %arg8[%c0_30, %c0_31, %c0_32] : memref<1x1x128xf32, #tpu.memory_space<vmem>>, vector<1x1x128xf32>
      %38 = vector.shape_cast %37 : vector<1x1x128xf32> to vector<1x128xf32>
      %39 = vector.shape_cast %36 : vector<1x128xf32> to vector<1x1x128xf32>
      tpu.vector_store %arg8[%c0_30, %c0_31, %c0_32], %39 {strides = array<i32>} : memref<1x1x128xf32, #tpu.memory_space<vmem>>, vector<1x1x128xf32>,
    } else {
    }
    return
  }
  func.func @transform_0(%arg0: i32, %arg1: i32, %arg2: i32, %arg3: i32) -> (i32, i32, i32) {
    %c0_i32 = arith.constant 0 : i32
    return %arg0, %arg2, %arg3 : i32, i32, i32
  }
  func.func @transform_1(%arg0: i32, %arg1: i32, %arg2: i32, %arg3: i32) -> (i32, i32) {
    %c0_i32 = arith.constant 0 : i32
    return %arg3, %arg1 : i32, i32
  }
  func.func @transform_2(%arg0: i32, %arg1: i32, %arg2: i32, %arg3: i32) -> (i32, i32, i32) {
    %c0_i32 = arith.constant 0 : i32
    return %arg0, %arg2, %arg1 : i32, i32, i32
  }
  func.func @transform_3(%arg0: i32, %arg1: i32, %arg2: i32, %arg3: i32) -> (i32, i32, i32) {
    %c0_i32 = arith.constant 0 : i32
    %c0_i32_0 = arith.constant 0 : i32
    return %arg0, %c0_i32, %arg1 : i32, i32, i32
  }
  func.func @transform_4(%arg0: i32, %arg1: i32, %arg2: i32, %arg3: i32) -> (i32, i32, i32) {
    %c0_i32 = arith.constant 0 : i32
    %c0_i32_0 = arith.constant 0 : i32
    return %arg0, %c0_i32, %arg1 : i32, i32, i32
  }
}

module attributes {stable_mosaic.version = 11 : i64} {
  func.func @_norm_kernel(%arg0: i32, %arg1: i32, %arg2: i32, %arg3: memref<1x512x128xbf16, #tpu.memory_space<vmem>>, %arg4: memref<1x1x128xf32, #tpu.memory_space<vmem>>, %arg5: memref<1x1x128xf32, #tpu.memory_space<vmem>>, %arg6: memref<1x512x128xbf16, #tpu.memory_space<vmem>>) attributes {dimension_semantics = [#tpu.dimension_semantics<parallel>, #tpu.dimension_semantics<parallel>, #tpu.dimension_semantics<parallel>], iteration_bounds = array<i64: 2, 1, 2>, scalar_prefetch = 0 : i64, scratch_operands = 0 : i64, tpu.core_type = #tpu.core_type<tc>, window_params = [{transform_indices = @transform_0, window_bounds = array<i64: 1, 512, 128>}, {transform_indices = @transform_1, window_bounds = array<i64: 1, 1, 128>}, {transform_indices = @transform_2, window_bounds = array<i64: 1, 1, 128>}, {transform_indices = @transform_3, window_bounds = array<i64: 1, 512, 128>}]} {
    %c0 = arith.constant 0 : index
    %c0_0 = arith.constant 0 : index
    %c0_1 = arith.constant 0 : index
    %0 = vector.load %arg3[%c0, %c0_0, %c0_1] : memref<1x512x128xbf16, #tpu.memory_space<vmem>>, vector<1x512x128xbf16>
    %1 = vector.shape_cast %0 : vector<1x512x128xbf16> to vector<512x128xbf16>
    %2 = arith.extf %1 : vector<512x128xbf16> to vector<512x128xf32>
    %c0_2 = arith.constant 0 : index
    %c0_3 = arith.constant 0 : index
    %c0_4 = arith.constant 0 : index
    %3 = vector.load %arg4[%c0_2, %c0_3, %c0_4] : memref<1x1x128xf32, #tpu.memory_space<vmem>>, vector<1x1x128xf32>
    %4 = vector.shape_cast %3 : vector<1x1x128xf32> to vector<1x128xf32>
    %cst = arith.constant 9.765625E-4 : f32
    %5 = vector.broadcast %cst : f32 to vector<1x128xf32>
    %6 = arith.mulf %4, %5 : vector<1x128xf32>
    %c0_5 = arith.constant 0 : index
    %c0_6 = arith.constant 0 : index
    %c0_7 = arith.constant 0 : index
    %7 = vector.load %arg5[%c0_5, %c0_6, %c0_7] : memref<1x1x128xf32, #tpu.memory_space<vmem>>, vector<1x1x128xf32>
    %8 = vector.shape_cast %7 : vector<1x1x128xf32> to vector<1x128xf32>
    %cst_8 = arith.constant 9.765625E-4 : f32
    %9 = vector.broadcast %cst_8 : f32 to vector<1x128xf32>
    %10 = arith.mulf %8, %9 : vector<1x128xf32>
    %11 = arith.mulf %6, %6 : vector<1x128xf32>
    %12 = arith.subf %10, %11 : vector<1x128xf32>
    %cst_9 = arith.constant 0.000000e+00 : f32
    %13 = vector.broadcast %cst_9 : f32 to vector<1x128xf32>
    %14 = arith.maximumf %12, %13 : vector<1x128xf32>
    %15 = vector.broadcast %6 : vector<1x128xf32> to vector<512x128xf32>
    %16 = arith.subf %2, %15 : vector<512x128xf32>
    %cst_10 = arith.constant 9.99999974E-6 : f32
    %17 = vector.broadcast %cst_10 : f32 to vector<1x128xf32>
    %18 = arith.addf %14, %17 : vector<1x128xf32>
    %19 = math.rsqrt %18 : vector<1x128xf32>
    %20 = vector.broadcast %19 : vector<1x128xf32> to vector<512x128xf32>
    %21 = arith.mulf %16, %20 : vector<512x128xf32>
    %cst_11 = arith.constant 0.000000e+00 : f32
    %22 = vector.broadcast %cst_11 : f32 to vector<512x128xf32>
    %23 = arith.maximumf %21, %22 : vector<512x128xf32>
    %24 = arith.truncf %23 : vector<512x128xf32> to vector<512x128xbf16>
    %c0_12 = arith.constant 0 : index
    %c0_13 = arith.constant 0 : index
    %c0_14 = arith.constant 0 : index
    %25 = vector.load %arg6[%c0_12, %c0_13, %c0_14] : memref<1x512x128xbf16, #tpu.memory_space<vmem>>, vector<1x512x128xbf16>
    %26 = vector.shape_cast %25 : vector<1x512x128xbf16> to vector<512x128xbf16>
    %27 = vector.shape_cast %24 : vector<512x128xbf16> to vector<1x512x128xbf16>
    tpu.vector_store %arg6[%c0_12, %c0_13, %c0_14], %27 {strides = array<i32>} : memref<1x512x128xbf16, #tpu.memory_space<vmem>>, vector<1x512x128xbf16>,
    return
  }
  func.func @transform_0(%arg0: i32, %arg1: i32, %arg2: i32) -> (i32, i32, i32) {
    %c0_i32 = arith.constant 0 : i32
    return %arg0, %arg2, %arg1 : i32, i32, i32
  }
  func.func @transform_1(%arg0: i32, %arg1: i32, %arg2: i32) -> (i32, i32, i32) {
    %c0_i32 = arith.constant 0 : i32
    %c0_i32_0 = arith.constant 0 : i32
    return %arg0, %c0_i32, %arg1 : i32, i32, i32
  }
  func.func @transform_2(%arg0: i32, %arg1: i32, %arg2: i32) -> (i32, i32, i32) {
    %c0_i32 = arith.constant 0 : i32
    %c0_i32_0 = arith.constant 0 : i32
    return %arg0, %c0_i32, %arg1 : i32, i32, i32
  }
  func.func @transform_3(%arg0: i32, %arg1: i32, %arg2: i32) -> (i32, i32, i32) {
    %c0_i32 = arith.constant 0 : i32
    return %arg0, %arg2, %arg1 : i32, i32, i32
  }
}

module attributes {stable_mosaic.version = 11 : i64} {
  func.func @_matmul_kernel(%arg0: i32, %arg1: i32, %arg2: i32, %arg3: i32, %arg4: memref<1x256x128xbf16, #tpu.memory_space<vmem>>, %arg5: memref<128x128xbf16, #tpu.memory_space<vmem>>, %arg6: memref<1x256x128xbf16, #tpu.memory_space<vmem>>, %arg7: memref<1x1x128xf32, #tpu.memory_space<vmem>>, %arg8: memref<1x1x128xf32, #tpu.memory_space<vmem>>, %arg9: memref<256x128xf32, #tpu.memory_space<vmem>>) attributes {dimension_semantics = [#tpu.dimension_semantics<parallel>, #tpu.dimension_semantics<parallel>, #tpu.dimension_semantics<arbitrary>, #tpu.dimension_semantics<arbitrary>], iteration_bounds = array<i64: 2, 1, 1, 1>, scalar_prefetch = 0 : i64, scratch_operands = 1 : i64, tpu.core_type = #tpu.core_type<tc>, window_params = [{transform_indices = @transform_0, window_bounds = array<i64: 1, 256, 128>}, {transform_indices = @transform_1, window_bounds = array<i64: 128, 128>}, {transform_indices = @transform_2, window_bounds = array<i64: 1, 256, 128>}, {transform_indices = @transform_3, window_bounds = array<i64: 1, 1, 128>}, {transform_indices = @transform_4, window_bounds = array<i64: 1, 1, 128>}]} {
    %c0_i32 = arith.constant 0 : i32
    %0 = arith.cmpi eq, %arg3, %c0_i32 : i32
    %1 = arith.extui %0 : i1 to i32
    %c0_i32_0 = arith.constant 0 : i32
    %2 = arith.cmpi ne, %1, %c0_i32_0 : i32
    scf.if %2 {
      %cst_14 = arith.constant 0.000000e+00 : f32
      %18 = vector.broadcast %cst_14 : f32 to vector<256x128xf32>
      %c0_15 = arith.constant 0 : index
      %c0_16 = arith.constant 0 : index
      %19 = vector.load %arg9[%c0_15, %c0_16] : memref<256x128xf32, #tpu.memory_space<vmem>>, vector<256x128xf32>
      tpu.vector_store %arg9[%c0_15, %c0_16], %18 {strides = array<i32>} : memref<256x128xf32, #tpu.memory_space<vmem>>, vector<256x128xf32>,
    } else {
    }
    %c0 = arith.constant 0 : index
    %c0_1 = arith.constant 0 : index
    %3 = vector.load %arg9[%c0, %c0_1] : memref<256x128xf32, #tpu.memory_space<vmem>>, vector<256x128xf32>
    %c0_2 = arith.constant 0 : index
    %c0_3 = arith.constant 0 : index
    %c0_4 = arith.constant 0 : index
    %4 = vector.load %arg4[%c0_2, %c0_3, %c0_4] : memref<1x256x128xbf16, #tpu.memory_space<vmem>>, vector<1x256x128xbf16>
    %5 = vector.shape_cast %4 : vector<1x256x128xbf16> to vector<256x128xbf16>
    %c0_5 = arith.constant 0 : index
    %c0_6 = arith.constant 0 : index
    %6 = vector.load %arg5[%c0_5, %c0_6] : memref<128x128xbf16, #tpu.memory_space<vmem>>, vector<128x128xbf16>
    %cst = arith.constant dense<0.000000e+00> : vector<256x128xf32>
    %7 = tpu.matmul %5, %6, %cst {dimension_numbers = #tpu.dot_dimension_numbers<[1], [0], [0], [1], [0, 0, 1, 1], [], []>} : vector<256x128xbf16>, vector<128x128xbf16>, vector<256x128xf32> -> vector<256x128xf32>
    %8 = arith.addf %3, %7 : vector<256x128xf32>
    %c0_7 = arith.constant 0 : index
    %c0_8 = arith.constant 0 : index
    %9 = vector.load %arg9[%c0_7, %c0_8] : memref<256x128xf32, #tpu.memory_space<vmem>>, vector<256x128xf32>
    tpu.vector_store %arg9[%c0_7, %c0_8], %8 {strides = array<i32>} : memref<256x128xf32, #tpu.memory_space<vmem>>, vector<256x128xf32>,
    %c0_i32_9 = arith.constant 0 : i32
    %10 = arith.cmpi eq, %arg3, %c0_i32_9 : i32
    %c0_i32_10 = arith.constant 0 : i32
    %11 = arith.cmpi eq, %arg2, %c0_i32_10 : i32
    %12 = arith.andi %10, %11 : i1
    %13 = arith.extui %12 : i1 to i32
    %c0_i32_11 = arith.constant 0 : i32
    %14 = arith.cmpi ne, %13, %c0_i32_11 : i32
    scf.if %14 {
      %cst_14 = arith.constant 0.000000e+00 : f32
      %18 = vector.broadcast %cst_14 : f32 to vector<1x128xf32>
      %c0_15 = arith.constant 0 : index
      %c0_16 = arith.constant 0 : index
      %c0_17 = arith.constant 0 : index
      %19 = vector.load %arg7[%c0_15, %c0_16, %c0_17] : memref<1x1x128xf32, #tpu.memory_space<vmem>>, vector<1x1x128xf32>
      %20 = vector.shape_cast %19 : vector<1x1x128xf32> to vector<1x128xf32>
      %21 = vector.shape_cast %18 : vector<1x128xf32> to vector<1x1x128xf32>
      tpu.vector_store %arg7[%c0_15, %c0_16, %c0_17], %21 {strides = array<i32>} : memref<1x1x128xf32, #tpu.memory_space<vmem>>, vector<1x1x128xf32>,
      %cst_18 = arith.constant 0.000000e+00 : f32
      %22 = vector.broadcast %cst_18 : f32 to vector<1x128xf32>
      %c0_19 = arith.constant 0 : index
      %c0_20 = arith.constant 0 : index
      %c0_21 = arith.constant 0 : index
      %23 = vector.load %arg8[%c0_19, %c0_20, %c0_21] : memref<1x1x128xf32, #tpu.memory_space<vmem>>, vector<1x1x128xf32>
      %24 = vector.shape_cast %23 : vector<1x1x128xf32> to vector<1x128xf32>
      %25 = vector.shape_cast %22 : vector<1x128xf32> to vector<1x1x128xf32>
      tpu.vector_store %arg8[%c0_19, %c0_20, %c0_21], %25 {strides = array<i32>} : memref<1x1x128xf32, #tpu.memory_space<vmem>>, vector<1x1x128xf32>,
    } else {
    }
    %c0_i32_12 = arith.constant 0 : i32
    %15 = arith.cmpi eq, %arg3, %c0_i32_12 : i32
    %16 = arith.extui %15 : i1 to i32
    %c0_i32_13 = arith.constant 0 : i32
    %17 = arith.cmpi ne, %16, %c0_i32_13 : i32
    scf.if %17 {
      %c0_14 = arith.constant 0 : index
      %c0_15 = arith.constant 0 : index
      %18 = vector.load %arg9[%c0_14, %c0_15] : memref<256x128xf32, #tpu.memory_space<vmem>>, vector<256x128xf32>
      %19 = arith.truncf %18 : vector<256x128xf32> to vector<256x128xbf16>
      %c0_16 = arith.constant 0 : index
      %c0_17 = arith.constant 0 : index
      %c0_18 = arith.constant 0 : index
      %20 = vector.load %arg6[%c0_16, %c0_17, %c0_18] : memref<1x256x128xbf16, #tpu.memory_space<vmem>>, vector<1x256x128xbf16>
      %21 = vector.shape_cast %20 : vector<1x256x128xbf16> to vector<256x128xbf16>
      %22 = vector.shape_cast %19 : vector<256x128xbf16> to vector<1x256x128xbf16>
      tpu.vector_store %arg6[%c0_16, %c0_17, %c0_18], %22 {strides = array<i32>} : memref<1x256x128xbf16, #tpu.memory_space<vmem>>, vector<1x256x128xbf16>,
      %c0_19 = arith.constant 0 : index
      %c0_20 = arith.constant 0 : index
      %c0_21 = arith.constant 0 : index
      %23 = vector.load %arg7[%c0_19, %c0_20, %c0_21] : memref<1x1x128xf32, #tpu.memory_space<vmem>>, vector<1x1x128xf32>
      %24 = vector.shape_cast %23 : vector<1x1x128xf32> to vector<1x128xf32>
      %cst_22 = arith.constant dense<0.000000e+00> : vector<128xf32>
      %25 = vector.multi_reduction <add>, %18, %cst_22 [0] : vector<256x128xf32> to vector<128xf32>
      %26 = vector.shape_cast %25 : vector<128xf32> to vector<1x128xf32>
      %27 = arith.addf %24, %26 : vector<1x128xf32>
      %c0_23 = arith.constant 0 : index
      %c0_24 = arith.constant 0 : index
      %c0_25 = arith.constant 0 : index
      %28 = vector.load %arg7[%c0_23, %c0_24, %c0_25] : memref<1x1x128xf32, #tpu.memory_space<vmem>>, vector<1x1x128xf32>
      %29 = vector.shape_cast %28 : vector<1x1x128xf32> to vector<1x128xf32>
      %30 = vector.shape_cast %27 : vector<1x128xf32> to vector<1x1x128xf32>
      tpu.vector_store %arg7[%c0_23, %c0_24, %c0_25], %30 {strides = array<i32>} : memref<1x1x128xf32, #tpu.memory_space<vmem>>, vector<1x1x128xf32>,
      %c0_26 = arith.constant 0 : index
      %c0_27 = arith.constant 0 : index
      %c0_28 = arith.constant 0 : index
      %31 = vector.load %arg8[%c0_26, %c0_27, %c0_28] : memref<1x1x128xf32, #tpu.memory_space<vmem>>, vector<1x1x128xf32>
      %32 = vector.shape_cast %31 : vector<1x1x128xf32> to vector<1x128xf32>
      %33 = arith.mulf %18, %18 : vector<256x128xf32>
      %cst_29 = arith.constant dense<0.000000e+00> : vector<128xf32>
      %34 = vector.multi_reduction <add>, %33, %cst_29 [0] : vector<256x128xf32> to vector<128xf32>
      %35 = vector.shape_cast %34 : vector<128xf32> to vector<1x128xf32>
      %36 = arith.addf %32, %35 : vector<1x128xf32>
      %c0_30 = arith.constant 0 : index
      %c0_31 = arith.constant 0 : index
      %c0_32 = arith.constant 0 : index
      %37 = vector.load %arg8[%c0_30, %c0_31, %c0_32] : memref<1x1x128xf32, #tpu.memory_space<vmem>>, vector<1x1x128xf32>
      %38 = vector.shape_cast %37 : vector<1x1x128xf32> to vector<1x128xf32>
      %39 = vector.shape_cast %36 : vector<1x128xf32> to vector<1x1x128xf32>
      tpu.vector_store %arg8[%c0_30, %c0_31, %c0_32], %39 {strides = array<i32>} : memref<1x1x128xf32, #tpu.memory_space<vmem>>, vector<1x1x128xf32>,
    } else {
    }
    return
  }
  func.func @transform_0(%arg0: i32, %arg1: i32, %arg2: i32, %arg3: i32) -> (i32, i32, i32) {
    %c0_i32 = arith.constant 0 : i32
    return %arg0, %arg2, %arg3 : i32, i32, i32
  }
  func.func @transform_1(%arg0: i32, %arg1: i32, %arg2: i32, %arg3: i32) -> (i32, i32) {
    %c0_i32 = arith.constant 0 : i32
    return %arg3, %arg1 : i32, i32
  }
  func.func @transform_2(%arg0: i32, %arg1: i32, %arg2: i32, %arg3: i32) -> (i32, i32, i32) {
    %c0_i32 = arith.constant 0 : i32
    return %arg0, %arg2, %arg1 : i32, i32, i32
  }
  func.func @transform_3(%arg0: i32, %arg1: i32, %arg2: i32, %arg3: i32) -> (i32, i32, i32) {
    %c0_i32 = arith.constant 0 : i32
    %c0_i32_0 = arith.constant 0 : i32
    return %arg0, %c0_i32, %arg1 : i32, i32, i32
  }
  func.func @transform_4(%arg0: i32, %arg1: i32, %arg2: i32, %arg3: i32) -> (i32, i32, i32) {
    %c0_i32 = arith.constant 0 : i32
    %c0_i32_0 = arith.constant 0 : i32
    return %arg0, %c0_i32, %arg1 : i32, i32, i32
  }
}

module attributes {stable_mosaic.version = 11 : i64} {
  func.func @_norm_kernel(%arg0: i32, %arg1: i32, %arg2: i32, %arg3: memref<1x256x128xbf16, #tpu.memory_space<vmem>>, %arg4: memref<1x1x128xf32, #tpu.memory_space<vmem>>, %arg5: memref<1x1x128xf32, #tpu.memory_space<vmem>>, %arg6: memref<1x256x128xbf16, #tpu.memory_space<vmem>>) attributes {dimension_semantics = [#tpu.dimension_semantics<parallel>, #tpu.dimension_semantics<parallel>, #tpu.dimension_semantics<parallel>], iteration_bounds = array<i64: 2, 1, 1>, scalar_prefetch = 0 : i64, scratch_operands = 0 : i64, tpu.core_type = #tpu.core_type<tc>, window_params = [{transform_indices = @transform_0, window_bounds = array<i64: 1, 256, 128>}, {transform_indices = @transform_1, window_bounds = array<i64: 1, 1, 128>}, {transform_indices = @transform_2, window_bounds = array<i64: 1, 1, 128>}, {transform_indices = @transform_3, window_bounds = array<i64: 1, 256, 128>}]} {
    %c0 = arith.constant 0 : index
    %c0_0 = arith.constant 0 : index
    %c0_1 = arith.constant 0 : index
    %0 = vector.load %arg3[%c0, %c0_0, %c0_1] : memref<1x256x128xbf16, #tpu.memory_space<vmem>>, vector<1x256x128xbf16>
    %1 = vector.shape_cast %0 : vector<1x256x128xbf16> to vector<256x128xbf16>
    %2 = arith.extf %1 : vector<256x128xbf16> to vector<256x128xf32>
    %c0_2 = arith.constant 0 : index
    %c0_3 = arith.constant 0 : index
    %c0_4 = arith.constant 0 : index
    %3 = vector.load %arg4[%c0_2, %c0_3, %c0_4] : memref<1x1x128xf32, #tpu.memory_space<vmem>>, vector<1x1x128xf32>
    %4 = vector.shape_cast %3 : vector<1x1x128xf32> to vector<1x128xf32>
    %cst = arith.constant 3.906250e-03 : f32
    %5 = vector.broadcast %cst : f32 to vector<1x128xf32>
    %6 = arith.mulf %4, %5 : vector<1x128xf32>
    %c0_5 = arith.constant 0 : index
    %c0_6 = arith.constant 0 : index
    %c0_7 = arith.constant 0 : index
    %7 = vector.load %arg5[%c0_5, %c0_6, %c0_7] : memref<1x1x128xf32, #tpu.memory_space<vmem>>, vector<1x1x128xf32>
    %8 = vector.shape_cast %7 : vector<1x1x128xf32> to vector<1x128xf32>
    %cst_8 = arith.constant 3.906250e-03 : f32
    %9 = vector.broadcast %cst_8 : f32 to vector<1x128xf32>
    %10 = arith.mulf %8, %9 : vector<1x128xf32>
    %11 = arith.mulf %6, %6 : vector<1x128xf32>
    %12 = arith.subf %10, %11 : vector<1x128xf32>
    %cst_9 = arith.constant 0.000000e+00 : f32
    %13 = vector.broadcast %cst_9 : f32 to vector<1x128xf32>
    %14 = arith.maximumf %12, %13 : vector<1x128xf32>
    %15 = vector.broadcast %6 : vector<1x128xf32> to vector<256x128xf32>
    %16 = arith.subf %2, %15 : vector<256x128xf32>
    %cst_10 = arith.constant 9.99999974E-6 : f32
    %17 = vector.broadcast %cst_10 : f32 to vector<1x128xf32>
    %18 = arith.addf %14, %17 : vector<1x128xf32>
    %19 = math.rsqrt %18 : vector<1x128xf32>
    %20 = vector.broadcast %19 : vector<1x128xf32> to vector<256x128xf32>
    %21 = arith.mulf %16, %20 : vector<256x128xf32>
    %cst_11 = arith.constant 0.000000e+00 : f32
    %22 = vector.broadcast %cst_11 : f32 to vector<256x128xf32>
    %23 = arith.maximumf %21, %22 : vector<256x128xf32>
    %24 = arith.truncf %23 : vector<256x128xf32> to vector<256x128xbf16>
    %c0_12 = arith.constant 0 : index
    %c0_13 = arith.constant 0 : index
    %c0_14 = arith.constant 0 : index
    %25 = vector.load %arg6[%c0_12, %c0_13, %c0_14] : memref<1x256x128xbf16, #tpu.memory_space<vmem>>, vector<1x256x128xbf16>
    %26 = vector.shape_cast %25 : vector<1x256x128xbf16> to vector<256x128xbf16>
    %27 = vector.shape_cast %24 : vector<256x128xbf16> to vector<1x256x128xbf16>
    tpu.vector_store %arg6[%c0_12, %c0_13, %c0_14], %27 {strides = array<i32>} : memref<1x256x128xbf16, #tpu.memory_space<vmem>>, vector<1x256x128xbf16>,
    return
  }
  func.func @transform_0(%arg0: i32, %arg1: i32, %arg2: i32) -> (i32, i32, i32) {
    %c0_i32 = arith.constant 0 : i32
    return %arg0, %arg2, %arg1 : i32, i32, i32
  }
  func.func @transform_1(%arg0: i32, %arg1: i32, %arg2: i32) -> (i32, i32, i32) {
    %c0_i32 = arith.constant 0 : i32
    %c0_i32_0 = arith.constant 0 : i32
    return %arg0, %c0_i32, %arg1 : i32, i32, i32
  }
  func.func @transform_2(%arg0: i32, %arg1: i32, %arg2: i32) -> (i32, i32, i32) {
    %c0_i32 = arith.constant 0 : i32
    %c0_i32_0 = arith.constant 0 : i32
    return %arg0, %c0_i32, %arg1 : i32, i32, i32
  }
  func.func @transform_3(%arg0: i32, %arg1: i32, %arg2: i32) -> (i32, i32, i32) {
    %c0_i32 = arith.constant 0 : i32
    return %arg0, %arg2, %arg1 : i32, i32, i32
  }
}

module attributes {stable_mosaic.version = 11 : i64} {
  func.func @_matmul_kernel(%arg0: i32, %arg1: i32, %arg2: i32, %arg3: i32, %arg4: memref<1x64x256xbf16, #tpu.memory_space<vmem>>, %arg5: memref<256x128xbf16, #tpu.memory_space<vmem>>, %arg6: memref<1x64x128xbf16, #tpu.memory_space<vmem>>, %arg7: memref<1x1x128xf32, #tpu.memory_space<vmem>>, %arg8: memref<1x1x128xf32, #tpu.memory_space<vmem>>, %arg9: memref<64x128xf32, #tpu.memory_space<vmem>>) attributes {dimension_semantics = [#tpu.dimension_semantics<parallel>, #tpu.dimension_semantics<parallel>, #tpu.dimension_semantics<arbitrary>, #tpu.dimension_semantics<arbitrary>], iteration_bounds = array<i64: 2, 1, 1, 1>, scalar_prefetch = 0 : i64, scratch_operands = 1 : i64, tpu.core_type = #tpu.core_type<tc>, window_params = [{transform_indices = @transform_0, window_bounds = array<i64: 1, 64, 256>}, {transform_indices = @transform_1, window_bounds = array<i64: 256, 128>}, {transform_indices = @transform_2, window_bounds = array<i64: 1, 64, 128>}, {transform_indices = @transform_3, window_bounds = array<i64: 1, 1, 128>}, {transform_indices = @transform_4, window_bounds = array<i64: 1, 1, 128>}]} {
    %c0_i32 = arith.constant 0 : i32
    %0 = arith.cmpi eq, %arg3, %c0_i32 : i32
    %1 = arith.extui %0 : i1 to i32
    %c0_i32_0 = arith.constant 0 : i32
    %2 = arith.cmpi ne, %1, %c0_i32_0 : i32
    scf.if %2 {
      %cst_14 = arith.constant 0.000000e+00 : f32
      %18 = vector.broadcast %cst_14 : f32 to vector<64x128xf32>
      %c0_15 = arith.constant 0 : index
      %c0_16 = arith.constant 0 : index
      %19 = vector.load %arg9[%c0_15, %c0_16] : memref<64x128xf32, #tpu.memory_space<vmem>>, vector<64x128xf32>
      tpu.vector_store %arg9[%c0_15, %c0_16], %18 {strides = array<i32>} : memref<64x128xf32, #tpu.memory_space<vmem>>, vector<64x128xf32>,
    } else {
    }
    %c0 = arith.constant 0 : index
    %c0_1 = arith.constant 0 : index
    %3 = vector.load %arg9[%c0, %c0_1] : memref<64x128xf32, #tpu.memory_space<vmem>>, vector<64x128xf32>
    %c0_2 = arith.constant 0 : index
    %c0_3 = arith.constant 0 : index
    %c0_4 = arith.constant 0 : index
    %4 = vector.load %arg4[%c0_2, %c0_3, %c0_4] : memref<1x64x256xbf16, #tpu.memory_space<vmem>>, vector<1x64x256xbf16>
    %5 = vector.shape_cast %4 : vector<1x64x256xbf16> to vector<64x256xbf16>
    %c0_5 = arith.constant 0 : index
    %c0_6 = arith.constant 0 : index
    %6 = vector.load %arg5[%c0_5, %c0_6] : memref<256x128xbf16, #tpu.memory_space<vmem>>, vector<256x128xbf16>
    %cst = arith.constant dense<0.000000e+00> : vector<64x128xf32>
    %7 = tpu.matmul %5, %6, %cst {dimension_numbers = #tpu.dot_dimension_numbers<[1], [0], [0], [1], [0, 0, 1, 1], [], []>} : vector<64x256xbf16>, vector<256x128xbf16>, vector<64x128xf32> -> vector<64x128xf32>
    %8 = arith.addf %3, %7 : vector<64x128xf32>
    %c0_7 = arith.constant 0 : index
    %c0_8 = arith.constant 0 : index
    %9 = vector.load %arg9[%c0_7, %c0_8] : memref<64x128xf32, #tpu.memory_space<vmem>>, vector<64x128xf32>
    tpu.vector_store %arg9[%c0_7, %c0_8], %8 {strides = array<i32>} : memref<64x128xf32, #tpu.memory_space<vmem>>, vector<64x128xf32>,
    %c0_i32_9 = arith.constant 0 : i32
    %10 = arith.cmpi eq, %arg3, %c0_i32_9 : i32
    %c0_i32_10 = arith.constant 0 : i32
    %11 = arith.cmpi eq, %arg2, %c0_i32_10 : i32
    %12 = arith.andi %10, %11 : i1
    %13 = arith.extui %12 : i1 to i32
    %c0_i32_11 = arith.constant 0 : i32
    %14 = arith.cmpi ne, %13, %c0_i32_11 : i32
    scf.if %14 {
      %cst_14 = arith.constant 0.000000e+00 : f32
      %18 = vector.broadcast %cst_14 : f32 to vector<1x128xf32>
      %c0_15 = arith.constant 0 : index
      %c0_16 = arith.constant 0 : index
      %c0_17 = arith.constant 0 : index
      %19 = vector.load %arg7[%c0_15, %c0_16, %c0_17] : memref<1x1x128xf32, #tpu.memory_space<vmem>>, vector<1x1x128xf32>
      %20 = vector.shape_cast %19 : vector<1x1x128xf32> to vector<1x128xf32>
      %21 = vector.shape_cast %18 : vector<1x128xf32> to vector<1x1x128xf32>
      tpu.vector_store %arg7[%c0_15, %c0_16, %c0_17], %21 {strides = array<i32>} : memref<1x1x128xf32, #tpu.memory_space<vmem>>, vector<1x1x128xf32>,
      %cst_18 = arith.constant 0.000000e+00 : f32
      %22 = vector.broadcast %cst_18 : f32 to vector<1x128xf32>
      %c0_19 = arith.constant 0 : index
      %c0_20 = arith.constant 0 : index
      %c0_21 = arith.constant 0 : index
      %23 = vector.load %arg8[%c0_19, %c0_20, %c0_21] : memref<1x1x128xf32, #tpu.memory_space<vmem>>, vector<1x1x128xf32>
      %24 = vector.shape_cast %23 : vector<1x1x128xf32> to vector<1x128xf32>
      %25 = vector.shape_cast %22 : vector<1x128xf32> to vector<1x1x128xf32>
      tpu.vector_store %arg8[%c0_19, %c0_20, %c0_21], %25 {strides = array<i32>} : memref<1x1x128xf32, #tpu.memory_space<vmem>>, vector<1x1x128xf32>,
    } else {
    }
    %c0_i32_12 = arith.constant 0 : i32
    %15 = arith.cmpi eq, %arg3, %c0_i32_12 : i32
    %16 = arith.extui %15 : i1 to i32
    %c0_i32_13 = arith.constant 0 : i32
    %17 = arith.cmpi ne, %16, %c0_i32_13 : i32
    scf.if %17 {
      %c0_14 = arith.constant 0 : index
      %c0_15 = arith.constant 0 : index
      %18 = vector.load %arg9[%c0_14, %c0_15] : memref<64x128xf32, #tpu.memory_space<vmem>>, vector<64x128xf32>
      %19 = arith.truncf %18 : vector<64x128xf32> to vector<64x128xbf16>
      %c0_16 = arith.constant 0 : index
      %c0_17 = arith.constant 0 : index
      %c0_18 = arith.constant 0 : index
      %20 = vector.load %arg6[%c0_16, %c0_17, %c0_18] : memref<1x64x128xbf16, #tpu.memory_space<vmem>>, vector<1x64x128xbf16>
      %21 = vector.shape_cast %20 : vector<1x64x128xbf16> to vector<64x128xbf16>
      %22 = vector.shape_cast %19 : vector<64x128xbf16> to vector<1x64x128xbf16>
      tpu.vector_store %arg6[%c0_16, %c0_17, %c0_18], %22 {strides = array<i32>} : memref<1x64x128xbf16, #tpu.memory_space<vmem>>, vector<1x64x128xbf16>,
      %c0_19 = arith.constant 0 : index
      %c0_20 = arith.constant 0 : index
      %c0_21 = arith.constant 0 : index
      %23 = vector.load %arg7[%c0_19, %c0_20, %c0_21] : memref<1x1x128xf32, #tpu.memory_space<vmem>>, vector<1x1x128xf32>
      %24 = vector.shape_cast %23 : vector<1x1x128xf32> to vector<1x128xf32>
      %cst_22 = arith.constant dense<0.000000e+00> : vector<128xf32>
      %25 = vector.multi_reduction <add>, %18, %cst_22 [0] : vector<64x128xf32> to vector<128xf32>
      %26 = vector.shape_cast %25 : vector<128xf32> to vector<1x128xf32>
      %27 = arith.addf %24, %26 : vector<1x128xf32>
      %c0_23 = arith.constant 0 : index
      %c0_24 = arith.constant 0 : index
      %c0_25 = arith.constant 0 : index
      %28 = vector.load %arg7[%c0_23, %c0_24, %c0_25] : memref<1x1x128xf32, #tpu.memory_space<vmem>>, vector<1x1x128xf32>
      %29 = vector.shape_cast %28 : vector<1x1x128xf32> to vector<1x128xf32>
      %30 = vector.shape_cast %27 : vector<1x128xf32> to vector<1x1x128xf32>
      tpu.vector_store %arg7[%c0_23, %c0_24, %c0_25], %30 {strides = array<i32>} : memref<1x1x128xf32, #tpu.memory_space<vmem>>, vector<1x1x128xf32>,
      %c0_26 = arith.constant 0 : index
      %c0_27 = arith.constant 0 : index
      %c0_28 = arith.constant 0 : index
      %31 = vector.load %arg8[%c0_26, %c0_27, %c0_28] : memref<1x1x128xf32, #tpu.memory_space<vmem>>, vector<1x1x128xf32>
      %32 = vector.shape_cast %31 : vector<1x1x128xf32> to vector<1x128xf32>
      %33 = arith.mulf %18, %18 : vector<64x128xf32>
      %cst_29 = arith.constant dense<0.000000e+00> : vector<128xf32>
      %34 = vector.multi_reduction <add>, %33, %cst_29 [0] : vector<64x128xf32> to vector<128xf32>
      %35 = vector.shape_cast %34 : vector<128xf32> to vector<1x128xf32>
      %36 = arith.addf %32, %35 : vector<1x128xf32>
      %c0_30 = arith.constant 0 : index
      %c0_31 = arith.constant 0 : index
      %c0_32 = arith.constant 0 : index
      %37 = vector.load %arg8[%c0_30, %c0_31, %c0_32] : memref<1x1x128xf32, #tpu.memory_space<vmem>>, vector<1x1x128xf32>
      %38 = vector.shape_cast %37 : vector<1x1x128xf32> to vector<1x128xf32>
      %39 = vector.shape_cast %36 : vector<1x128xf32> to vector<1x1x128xf32>
      tpu.vector_store %arg8[%c0_30, %c0_31, %c0_32], %39 {strides = array<i32>} : memref<1x1x128xf32, #tpu.memory_space<vmem>>, vector<1x1x128xf32>,
    } else {
    }
    return
  }
  func.func @transform_0(%arg0: i32, %arg1: i32, %arg2: i32, %arg3: i32) -> (i32, i32, i32) {
    %c0_i32 = arith.constant 0 : i32
    return %arg0, %arg2, %arg3 : i32, i32, i32
  }
  func.func @transform_1(%arg0: i32, %arg1: i32, %arg2: i32, %arg3: i32) -> (i32, i32) {
    %c0_i32 = arith.constant 0 : i32
    return %arg3, %arg1 : i32, i32
  }
  func.func @transform_2(%arg0: i32, %arg1: i32, %arg2: i32, %arg3: i32) -> (i32, i32, i32) {
    %c0_i32 = arith.constant 0 : i32
    return %arg0, %arg2, %arg1 : i32, i32, i32
  }
  func.func @transform_3(%arg0: i32, %arg1: i32, %arg2: i32, %arg3: i32) -> (i32, i32, i32) {
    %c0_i32 = arith.constant 0 : i32
    %c0_i32_0 = arith.constant 0 : i32
    return %arg0, %c0_i32, %arg1 : i32, i32, i32
  }
  func.func @transform_4(%arg0: i32, %arg1: i32, %arg2: i32, %arg3: i32) -> (i32, i32, i32) {
    %c0_i32 = arith.constant 0 : i32
    %c0_i32_0 = arith.constant 0 : i32
    return %arg0, %c0_i32, %arg1 : i32, i32, i32
  }
}

module attributes {stable_mosaic.version = 11 : i64} {
  func.func @_norm_kernel(%arg0: i32, %arg1: i32, %arg2: i32, %arg3: memref<1x64x128xbf16, #tpu.memory_space<vmem>>, %arg4: memref<1x1x128xf32, #tpu.memory_space<vmem>>, %arg5: memref<1x1x128xf32, #tpu.memory_space<vmem>>, %arg6: memref<1x64x128xbf16, #tpu.memory_space<vmem>>) attributes {dimension_semantics = [#tpu.dimension_semantics<parallel>, #tpu.dimension_semantics<parallel>, #tpu.dimension_semantics<parallel>], iteration_bounds = array<i64: 2, 1, 1>, scalar_prefetch = 0 : i64, scratch_operands = 0 : i64, tpu.core_type = #tpu.core_type<tc>, window_params = [{transform_indices = @transform_0, window_bounds = array<i64: 1, 64, 128>}, {transform_indices = @transform_1, window_bounds = array<i64: 1, 1, 128>}, {transform_indices = @transform_2, window_bounds = array<i64: 1, 1, 128>}, {transform_indices = @transform_3, window_bounds = array<i64: 1, 64, 128>}]} {
    %c0 = arith.constant 0 : index
    %c0_0 = arith.constant 0 : index
    %c0_1 = arith.constant 0 : index
    %0 = vector.load %arg3[%c0, %c0_0, %c0_1] : memref<1x64x128xbf16, #tpu.memory_space<vmem>>, vector<1x64x128xbf16>
    %1 = vector.shape_cast %0 : vector<1x64x128xbf16> to vector<64x128xbf16>
    %2 = arith.extf %1 : vector<64x128xbf16> to vector<64x128xf32>
    %c0_2 = arith.constant 0 : index
    %c0_3 = arith.constant 0 : index
    %c0_4 = arith.constant 0 : index
    %3 = vector.load %arg4[%c0_2, %c0_3, %c0_4] : memref<1x1x128xf32, #tpu.memory_space<vmem>>, vector<1x1x128xf32>
    %4 = vector.shape_cast %3 : vector<1x1x128xf32> to vector<1x128xf32>
    %cst = arith.constant 1.562500e-02 : f32
    %5 = vector.broadcast %cst : f32 to vector<1x128xf32>
    %6 = arith.mulf %4, %5 : vector<1x128xf32>
    %c0_5 = arith.constant 0 : index
    %c0_6 = arith.constant 0 : index
    %c0_7 = arith.constant 0 : index
    %7 = vector.load %arg5[%c0_5, %c0_6, %c0_7] : memref<1x1x128xf32, #tpu.memory_space<vmem>>, vector<1x1x128xf32>
    %8 = vector.shape_cast %7 : vector<1x1x128xf32> to vector<1x128xf32>
    %cst_8 = arith.constant 1.562500e-02 : f32
    %9 = vector.broadcast %cst_8 : f32 to vector<1x128xf32>
    %10 = arith.mulf %8, %9 : vector<1x128xf32>
    %11 = arith.mulf %6, %6 : vector<1x128xf32>
    %12 = arith.subf %10, %11 : vector<1x128xf32>
    %cst_9 = arith.constant 0.000000e+00 : f32
    %13 = vector.broadcast %cst_9 : f32 to vector<1x128xf32>
    %14 = arith.maximumf %12, %13 : vector<1x128xf32>
    %15 = vector.broadcast %6 : vector<1x128xf32> to vector<64x128xf32>
    %16 = arith.subf %2, %15 : vector<64x128xf32>
    %cst_10 = arith.constant 9.99999974E-6 : f32
    %17 = vector.broadcast %cst_10 : f32 to vector<1x128xf32>
    %18 = arith.addf %14, %17 : vector<1x128xf32>
    %19 = math.rsqrt %18 : vector<1x128xf32>
    %20 = vector.broadcast %19 : vector<1x128xf32> to vector<64x128xf32>
    %21 = arith.mulf %16, %20 : vector<64x128xf32>
    %cst_11 = arith.constant 0.000000e+00 : f32
    %22 = vector.broadcast %cst_11 : f32 to vector<64x128xf32>
    %23 = arith.maximumf %21, %22 : vector<64x128xf32>
    %24 = arith.truncf %23 : vector<64x128xf32> to vector<64x128xbf16>
    %c0_12 = arith.constant 0 : index
    %c0_13 = arith.constant 0 : index
    %c0_14 = arith.constant 0 : index
    %25 = vector.load %arg6[%c0_12, %c0_13, %c0_14] : memref<1x64x128xbf16, #tpu.memory_space<vmem>>, vector<1x64x128xbf16>
    %26 = vector.shape_cast %25 : vector<1x64x128xbf16> to vector<64x128xbf16>
    %27 = vector.shape_cast %24 : vector<64x128xbf16> to vector<1x64x128xbf16>
    tpu.vector_store %arg6[%c0_12, %c0_13, %c0_14], %27 {strides = array<i32>} : memref<1x64x128xbf16, #tpu.memory_space<vmem>>, vector<1x64x128xbf16>,
    return
  }
  func.func @transform_0(%arg0: i32, %arg1: i32, %arg2: i32) -> (i32, i32, i32) {
    %c0_i32 = arith.constant 0 : i32
    return %arg0, %arg2, %arg1 : i32, i32, i32
  }
  func.func @transform_1(%arg0: i32, %arg1: i32, %arg2: i32) -> (i32, i32, i32) {
    %c0_i32 = arith.constant 0 : i32
    %c0_i32_0 = arith.constant 0 : i32
    return %arg0, %c0_i32, %arg1 : i32, i32, i32
  }
  func.func @transform_2(%arg0: i32, %arg1: i32, %arg2: i32) -> (i32, i32, i32) {
    %c0_i32 = arith.constant 0 : i32
    %c0_i32_0 = arith.constant 0 : i32
    return %arg0, %c0_i32, %arg1 : i32, i32, i32
  }
  func.func @transform_3(%arg0: i32, %arg1: i32, %arg2: i32) -> (i32, i32, i32) {
    %c0_i32 = arith.constant 0 : i32
    return %arg0, %arg2, %arg1 : i32, i32, i32
  }
}

module attributes {stable_mosaic.version = 11 : i64} {
  func.func @_matmul_kernel(%arg0: i32, %arg1: i32, %arg2: i32, %arg3: i32, %arg4: memref<1x16x128xbf16, #tpu.memory_space<vmem>>, %arg5: memref<128x128xbf16, #tpu.memory_space<vmem>>, %arg6: memref<1x16x128xbf16, #tpu.memory_space<vmem>>, %arg7: memref<1x1x128xf32, #tpu.memory_space<vmem>>, %arg8: memref<1x1x128xf32, #tpu.memory_space<vmem>>, %arg9: memref<16x128xf32, #tpu.memory_space<vmem>>) attributes {dimension_semantics = [#tpu.dimension_semantics<parallel>, #tpu.dimension_semantics<parallel>, #tpu.dimension_semantics<arbitrary>, #tpu.dimension_semantics<arbitrary>], iteration_bounds = array<i64: 2, 1, 1, 3>, scalar_prefetch = 0 : i64, scratch_operands = 1 : i64, tpu.core_type = #tpu.core_type<tc>, window_params = [{transform_indices = @transform_0, window_bounds = array<i64: 1, 16, 128>}, {transform_indices = @transform_1, window_bounds = array<i64: 128, 128>}, {transform_indices = @transform_2, window_bounds = array<i64: 1, 16, 128>}, {transform_indices = @transform_3, window_bounds = array<i64: 1, 1, 128>}, {transform_indices = @transform_4, window_bounds = array<i64: 1, 1, 128>}]} {
    %c0_i32 = arith.constant 0 : i32
    %0 = arith.cmpi eq, %arg3, %c0_i32 : i32
    %1 = arith.extui %0 : i1 to i32
    %c0_i32_0 = arith.constant 0 : i32
    %2 = arith.cmpi ne, %1, %c0_i32_0 : i32
    scf.if %2 {
      %cst_13 = arith.constant 0.000000e+00 : f32
      %18 = vector.broadcast %cst_13 : f32 to vector<16x128xf32>
      %c0_14 = arith.constant 0 : index
      %c0_15 = arith.constant 0 : index
      %19 = vector.load %arg9[%c0_14, %c0_15] : memref<16x128xf32, #tpu.memory_space<vmem>>, vector<16x128xf32>
      tpu.vector_store %arg9[%c0_14, %c0_15], %18 {strides = array<i32>} : memref<16x128xf32, #tpu.memory_space<vmem>>, vector<16x128xf32>,
    } else {
    }
    %c0 = arith.constant 0 : index
    %c0_1 = arith.constant 0 : index
    %3 = vector.load %arg9[%c0, %c0_1] : memref<16x128xf32, #tpu.memory_space<vmem>>, vector<16x128xf32>
    %c0_2 = arith.constant 0 : index
    %c0_3 = arith.constant 0 : index
    %c0_4 = arith.constant 0 : index
    %4 = vector.load %arg4[%c0_2, %c0_3, %c0_4] : memref<1x16x128xbf16, #tpu.memory_space<vmem>>, vector<1x16x128xbf16>
    %5 = vector.shape_cast %4 : vector<1x16x128xbf16> to vector<16x128xbf16>
    %c0_5 = arith.constant 0 : index
    %c0_6 = arith.constant 0 : index
    %6 = vector.load %arg5[%c0_5, %c0_6] : memref<128x128xbf16, #tpu.memory_space<vmem>>, vector<128x128xbf16>
    %cst = arith.constant dense<0.000000e+00> : vector<16x128xf32>
    %7 = tpu.matmul %5, %6, %cst {dimension_numbers = #tpu.dot_dimension_numbers<[1], [0], [0], [1], [0, 0, 1, 1], [], []>} : vector<16x128xbf16>, vector<128x128xbf16>, vector<16x128xf32> -> vector<16x128xf32>
    %8 = arith.addf %3, %7 : vector<16x128xf32>
    %c0_7 = arith.constant 0 : index
    %c0_8 = arith.constant 0 : index
    %9 = vector.load %arg9[%c0_7, %c0_8] : memref<16x128xf32, #tpu.memory_space<vmem>>, vector<16x128xf32>
    tpu.vector_store %arg9[%c0_7, %c0_8], %8 {strides = array<i32>} : memref<16x128xf32, #tpu.memory_space<vmem>>, vector<16x128xf32>,
    %c2_i32 = arith.constant 2 : i32
    %10 = arith.cmpi eq, %arg3, %c2_i32 : i32
    %c0_i32_9 = arith.constant 0 : i32
    %11 = arith.cmpi eq, %arg2, %c0_i32_9 : i32
    %12 = arith.andi %10, %11 : i1
    %13 = arith.extui %12 : i1 to i32
    %c0_i32_10 = arith.constant 0 : i32
    %14 = arith.cmpi ne, %13, %c0_i32_10 : i32
    scf.if %14 {
      %cst_13 = arith.constant 0.000000e+00 : f32
      %18 = vector.broadcast %cst_13 : f32 to vector<1x128xf32>
      %c0_14 = arith.constant 0 : index
      %c0_15 = arith.constant 0 : index
      %c0_16 = arith.constant 0 : index
      %19 = vector.load %arg7[%c0_14, %c0_15, %c0_16] : memref<1x1x128xf32, #tpu.memory_space<vmem>>, vector<1x1x128xf32>
      %20 = vector.shape_cast %19 : vector<1x1x128xf32> to vector<1x128xf32>
      %21 = vector.shape_cast %18 : vector<1x128xf32> to vector<1x1x128xf32>
      tpu.vector_store %arg7[%c0_14, %c0_15, %c0_16], %21 {strides = array<i32>} : memref<1x1x128xf32, #tpu.memory_space<vmem>>, vector<1x1x128xf32>,
      %cst_17 = arith.constant 0.000000e+00 : f32
      %22 = vector.broadcast %cst_17 : f32 to vector<1x128xf32>
      %c0_18 = arith.constant 0 : index
      %c0_19 = arith.constant 0 : index
      %c0_20 = arith.constant 0 : index
      %23 = vector.load %arg8[%c0_18, %c0_19, %c0_20] : memref<1x1x128xf32, #tpu.memory_space<vmem>>, vector<1x1x128xf32>
      %24 = vector.shape_cast %23 : vector<1x1x128xf32> to vector<1x128xf32>
      %25 = vector.shape_cast %22 : vector<1x128xf32> to vector<1x1x128xf32>
      tpu.vector_store %arg8[%c0_18, %c0_19, %c0_20], %25 {strides = array<i32>} : memref<1x1x128xf32, #tpu.memory_space<vmem>>, vector<1x1x128xf32>,
    } else {
    }
    %c2_i32_11 = arith.constant 2 : i32
    %15 = arith.cmpi eq, %arg3, %c2_i32_11 : i32
    %16 = arith.extui %15 : i1 to i32
    %c0_i32_12 = arith.constant 0 : i32
    %17 = arith.cmpi ne, %16, %c0_i32_12 : i32
    scf.if %17 {
      %c0_13 = arith.constant 0 : index
      %c0_14 = arith.constant 0 : index
      %18 = vector.load %arg9[%c0_13, %c0_14] : memref<16x128xf32, #tpu.memory_space<vmem>>, vector<16x128xf32>
      %19 = arith.truncf %18 : vector<16x128xf32> to vector<16x128xbf16>
      %c0_15 = arith.constant 0 : index
      %c0_16 = arith.constant 0 : index
      %c0_17 = arith.constant 0 : index
      %20 = vector.load %arg6[%c0_15, %c0_16, %c0_17] : memref<1x16x128xbf16, #tpu.memory_space<vmem>>, vector<1x16x128xbf16>
      %21 = vector.shape_cast %20 : vector<1x16x128xbf16> to vector<16x128xbf16>
      %22 = vector.shape_cast %19 : vector<16x128xbf16> to vector<1x16x128xbf16>
      tpu.vector_store %arg6[%c0_15, %c0_16, %c0_17], %22 {strides = array<i32>} : memref<1x16x128xbf16, #tpu.memory_space<vmem>>, vector<1x16x128xbf16>,
      %c0_18 = arith.constant 0 : index
      %c0_19 = arith.constant 0 : index
      %c0_20 = arith.constant 0 : index
      %23 = vector.load %arg7[%c0_18, %c0_19, %c0_20] : memref<1x1x128xf32, #tpu.memory_space<vmem>>, vector<1x1x128xf32>
      %24 = vector.shape_cast %23 : vector<1x1x128xf32> to vector<1x128xf32>
      %cst_21 = arith.constant dense<0.000000e+00> : vector<128xf32>
      %25 = vector.multi_reduction <add>, %18, %cst_21 [0] : vector<16x128xf32> to vector<128xf32>
      %26 = vector.shape_cast %25 : vector<128xf32> to vector<1x128xf32>
      %27 = arith.addf %24, %26 : vector<1x128xf32>
      %c0_22 = arith.constant 0 : index
      %c0_23 = arith.constant 0 : index
      %c0_24 = arith.constant 0 : index
      %28 = vector.load %arg7[%c0_22, %c0_23, %c0_24] : memref<1x1x128xf32, #tpu.memory_space<vmem>>, vector<1x1x128xf32>
      %29 = vector.shape_cast %28 : vector<1x1x128xf32> to vector<1x128xf32>
      %30 = vector.shape_cast %27 : vector<1x128xf32> to vector<1x1x128xf32>
      tpu.vector_store %arg7[%c0_22, %c0_23, %c0_24], %30 {strides = array<i32>} : memref<1x1x128xf32, #tpu.memory_space<vmem>>, vector<1x1x128xf32>,
      %c0_25 = arith.constant 0 : index
      %c0_26 = arith.constant 0 : index
      %c0_27 = arith.constant 0 : index
      %31 = vector.load %arg8[%c0_25, %c0_26, %c0_27] : memref<1x1x128xf32, #tpu.memory_space<vmem>>, vector<1x1x128xf32>
      %32 = vector.shape_cast %31 : vector<1x1x128xf32> to vector<1x128xf32>
      %33 = arith.mulf %18, %18 : vector<16x128xf32>
      %cst_28 = arith.constant dense<0.000000e+00> : vector<128xf32>
      %34 = vector.multi_reduction <add>, %33, %cst_28 [0] : vector<16x128xf32> to vector<128xf32>
      %35 = vector.shape_cast %34 : vector<128xf32> to vector<1x128xf32>
      %36 = arith.addf %32, %35 : vector<1x128xf32>
      %c0_29 = arith.constant 0 : index
      %c0_30 = arith.constant 0 : index
      %c0_31 = arith.constant 0 : index
      %37 = vector.load %arg8[%c0_29, %c0_30, %c0_31] : memref<1x1x128xf32, #tpu.memory_space<vmem>>, vector<1x1x128xf32>
      %38 = vector.shape_cast %37 : vector<1x1x128xf32> to vector<1x128xf32>
      %39 = vector.shape_cast %36 : vector<1x128xf32> to vector<1x1x128xf32>
      tpu.vector_store %arg8[%c0_29, %c0_30, %c0_31], %39 {strides = array<i32>} : memref<1x1x128xf32, #tpu.memory_space<vmem>>, vector<1x1x128xf32>,
    } else {
    }
    return
  }
  func.func @transform_0(%arg0: i32, %arg1: i32, %arg2: i32, %arg3: i32) -> (i32, i32, i32) {
    %c0_i32 = arith.constant 0 : i32
    return %arg0, %arg2, %arg3 : i32, i32, i32
  }
  func.func @transform_1(%arg0: i32, %arg1: i32, %arg2: i32, %arg3: i32) -> (i32, i32) {
    %c0_i32 = arith.constant 0 : i32
    return %arg3, %arg1 : i32, i32
  }
  func.func @transform_2(%arg0: i32, %arg1: i32, %arg2: i32, %arg3: i32) -> (i32, i32, i32) {
    %c0_i32 = arith.constant 0 : i32
    return %arg0, %arg2, %arg1 : i32, i32, i32
  }
  func.func @transform_3(%arg0: i32, %arg1: i32, %arg2: i32, %arg3: i32) -> (i32, i32, i32) {
    %c0_i32 = arith.constant 0 : i32
    %c0_i32_0 = arith.constant 0 : i32
    return %arg0, %c0_i32, %arg1 : i32, i32, i32
  }
  func.func @transform_4(%arg0: i32, %arg1: i32, %arg2: i32, %arg3: i32) -> (i32, i32, i32) {
    %c0_i32 = arith.constant 0 : i32
    %c0_i32_0 = arith.constant 0 : i32
    return %arg0, %c0_i32, %arg1 : i32, i32, i32
  }
}

module attributes {stable_mosaic.version = 11 : i64} {
  func.func @_norm_kernel(%arg0: i32, %arg1: i32, %arg2: i32, %arg3: memref<1x16x128xbf16, #tpu.memory_space<vmem>>, %arg4: memref<1x1x128xf32, #tpu.memory_space<vmem>>, %arg5: memref<1x1x128xf32, #tpu.memory_space<vmem>>, %arg6: memref<1x16x128xbf16, #tpu.memory_space<vmem>>) attributes {dimension_semantics = [#tpu.dimension_semantics<parallel>, #tpu.dimension_semantics<parallel>, #tpu.dimension_semantics<parallel>], iteration_bounds = array<i64: 2, 1, 1>, scalar_prefetch = 0 : i64, scratch_operands = 0 : i64, tpu.core_type = #tpu.core_type<tc>, window_params = [{transform_indices = @transform_0, window_bounds = array<i64: 1, 16, 128>}, {transform_indices = @transform_1, window_bounds = array<i64: 1, 1, 128>}, {transform_indices = @transform_2, window_bounds = array<i64: 1, 1, 128>}, {transform_indices = @transform_3, window_bounds = array<i64: 1, 16, 128>}]} {
    %c0 = arith.constant 0 : index
    %c0_0 = arith.constant 0 : index
    %c0_1 = arith.constant 0 : index
    %0 = vector.load %arg3[%c0, %c0_0, %c0_1] : memref<1x16x128xbf16, #tpu.memory_space<vmem>>, vector<1x16x128xbf16>
    %1 = vector.shape_cast %0 : vector<1x16x128xbf16> to vector<16x128xbf16>
    %2 = arith.extf %1 : vector<16x128xbf16> to vector<16x128xf32>
    %c0_2 = arith.constant 0 : index
    %c0_3 = arith.constant 0 : index
    %c0_4 = arith.constant 0 : index
    %3 = vector.load %arg4[%c0_2, %c0_3, %c0_4] : memref<1x1x128xf32, #tpu.memory_space<vmem>>, vector<1x1x128xf32>
    %4 = vector.shape_cast %3 : vector<1x1x128xf32> to vector<1x128xf32>
    %cst = arith.constant 6.250000e-02 : f32
    %5 = vector.broadcast %cst : f32 to vector<1x128xf32>
    %6 = arith.mulf %4, %5 : vector<1x128xf32>
    %c0_5 = arith.constant 0 : index
    %c0_6 = arith.constant 0 : index
    %c0_7 = arith.constant 0 : index
    %7 = vector.load %arg5[%c0_5, %c0_6, %c0_7] : memref<1x1x128xf32, #tpu.memory_space<vmem>>, vector<1x1x128xf32>
    %8 = vector.shape_cast %7 : vector<1x1x128xf32> to vector<1x128xf32>
    %cst_8 = arith.constant 6.250000e-02 : f32
    %9 = vector.broadcast %cst_8 : f32 to vector<1x128xf32>
    %10 = arith.mulf %8, %9 : vector<1x128xf32>
    %11 = arith.mulf %6, %6 : vector<1x128xf32>
    %12 = arith.subf %10, %11 : vector<1x128xf32>
    %cst_9 = arith.constant 0.000000e+00 : f32
    %13 = vector.broadcast %cst_9 : f32 to vector<1x128xf32>
    %14 = arith.maximumf %12, %13 : vector<1x128xf32>
    %15 = vector.broadcast %6 : vector<1x128xf32> to vector<16x128xf32>
    %16 = arith.subf %2, %15 : vector<16x128xf32>
    %cst_10 = arith.constant 9.99999974E-6 : f32
    %17 = vector.broadcast %cst_10 : f32 to vector<1x128xf32>
    %18 = arith.addf %14, %17 : vector<1x128xf32>
    %19 = math.rsqrt %18 : vector<1x128xf32>
    %20 = vector.broadcast %19 : vector<1x128xf32> to vector<16x128xf32>
    %21 = arith.mulf %16, %20 : vector<16x128xf32>
    %cst_11 = arith.constant 0.000000e+00 : f32
    %22 = vector.broadcast %cst_11 : f32 to vector<16x128xf32>
    %23 = arith.maximumf %21, %22 : vector<16x128xf32>
    %24 = arith.truncf %23 : vector<16x128xf32> to vector<16x128xbf16>
    %c0_12 = arith.constant 0 : index
    %c0_13 = arith.constant 0 : index
    %c0_14 = arith.constant 0 : index
    %25 = vector.load %arg6[%c0_12, %c0_13, %c0_14] : memref<1x16x128xbf16, #tpu.memory_space<vmem>>, vector<1x16x128xbf16>
    %26 = vector.shape_cast %25 : vector<1x16x128xbf16> to vector<16x128xbf16>
    %27 = vector.shape_cast %24 : vector<16x128xbf16> to vector<1x16x128xbf16>
    tpu.vector_store %arg6[%c0_12, %c0_13, %c0_14], %27 {strides = array<i32>} : memref<1x16x128xbf16, #tpu.memory_space<vmem>>, vector<1x16x128xbf16>,
    return
  }
  func.func @transform_0(%arg0: i32, %arg1: i32, %arg2: i32) -> (i32, i32, i32) {
    %c0_i32 = arith.constant 0 : i32
    return %arg0, %arg2, %arg1 : i32, i32, i32
  }
  func.func @transform_1(%arg0: i32, %arg1: i32, %arg2: i32) -> (i32, i32, i32) {
    %c0_i32 = arith.constant 0 : i32
    %c0_i32_0 = arith.constant 0 : i32
    return %arg0, %c0_i32, %arg1 : i32, i32, i32
  }
  func.func @transform_2(%arg0: i32, %arg1: i32, %arg2: i32) -> (i32, i32, i32) {
    %c0_i32 = arith.constant 0 : i32
    %c0_i32_0 = arith.constant 0 : i32
    return %arg0, %c0_i32, %arg1 : i32, i32, i32
  }
  func.func @transform_3(%arg0: i32, %arg1: i32, %arg2: i32) -> (i32, i32, i32) {
    %c0_i32 = arith.constant 0 : i32
    return %arg0, %arg2, %arg1 : i32, i32, i32
  }
}

module attributes {stable_mosaic.version = 11 : i64} {
  func.func @_matmul_kernel(%arg0: i32, %arg1: i32, %arg2: i32, %arg3: i32, %arg4: memref<1x16x128xbf16, #tpu.memory_space<vmem>>, %arg5: memref<128x128xbf16, #tpu.memory_space<vmem>>, %arg6: memref<1x16x128xbf16, #tpu.memory_space<vmem>>, %arg7: memref<1x1x128xf32, #tpu.memory_space<vmem>>, %arg8: memref<1x1x128xf32, #tpu.memory_space<vmem>>, %arg9: memref<16x128xf32, #tpu.memory_space<vmem>>) attributes {dimension_semantics = [#tpu.dimension_semantics<parallel>, #tpu.dimension_semantics<parallel>, #tpu.dimension_semantics<arbitrary>, #tpu.dimension_semantics<arbitrary>], iteration_bounds = array<i64: 2, 1, 1, 5>, scalar_prefetch = 0 : i64, scratch_operands = 1 : i64, tpu.core_type = #tpu.core_type<tc>, window_params = [{transform_indices = @transform_0, window_bounds = array<i64: 1, 16, 128>}, {transform_indices = @transform_1, window_bounds = array<i64: 128, 128>}, {transform_indices = @transform_2, window_bounds = array<i64: 1, 16, 128>}, {transform_indices = @transform_3, window_bounds = array<i64: 1, 1, 128>}, {transform_indices = @transform_4, window_bounds = array<i64: 1, 1, 128>}]} {
    %c0_i32 = arith.constant 0 : i32
    %0 = arith.cmpi eq, %arg3, %c0_i32 : i32
    %1 = arith.extui %0 : i1 to i32
    %c0_i32_0 = arith.constant 0 : i32
    %2 = arith.cmpi ne, %1, %c0_i32_0 : i32
    scf.if %2 {
      %cst_13 = arith.constant 0.000000e+00 : f32
      %18 = vector.broadcast %cst_13 : f32 to vector<16x128xf32>
      %c0_14 = arith.constant 0 : index
      %c0_15 = arith.constant 0 : index
      %19 = vector.load %arg9[%c0_14, %c0_15] : memref<16x128xf32, #tpu.memory_space<vmem>>, vector<16x128xf32>
      tpu.vector_store %arg9[%c0_14, %c0_15], %18 {strides = array<i32>} : memref<16x128xf32, #tpu.memory_space<vmem>>, vector<16x128xf32>,
    } else {
    }
    %c0 = arith.constant 0 : index
    %c0_1 = arith.constant 0 : index
    %3 = vector.load %arg9[%c0, %c0_1] : memref<16x128xf32, #tpu.memory_space<vmem>>, vector<16x128xf32>
    %c0_2 = arith.constant 0 : index
    %c0_3 = arith.constant 0 : index
    %c0_4 = arith.constant 0 : index
    %4 = vector.load %arg4[%c0_2, %c0_3, %c0_4] : memref<1x16x128xbf16, #tpu.memory_space<vmem>>, vector<1x16x128xbf16>
    %5 = vector.shape_cast %4 : vector<1x16x128xbf16> to vector<16x128xbf16>
    %c0_5 = arith.constant 0 : index
    %c0_6 = arith.constant 0 : index
    %6 = vector.load %arg5[%c0_5, %c0_6] : memref<128x128xbf16, #tpu.memory_space<vmem>>, vector<128x128xbf16>
    %cst = arith.constant dense<0.000000e+00> : vector<16x128xf32>
    %7 = tpu.matmul %5, %6, %cst {dimension_numbers = #tpu.dot_dimension_numbers<[1], [0], [0], [1], [0, 0, 1, 1], [], []>} : vector<16x128xbf16>, vector<128x128xbf16>, vector<16x128xf32> -> vector<16x128xf32>
    %8 = arith.addf %3, %7 : vector<16x128xf32>
    %c0_7 = arith.constant 0 : index
    %c0_8 = arith.constant 0 : index
    %9 = vector.load %arg9[%c0_7, %c0_8] : memref<16x128xf32, #tpu.memory_space<vmem>>, vector<16x128xf32>
    tpu.vector_store %arg9[%c0_7, %c0_8], %8 {strides = array<i32>} : memref<16x128xf32, #tpu.memory_space<vmem>>, vector<16x128xf32>,
    %c4_i32 = arith.constant 4 : i32
    %10 = arith.cmpi eq, %arg3, %c4_i32 : i32
    %c0_i32_9 = arith.constant 0 : i32
    %11 = arith.cmpi eq, %arg2, %c0_i32_9 : i32
    %12 = arith.andi %10, %11 : i1
    %13 = arith.extui %12 : i1 to i32
    %c0_i32_10 = arith.constant 0 : i32
    %14 = arith.cmpi ne, %13, %c0_i32_10 : i32
    scf.if %14 {
      %cst_13 = arith.constant 0.000000e+00 : f32
      %18 = vector.broadcast %cst_13 : f32 to vector<1x128xf32>
      %c0_14 = arith.constant 0 : index
      %c0_15 = arith.constant 0 : index
      %c0_16 = arith.constant 0 : index
      %19 = vector.load %arg7[%c0_14, %c0_15, %c0_16] : memref<1x1x128xf32, #tpu.memory_space<vmem>>, vector<1x1x128xf32>
      %20 = vector.shape_cast %19 : vector<1x1x128xf32> to vector<1x128xf32>
      %21 = vector.shape_cast %18 : vector<1x128xf32> to vector<1x1x128xf32>
      tpu.vector_store %arg7[%c0_14, %c0_15, %c0_16], %21 {strides = array<i32>} : memref<1x1x128xf32, #tpu.memory_space<vmem>>, vector<1x1x128xf32>,
      %cst_17 = arith.constant 0.000000e+00 : f32
      %22 = vector.broadcast %cst_17 : f32 to vector<1x128xf32>
      %c0_18 = arith.constant 0 : index
      %c0_19 = arith.constant 0 : index
      %c0_20 = arith.constant 0 : index
      %23 = vector.load %arg8[%c0_18, %c0_19, %c0_20] : memref<1x1x128xf32, #tpu.memory_space<vmem>>, vector<1x1x128xf32>
      %24 = vector.shape_cast %23 : vector<1x1x128xf32> to vector<1x128xf32>
      %25 = vector.shape_cast %22 : vector<1x128xf32> to vector<1x1x128xf32>
      tpu.vector_store %arg8[%c0_18, %c0_19, %c0_20], %25 {strides = array<i32>} : memref<1x1x128xf32, #tpu.memory_space<vmem>>, vector<1x1x128xf32>,
    } else {
    }
    %c4_i32_11 = arith.constant 4 : i32
    %15 = arith.cmpi eq, %arg3, %c4_i32_11 : i32
    %16 = arith.extui %15 : i1 to i32
    %c0_i32_12 = arith.constant 0 : i32
    %17 = arith.cmpi ne, %16, %c0_i32_12 : i32
    scf.if %17 {
      %c0_13 = arith.constant 0 : index
      %c0_14 = arith.constant 0 : index
      %18 = vector.load %arg9[%c0_13, %c0_14] : memref<16x128xf32, #tpu.memory_space<vmem>>, vector<16x128xf32>
      %19 = arith.truncf %18 : vector<16x128xf32> to vector<16x128xbf16>
      %c0_15 = arith.constant 0 : index
      %c0_16 = arith.constant 0 : index
      %c0_17 = arith.constant 0 : index
      %20 = vector.load %arg6[%c0_15, %c0_16, %c0_17] : memref<1x16x128xbf16, #tpu.memory_space<vmem>>, vector<1x16x128xbf16>
      %21 = vector.shape_cast %20 : vector<1x16x128xbf16> to vector<16x128xbf16>
      %22 = vector.shape_cast %19 : vector<16x128xbf16> to vector<1x16x128xbf16>
      tpu.vector_store %arg6[%c0_15, %c0_16, %c0_17], %22 {strides = array<i32>} : memref<1x16x128xbf16, #tpu.memory_space<vmem>>, vector<1x16x128xbf16>,
      %c0_18 = arith.constant 0 : index
      %c0_19 = arith.constant 0 : index
      %c0_20 = arith.constant 0 : index
      %23 = vector.load %arg7[%c0_18, %c0_19, %c0_20] : memref<1x1x128xf32, #tpu.memory_space<vmem>>, vector<1x1x128xf32>
      %24 = vector.shape_cast %23 : vector<1x1x128xf32> to vector<1x128xf32>
      %cst_21 = arith.constant dense<0.000000e+00> : vector<128xf32>
      %25 = vector.multi_reduction <add>, %18, %cst_21 [0] : vector<16x128xf32> to vector<128xf32>
      %26 = vector.shape_cast %25 : vector<128xf32> to vector<1x128xf32>
      %27 = arith.addf %24, %26 : vector<1x128xf32>
      %c0_22 = arith.constant 0 : index
      %c0_23 = arith.constant 0 : index
      %c0_24 = arith.constant 0 : index
      %28 = vector.load %arg7[%c0_22, %c0_23, %c0_24] : memref<1x1x128xf32, #tpu.memory_space<vmem>>, vector<1x1x128xf32>
      %29 = vector.shape_cast %28 : vector<1x1x128xf32> to vector<1x128xf32>
      %30 = vector.shape_cast %27 : vector<1x128xf32> to vector<1x1x128xf32>
      tpu.vector_store %arg7[%c0_22, %c0_23, %c0_24], %30 {strides = array<i32>} : memref<1x1x128xf32, #tpu.memory_space<vmem>>, vector<1x1x128xf32>,
      %c0_25 = arith.constant 0 : index
      %c0_26 = arith.constant 0 : index
      %c0_27 = arith.constant 0 : index
      %31 = vector.load %arg8[%c0_25, %c0_26, %c0_27] : memref<1x1x128xf32, #tpu.memory_space<vmem>>, vector<1x1x128xf32>
      %32 = vector.shape_cast %31 : vector<1x1x128xf32> to vector<1x128xf32>
      %33 = arith.mulf %18, %18 : vector<16x128xf32>
      %cst_28 = arith.constant dense<0.000000e+00> : vector<128xf32>
      %34 = vector.multi_reduction <add>, %33, %cst_28 [0] : vector<16x128xf32> to vector<128xf32>
      %35 = vector.shape_cast %34 : vector<128xf32> to vector<1x128xf32>
      %36 = arith.addf %32, %35 : vector<1x128xf32>
      %c0_29 = arith.constant 0 : index
      %c0_30 = arith.constant 0 : index
      %c0_31 = arith.constant 0 : index
      %37 = vector.load %arg8[%c0_29, %c0_30, %c0_31] : memref<1x1x128xf32, #tpu.memory_space<vmem>>, vector<1x1x128xf32>
      %38 = vector.shape_cast %37 : vector<1x1x128xf32> to vector<1x128xf32>
      %39 = vector.shape_cast %36 : vector<1x128xf32> to vector<1x1x128xf32>
      tpu.vector_store %arg8[%c0_29, %c0_30, %c0_31], %39 {strides = array<i32>} : memref<1x1x128xf32, #tpu.memory_space<vmem>>, vector<1x1x128xf32>,
    } else {
    }
    return
  }
  func.func @transform_0(%arg0: i32, %arg1: i32, %arg2: i32, %arg3: i32) -> (i32, i32, i32) {
    %c0_i32 = arith.constant 0 : i32
    return %arg0, %arg2, %arg3 : i32, i32, i32
  }
  func.func @transform_1(%arg0: i32, %arg1: i32, %arg2: i32, %arg3: i32) -> (i32, i32) {
    %c0_i32 = arith.constant 0 : i32
    return %arg3, %arg1 : i32, i32
  }
  func.func @transform_2(%arg0: i32, %arg1: i32, %arg2: i32, %arg3: i32) -> (i32, i32, i32) {
    %c0_i32 = arith.constant 0 : i32
    return %arg0, %arg2, %arg1 : i32, i32, i32
  }
  func.func @transform_3(%arg0: i32, %arg1: i32, %arg2: i32, %arg3: i32) -> (i32, i32, i32) {
    %c0_i32 = arith.constant 0 : i32
    %c0_i32_0 = arith.constant 0 : i32
    return %arg0, %c0_i32, %arg1 : i32, i32, i32
  }
  func.func @transform_4(%arg0: i32, %arg1: i32, %arg2: i32, %arg3: i32) -> (i32, i32, i32) {
    %c0_i32 = arith.constant 0 : i32
    %c0_i32_0 = arith.constant 0 : i32
    return %arg0, %c0_i32, %arg1 : i32, i32, i32
  }
}

module attributes {stable_mosaic.version = 11 : i64} {
  func.func @_norm_kernel(%arg0: i32, %arg1: i32, %arg2: i32, %arg3: memref<1x16x128xbf16, #tpu.memory_space<vmem>>, %arg4: memref<1x1x128xf32, #tpu.memory_space<vmem>>, %arg5: memref<1x1x128xf32, #tpu.memory_space<vmem>>, %arg6: memref<1x16x128xbf16, #tpu.memory_space<vmem>>) attributes {dimension_semantics = [#tpu.dimension_semantics<parallel>, #tpu.dimension_semantics<parallel>, #tpu.dimension_semantics<parallel>], iteration_bounds = array<i64: 2, 1, 1>, scalar_prefetch = 0 : i64, scratch_operands = 0 : i64, tpu.core_type = #tpu.core_type<tc>, window_params = [{transform_indices = @transform_0, window_bounds = array<i64: 1, 16, 128>}, {transform_indices = @transform_1, window_bounds = array<i64: 1, 1, 128>}, {transform_indices = @transform_2, window_bounds = array<i64: 1, 1, 128>}, {transform_indices = @transform_3, window_bounds = array<i64: 1, 16, 128>}]} {
    %c0 = arith.constant 0 : index
    %c0_0 = arith.constant 0 : index
    %c0_1 = arith.constant 0 : index
    %0 = vector.load %arg3[%c0, %c0_0, %c0_1] : memref<1x16x128xbf16, #tpu.memory_space<vmem>>, vector<1x16x128xbf16>
    %1 = vector.shape_cast %0 : vector<1x16x128xbf16> to vector<16x128xbf16>
    %2 = arith.extf %1 : vector<16x128xbf16> to vector<16x128xf32>
    %c0_2 = arith.constant 0 : index
    %c0_3 = arith.constant 0 : index
    %c0_4 = arith.constant 0 : index
    %3 = vector.load %arg4[%c0_2, %c0_3, %c0_4] : memref<1x1x128xf32, #tpu.memory_space<vmem>>, vector<1x1x128xf32>
    %4 = vector.shape_cast %3 : vector<1x1x128xf32> to vector<1x128xf32>
    %cst = arith.constant 2.500000e-01 : f32
    %5 = vector.broadcast %cst : f32 to vector<1x128xf32>
    %6 = arith.mulf %4, %5 : vector<1x128xf32>
    %c0_5 = arith.constant 0 : index
    %c0_6 = arith.constant 0 : index
    %c0_7 = arith.constant 0 : index
    %7 = vector.load %arg5[%c0_5, %c0_6, %c0_7] : memref<1x1x128xf32, #tpu.memory_space<vmem>>, vector<1x1x128xf32>
    %8 = vector.shape_cast %7 : vector<1x1x128xf32> to vector<1x128xf32>
    %cst_8 = arith.constant 2.500000e-01 : f32
    %9 = vector.broadcast %cst_8 : f32 to vector<1x128xf32>
    %10 = arith.mulf %8, %9 : vector<1x128xf32>
    %11 = arith.mulf %6, %6 : vector<1x128xf32>
    %12 = arith.subf %10, %11 : vector<1x128xf32>
    %cst_9 = arith.constant 0.000000e+00 : f32
    %13 = vector.broadcast %cst_9 : f32 to vector<1x128xf32>
    %14 = arith.maximumf %12, %13 : vector<1x128xf32>
    %15 = vector.broadcast %6 : vector<1x128xf32> to vector<16x128xf32>
    %16 = arith.subf %2, %15 : vector<16x128xf32>
    %cst_10 = arith.constant 9.99999974E-6 : f32
    %17 = vector.broadcast %cst_10 : f32 to vector<1x128xf32>
    %18 = arith.addf %14, %17 : vector<1x128xf32>
    %19 = math.rsqrt %18 : vector<1x128xf32>
    %20 = vector.broadcast %19 : vector<1x128xf32> to vector<16x128xf32>
    %21 = arith.mulf %16, %20 : vector<16x128xf32>
    %cst_11 = arith.constant 0.000000e+00 : f32
    %22 = vector.broadcast %cst_11 : f32 to vector<16x128xf32>
    %23 = arith.maximumf %21, %22 : vector<16x128xf32>
    %24 = arith.truncf %23 : vector<16x128xf32> to vector<16x128xbf16>
    %c0_12 = arith.constant 0 : index
    %c0_13 = arith.constant 0 : index
    %c0_14 = arith.constant 0 : index
    %25 = vector.load %arg6[%c0_12, %c0_13, %c0_14] : memref<1x16x128xbf16, #tpu.memory_space<vmem>>, vector<1x16x128xbf16>
    %26 = vector.shape_cast %25 : vector<1x16x128xbf16> to vector<16x128xbf16>
    %27 = vector.shape_cast %24 : vector<16x128xbf16> to vector<1x16x128xbf16>
    tpu.vector_store %arg6[%c0_12, %c0_13, %c0_14], %27 {strides = array<i32>} : memref<1x16x128xbf16, #tpu.memory_space<vmem>>, vector<1x16x128xbf16>,
    return
  }
  func.func @transform_0(%arg0: i32, %arg1: i32, %arg2: i32) -> (i32, i32, i32) {
    %c0_i32 = arith.constant 0 : i32
    return %arg0, %arg2, %arg1 : i32, i32, i32
  }
  func.func @transform_1(%arg0: i32, %arg1: i32, %arg2: i32) -> (i32, i32, i32) {
    %c0_i32 = arith.constant 0 : i32
    %c0_i32_0 = arith.constant 0 : i32
    return %arg0, %c0_i32, %arg1 : i32, i32, i32
  }
  func.func @transform_2(%arg0: i32, %arg1: i32, %arg2: i32) -> (i32, i32, i32) {
    %c0_i32 = arith.constant 0 : i32
    %c0_i32_0 = arith.constant 0 : i32
    return %arg0, %c0_i32, %arg1 : i32, i32, i32
  }
  func.func @transform_3(%arg0: i32, %arg1: i32, %arg2: i32) -> (i32, i32, i32) {
    %c0_i32 = arith.constant 0 : i32
    return %arg0, %arg2, %arg1 : i32, i32, i32
  }
}

module attributes {stable_mosaic.version = 11 : i64} {
  func.func @_norm_kernel(%arg0: i32, %arg1: i32, %arg2: i32, %arg3: memref<1x16x128xbf16, #tpu.memory_space<vmem>>, %arg4: memref<1x1x128xf32, #tpu.memory_space<vmem>>, %arg5: memref<1x1x128xf32, #tpu.memory_space<vmem>>, %arg6: memref<1x16x128xbf16, #tpu.memory_space<vmem>>, %arg7: memref<1x16x128xbf16, #tpu.memory_space<vmem>>) attributes {dimension_semantics = [#tpu.dimension_semantics<parallel>, #tpu.dimension_semantics<parallel>, #tpu.dimension_semantics<parallel>], iteration_bounds = array<i64: 2, 1, 1>, scalar_prefetch = 0 : i64, scratch_operands = 0 : i64, tpu.core_type = #tpu.core_type<tc>, window_params = [{transform_indices = @transform_0, window_bounds = array<i64: 1, 16, 128>}, {transform_indices = @transform_1, window_bounds = array<i64: 1, 1, 128>}, {transform_indices = @transform_2, window_bounds = array<i64: 1, 1, 128>}, {transform_indices = @transform_3, window_bounds = array<i64: 1, 16, 128>}, {transform_indices = @transform_4, window_bounds = array<i64: 1, 16, 128>}]} {
    %c0 = arith.constant 0 : index
    %c0_0 = arith.constant 0 : index
    %c0_1 = arith.constant 0 : index
    %0 = vector.load %arg3[%c0, %c0_0, %c0_1] : memref<1x16x128xbf16, #tpu.memory_space<vmem>>, vector<1x16x128xbf16>
    %1 = vector.shape_cast %0 : vector<1x16x128xbf16> to vector<16x128xbf16>
    %2 = arith.extf %1 : vector<16x128xbf16> to vector<16x128xf32>
    %c0_2 = arith.constant 0 : index
    %c0_3 = arith.constant 0 : index
    %c0_4 = arith.constant 0 : index
    %3 = vector.load %arg4[%c0_2, %c0_3, %c0_4] : memref<1x1x128xf32, #tpu.memory_space<vmem>>, vector<1x1x128xf32>
    %4 = vector.shape_cast %3 : vector<1x1x128xf32> to vector<1x128xf32>
    %cst = arith.constant 2.500000e-01 : f32
    %5 = vector.broadcast %cst : f32 to vector<1x128xf32>
    %6 = arith.mulf %4, %5 : vector<1x128xf32>
    %c0_5 = arith.constant 0 : index
    %c0_6 = arith.constant 0 : index
    %c0_7 = arith.constant 0 : index
    %7 = vector.load %arg5[%c0_5, %c0_6, %c0_7] : memref<1x1x128xf32, #tpu.memory_space<vmem>>, vector<1x1x128xf32>
    %8 = vector.shape_cast %7 : vector<1x1x128xf32> to vector<1x128xf32>
    %cst_8 = arith.constant 2.500000e-01 : f32
    %9 = vector.broadcast %cst_8 : f32 to vector<1x128xf32>
    %10 = arith.mulf %8, %9 : vector<1x128xf32>
    %11 = arith.mulf %6, %6 : vector<1x128xf32>
    %12 = arith.subf %10, %11 : vector<1x128xf32>
    %cst_9 = arith.constant 0.000000e+00 : f32
    %13 = vector.broadcast %cst_9 : f32 to vector<1x128xf32>
    %14 = arith.maximumf %12, %13 : vector<1x128xf32>
    %15 = vector.broadcast %6 : vector<1x128xf32> to vector<16x128xf32>
    %16 = arith.subf %2, %15 : vector<16x128xf32>
    %cst_10 = arith.constant 9.99999974E-6 : f32
    %17 = vector.broadcast %cst_10 : f32 to vector<1x128xf32>
    %18 = arith.addf %14, %17 : vector<1x128xf32>
    %19 = math.rsqrt %18 : vector<1x128xf32>
    %20 = vector.broadcast %19 : vector<1x128xf32> to vector<16x128xf32>
    %21 = arith.mulf %16, %20 : vector<16x128xf32>
    %c0_11 = arith.constant 0 : index
    %c0_12 = arith.constant 0 : index
    %c0_13 = arith.constant 0 : index
    %22 = vector.load %arg6[%c0_11, %c0_12, %c0_13] : memref<1x16x128xbf16, #tpu.memory_space<vmem>>, vector<1x16x128xbf16>
    %23 = vector.shape_cast %22 : vector<1x16x128xbf16> to vector<16x128xbf16>
    %24 = arith.extf %23 : vector<16x128xbf16> to vector<16x128xf32>
    %25 = arith.addf %21, %24 : vector<16x128xf32>
    %26 = arith.truncf %25 : vector<16x128xf32> to vector<16x128xbf16>
    %c0_14 = arith.constant 0 : index
    %c0_15 = arith.constant 0 : index
    %c0_16 = arith.constant 0 : index
    %27 = vector.load %arg7[%c0_14, %c0_15, %c0_16] : memref<1x16x128xbf16, #tpu.memory_space<vmem>>, vector<1x16x128xbf16>
    %28 = vector.shape_cast %27 : vector<1x16x128xbf16> to vector<16x128xbf16>
    %29 = vector.shape_cast %26 : vector<16x128xbf16> to vector<1x16x128xbf16>
    tpu.vector_store %arg7[%c0_14, %c0_15, %c0_16], %29 {strides = array<i32>} : memref<1x16x128xbf16, #tpu.memory_space<vmem>>, vector<1x16x128xbf16>,
    return
  }
  func.func @transform_0(%arg0: i32, %arg1: i32, %arg2: i32) -> (i32, i32, i32) {
    %c0_i32 = arith.constant 0 : i32
    return %arg0, %arg2, %arg1 : i32, i32, i32
  }
  func.func @transform_1(%arg0: i32, %arg1: i32, %arg2: i32) -> (i32, i32, i32) {
    %c0_i32 = arith.constant 0 : i32
    %c0_i32_0 = arith.constant 0 : i32
    return %arg0, %c0_i32, %arg1 : i32, i32, i32
  }
  func.func @transform_2(%arg0: i32, %arg1: i32, %arg2: i32) -> (i32, i32, i32) {
    %c0_i32 = arith.constant 0 : i32
    %c0_i32_0 = arith.constant 0 : i32
    return %arg0, %c0_i32, %arg1 : i32, i32, i32
  }
  func.func @transform_3(%arg0: i32, %arg1: i32, %arg2: i32) -> (i32, i32, i32) {
    %c0_i32 = arith.constant 0 : i32
    return %arg0, %arg2, %arg1 : i32, i32, i32
  }
  func.func @transform_4(%arg0: i32, %arg1: i32, %arg2: i32) -> (i32, i32, i32) {
    %c0_i32 = arith.constant 0 : i32
    return %arg0, %arg2, %arg1 : i32, i32, i32
  }
}

module attributes {stable_mosaic.version = 11 : i64} {
  func.func @_matmul_kernel(%arg0: i32, %arg1: i32, %arg2: i32, %arg3: i32, %arg4: memref<1x16x128xbf16, #tpu.memory_space<vmem>>, %arg5: memref<128x128xbf16, #tpu.memory_space<vmem>>, %arg6: memref<1x16x128xbf16, #tpu.memory_space<vmem>>, %arg7: memref<1x1x128xf32, #tpu.memory_space<vmem>>, %arg8: memref<1x1x128xf32, #tpu.memory_space<vmem>>, %arg9: memref<16x128xf32, #tpu.memory_space<vmem>>) attributes {dimension_semantics = [#tpu.dimension_semantics<parallel>, #tpu.dimension_semantics<parallel>, #tpu.dimension_semantics<arbitrary>, #tpu.dimension_semantics<arbitrary>], iteration_bounds = array<i64: 2, 1, 1, 9>, scalar_prefetch = 0 : i64, scratch_operands = 1 : i64, tpu.core_type = #tpu.core_type<tc>, window_params = [{transform_indices = @transform_0, window_bounds = array<i64: 1, 16, 128>}, {transform_indices = @transform_1, window_bounds = array<i64: 128, 128>}, {transform_indices = @transform_2, window_bounds = array<i64: 1, 16, 128>}, {transform_indices = @transform_3, window_bounds = array<i64: 1, 1, 128>}, {transform_indices = @transform_4, window_bounds = array<i64: 1, 1, 128>}]} {
    %c0_i32 = arith.constant 0 : i32
    %0 = arith.cmpi eq, %arg3, %c0_i32 : i32
    %1 = arith.extui %0 : i1 to i32
    %c0_i32_0 = arith.constant 0 : i32
    %2 = arith.cmpi ne, %1, %c0_i32_0 : i32
    scf.if %2 {
      %cst_13 = arith.constant 0.000000e+00 : f32
      %18 = vector.broadcast %cst_13 : f32 to vector<16x128xf32>
      %c0_14 = arith.constant 0 : index
      %c0_15 = arith.constant 0 : index
      %19 = vector.load %arg9[%c0_14, %c0_15] : memref<16x128xf32, #tpu.memory_space<vmem>>, vector<16x128xf32>
      tpu.vector_store %arg9[%c0_14, %c0_15], %18 {strides = array<i32>} : memref<16x128xf32, #tpu.memory_space<vmem>>, vector<16x128xf32>,
    } else {
    }
    %c0 = arith.constant 0 : index
    %c0_1 = arith.constant 0 : index
    %3 = vector.load %arg9[%c0, %c0_1] : memref<16x128xf32, #tpu.memory_space<vmem>>, vector<16x128xf32>
    %c0_2 = arith.constant 0 : index
    %c0_3 = arith.constant 0 : index
    %c0_4 = arith.constant 0 : index
    %4 = vector.load %arg4[%c0_2, %c0_3, %c0_4] : memref<1x16x128xbf16, #tpu.memory_space<vmem>>, vector<1x16x128xbf16>
    %5 = vector.shape_cast %4 : vector<1x16x128xbf16> to vector<16x128xbf16>
    %c0_5 = arith.constant 0 : index
    %c0_6 = arith.constant 0 : index
    %6 = vector.load %arg5[%c0_5, %c0_6] : memref<128x128xbf16, #tpu.memory_space<vmem>>, vector<128x128xbf16>
    %cst = arith.constant dense<0.000000e+00> : vector<16x128xf32>
    %7 = tpu.matmul %5, %6, %cst {dimension_numbers = #tpu.dot_dimension_numbers<[1], [0], [0], [1], [0, 0, 1, 1], [], []>} : vector<16x128xbf16>, vector<128x128xbf16>, vector<16x128xf32> -> vector<16x128xf32>
    %8 = arith.addf %3, %7 : vector<16x128xf32>
    %c0_7 = arith.constant 0 : index
    %c0_8 = arith.constant 0 : index
    %9 = vector.load %arg9[%c0_7, %c0_8] : memref<16x128xf32, #tpu.memory_space<vmem>>, vector<16x128xf32>
    tpu.vector_store %arg9[%c0_7, %c0_8], %8 {strides = array<i32>} : memref<16x128xf32, #tpu.memory_space<vmem>>, vector<16x128xf32>,
    %c8_i32 = arith.constant 8 : i32
    %10 = arith.cmpi eq, %arg3, %c8_i32 : i32
    %c0_i32_9 = arith.constant 0 : i32
    %11 = arith.cmpi eq, %arg2, %c0_i32_9 : i32
    %12 = arith.andi %10, %11 : i1
    %13 = arith.extui %12 : i1 to i32
    %c0_i32_10 = arith.constant 0 : i32
    %14 = arith.cmpi ne, %13, %c0_i32_10 : i32
    scf.if %14 {
      %cst_13 = arith.constant 0.000000e+00 : f32
      %18 = vector.broadcast %cst_13 : f32 to vector<1x128xf32>
      %c0_14 = arith.constant 0 : index
      %c0_15 = arith.constant 0 : index
      %c0_16 = arith.constant 0 : index
      %19 = vector.load %arg7[%c0_14, %c0_15, %c0_16] : memref<1x1x128xf32, #tpu.memory_space<vmem>>, vector<1x1x128xf32>
      %20 = vector.shape_cast %19 : vector<1x1x128xf32> to vector<1x128xf32>
      %21 = vector.shape_cast %18 : vector<1x128xf32> to vector<1x1x128xf32>
      tpu.vector_store %arg7[%c0_14, %c0_15, %c0_16], %21 {strides = array<i32>} : memref<1x1x128xf32, #tpu.memory_space<vmem>>, vector<1x1x128xf32>,
      %cst_17 = arith.constant 0.000000e+00 : f32
      %22 = vector.broadcast %cst_17 : f32 to vector<1x128xf32>
      %c0_18 = arith.constant 0 : index
      %c0_19 = arith.constant 0 : index
      %c0_20 = arith.constant 0 : index
      %23 = vector.load %arg8[%c0_18, %c0_19, %c0_20] : memref<1x1x128xf32, #tpu.memory_space<vmem>>, vector<1x1x128xf32>
      %24 = vector.shape_cast %23 : vector<1x1x128xf32> to vector<1x128xf32>
      %25 = vector.shape_cast %22 : vector<1x128xf32> to vector<1x1x128xf32>
      tpu.vector_store %arg8[%c0_18, %c0_19, %c0_20], %25 {strides = array<i32>} : memref<1x1x128xf32, #tpu.memory_space<vmem>>, vector<1x1x128xf32>,
    } else {
    }
    %c8_i32_11 = arith.constant 8 : i32
    %15 = arith.cmpi eq, %arg3, %c8_i32_11 : i32
    %16 = arith.extui %15 : i1 to i32
    %c0_i32_12 = arith.constant 0 : i32
    %17 = arith.cmpi ne, %16, %c0_i32_12 : i32
    scf.if %17 {
      %c0_13 = arith.constant 0 : index
      %c0_14 = arith.constant 0 : index
      %18 = vector.load %arg9[%c0_13, %c0_14] : memref<16x128xf32, #tpu.memory_space<vmem>>, vector<16x128xf32>
      %19 = arith.truncf %18 : vector<16x128xf32> to vector<16x128xbf16>
      %c0_15 = arith.constant 0 : index
      %c0_16 = arith.constant 0 : index
      %c0_17 = arith.constant 0 : index
      %20 = vector.load %arg6[%c0_15, %c0_16, %c0_17] : memref<1x16x128xbf16, #tpu.memory_space<vmem>>, vector<1x16x128xbf16>
      %21 = vector.shape_cast %20 : vector<1x16x128xbf16> to vector<16x128xbf16>
      %22 = vector.shape_cast %19 : vector<16x128xbf16> to vector<1x16x128xbf16>
      tpu.vector_store %arg6[%c0_15, %c0_16, %c0_17], %22 {strides = array<i32>} : memref<1x16x128xbf16, #tpu.memory_space<vmem>>, vector<1x16x128xbf16>,
      %c0_18 = arith.constant 0 : index
      %c0_19 = arith.constant 0 : index
      %c0_20 = arith.constant 0 : index
      %23 = vector.load %arg7[%c0_18, %c0_19, %c0_20] : memref<1x1x128xf32, #tpu.memory_space<vmem>>, vector<1x1x128xf32>
      %24 = vector.shape_cast %23 : vector<1x1x128xf32> to vector<1x128xf32>
      %cst_21 = arith.constant dense<0.000000e+00> : vector<128xf32>
      %25 = vector.multi_reduction <add>, %18, %cst_21 [0] : vector<16x128xf32> to vector<128xf32>
      %26 = vector.shape_cast %25 : vector<128xf32> to vector<1x128xf32>
      %27 = arith.addf %24, %26 : vector<1x128xf32>
      %c0_22 = arith.constant 0 : index
      %c0_23 = arith.constant 0 : index
      %c0_24 = arith.constant 0 : index
      %28 = vector.load %arg7[%c0_22, %c0_23, %c0_24] : memref<1x1x128xf32, #tpu.memory_space<vmem>>, vector<1x1x128xf32>
      %29 = vector.shape_cast %28 : vector<1x1x128xf32> to vector<1x128xf32>
      %30 = vector.shape_cast %27 : vector<1x128xf32> to vector<1x1x128xf32>
      tpu.vector_store %arg7[%c0_22, %c0_23, %c0_24], %30 {strides = array<i32>} : memref<1x1x128xf32, #tpu.memory_space<vmem>>, vector<1x1x128xf32>,
      %c0_25 = arith.constant 0 : index
      %c0_26 = arith.constant 0 : index
      %c0_27 = arith.constant 0 : index
      %31 = vector.load %arg8[%c0_25, %c0_26, %c0_27] : memref<1x1x128xf32, #tpu.memory_space<vmem>>, vector<1x1x128xf32>
      %32 = vector.shape_cast %31 : vector<1x1x128xf32> to vector<1x128xf32>
      %33 = arith.mulf %18, %18 : vector<16x128xf32>
      %cst_28 = arith.constant dense<0.000000e+00> : vector<128xf32>
      %34 = vector.multi_reduction <add>, %33, %cst_28 [0] : vector<16x128xf32> to vector<128xf32>
      %35 = vector.shape_cast %34 : vector<128xf32> to vector<1x128xf32>
      %36 = arith.addf %32, %35 : vector<1x128xf32>
      %c0_29 = arith.constant 0 : index
      %c0_30 = arith.constant 0 : index
      %c0_31 = arith.constant 0 : index
      %37 = vector.load %arg8[%c0_29, %c0_30, %c0_31] : memref<1x1x128xf32, #tpu.memory_space<vmem>>, vector<1x1x128xf32>
      %38 = vector.shape_cast %37 : vector<1x1x128xf32> to vector<1x128xf32>
      %39 = vector.shape_cast %36 : vector<1x128xf32> to vector<1x1x128xf32>
      tpu.vector_store %arg8[%c0_29, %c0_30, %c0_31], %39 {strides = array<i32>} : memref<1x1x128xf32, #tpu.memory_space<vmem>>, vector<1x1x128xf32>,
    } else {
    }
    return
  }
  func.func @transform_0(%arg0: i32, %arg1: i32, %arg2: i32, %arg3: i32) -> (i32, i32, i32) {
    %c0_i32 = arith.constant 0 : i32
    return %arg0, %arg2, %arg3 : i32, i32, i32
  }
  func.func @transform_1(%arg0: i32, %arg1: i32, %arg2: i32, %arg3: i32) -> (i32, i32) {
    %c0_i32 = arith.constant 0 : i32
    return %arg3, %arg1 : i32, i32
  }
  func.func @transform_2(%arg0: i32, %arg1: i32, %arg2: i32, %arg3: i32) -> (i32, i32, i32) {
    %c0_i32 = arith.constant 0 : i32
    return %arg0, %arg2, %arg1 : i32, i32, i32
  }
  func.func @transform_3(%arg0: i32, %arg1: i32, %arg2: i32, %arg3: i32) -> (i32, i32, i32) {
    %c0_i32 = arith.constant 0 : i32
    %c0_i32_0 = arith.constant 0 : i32
    return %arg0, %c0_i32, %arg1 : i32, i32, i32
  }
  func.func @transform_4(%arg0: i32, %arg1: i32, %arg2: i32, %arg3: i32) -> (i32, i32, i32) {
    %c0_i32 = arith.constant 0 : i32
    %c0_i32_0 = arith.constant 0 : i32
    return %arg0, %c0_i32, %arg1 : i32, i32, i32
  }
}

module attributes {stable_mosaic.version = 11 : i64} {
  func.func @_matmul_kernel(%arg0: i32, %arg1: i32, %arg2: i32, %arg3: i32, %arg4: memref<1x16x512xbf16, #tpu.memory_space<vmem>>, %arg5: memref<512x256xbf16, #tpu.memory_space<vmem>>, %arg6: memref<1x16x256xbf16, #tpu.memory_space<vmem>>, %arg7: memref<1x1x256xf32, #tpu.memory_space<vmem>>, %arg8: memref<1x1x256xf32, #tpu.memory_space<vmem>>, %arg9: memref<16x256xf32, #tpu.memory_space<vmem>>) attributes {dimension_semantics = [#tpu.dimension_semantics<parallel>, #tpu.dimension_semantics<parallel>, #tpu.dimension_semantics<arbitrary>, #tpu.dimension_semantics<arbitrary>], iteration_bounds = array<i64: 2, 1, 1, 1>, scalar_prefetch = 0 : i64, scratch_operands = 1 : i64, tpu.core_type = #tpu.core_type<tc>, window_params = [{transform_indices = @transform_0, window_bounds = array<i64: 1, 16, 512>}, {transform_indices = @transform_1, window_bounds = array<i64: 512, 256>}, {transform_indices = @transform_2, window_bounds = array<i64: 1, 16, 256>}, {transform_indices = @transform_3, window_bounds = array<i64: 1, 1, 256>}, {transform_indices = @transform_4, window_bounds = array<i64: 1, 1, 256>}]} {
    %c0_i32 = arith.constant 0 : i32
    %0 = arith.cmpi eq, %arg3, %c0_i32 : i32
    %1 = arith.extui %0 : i1 to i32
    %c0_i32_0 = arith.constant 0 : i32
    %2 = arith.cmpi ne, %1, %c0_i32_0 : i32
    scf.if %2 {
      %cst_14 = arith.constant 0.000000e+00 : f32
      %18 = vector.broadcast %cst_14 : f32 to vector<16x256xf32>
      %c0_15 = arith.constant 0 : index
      %c0_16 = arith.constant 0 : index
      %19 = vector.load %arg9[%c0_15, %c0_16] : memref<16x256xf32, #tpu.memory_space<vmem>>, vector<16x256xf32>
      tpu.vector_store %arg9[%c0_15, %c0_16], %18 {strides = array<i32>} : memref<16x256xf32, #tpu.memory_space<vmem>>, vector<16x256xf32>,
    } else {
    }
    %c0 = arith.constant 0 : index
    %c0_1 = arith.constant 0 : index
    %3 = vector.load %arg9[%c0, %c0_1] : memref<16x256xf32, #tpu.memory_space<vmem>>, vector<16x256xf32>
    %c0_2 = arith.constant 0 : index
    %c0_3 = arith.constant 0 : index
    %c0_4 = arith.constant 0 : index
    %4 = vector.load %arg4[%c0_2, %c0_3, %c0_4] : memref<1x16x512xbf16, #tpu.memory_space<vmem>>, vector<1x16x512xbf16>
    %5 = vector.shape_cast %4 : vector<1x16x512xbf16> to vector<16x512xbf16>
    %c0_5 = arith.constant 0 : index
    %c0_6 = arith.constant 0 : index
    %6 = vector.load %arg5[%c0_5, %c0_6] : memref<512x256xbf16, #tpu.memory_space<vmem>>, vector<512x256xbf16>
    %cst = arith.constant dense<0.000000e+00> : vector<16x256xf32>
    %7 = tpu.matmul %5, %6, %cst {dimension_numbers = #tpu.dot_dimension_numbers<[1], [0], [0], [1], [0, 0, 1, 1], [], []>} : vector<16x512xbf16>, vector<512x256xbf16>, vector<16x256xf32> -> vector<16x256xf32>
    %8 = arith.addf %3, %7 : vector<16x256xf32>
    %c0_7 = arith.constant 0 : index
    %c0_8 = arith.constant 0 : index
    %9 = vector.load %arg9[%c0_7, %c0_8] : memref<16x256xf32, #tpu.memory_space<vmem>>, vector<16x256xf32>
    tpu.vector_store %arg9[%c0_7, %c0_8], %8 {strides = array<i32>} : memref<16x256xf32, #tpu.memory_space<vmem>>, vector<16x256xf32>,
    %c0_i32_9 = arith.constant 0 : i32
    %10 = arith.cmpi eq, %arg3, %c0_i32_9 : i32
    %c0_i32_10 = arith.constant 0 : i32
    %11 = arith.cmpi eq, %arg2, %c0_i32_10 : i32
    %12 = arith.andi %10, %11 : i1
    %13 = arith.extui %12 : i1 to i32
    %c0_i32_11 = arith.constant 0 : i32
    %14 = arith.cmpi ne, %13, %c0_i32_11 : i32
    scf.if %14 {
      %cst_14 = arith.constant 0.000000e+00 : f32
      %18 = vector.broadcast %cst_14 : f32 to vector<1x256xf32>
      %c0_15 = arith.constant 0 : index
      %c0_16 = arith.constant 0 : index
      %c0_17 = arith.constant 0 : index
      %19 = vector.load %arg7[%c0_15, %c0_16, %c0_17] : memref<1x1x256xf32, #tpu.memory_space<vmem>>, vector<1x1x256xf32>
      %20 = vector.shape_cast %19 : vector<1x1x256xf32> to vector<1x256xf32>
      %21 = vector.shape_cast %18 : vector<1x256xf32> to vector<1x1x256xf32>
      tpu.vector_store %arg7[%c0_15, %c0_16, %c0_17], %21 {strides = array<i32>} : memref<1x1x256xf32, #tpu.memory_space<vmem>>, vector<1x1x256xf32>,
      %cst_18 = arith.constant 0.000000e+00 : f32
      %22 = vector.broadcast %cst_18 : f32 to vector<1x256xf32>
      %c0_19 = arith.constant 0 : index
      %c0_20 = arith.constant 0 : index
      %c0_21 = arith.constant 0 : index
      %23 = vector.load %arg8[%c0_19, %c0_20, %c0_21] : memref<1x1x256xf32, #tpu.memory_space<vmem>>, vector<1x1x256xf32>
      %24 = vector.shape_cast %23 : vector<1x1x256xf32> to vector<1x256xf32>
      %25 = vector.shape_cast %22 : vector<1x256xf32> to vector<1x1x256xf32>
      tpu.vector_store %arg8[%c0_19, %c0_20, %c0_21], %25 {strides = array<i32>} : memref<1x1x256xf32, #tpu.memory_space<vmem>>, vector<1x1x256xf32>,
    } else {
    }
    %c0_i32_12 = arith.constant 0 : i32
    %15 = arith.cmpi eq, %arg3, %c0_i32_12 : i32
    %16 = arith.extui %15 : i1 to i32
    %c0_i32_13 = arith.constant 0 : i32
    %17 = arith.cmpi ne, %16, %c0_i32_13 : i32
    scf.if %17 {
      %c0_14 = arith.constant 0 : index
      %c0_15 = arith.constant 0 : index
      %18 = vector.load %arg9[%c0_14, %c0_15] : memref<16x256xf32, #tpu.memory_space<vmem>>, vector<16x256xf32>
      %19 = arith.truncf %18 : vector<16x256xf32> to vector<16x256xbf16>
      %c0_16 = arith.constant 0 : index
      %c0_17 = arith.constant 0 : index
      %c0_18 = arith.constant 0 : index
      %20 = vector.load %arg6[%c0_16, %c0_17, %c0_18] : memref<1x16x256xbf16, #tpu.memory_space<vmem>>, vector<1x16x256xbf16>
      %21 = vector.shape_cast %20 : vector<1x16x256xbf16> to vector<16x256xbf16>
      %22 = vector.shape_cast %19 : vector<16x256xbf16> to vector<1x16x256xbf16>
      tpu.vector_store %arg6[%c0_16, %c0_17, %c0_18], %22 {strides = array<i32>} : memref<1x16x256xbf16, #tpu.memory_space<vmem>>, vector<1x16x256xbf16>,
      %c0_19 = arith.constant 0 : index
      %c0_20 = arith.constant 0 : index
      %c0_21 = arith.constant 0 : index
      %23 = vector.load %arg7[%c0_19, %c0_20, %c0_21] : memref<1x1x256xf32, #tpu.memory_space<vmem>>, vector<1x1x256xf32>
      %24 = vector.shape_cast %23 : vector<1x1x256xf32> to vector<1x256xf32>
      %cst_22 = arith.constant dense<0.000000e+00> : vector<256xf32>
      %25 = vector.multi_reduction <add>, %18, %cst_22 [0] : vector<16x256xf32> to vector<256xf32>
      %26 = vector.shape_cast %25 : vector<256xf32> to vector<1x256xf32>
      %27 = arith.addf %24, %26 : vector<1x256xf32>
      %c0_23 = arith.constant 0 : index
      %c0_24 = arith.constant 0 : index
      %c0_25 = arith.constant 0 : index
      %28 = vector.load %arg7[%c0_23, %c0_24, %c0_25] : memref<1x1x256xf32, #tpu.memory_space<vmem>>, vector<1x1x256xf32>
      %29 = vector.shape_cast %28 : vector<1x1x256xf32> to vector<1x256xf32>
      %30 = vector.shape_cast %27 : vector<1x256xf32> to vector<1x1x256xf32>
      tpu.vector_store %arg7[%c0_23, %c0_24, %c0_25], %30 {strides = array<i32>} : memref<1x1x256xf32, #tpu.memory_space<vmem>>, vector<1x1x256xf32>,
      %c0_26 = arith.constant 0 : index
      %c0_27 = arith.constant 0 : index
      %c0_28 = arith.constant 0 : index
      %31 = vector.load %arg8[%c0_26, %c0_27, %c0_28] : memref<1x1x256xf32, #tpu.memory_space<vmem>>, vector<1x1x256xf32>
      %32 = vector.shape_cast %31 : vector<1x1x256xf32> to vector<1x256xf32>
      %33 = arith.mulf %18, %18 : vector<16x256xf32>
      %cst_29 = arith.constant dense<0.000000e+00> : vector<256xf32>
      %34 = vector.multi_reduction <add>, %33, %cst_29 [0] : vector<16x256xf32> to vector<256xf32>
      %35 = vector.shape_cast %34 : vector<256xf32> to vector<1x256xf32>
      %36 = arith.addf %32, %35 : vector<1x256xf32>
      %c0_30 = arith.constant 0 : index
      %c0_31 = arith.constant 0 : index
      %c0_32 = arith.constant 0 : index
      %37 = vector.load %arg8[%c0_30, %c0_31, %c0_32] : memref<1x1x256xf32, #tpu.memory_space<vmem>>, vector<1x1x256xf32>
      %38 = vector.shape_cast %37 : vector<1x1x256xf32> to vector<1x256xf32>
      %39 = vector.shape_cast %36 : vector<1x256xf32> to vector<1x1x256xf32>
      tpu.vector_store %arg8[%c0_30, %c0_31, %c0_32], %39 {strides = array<i32>} : memref<1x1x256xf32, #tpu.memory_space<vmem>>, vector<1x1x256xf32>,
    } else {
    }
    return
  }
  func.func @transform_0(%arg0: i32, %arg1: i32, %arg2: i32, %arg3: i32) -> (i32, i32, i32) {
    %c0_i32 = arith.constant 0 : i32
    return %arg0, %arg2, %arg3 : i32, i32, i32
  }
  func.func @transform_1(%arg0: i32, %arg1: i32, %arg2: i32, %arg3: i32) -> (i32, i32) {
    %c0_i32 = arith.constant 0 : i32
    return %arg3, %arg1 : i32, i32
  }
  func.func @transform_2(%arg0: i32, %arg1: i32, %arg2: i32, %arg3: i32) -> (i32, i32, i32) {
    %c0_i32 = arith.constant 0 : i32
    return %arg0, %arg2, %arg1 : i32, i32, i32
  }
  func.func @transform_3(%arg0: i32, %arg1: i32, %arg2: i32, %arg3: i32) -> (i32, i32, i32) {
    %c0_i32 = arith.constant 0 : i32
    %c0_i32_0 = arith.constant 0 : i32
    return %arg0, %c0_i32, %arg1 : i32, i32, i32
  }
  func.func @transform_4(%arg0: i32, %arg1: i32, %arg2: i32, %arg3: i32) -> (i32, i32, i32) {
    %c0_i32 = arith.constant 0 : i32
    %c0_i32_0 = arith.constant 0 : i32
    return %arg0, %c0_i32, %arg1 : i32, i32, i32
  }
}

module attributes {stable_mosaic.version = 11 : i64} {
  func.func @_norm_kernel(%arg0: i32, %arg1: i32, %arg2: i32, %arg3: memref<1x16x256xbf16, #tpu.memory_space<vmem>>, %arg4: memref<1x1x256xf32, #tpu.memory_space<vmem>>, %arg5: memref<1x1x256xf32, #tpu.memory_space<vmem>>, %arg6: memref<1x16x256xbf16, #tpu.memory_space<vmem>>) attributes {dimension_semantics = [#tpu.dimension_semantics<parallel>, #tpu.dimension_semantics<parallel>, #tpu.dimension_semantics<parallel>], iteration_bounds = array<i64: 2, 1, 1>, scalar_prefetch = 0 : i64, scratch_operands = 0 : i64, tpu.core_type = #tpu.core_type<tc>, window_params = [{transform_indices = @transform_0, window_bounds = array<i64: 1, 16, 256>}, {transform_indices = @transform_1, window_bounds = array<i64: 1, 1, 256>}, {transform_indices = @transform_2, window_bounds = array<i64: 1, 1, 256>}, {transform_indices = @transform_3, window_bounds = array<i64: 1, 16, 256>}]} {
    %c0 = arith.constant 0 : index
    %c0_0 = arith.constant 0 : index
    %c0_1 = arith.constant 0 : index
    %0 = vector.load %arg3[%c0, %c0_0, %c0_1] : memref<1x16x256xbf16, #tpu.memory_space<vmem>>, vector<1x16x256xbf16>
    %1 = vector.shape_cast %0 : vector<1x16x256xbf16> to vector<16x256xbf16>
    %2 = arith.extf %1 : vector<16x256xbf16> to vector<16x256xf32>
    %c0_2 = arith.constant 0 : index
    %c0_3 = arith.constant 0 : index
    %c0_4 = arith.constant 0 : index
    %3 = vector.load %arg4[%c0_2, %c0_3, %c0_4] : memref<1x1x256xf32, #tpu.memory_space<vmem>>, vector<1x1x256xf32>
    %4 = vector.shape_cast %3 : vector<1x1x256xf32> to vector<1x256xf32>
    %cst = arith.constant 6.250000e-02 : f32
    %5 = vector.broadcast %cst : f32 to vector<1x256xf32>
    %6 = arith.mulf %4, %5 : vector<1x256xf32>
    %c0_5 = arith.constant 0 : index
    %c0_6 = arith.constant 0 : index
    %c0_7 = arith.constant 0 : index
    %7 = vector.load %arg5[%c0_5, %c0_6, %c0_7] : memref<1x1x256xf32, #tpu.memory_space<vmem>>, vector<1x1x256xf32>
    %8 = vector.shape_cast %7 : vector<1x1x256xf32> to vector<1x256xf32>
    %cst_8 = arith.constant 6.250000e-02 : f32
    %9 = vector.broadcast %cst_8 : f32 to vector<1x256xf32>
    %10 = arith.mulf %8, %9 : vector<1x256xf32>
    %11 = arith.mulf %6, %6 : vector<1x256xf32>
    %12 = arith.subf %10, %11 : vector<1x256xf32>
    %cst_9 = arith.constant 0.000000e+00 : f32
    %13 = vector.broadcast %cst_9 : f32 to vector<1x256xf32>
    %14 = arith.maximumf %12, %13 : vector<1x256xf32>
    %15 = vector.broadcast %6 : vector<1x256xf32> to vector<16x256xf32>
    %16 = arith.subf %2, %15 : vector<16x256xf32>
    %cst_10 = arith.constant 9.99999974E-6 : f32
    %17 = vector.broadcast %cst_10 : f32 to vector<1x256xf32>
    %18 = arith.addf %14, %17 : vector<1x256xf32>
    %19 = math.rsqrt %18 : vector<1x256xf32>
    %20 = vector.broadcast %19 : vector<1x256xf32> to vector<16x256xf32>
    %21 = arith.mulf %16, %20 : vector<16x256xf32>
    %cst_11 = arith.constant 0.000000e+00 : f32
    %22 = vector.broadcast %cst_11 : f32 to vector<16x256xf32>
    %23 = arith.maximumf %21, %22 : vector<16x256xf32>
    %24 = arith.truncf %23 : vector<16x256xf32> to vector<16x256xbf16>
    %c0_12 = arith.constant 0 : index
    %c0_13 = arith.constant 0 : index
    %c0_14 = arith.constant 0 : index
    %25 = vector.load %arg6[%c0_12, %c0_13, %c0_14] : memref<1x16x256xbf16, #tpu.memory_space<vmem>>, vector<1x16x256xbf16>
    %26 = vector.shape_cast %25 : vector<1x16x256xbf16> to vector<16x256xbf16>
    %27 = vector.shape_cast %24 : vector<16x256xbf16> to vector<1x16x256xbf16>
    tpu.vector_store %arg6[%c0_12, %c0_13, %c0_14], %27 {strides = array<i32>} : memref<1x16x256xbf16, #tpu.memory_space<vmem>>, vector<1x16x256xbf16>,
    return
  }
  func.func @transform_0(%arg0: i32, %arg1: i32, %arg2: i32) -> (i32, i32, i32) {
    %c0_i32 = arith.constant 0 : i32
    return %arg0, %arg2, %arg1 : i32, i32, i32
  }
  func.func @transform_1(%arg0: i32, %arg1: i32, %arg2: i32) -> (i32, i32, i32) {
    %c0_i32 = arith.constant 0 : i32
    %c0_i32_0 = arith.constant 0 : i32
    return %arg0, %c0_i32, %arg1 : i32, i32, i32
  }
  func.func @transform_2(%arg0: i32, %arg1: i32, %arg2: i32) -> (i32, i32, i32) {
    %c0_i32 = arith.constant 0 : i32
    %c0_i32_0 = arith.constant 0 : i32
    return %arg0, %c0_i32, %arg1 : i32, i32, i32
  }
  func.func @transform_3(%arg0: i32, %arg1: i32, %arg2: i32) -> (i32, i32, i32) {
    %c0_i32 = arith.constant 0 : i32
    return %arg0, %arg2, %arg1 : i32, i32, i32
  }
}

module attributes {stable_mosaic.version = 11 : i64} {
  func.func @_matmul_kernel(%arg0: i32, %arg1: i32, %arg2: i32, %arg3: i32, %arg4: memref<1x16x256xbf16, #tpu.memory_space<vmem>>, %arg5: memref<256x128xbf16, #tpu.memory_space<vmem>>, %arg6: memref<1x16x128xbf16, #tpu.memory_space<vmem>>, %arg7: memref<1x1x128xf32, #tpu.memory_space<vmem>>, %arg8: memref<1x1x128xf32, #tpu.memory_space<vmem>>, %arg9: memref<16x128xf32, #tpu.memory_space<vmem>>) attributes {dimension_semantics = [#tpu.dimension_semantics<parallel>, #tpu.dimension_semantics<parallel>, #tpu.dimension_semantics<arbitrary>, #tpu.dimension_semantics<arbitrary>], iteration_bounds = array<i64: 2, 1, 1, 1>, scalar_prefetch = 0 : i64, scratch_operands = 1 : i64, tpu.core_type = #tpu.core_type<tc>, window_params = [{transform_indices = @transform_0, window_bounds = array<i64: 1, 16, 256>}, {transform_indices = @transform_1, window_bounds = array<i64: 256, 128>}, {transform_indices = @transform_2, window_bounds = array<i64: 1, 16, 128>}, {transform_indices = @transform_3, window_bounds = array<i64: 1, 1, 128>}, {transform_indices = @transform_4, window_bounds = array<i64: 1, 1, 128>}]} {
    %c0_i32 = arith.constant 0 : i32
    %0 = arith.cmpi eq, %arg3, %c0_i32 : i32
    %1 = arith.extui %0 : i1 to i32
    %c0_i32_0 = arith.constant 0 : i32
    %2 = arith.cmpi ne, %1, %c0_i32_0 : i32
    scf.if %2 {
      %cst_14 = arith.constant 0.000000e+00 : f32
      %18 = vector.broadcast %cst_14 : f32 to vector<16x128xf32>
      %c0_15 = arith.constant 0 : index
      %c0_16 = arith.constant 0 : index
      %19 = vector.load %arg9[%c0_15, %c0_16] : memref<16x128xf32, #tpu.memory_space<vmem>>, vector<16x128xf32>
      tpu.vector_store %arg9[%c0_15, %c0_16], %18 {strides = array<i32>} : memref<16x128xf32, #tpu.memory_space<vmem>>, vector<16x128xf32>,
    } else {
    }
    %c0 = arith.constant 0 : index
    %c0_1 = arith.constant 0 : index
    %3 = vector.load %arg9[%c0, %c0_1] : memref<16x128xf32, #tpu.memory_space<vmem>>, vector<16x128xf32>
    %c0_2 = arith.constant 0 : index
    %c0_3 = arith.constant 0 : index
    %c0_4 = arith.constant 0 : index
    %4 = vector.load %arg4[%c0_2, %c0_3, %c0_4] : memref<1x16x256xbf16, #tpu.memory_space<vmem>>, vector<1x16x256xbf16>
    %5 = vector.shape_cast %4 : vector<1x16x256xbf16> to vector<16x256xbf16>
    %c0_5 = arith.constant 0 : index
    %c0_6 = arith.constant 0 : index
    %6 = vector.load %arg5[%c0_5, %c0_6] : memref<256x128xbf16, #tpu.memory_space<vmem>>, vector<256x128xbf16>
    %cst = arith.constant dense<0.000000e+00> : vector<16x128xf32>
    %7 = tpu.matmul %5, %6, %cst {dimension_numbers = #tpu.dot_dimension_numbers<[1], [0], [0], [1], [0, 0, 1, 1], [], []>} : vector<16x256xbf16>, vector<256x128xbf16>, vector<16x128xf32> -> vector<16x128xf32>
    %8 = arith.addf %3, %7 : vector<16x128xf32>
    %c0_7 = arith.constant 0 : index
    %c0_8 = arith.constant 0 : index
    %9 = vector.load %arg9[%c0_7, %c0_8] : memref<16x128xf32, #tpu.memory_space<vmem>>, vector<16x128xf32>
    tpu.vector_store %arg9[%c0_7, %c0_8], %8 {strides = array<i32>} : memref<16x128xf32, #tpu.memory_space<vmem>>, vector<16x128xf32>,
    %c0_i32_9 = arith.constant 0 : i32
    %10 = arith.cmpi eq, %arg3, %c0_i32_9 : i32
    %c0_i32_10 = arith.constant 0 : i32
    %11 = arith.cmpi eq, %arg2, %c0_i32_10 : i32
    %12 = arith.andi %10, %11 : i1
    %13 = arith.extui %12 : i1 to i32
    %c0_i32_11 = arith.constant 0 : i32
    %14 = arith.cmpi ne, %13, %c0_i32_11 : i32
    scf.if %14 {
      %cst_14 = arith.constant 0.000000e+00 : f32
      %18 = vector.broadcast %cst_14 : f32 to vector<1x128xf32>
      %c0_15 = arith.constant 0 : index
      %c0_16 = arith.constant 0 : index
      %c0_17 = arith.constant 0 : index
      %19 = vector.load %arg7[%c0_15, %c0_16, %c0_17] : memref<1x1x128xf32, #tpu.memory_space<vmem>>, vector<1x1x128xf32>
      %20 = vector.shape_cast %19 : vector<1x1x128xf32> to vector<1x128xf32>
      %21 = vector.shape_cast %18 : vector<1x128xf32> to vector<1x1x128xf32>
      tpu.vector_store %arg7[%c0_15, %c0_16, %c0_17], %21 {strides = array<i32>} : memref<1x1x128xf32, #tpu.memory_space<vmem>>, vector<1x1x128xf32>,
      %cst_18 = arith.constant 0.000000e+00 : f32
      %22 = vector.broadcast %cst_18 : f32 to vector<1x128xf32>
      %c0_19 = arith.constant 0 : index
      %c0_20 = arith.constant 0 : index
      %c0_21 = arith.constant 0 : index
      %23 = vector.load %arg8[%c0_19, %c0_20, %c0_21] : memref<1x1x128xf32, #tpu.memory_space<vmem>>, vector<1x1x128xf32>
      %24 = vector.shape_cast %23 : vector<1x1x128xf32> to vector<1x128xf32>
      %25 = vector.shape_cast %22 : vector<1x128xf32> to vector<1x1x128xf32>
      tpu.vector_store %arg8[%c0_19, %c0_20, %c0_21], %25 {strides = array<i32>} : memref<1x1x128xf32, #tpu.memory_space<vmem>>, vector<1x1x128xf32>,
    } else {
    }
    %c0_i32_12 = arith.constant 0 : i32
    %15 = arith.cmpi eq, %arg3, %c0_i32_12 : i32
    %16 = arith.extui %15 : i1 to i32
    %c0_i32_13 = arith.constant 0 : i32
    %17 = arith.cmpi ne, %16, %c0_i32_13 : i32
    scf.if %17 {
      %c0_14 = arith.constant 0 : index
      %c0_15 = arith.constant 0 : index
      %18 = vector.load %arg9[%c0_14, %c0_15] : memref<16x128xf32, #tpu.memory_space<vmem>>, vector<16x128xf32>
      %19 = arith.truncf %18 : vector<16x128xf32> to vector<16x128xbf16>
      %c0_16 = arith.constant 0 : index
      %c0_17 = arith.constant 0 : index
      %c0_18 = arith.constant 0 : index
      %20 = vector.load %arg6[%c0_16, %c0_17, %c0_18] : memref<1x16x128xbf16, #tpu.memory_space<vmem>>, vector<1x16x128xbf16>
      %21 = vector.shape_cast %20 : vector<1x16x128xbf16> to vector<16x128xbf16>
      %22 = vector.shape_cast %19 : vector<16x128xbf16> to vector<1x16x128xbf16>
      tpu.vector_store %arg6[%c0_16, %c0_17, %c0_18], %22 {strides = array<i32>} : memref<1x16x128xbf16, #tpu.memory_space<vmem>>, vector<1x16x128xbf16>,
      %c0_19 = arith.constant 0 : index
      %c0_20 = arith.constant 0 : index
      %c0_21 = arith.constant 0 : index
      %23 = vector.load %arg7[%c0_19, %c0_20, %c0_21] : memref<1x1x128xf32, #tpu.memory_space<vmem>>, vector<1x1x128xf32>
      %24 = vector.shape_cast %23 : vector<1x1x128xf32> to vector<1x128xf32>
      %cst_22 = arith.constant dense<0.000000e+00> : vector<128xf32>
      %25 = vector.multi_reduction <add>, %18, %cst_22 [0] : vector<16x128xf32> to vector<128xf32>
      %26 = vector.shape_cast %25 : vector<128xf32> to vector<1x128xf32>
      %27 = arith.addf %24, %26 : vector<1x128xf32>
      %c0_23 = arith.constant 0 : index
      %c0_24 = arith.constant 0 : index
      %c0_25 = arith.constant 0 : index
      %28 = vector.load %arg7[%c0_23, %c0_24, %c0_25] : memref<1x1x128xf32, #tpu.memory_space<vmem>>, vector<1x1x128xf32>
      %29 = vector.shape_cast %28 : vector<1x1x128xf32> to vector<1x128xf32>
      %30 = vector.shape_cast %27 : vector<1x128xf32> to vector<1x1x128xf32>
      tpu.vector_store %arg7[%c0_23, %c0_24, %c0_25], %30 {strides = array<i32>} : memref<1x1x128xf32, #tpu.memory_space<vmem>>, vector<1x1x128xf32>,
      %c0_26 = arith.constant 0 : index
      %c0_27 = arith.constant 0 : index
      %c0_28 = arith.constant 0 : index
      %31 = vector.load %arg8[%c0_26, %c0_27, %c0_28] : memref<1x1x128xf32, #tpu.memory_space<vmem>>, vector<1x1x128xf32>
      %32 = vector.shape_cast %31 : vector<1x1x128xf32> to vector<1x128xf32>
      %33 = arith.mulf %18, %18 : vector<16x128xf32>
      %cst_29 = arith.constant dense<0.000000e+00> : vector<128xf32>
      %34 = vector.multi_reduction <add>, %33, %cst_29 [0] : vector<16x128xf32> to vector<128xf32>
      %35 = vector.shape_cast %34 : vector<128xf32> to vector<1x128xf32>
      %36 = arith.addf %32, %35 : vector<1x128xf32>
      %c0_30 = arith.constant 0 : index
      %c0_31 = arith.constant 0 : index
      %c0_32 = arith.constant 0 : index
      %37 = vector.load %arg8[%c0_30, %c0_31, %c0_32] : memref<1x1x128xf32, #tpu.memory_space<vmem>>, vector<1x1x128xf32>
      %38 = vector.shape_cast %37 : vector<1x1x128xf32> to vector<1x128xf32>
      %39 = vector.shape_cast %36 : vector<1x128xf32> to vector<1x1x128xf32>
      tpu.vector_store %arg8[%c0_30, %c0_31, %c0_32], %39 {strides = array<i32>} : memref<1x1x128xf32, #tpu.memory_space<vmem>>, vector<1x1x128xf32>,
    } else {
    }
    return
  }
  func.func @transform_0(%arg0: i32, %arg1: i32, %arg2: i32, %arg3: i32) -> (i32, i32, i32) {
    %c0_i32 = arith.constant 0 : i32
    return %arg0, %arg2, %arg3 : i32, i32, i32
  }
  func.func @transform_1(%arg0: i32, %arg1: i32, %arg2: i32, %arg3: i32) -> (i32, i32) {
    %c0_i32 = arith.constant 0 : i32
    return %arg3, %arg1 : i32, i32
  }
  func.func @transform_2(%arg0: i32, %arg1: i32, %arg2: i32, %arg3: i32) -> (i32, i32, i32) {
    %c0_i32 = arith.constant 0 : i32
    return %arg0, %arg2, %arg1 : i32, i32, i32
  }
  func.func @transform_3(%arg0: i32, %arg1: i32, %arg2: i32, %arg3: i32) -> (i32, i32, i32) {
    %c0_i32 = arith.constant 0 : i32
    %c0_i32_0 = arith.constant 0 : i32
    return %arg0, %c0_i32, %arg1 : i32, i32, i32
  }
  func.func @transform_4(%arg0: i32, %arg1: i32, %arg2: i32, %arg3: i32) -> (i32, i32, i32) {
    %c0_i32 = arith.constant 0 : i32
    %c0_i32_0 = arith.constant 0 : i32
    return %arg0, %c0_i32, %arg1 : i32, i32, i32
  }
}

module attributes {stable_mosaic.version = 11 : i64} {
  func.func @_norm_kernel(%arg0: i32, %arg1: i32, %arg2: i32, %arg3: memref<1x16x128xbf16, #tpu.memory_space<vmem>>, %arg4: memref<1x1x128xf32, #tpu.memory_space<vmem>>, %arg5: memref<1x1x128xf32, #tpu.memory_space<vmem>>, %arg6: memref<1x16x128xbf16, #tpu.memory_space<vmem>>) attributes {dimension_semantics = [#tpu.dimension_semantics<parallel>, #tpu.dimension_semantics<parallel>, #tpu.dimension_semantics<parallel>], iteration_bounds = array<i64: 2, 1, 1>, scalar_prefetch = 0 : i64, scratch_operands = 0 : i64, tpu.core_type = #tpu.core_type<tc>, window_params = [{transform_indices = @transform_0, window_bounds = array<i64: 1, 16, 128>}, {transform_indices = @transform_1, window_bounds = array<i64: 1, 1, 128>}, {transform_indices = @transform_2, window_bounds = array<i64: 1, 1, 128>}, {transform_indices = @transform_3, window_bounds = array<i64: 1, 16, 128>}]} {
    %c0 = arith.constant 0 : index
    %c0_0 = arith.constant 0 : index
    %c0_1 = arith.constant 0 : index
    %0 = vector.load %arg3[%c0, %c0_0, %c0_1] : memref<1x16x128xbf16, #tpu.memory_space<vmem>>, vector<1x16x128xbf16>
    %1 = vector.shape_cast %0 : vector<1x16x128xbf16> to vector<16x128xbf16>
    %2 = arith.extf %1 : vector<16x128xbf16> to vector<16x128xf32>
    %c0_2 = arith.constant 0 : index
    %c0_3 = arith.constant 0 : index
    %c0_4 = arith.constant 0 : index
    %3 = vector.load %arg4[%c0_2, %c0_3, %c0_4] : memref<1x1x128xf32, #tpu.memory_space<vmem>>, vector<1x1x128xf32>
    %4 = vector.shape_cast %3 : vector<1x1x128xf32> to vector<1x128xf32>
    %cst = arith.constant 1.562500e-02 : f32
    %5 = vector.broadcast %cst : f32 to vector<1x128xf32>
    %6 = arith.mulf %4, %5 : vector<1x128xf32>
    %c0_5 = arith.constant 0 : index
    %c0_6 = arith.constant 0 : index
    %c0_7 = arith.constant 0 : index
    %7 = vector.load %arg5[%c0_5, %c0_6, %c0_7] : memref<1x1x128xf32, #tpu.memory_space<vmem>>, vector<1x1x128xf32>
    %8 = vector.shape_cast %7 : vector<1x1x128xf32> to vector<1x128xf32>
    %cst_8 = arith.constant 1.562500e-02 : f32
    %9 = vector.broadcast %cst_8 : f32 to vector<1x128xf32>
    %10 = arith.mulf %8, %9 : vector<1x128xf32>
    %11 = arith.mulf %6, %6 : vector<1x128xf32>
    %12 = arith.subf %10, %11 : vector<1x128xf32>
    %cst_9 = arith.constant 0.000000e+00 : f32
    %13 = vector.broadcast %cst_9 : f32 to vector<1x128xf32>
    %14 = arith.maximumf %12, %13 : vector<1x128xf32>
    %15 = vector.broadcast %6 : vector<1x128xf32> to vector<16x128xf32>
    %16 = arith.subf %2, %15 : vector<16x128xf32>
    %cst_10 = arith.constant 9.99999974E-6 : f32
    %17 = vector.broadcast %cst_10 : f32 to vector<1x128xf32>
    %18 = arith.addf %14, %17 : vector<1x128xf32>
    %19 = math.rsqrt %18 : vector<1x128xf32>
    %20 = vector.broadcast %19 : vector<1x128xf32> to vector<16x128xf32>
    %21 = arith.mulf %16, %20 : vector<16x128xf32>
    %cst_11 = arith.constant 0.000000e+00 : f32
    %22 = vector.broadcast %cst_11 : f32 to vector<16x128xf32>
    %23 = arith.maximumf %21, %22 : vector<16x128xf32>
    %24 = arith.truncf %23 : vector<16x128xf32> to vector<16x128xbf16>
    %c0_12 = arith.constant 0 : index
    %c0_13 = arith.constant 0 : index
    %c0_14 = arith.constant 0 : index
    %25 = vector.load %arg6[%c0_12, %c0_13, %c0_14] : memref<1x16x128xbf16, #tpu.memory_space<vmem>>, vector<1x16x128xbf16>
    %26 = vector.shape_cast %25 : vector<1x16x128xbf16> to vector<16x128xbf16>
    %27 = vector.shape_cast %24 : vector<16x128xbf16> to vector<1x16x128xbf16>
    tpu.vector_store %arg6[%c0_12, %c0_13, %c0_14], %27 {strides = array<i32>} : memref<1x16x128xbf16, #tpu.memory_space<vmem>>, vector<1x16x128xbf16>,
    return
  }
  func.func @transform_0(%arg0: i32, %arg1: i32, %arg2: i32) -> (i32, i32, i32) {
    %c0_i32 = arith.constant 0 : i32
    return %arg0, %arg2, %arg1 : i32, i32, i32
  }
  func.func @transform_1(%arg0: i32, %arg1: i32, %arg2: i32) -> (i32, i32, i32) {
    %c0_i32 = arith.constant 0 : i32
    %c0_i32_0 = arith.constant 0 : i32
    return %arg0, %c0_i32, %arg1 : i32, i32, i32
  }
  func.func @transform_2(%arg0: i32, %arg1: i32, %arg2: i32) -> (i32, i32, i32) {
    %c0_i32 = arith.constant 0 : i32
    %c0_i32_0 = arith.constant 0 : i32
    return %arg0, %c0_i32, %arg1 : i32, i32, i32
  }
  func.func @transform_3(%arg0: i32, %arg1: i32, %arg2: i32) -> (i32, i32, i32) {
    %c0_i32 = arith.constant 0 : i32
    return %arg0, %arg2, %arg1 : i32, i32, i32
  }
}

module attributes {stable_mosaic.version = 11 : i64} {
  func.func @_norm_kernel(%arg0: i32, %arg1: i32, %arg2: i32, %arg3: memref<1x64x128xbf16, #tpu.memory_space<vmem>>, %arg4: memref<1x1x128xf32, #tpu.memory_space<vmem>>, %arg5: memref<1x1x128xf32, #tpu.memory_space<vmem>>, %arg6: memref<1x64x128xbf16, #tpu.memory_space<vmem>>) attributes {dimension_semantics = [#tpu.dimension_semantics<parallel>, #tpu.dimension_semantics<parallel>, #tpu.dimension_semantics<parallel>], iteration_bounds = array<i64: 2, 1, 1>, scalar_prefetch = 0 : i64, scratch_operands = 0 : i64, tpu.core_type = #tpu.core_type<tc>, window_params = [{transform_indices = @transform_0, window_bounds = array<i64: 1, 64, 128>}, {transform_indices = @transform_1, window_bounds = array<i64: 1, 1, 128>}, {transform_indices = @transform_2, window_bounds = array<i64: 1, 1, 128>}, {transform_indices = @transform_3, window_bounds = array<i64: 1, 64, 128>}]} {
    %c0 = arith.constant 0 : index
    %c0_0 = arith.constant 0 : index
    %c0_1 = arith.constant 0 : index
    %0 = vector.load %arg3[%c0, %c0_0, %c0_1] : memref<1x64x128xbf16, #tpu.memory_space<vmem>>, vector<1x64x128xbf16>
    %1 = vector.shape_cast %0 : vector<1x64x128xbf16> to vector<64x128xbf16>
    %2 = arith.extf %1 : vector<64x128xbf16> to vector<64x128xf32>
    %c0_2 = arith.constant 0 : index
    %c0_3 = arith.constant 0 : index
    %c0_4 = arith.constant 0 : index
    %3 = vector.load %arg4[%c0_2, %c0_3, %c0_4] : memref<1x1x128xf32, #tpu.memory_space<vmem>>, vector<1x1x128xf32>
    %4 = vector.shape_cast %3 : vector<1x1x128xf32> to vector<1x128xf32>
    %cst = arith.constant 3.906250e-03 : f32
    %5 = vector.broadcast %cst : f32 to vector<1x128xf32>
    %6 = arith.mulf %4, %5 : vector<1x128xf32>
    %c0_5 = arith.constant 0 : index
    %c0_6 = arith.constant 0 : index
    %c0_7 = arith.constant 0 : index
    %7 = vector.load %arg5[%c0_5, %c0_6, %c0_7] : memref<1x1x128xf32, #tpu.memory_space<vmem>>, vector<1x1x128xf32>
    %8 = vector.shape_cast %7 : vector<1x1x128xf32> to vector<1x128xf32>
    %cst_8 = arith.constant 3.906250e-03 : f32
    %9 = vector.broadcast %cst_8 : f32 to vector<1x128xf32>
    %10 = arith.mulf %8, %9 : vector<1x128xf32>
    %11 = arith.mulf %6, %6 : vector<1x128xf32>
    %12 = arith.subf %10, %11 : vector<1x128xf32>
    %cst_9 = arith.constant 0.000000e+00 : f32
    %13 = vector.broadcast %cst_9 : f32 to vector<1x128xf32>
    %14 = arith.maximumf %12, %13 : vector<1x128xf32>
    %15 = vector.broadcast %6 : vector<1x128xf32> to vector<64x128xf32>
    %16 = arith.subf %2, %15 : vector<64x128xf32>
    %cst_10 = arith.constant 9.99999974E-6 : f32
    %17 = vector.broadcast %cst_10 : f32 to vector<1x128xf32>
    %18 = arith.addf %14, %17 : vector<1x128xf32>
    %19 = math.rsqrt %18 : vector<1x128xf32>
    %20 = vector.broadcast %19 : vector<1x128xf32> to vector<64x128xf32>
    %21 = arith.mulf %16, %20 : vector<64x128xf32>
    %cst_11 = arith.constant 0.000000e+00 : f32
    %22 = vector.broadcast %cst_11 : f32 to vector<64x128xf32>
    %23 = arith.maximumf %21, %22 : vector<64x128xf32>
    %24 = arith.truncf %23 : vector<64x128xf32> to vector<64x128xbf16>
    %c0_12 = arith.constant 0 : index
    %c0_13 = arith.constant 0 : index
    %c0_14 = arith.constant 0 : index
    %25 = vector.load %arg6[%c0_12, %c0_13, %c0_14] : memref<1x64x128xbf16, #tpu.memory_space<vmem>>, vector<1x64x128xbf16>
    %26 = vector.shape_cast %25 : vector<1x64x128xbf16> to vector<64x128xbf16>
    %27 = vector.shape_cast %24 : vector<64x128xbf16> to vector<1x64x128xbf16>
    tpu.vector_store %arg6[%c0_12, %c0_13, %c0_14], %27 {strides = array<i32>} : memref<1x64x128xbf16, #tpu.memory_space<vmem>>, vector<1x64x128xbf16>,
    return
  }
  func.func @transform_0(%arg0: i32, %arg1: i32, %arg2: i32) -> (i32, i32, i32) {
    %c0_i32 = arith.constant 0 : i32
    return %arg0, %arg2, %arg1 : i32, i32, i32
  }
  func.func @transform_1(%arg0: i32, %arg1: i32, %arg2: i32) -> (i32, i32, i32) {
    %c0_i32 = arith.constant 0 : i32
    %c0_i32_0 = arith.constant 0 : i32
    return %arg0, %c0_i32, %arg1 : i32, i32, i32
  }
  func.func @transform_2(%arg0: i32, %arg1: i32, %arg2: i32) -> (i32, i32, i32) {
    %c0_i32 = arith.constant 0 : i32
    %c0_i32_0 = arith.constant 0 : i32
    return %arg0, %c0_i32, %arg1 : i32, i32, i32
  }
  func.func @transform_3(%arg0: i32, %arg1: i32, %arg2: i32) -> (i32, i32, i32) {
    %c0_i32 = arith.constant 0 : i32
    return %arg0, %arg2, %arg1 : i32, i32, i32
  }
}

module attributes {stable_mosaic.version = 11 : i64} {
  func.func @_matmul_kernel(%arg0: i32, %arg1: i32, %arg2: i32, %arg3: i32, %arg4: memref<1x64x128xbf16, #tpu.memory_space<vmem>>, %arg5: memref<128x128xbf16, #tpu.memory_space<vmem>>, %arg6: memref<1x64x128xbf16, #tpu.memory_space<vmem>>, %arg7: memref<1x1x128xf32, #tpu.memory_space<vmem>>, %arg8: memref<1x1x128xf32, #tpu.memory_space<vmem>>, %arg9: memref<64x128xf32, #tpu.memory_space<vmem>>) attributes {dimension_semantics = [#tpu.dimension_semantics<parallel>, #tpu.dimension_semantics<parallel>, #tpu.dimension_semantics<arbitrary>, #tpu.dimension_semantics<arbitrary>], iteration_bounds = array<i64: 2, 1, 1, 1>, scalar_prefetch = 0 : i64, scratch_operands = 1 : i64, tpu.core_type = #tpu.core_type<tc>, window_params = [{transform_indices = @transform_0, window_bounds = array<i64: 1, 64, 128>}, {transform_indices = @transform_1, window_bounds = array<i64: 128, 128>}, {transform_indices = @transform_2, window_bounds = array<i64: 1, 64, 128>}, {transform_indices = @transform_3, window_bounds = array<i64: 1, 1, 128>}, {transform_indices = @transform_4, window_bounds = array<i64: 1, 1, 128>}]} {
    %c0_i32 = arith.constant 0 : i32
    %0 = arith.cmpi eq, %arg3, %c0_i32 : i32
    %1 = arith.extui %0 : i1 to i32
    %c0_i32_0 = arith.constant 0 : i32
    %2 = arith.cmpi ne, %1, %c0_i32_0 : i32
    scf.if %2 {
      %cst_14 = arith.constant 0.000000e+00 : f32
      %18 = vector.broadcast %cst_14 : f32 to vector<64x128xf32>
      %c0_15 = arith.constant 0 : index
      %c0_16 = arith.constant 0 : index
      %19 = vector.load %arg9[%c0_15, %c0_16] : memref<64x128xf32, #tpu.memory_space<vmem>>, vector<64x128xf32>
      tpu.vector_store %arg9[%c0_15, %c0_16], %18 {strides = array<i32>} : memref<64x128xf32, #tpu.memory_space<vmem>>, vector<64x128xf32>,
    } else {
    }
    %c0 = arith.constant 0 : index
    %c0_1 = arith.constant 0 : index
    %3 = vector.load %arg9[%c0, %c0_1] : memref<64x128xf32, #tpu.memory_space<vmem>>, vector<64x128xf32>
    %c0_2 = arith.constant 0 : index
    %c0_3 = arith.constant 0 : index
    %c0_4 = arith.constant 0 : index
    %4 = vector.load %arg4[%c0_2, %c0_3, %c0_4] : memref<1x64x128xbf16, #tpu.memory_space<vmem>>, vector<1x64x128xbf16>
    %5 = vector.shape_cast %4 : vector<1x64x128xbf16> to vector<64x128xbf16>
    %c0_5 = arith.constant 0 : index
    %c0_6 = arith.constant 0 : index
    %6 = vector.load %arg5[%c0_5, %c0_6] : memref<128x128xbf16, #tpu.memory_space<vmem>>, vector<128x128xbf16>
    %cst = arith.constant dense<0.000000e+00> : vector<64x128xf32>
    %7 = tpu.matmul %5, %6, %cst {dimension_numbers = #tpu.dot_dimension_numbers<[1], [0], [0], [1], [0, 0, 1, 1], [], []>} : vector<64x128xbf16>, vector<128x128xbf16>, vector<64x128xf32> -> vector<64x128xf32>
    %8 = arith.addf %3, %7 : vector<64x128xf32>
    %c0_7 = arith.constant 0 : index
    %c0_8 = arith.constant 0 : index
    %9 = vector.load %arg9[%c0_7, %c0_8] : memref<64x128xf32, #tpu.memory_space<vmem>>, vector<64x128xf32>
    tpu.vector_store %arg9[%c0_7, %c0_8], %8 {strides = array<i32>} : memref<64x128xf32, #tpu.memory_space<vmem>>, vector<64x128xf32>,
    %c0_i32_9 = arith.constant 0 : i32
    %10 = arith.cmpi eq, %arg3, %c0_i32_9 : i32
    %c0_i32_10 = arith.constant 0 : i32
    %11 = arith.cmpi eq, %arg2, %c0_i32_10 : i32
    %12 = arith.andi %10, %11 : i1
    %13 = arith.extui %12 : i1 to i32
    %c0_i32_11 = arith.constant 0 : i32
    %14 = arith.cmpi ne, %13, %c0_i32_11 : i32
    scf.if %14 {
      %cst_14 = arith.constant 0.000000e+00 : f32
      %18 = vector.broadcast %cst_14 : f32 to vector<1x128xf32>
      %c0_15 = arith.constant 0 : index
      %c0_16 = arith.constant 0 : index
      %c0_17 = arith.constant 0 : index
      %19 = vector.load %arg7[%c0_15, %c0_16, %c0_17] : memref<1x1x128xf32, #tpu.memory_space<vmem>>, vector<1x1x128xf32>
      %20 = vector.shape_cast %19 : vector<1x1x128xf32> to vector<1x128xf32>
      %21 = vector.shape_cast %18 : vector<1x128xf32> to vector<1x1x128xf32>
      tpu.vector_store %arg7[%c0_15, %c0_16, %c0_17], %21 {strides = array<i32>} : memref<1x1x128xf32, #tpu.memory_space<vmem>>, vector<1x1x128xf32>,
      %cst_18 = arith.constant 0.000000e+00 : f32
      %22 = vector.broadcast %cst_18 : f32 to vector<1x128xf32>
      %c0_19 = arith.constant 0 : index
      %c0_20 = arith.constant 0 : index
      %c0_21 = arith.constant 0 : index
      %23 = vector.load %arg8[%c0_19, %c0_20, %c0_21] : memref<1x1x128xf32, #tpu.memory_space<vmem>>, vector<1x1x128xf32>
      %24 = vector.shape_cast %23 : vector<1x1x128xf32> to vector<1x128xf32>
      %25 = vector.shape_cast %22 : vector<1x128xf32> to vector<1x1x128xf32>
      tpu.vector_store %arg8[%c0_19, %c0_20, %c0_21], %25 {strides = array<i32>} : memref<1x1x128xf32, #tpu.memory_space<vmem>>, vector<1x1x128xf32>,
    } else {
    }
    %c0_i32_12 = arith.constant 0 : i32
    %15 = arith.cmpi eq, %arg3, %c0_i32_12 : i32
    %16 = arith.extui %15 : i1 to i32
    %c0_i32_13 = arith.constant 0 : i32
    %17 = arith.cmpi ne, %16, %c0_i32_13 : i32
    scf.if %17 {
      %c0_14 = arith.constant 0 : index
      %c0_15 = arith.constant 0 : index
      %18 = vector.load %arg9[%c0_14, %c0_15] : memref<64x128xf32, #tpu.memory_space<vmem>>, vector<64x128xf32>
      %19 = arith.truncf %18 : vector<64x128xf32> to vector<64x128xbf16>
      %c0_16 = arith.constant 0 : index
      %c0_17 = arith.constant 0 : index
      %c0_18 = arith.constant 0 : index
      %20 = vector.load %arg6[%c0_16, %c0_17, %c0_18] : memref<1x64x128xbf16, #tpu.memory_space<vmem>>, vector<1x64x128xbf16>
      %21 = vector.shape_cast %20 : vector<1x64x128xbf16> to vector<64x128xbf16>
      %22 = vector.shape_cast %19 : vector<64x128xbf16> to vector<1x64x128xbf16>
      tpu.vector_store %arg6[%c0_16, %c0_17, %c0_18], %22 {strides = array<i32>} : memref<1x64x128xbf16, #tpu.memory_space<vmem>>, vector<1x64x128xbf16>,
      %c0_19 = arith.constant 0 : index
      %c0_20 = arith.constant 0 : index
      %c0_21 = arith.constant 0 : index
      %23 = vector.load %arg7[%c0_19, %c0_20, %c0_21] : memref<1x1x128xf32, #tpu.memory_space<vmem>>, vector<1x1x128xf32>
      %24 = vector.shape_cast %23 : vector<1x1x128xf32> to vector<1x128xf32>
      %cst_22 = arith.constant dense<0.000000e+00> : vector<128xf32>
      %25 = vector.multi_reduction <add>, %18, %cst_22 [0] : vector<64x128xf32> to vector<128xf32>
      %26 = vector.shape_cast %25 : vector<128xf32> to vector<1x128xf32>
      %27 = arith.addf %24, %26 : vector<1x128xf32>
      %c0_23 = arith.constant 0 : index
      %c0_24 = arith.constant 0 : index
      %c0_25 = arith.constant 0 : index
      %28 = vector.load %arg7[%c0_23, %c0_24, %c0_25] : memref<1x1x128xf32, #tpu.memory_space<vmem>>, vector<1x1x128xf32>
      %29 = vector.shape_cast %28 : vector<1x1x128xf32> to vector<1x128xf32>
      %30 = vector.shape_cast %27 : vector<1x128xf32> to vector<1x1x128xf32>
      tpu.vector_store %arg7[%c0_23, %c0_24, %c0_25], %30 {strides = array<i32>} : memref<1x1x128xf32, #tpu.memory_space<vmem>>, vector<1x1x128xf32>,
      %c0_26 = arith.constant 0 : index
      %c0_27 = arith.constant 0 : index
      %c0_28 = arith.constant 0 : index
      %31 = vector.load %arg8[%c0_26, %c0_27, %c0_28] : memref<1x1x128xf32, #tpu.memory_space<vmem>>, vector<1x1x128xf32>
      %32 = vector.shape_cast %31 : vector<1x1x128xf32> to vector<1x128xf32>
      %33 = arith.mulf %18, %18 : vector<64x128xf32>
      %cst_29 = arith.constant dense<0.000000e+00> : vector<128xf32>
      %34 = vector.multi_reduction <add>, %33, %cst_29 [0] : vector<64x128xf32> to vector<128xf32>
      %35 = vector.shape_cast %34 : vector<128xf32> to vector<1x128xf32>
      %36 = arith.addf %32, %35 : vector<1x128xf32>
      %c0_30 = arith.constant 0 : index
      %c0_31 = arith.constant 0 : index
      %c0_32 = arith.constant 0 : index
      %37 = vector.load %arg8[%c0_30, %c0_31, %c0_32] : memref<1x1x128xf32, #tpu.memory_space<vmem>>, vector<1x1x128xf32>
      %38 = vector.shape_cast %37 : vector<1x1x128xf32> to vector<1x128xf32>
      %39 = vector.shape_cast %36 : vector<1x128xf32> to vector<1x1x128xf32>
      tpu.vector_store %arg8[%c0_30, %c0_31, %c0_32], %39 {strides = array<i32>} : memref<1x1x128xf32, #tpu.memory_space<vmem>>, vector<1x1x128xf32>,
    } else {
    }
    return
  }
  func.func @transform_0(%arg0: i32, %arg1: i32, %arg2: i32, %arg3: i32) -> (i32, i32, i32) {
    %c0_i32 = arith.constant 0 : i32
    return %arg0, %arg2, %arg3 : i32, i32, i32
  }
  func.func @transform_1(%arg0: i32, %arg1: i32, %arg2: i32, %arg3: i32) -> (i32, i32) {
    %c0_i32 = arith.constant 0 : i32
    return %arg3, %arg1 : i32, i32
  }
  func.func @transform_2(%arg0: i32, %arg1: i32, %arg2: i32, %arg3: i32) -> (i32, i32, i32) {
    %c0_i32 = arith.constant 0 : i32
    return %arg0, %arg2, %arg1 : i32, i32, i32
  }
  func.func @transform_3(%arg0: i32, %arg1: i32, %arg2: i32, %arg3: i32) -> (i32, i32, i32) {
    %c0_i32 = arith.constant 0 : i32
    %c0_i32_0 = arith.constant 0 : i32
    return %arg0, %c0_i32, %arg1 : i32, i32, i32
  }
  func.func @transform_4(%arg0: i32, %arg1: i32, %arg2: i32, %arg3: i32) -> (i32, i32, i32) {
    %c0_i32 = arith.constant 0 : i32
    %c0_i32_0 = arith.constant 0 : i32
    return %arg0, %c0_i32, %arg1 : i32, i32, i32
  }
}

module attributes {stable_mosaic.version = 11 : i64} {
  func.func @_norm_kernel(%arg0: i32, %arg1: i32, %arg2: i32, %arg3: memref<1x256x128xbf16, #tpu.memory_space<vmem>>, %arg4: memref<1x1x128xf32, #tpu.memory_space<vmem>>, %arg5: memref<1x1x128xf32, #tpu.memory_space<vmem>>, %arg6: memref<1x256x128xbf16, #tpu.memory_space<vmem>>) attributes {dimension_semantics = [#tpu.dimension_semantics<parallel>, #tpu.dimension_semantics<parallel>, #tpu.dimension_semantics<parallel>], iteration_bounds = array<i64: 2, 1, 1>, scalar_prefetch = 0 : i64, scratch_operands = 0 : i64, tpu.core_type = #tpu.core_type<tc>, window_params = [{transform_indices = @transform_0, window_bounds = array<i64: 1, 256, 128>}, {transform_indices = @transform_1, window_bounds = array<i64: 1, 1, 128>}, {transform_indices = @transform_2, window_bounds = array<i64: 1, 1, 128>}, {transform_indices = @transform_3, window_bounds = array<i64: 1, 256, 128>}]} {
    %c0 = arith.constant 0 : index
    %c0_0 = arith.constant 0 : index
    %c0_1 = arith.constant 0 : index
    %0 = vector.load %arg3[%c0, %c0_0, %c0_1] : memref<1x256x128xbf16, #tpu.memory_space<vmem>>, vector<1x256x128xbf16>
    %1 = vector.shape_cast %0 : vector<1x256x128xbf16> to vector<256x128xbf16>
    %2 = arith.extf %1 : vector<256x128xbf16> to vector<256x128xf32>
    %c0_2 = arith.constant 0 : index
    %c0_3 = arith.constant 0 : index
    %c0_4 = arith.constant 0 : index
    %3 = vector.load %arg4[%c0_2, %c0_3, %c0_4] : memref<1x1x128xf32, #tpu.memory_space<vmem>>, vector<1x1x128xf32>
    %4 = vector.shape_cast %3 : vector<1x1x128xf32> to vector<1x128xf32>
    %cst = arith.constant 9.765625E-4 : f32
    %5 = vector.broadcast %cst : f32 to vector<1x128xf32>
    %6 = arith.mulf %4, %5 : vector<1x128xf32>
    %c0_5 = arith.constant 0 : index
    %c0_6 = arith.constant 0 : index
    %c0_7 = arith.constant 0 : index
    %7 = vector.load %arg5[%c0_5, %c0_6, %c0_7] : memref<1x1x128xf32, #tpu.memory_space<vmem>>, vector<1x1x128xf32>
    %8 = vector.shape_cast %7 : vector<1x1x128xf32> to vector<1x128xf32>
    %cst_8 = arith.constant 9.765625E-4 : f32
    %9 = vector.broadcast %cst_8 : f32 to vector<1x128xf32>
    %10 = arith.mulf %8, %9 : vector<1x128xf32>
    %11 = arith.mulf %6, %6 : vector<1x128xf32>
    %12 = arith.subf %10, %11 : vector<1x128xf32>
    %cst_9 = arith.constant 0.000000e+00 : f32
    %13 = vector.broadcast %cst_9 : f32 to vector<1x128xf32>
    %14 = arith.maximumf %12, %13 : vector<1x128xf32>
    %15 = vector.broadcast %6 : vector<1x128xf32> to vector<256x128xf32>
    %16 = arith.subf %2, %15 : vector<256x128xf32>
    %cst_10 = arith.constant 9.99999974E-6 : f32
    %17 = vector.broadcast %cst_10 : f32 to vector<1x128xf32>
    %18 = arith.addf %14, %17 : vector<1x128xf32>
    %19 = math.rsqrt %18 : vector<1x128xf32>
    %20 = vector.broadcast %19 : vector<1x128xf32> to vector<256x128xf32>
    %21 = arith.mulf %16, %20 : vector<256x128xf32>
    %cst_11 = arith.constant 0.000000e+00 : f32
    %22 = vector.broadcast %cst_11 : f32 to vector<256x128xf32>
    %23 = arith.maximumf %21, %22 : vector<256x128xf32>
    %24 = arith.truncf %23 : vector<256x128xf32> to vector<256x128xbf16>
    %c0_12 = arith.constant 0 : index
    %c0_13 = arith.constant 0 : index
    %c0_14 = arith.constant 0 : index
    %25 = vector.load %arg6[%c0_12, %c0_13, %c0_14] : memref<1x256x128xbf16, #tpu.memory_space<vmem>>, vector<1x256x128xbf16>
    %26 = vector.shape_cast %25 : vector<1x256x128xbf16> to vector<256x128xbf16>
    %27 = vector.shape_cast %24 : vector<256x128xbf16> to vector<1x256x128xbf16>
    tpu.vector_store %arg6[%c0_12, %c0_13, %c0_14], %27 {strides = array<i32>} : memref<1x256x128xbf16, #tpu.memory_space<vmem>>, vector<1x256x128xbf16>,
    return
  }
  func.func @transform_0(%arg0: i32, %arg1: i32, %arg2: i32) -> (i32, i32, i32) {
    %c0_i32 = arith.constant 0 : i32
    return %arg0, %arg2, %arg1 : i32, i32, i32
  }
  func.func @transform_1(%arg0: i32, %arg1: i32, %arg2: i32) -> (i32, i32, i32) {
    %c0_i32 = arith.constant 0 : i32
    %c0_i32_0 = arith.constant 0 : i32
    return %arg0, %c0_i32, %arg1 : i32, i32, i32
  }
  func.func @transform_2(%arg0: i32, %arg1: i32, %arg2: i32) -> (i32, i32, i32) {
    %c0_i32 = arith.constant 0 : i32
    %c0_i32_0 = arith.constant 0 : i32
    return %arg0, %c0_i32, %arg1 : i32, i32, i32
  }
  func.func @transform_3(%arg0: i32, %arg1: i32, %arg2: i32) -> (i32, i32, i32) {
    %c0_i32 = arith.constant 0 : i32
    return %arg0, %arg2, %arg1 : i32, i32, i32
  }
}

module attributes {stable_mosaic.version = 11 : i64} {
  func.func @_matmul_kernel(%arg0: i32, %arg1: i32, %arg2: i32, %arg3: i32, %arg4: memref<1x512x512xbf16, #tpu.memory_space<vmem>>, %arg5: memref<512x128xbf16, #tpu.memory_space<vmem>>, %arg6: memref<1x128xf32, #tpu.memory_space<vmem>>, %arg7: memref<1x512x128xf32, #tpu.memory_space<vmem>>, %arg8: memref<512x128xf32, #tpu.memory_space<vmem>>) attributes {dimension_semantics = [#tpu.dimension_semantics<parallel>, #tpu.dimension_semantics<parallel>, #tpu.dimension_semantics<arbitrary>, #tpu.dimension_semantics<arbitrary>], iteration_bounds = array<i64: 2, 1, 2, 1>, scalar_prefetch = 0 : i64, scratch_operands = 1 : i64, tpu.core_type = #tpu.core_type<tc>, window_params = [{transform_indices = @transform_0, window_bounds = array<i64: 1, 512, 512>}, {transform_indices = @transform_1, window_bounds = array<i64: 512, 128>}, {transform_indices = @transform_2, window_bounds = array<i64: 1, 128>}, {transform_indices = @transform_3, window_bounds = array<i64: 1, 512, 128>}]} {
    %c0_i32 = arith.constant 0 : i32
    %0 = arith.cmpi eq, %arg3, %c0_i32 : i32
    %1 = arith.extui %0 : i1 to i32
    %c0_i32_0 = arith.constant 0 : i32
    %2 = arith.cmpi ne, %1, %c0_i32_0 : i32
    scf.if %2 {
      %cst_11 = arith.constant 0.000000e+00 : f32
      %13 = vector.broadcast %cst_11 : f32 to vector<512x128xf32>
      %c0_12 = arith.constant 0 : index
      %c0_13 = arith.constant 0 : index
      %14 = vector.load %arg8[%c0_12, %c0_13] : memref<512x128xf32, #tpu.memory_space<vmem>>, vector<512x128xf32>
      tpu.vector_store %arg8[%c0_12, %c0_13], %13 {strides = array<i32>} : memref<512x128xf32, #tpu.memory_space<vmem>>, vector<512x128xf32>,
    } else {
    }
    %c0 = arith.constant 0 : index
    %c0_1 = arith.constant 0 : index
    %3 = vector.load %arg8[%c0, %c0_1] : memref<512x128xf32, #tpu.memory_space<vmem>>, vector<512x128xf32>
    %c0_2 = arith.constant 0 : index
    %c0_3 = arith.constant 0 : index
    %c0_4 = arith.constant 0 : index
    %4 = vector.load %arg4[%c0_2, %c0_3, %c0_4] : memref<1x512x512xbf16, #tpu.memory_space<vmem>>, vector<1x512x512xbf16>
    %5 = vector.shape_cast %4 : vector<1x512x512xbf16> to vector<512x512xbf16>
    %c0_5 = arith.constant 0 : index
    %c0_6 = arith.constant 0 : index
    %6 = vector.load %arg5[%c0_5, %c0_6] : memref<512x128xbf16, #tpu.memory_space<vmem>>, vector<512x128xbf16>
    %cst = arith.constant dense<0.000000e+00> : vector<512x128xf32>
    %7 = tpu.matmul %5, %6, %cst {dimension_numbers = #tpu.dot_dimension_numbers<[1], [0], [0], [1], [0, 0, 1, 1], [], []>} : vector<512x512xbf16>, vector<512x128xbf16>, vector<512x128xf32> -> vector<512x128xf32>
    %8 = arith.addf %3, %7 : vector<512x128xf32>
    %c0_7 = arith.constant 0 : index
    %c0_8 = arith.constant 0 : index
    %9 = vector.load %arg8[%c0_7, %c0_8] : memref<512x128xf32, #tpu.memory_space<vmem>>, vector<512x128xf32>
    tpu.vector_store %arg8[%c0_7, %c0_8], %8 {strides = array<i32>} : memref<512x128xf32, #tpu.memory_space<vmem>>, vector<512x128xf32>,
    %c0_i32_9 = arith.constant 0 : i32
    %10 = arith.cmpi eq, %arg3, %c0_i32_9 : i32
    %11 = arith.extui %10 : i1 to i32
    %c0_i32_10 = arith.constant 0 : i32
    %12 = arith.cmpi ne, %11, %c0_i32_10 : i32
    scf.if %12 {
      %c0_11 = arith.constant 0 : index
      %c0_12 = arith.constant 0 : index
      %13 = vector.load %arg8[%c0_11, %c0_12] : memref<512x128xf32, #tpu.memory_space<vmem>>, vector<512x128xf32>
      %c0_13 = arith.constant 0 : index
      %c0_14 = arith.constant 0 : index
      %14 = vector.load %arg6[%c0_13, %c0_14] : memref<1x128xf32, #tpu.memory_space<vmem>>, vector<1x128xf32>
      %15 = vector.broadcast %14 : vector<1x128xf32> to vector<512x128xf32>
      %16 = arith.addf %13, %15 : vector<512x128xf32>
      %c0_15 = arith.constant 0 : index
      %c0_16 = arith.constant 0 : index
      %c0_17 = arith.constant 0 : index
      %17 = vector.load %arg7[%c0_15, %c0_16, %c0_17] : memref<1x512x128xf32, #tpu.memory_space<vmem>>, vector<1x512x128xf32>
      %18 = vector.shape_cast %17 : vector<1x512x128xf32> to vector<512x128xf32>
      %19 = vector.shape_cast %16 : vector<512x128xf32> to vector<1x512x128xf32>
      tpu.vector_store %arg7[%c0_15, %c0_16, %c0_17], %19 {strides = array<i32>} : memref<1x512x128xf32, #tpu.memory_space<vmem>>, vector<1x512x128xf32>,
    } else {
    }
    return
  }
  func.func @transform_0(%arg0: i32, %arg1: i32, %arg2: i32, %arg3: i32) -> (i32, i32, i32) {
    %c0_i32 = arith.constant 0 : i32
    return %arg0, %arg2, %arg3 : i32, i32, i32
  }
  func.func @transform_1(%arg0: i32, %arg1: i32, %arg2: i32, %arg3: i32) -> (i32, i32) {
    %c0_i32 = arith.constant 0 : i32
    return %arg3, %arg1 : i32, i32
  }
  func.func @transform_2(%arg0: i32, %arg1: i32, %arg2: i32, %arg3: i32) -> (i32, i32) {
    %c0_i32 = arith.constant 0 : i32
    %c0_i32_0 = arith.constant 0 : i32
    return %c0_i32, %arg1 : i32, i32
  }
  func.func @transform_3(%arg0: i32, %arg1: i32, %arg2: i32, %arg3: i32) -> (i32, i32, i32) {
    %c0_i32 = arith.constant 0 : i32
    return %arg0, %arg2, %arg1 : i32, i32, i32
  }
}

</mosaic_0001>

<bundles_post_ra>
// kernel: generator_hd_forward.56
= control target key start
LH: loop header
LB: loop body
LE: loop exit
PB: predicated region body
PF: predicated region fallthrough
CT: control target
= control target key end

     0   :  { %s1670_s12 = smov 0   ;;  %s1672_s13 = smov 0   ;;  %s2058_s0 = inlined_call_operand.vmem [shape: bf16[2,1024,128], index: 0, kind: input, shape index: {}]   ;;  %s2059_s1 = inlined_call_operand.vmem [shape: f32[2,1,128], index: 1, kind: input, shape index: {}]   ;;  %s2060_s2 = inlined_call_operand.vmem [shape: f32[2,1,128], index: 2, kind: input, shape index: {}]   ;;  %s2061_s3 = inlined_call_operand.vmem [shape: bf16[2,1024,128], index: 3, kind: output, shape index: {}]  }
   0x1   :  { %s1674_s14 = smov 0   ;;  %s1676_s15 = smov 0  }
   0x2   :  { %s1678_s16 = smov 0  }
   0x3 LB: > { %s25_s17 = sadd.s32 1, %s1640_s14  ;;  %s32_s18 = sadd.s32 1, %s1644_s15  ;;  %s1648_s16 = sphi %s1678_s16, %s13_s16   ;;  %s1644_s15 = sphi %s1676_s15, %s2065_s15   ;;  %s1640_s14 = sphi %s1674_s14, %s2064_s14   ;;  %s1636_s13 = sphi %s1672_s13, %s2063_s13   ;;  %s1632_s12 = sphi %s1670_s12, %s2062_s12  }
   0x4   : > { %p26_p0 = scmp.ge.s32.totalorder %s25_s17, 2  ;;  %p1081_p1 = scmp.ge.s32.totalorder %s1648_s16, 1 }
   0x5   : > { %p198_p2 = scmp.lt.s32.totalorder %s1648_s16, 5 }
   0x6   : > { %s2067_s17 = smov (%p26_p0, %s25_s17), 0  ;;  %s2069_s18 = smov (!%p26_p0, %s32_s18), %s1644_s15 }
   0x7   : > { %p199_p3 = pnand %p1081_p1, %p198_p2  ;;  %p34_p4 = scmp.ge.s32.totalorder %s2069_s18, 2 }
   0x8   : > { %s1082_s19 = sshll.u32 (!%p199_p3), %s1632_s12, 6  ;;  %p249_p5 = scmp.lt.s32.totalorder (!%p199_p3), %s1636_s13, 1  ;;  %v422_v0 = vlaneseq (!%p199_p3) }
   0x9   : > { %s2071_s18 = smov (%p34_p4, %s2069_s18), 0  ;;  %202 = sbr.rel (%p199_p3) target bundleno = 102 (0x66), region = 32 }
   0xa   : > { %p251_p6 = scmp.lt.s32.totalorder (!%p199_p3), %s1082_s19, 127  ;;  %v1700_v1 = vshrl.u32 (!%p199_p3), %v422_v0, 7 }
   0xc   : > { %v424_v2 = vsub.s32 (!%p199_p3), 0, %v1700_v1 }
  0x10   : > { %s2073_s13 = smov (!%p249_p5, %s1636_s13), 1  ;;  %s2075_s19 = smov (!%p251_p6, %s1082_s19), 127 }
  0x11   : > { %s1083_s20 = sshll.u32 %s2073_s13, 7  ;;  %s266_s23 = scalar_lea.vmem %s2059_s1, %s2073_s13 }
  0x12   : > { %s1706_s24 = sadd.s32 %s1083_s20, %s2075_s19  ;;  %s272_s27 = scalar_lea.vmem %s2060_s2, %s2073_s13  ;;  %v414_v3 = vld [vmem:[%s266_s23] sm:$0x1] }
  0x13   : > { %s1084_s28 = sshll.u32 %s1706_s24, 2  ;;  %v415_v4 = vmul.f32 0.0009765625, %v414_v3  ;;  %v416_v5 = vld [vmem:[%s272_s27] sm:$0x1] }
  0x14   : > { %s1717_s4 = scalar_lea.vmem %s2058_s0, %s1084_s28  ;;  %v417_v6 = vmul.f32 0.0009765625, %v416_v5  ;;  %s1882_s7 = scalar_lea.vmem %s2061_s3, %s1084_s28 }
  0x15   : > { %v1219_v7 = vld [vmem:[%s1717_s4] sm:$0xff]   ;;  %v418_v8 = vmul.f32 %v415_v4, %v415_v4  ;;  %v1722_v9 = vrot.slane %v415_v4, %v424_v2  ;;  %v1506_v10 = vld [vmem:[%s1717_s4 + $0x8] sm:$0xff]   ;;  %v1507_v11 = vld [vmem:[%s1717_s4 + $0x10] sm:$0xff]  }
  0x16   : > { %v1220_v12 = vunpack.c.l.bf16 %v1219_v7  ;;  %v1221_v13 = vunpack.c.h.bf16 %v1219_v7  ;;  %v1224_v14 = vunpack.c.l.bf16 %v1506_v10  ;;  %v1225_v15 = vunpack.c.h.bf16 %v1506_v10  ;;  %v1508_v16 = vld [vmem:[%s1717_s4 + $0x18] sm:$0xff]   ;;  %v1509_v21 = vld [vmem:[%s1717_s4 + $0x20] sm:$0xff]   ;;  %v1510_v22 = vld [vmem:[%s1717_s4 + $0x28] sm:$0xff]  }
  0x17   : > { %v419_v17 = vsub.f32 %v417_v6, %v418_v8  ;;  %v1228_v18 = vunpack.c.l.bf16 %v1507_v11  ;;  %v1229_v19 = vunpack.c.h.bf16 %v1507_v11  ;;  %v1232_v20 = vunpack.c.l.bf16 %v1508_v16  ;;  %v1511_v27 = vld [vmem:[%s1717_s4 + $0x30] sm:$0xff]   ;;  %v1512_v36 = vld [vmem:[%s1717_s4 + $0x38] sm:$0xff]   ;;  %v1513_v41 = vld [vmem:[%s1717_s4 + $0x40] sm:$0xff]  }
  0x18   : > { %v1730_v23 = vsub.f32 %v1220_v12, %v1722_v9  ;;  %v1733_v24 = vsub.f32 %v1221_v13, %v1722_v9  ;;  %v1736_v25 = vsub.f32 %v1224_v14, %v1722_v9  ;;  %v1739_v26 = vsub.f32 %v1225_v15, %v1722_v9  ;;  %v1514_v46 = vld [vmem:[%s1717_s4 + $0x48] sm:$0xff]   ;;  %v1515_v47 = vld [vmem:[%s1717_s4 + $0x50] sm:$0xff]   ;;  %v1516_v55 = vld [vmem:[%s1717_s4 + $0x58] sm:$0xff]  }
  0x19   : > { %v420_v28 = vmax.f32 %v419_v17, 0.0  ;;  %v1743_v29 = vsub.f32 %v1228_v18, %v1722_v9  ;;  %v1746_v30 = vsub.f32 %v1229_v19, %v1722_v9  ;;  %v1233_v31 = vunpack.c.h.bf16 %v1508_v16  ;;  %v1517_v60 = vld [vmem:[%s1717_s4 + $0x60] sm:$0xff]   ;;  %v1518_v3 = vld [vmem:[%s1717_s4 + $0x68] sm:$0xff]   ;;  %v1519_v4 = vld [vmem:[%s1717_s4 + $0x70] sm:$0xff]  }
  0x1a   : > { %v1749_v32 = vsub.f32 %v1232_v20, %v1722_v9  ;;  %v1236_v33 = vunpack.c.l.bf16 %v1509_v21  ;;  %v1237_v34 = vunpack.c.h.bf16 %v1509_v21  ;;  %v1240_v35 = vunpack.c.l.bf16 %v1510_v22  ;;  %v1520_v14 = vld [vmem:[%s1717_s4 + $0x78] sm:$0xff]   ;;  %v1521_v19 = vld [vmem:[%s1717_s4 + $0x80] sm:$0xff]  }
  0x1b   : > { %v491_v37 = vadd.f32 1e-05, %v420_v28  ;;  %v1753_v38 = vsub.f32 %v1233_v31, %v1722_v9  ;;  %v1241_v39 = vunpack.c.h.bf16 %v1510_v22  ;;  %v1244_v40 = vunpack.c.l.bf16 %v1511_v27  ;;  %v1522_v28 = vld [vmem:[%s1717_s4 + $0x88] sm:$0xff]   ;;  %v1820_v31 = vld [vmem:[%s1717_s4 + $0x90] sm:$0xff]  }
  0x1c   : > { %v1757_v42 = vsub.f32 %v1236_v33, %v1722_v9  ;;  %v1760_v43 = vsub.f32 %v1237_v34, %v1722_v9  ;;  %v1763_v44 = vsub.f32 %v1240_v35, %v1722_v9  ;;  %v1245_v45 = vunpack.c.h.bf16 %v1511_v27 }
  0x1d   : > { %1608 = vrsqrt.f32 %v491_v37  ;;  %v1768_v48 = vsub.f32 %v1241_v39, %v1722_v9  ;;  %v1771_v49 = vsub.f32 %v1244_v40, %v1722_v9  ;;  %v1248_v50 = vunpack.c.l.bf16 %v1512_v36 }
  0x1e   : > { %v1774_v51 = vsub.f32 %v1245_v45, %v1722_v9  ;;  %v1249_v52 = vunpack.c.h.bf16 %v1512_v36  ;;  %v1252_v53 = vunpack.c.l.bf16 %v1513_v41  ;;  %v1253_v54 = vunpack.c.h.bf16 %v1513_v41 }
  0x1f   : > { %v1778_v56 = vsub.f32 %v1248_v50, %v1722_v9  ;;  %v1256_v57 = vunpack.c.l.bf16 %v1514_v46  ;;  %v1257_v58 = vunpack.c.h.bf16 %v1514_v46  ;;  %v1260_v59 = vunpack.c.l.bf16 %v1515_v47 }
  0x20   : > { %v1782_v61 = vsub.f32 %v1249_v52, %v1722_v9  ;;  %v1785_v62 = vsub.f32 %v1252_v53, %v1722_v9  ;;  %v1788_v63 = vsub.f32 %v1253_v54, %v1722_v9  ;;  %v1261_v0 = vunpack.c.h.bf16 %v1515_v47 }
  0x21   : > { %v1793_v5 = vsub.f32 %v1256_v57, %v1722_v9  ;;  %v1796_v6 = vsub.f32 %v1257_v58, %v1722_v9  ;;  %v1799_v7 = vsub.f32 %v1260_v59, %v1722_v9  ;;  %v1264_v8 = vunpack.c.l.bf16 %v1516_v55 }
  0x22   : > { %v1802_v10 = vsub.f32 %v1261_v0, %v1722_v9  ;;  %v1265_v11 = vunpack.c.h.bf16 %v1516_v55  ;;  %v1268_v12 = vunpack.c.l.bf16 %v1517_v60  ;;  %v1269_v13 = vunpack.c.h.bf16 %v1517_v60 }
  0x23   : > { %v1806_v15 = vsub.f32 %v1264_v8, %v1722_v9  ;;  %v1272_v16 = vunpack.c.l.bf16 %v1518_v3  ;;  %v1273_v17 = vunpack.c.h.bf16 %v1518_v3  ;;  %v1276_v18 = vunpack.c.l.bf16 %v1519_v4 }
  0x24   : > { %v1810_v20 = vsub.f32 %v1265_v11, %v1722_v9  ;;  %v1813_v21 = vsub.f32 %v1268_v12, %v1722_v9  ;;  %v1816_v22 = vsub.f32 %v1269_v13, %v1722_v9  ;;  %v1277_v27 = vunpack.c.h.bf16 %v1519_v4 }
  0x25   : > { %v1823_v33 = vsub.f32 %v1272_v16, %v1722_v9  ;;  %v1826_v34 = vsub.f32 %v1273_v17, %v1722_v9  ;;  %v1829_v35 = vsub.f32 %v1276_v18, %v1722_v9  ;;  %v1280_v36 = vunpack.c.l.bf16 %v1520_v14 }
  0x26   : > { %v1832_v37 = vsub.f32 %v1277_v27, %v1722_v9  ;;  %v1281_v39 = vunpack.c.h.bf16 %v1520_v14  ;;  %v1284_v40 = vunpack.c.l.bf16 %v1521_v19  ;;  %v1285_v41 = vunpack.c.h.bf16 %v1521_v19 }
  0x27   : > { %v1609_v45 = vpop.eup %1608  ;;  %v1835_v46 = vsub.f32 %v1280_v36, %v1722_v9  ;;  %v1288_v47 = vunpack.c.l.bf16 %v1522_v28  ;;  %v1289_v50 = vunpack.c.h.bf16 %v1522_v28  ;;  %v1292_v52 = vunpack.c.l.bf16 %v1820_v31 }
  0x28   : > { %v1840_v53 = vrot.slane %v1609_v45, %v424_v2  ;;  %v1843_v54 = vsub.f32 %v1281_v39, %v1722_v9  ;;  %v1846_v55 = vsub.f32 %v1284_v40, %v1722_v9  ;;  %v1849_v57 = vsub.f32 %v1285_v41, %v1722_v9 }
  0x29   : > { %v1852_v58 = vsub.f32 %v1288_v47, %v1722_v9  ;;  %v1855_v59 = vsub.f32 %v1289_v50, %v1722_v9  ;;  %v1293_v1 = vunpack.c.h.bf16 %v1820_v31  ;;  %v1859_v2 = vsub.f32 %v1292_v52, %v1722_v9 }
  0x2a   : > { %v499_v60 = vmul.f32 %v1840_v53, %v1730_v23  ;;  %v500_v0 = vmul.f32 %v1840_v53, %v1733_v24  ;;  %v501_v3 = vmul.f32 %v1840_v53, %v1736_v25  ;;  %v502_v4 = vmul.f32 %v1840_v53, %v1739_v26 }
  0x2b   : > { %v503_v8 = vmul.f32 %v1840_v53, %v1743_v29  ;;  %v504_v11 = vmul.f32 %v1840_v53, %v1746_v30  ;;  %v505_v12 = vmul.f32 %v1840_v53, %v1749_v32  ;;  %v506_v23 = vmul.f32 %v1840_v53, %v1753_v38 }
  0x2c   : > { %v563_v13 = vmax.f32 %v499_v60, 0.0  ;;  %v564_v24 = vmax.f32 %v500_v0, 0.0  ;;  %v565_v14 = vmax.f32 %v501_v3, 0.0  ;;  %v566_v16 = vmax.f32 %v502_v4, 0.0 }
  0x2d   : > { %v567_v25 = vmax.f32 %v503_v8, 0.0  ;;  %v568_v26 = vmax.f32 %v504_v11, 0.0  ;;  %v569_v29 = vmax.f32 %v505_v12, 0.0  ;;  %v570_v30 = vmax.f32 %v506_v23, 0.0 }
  0x2e   : > { %v1349_v32 = vpack.c.bf16 %v564_v24, %v563_v13  ;;  %v1354_v38 = vpack.c.bf16 %v566_v16, %v565_v14  ;;  %v507_v17 = vmul.f32 %v1840_v53, %v1757_v42  ;;  %v508_v18 = vmul.f32 %v1840_v53, %v1760_v43 }
  0x2f   : > { %v1359_v19 = vpack.c.bf16 %v568_v26, %v567_v25  ;;  %v1364_v27 = vpack.c.bf16 %v570_v30, %v569_v29  ;;  %v509_v28 = vmul.f32 %v1840_v53, %v1763_v44  ;;  %v510_v36 = vmul.f32 %v1840_v53, %v1768_v48 }
  0x30   : > { %1350 = vst [vmem:[%s1882_s7] sm:$0xff] %v1349_v32   ;;  %1537 = vst [vmem:[%s1882_s7 + $0x8] sm:$0xff] %v1354_v38   ;;  %v571_v39 = vmax.f32 %v507_v17, 0.0  ;;  %v572_v40 = vmax.f32 %v508_v18, 0.0  ;;  %v511_v41 = vmul.f32 %v1840_v53, %v1771_v49  ;;  %v512_v42 = vmul.f32 %v1840_v53, %v1774_v51 }
  0x31   : > { %1538 = vst [vmem:[%s1882_s7 + $0x10] sm:$0xff] %v1359_v19   ;;  %1539 = vst [vmem:[%s1882_s7 + $0x18] sm:$0xff] %v1364_v27   ;;  %v573_v43 = vmax.f32 %v509_v28, 0.0  ;;  %v574_v45 = vmax.f32 %v510_v36, 0.0  ;;  %v513_v44 = vmul.f32 %v1840_v53, %v1778_v56  ;;  %v514_v48 = vmul.f32 %v1840_v53, %v1782_v61 }
  0x32   : > { %v1369_v47 = vpack.c.bf16 %v572_v40, %v571_v39  ;;  %v575_v50 = vmax.f32 %v511_v41, 0.0  ;;  %v576_v52 = vmax.f32 %v512_v42, 0.0  ;;  %v515_v49 = vmul.f32 %v1840_v53, %v1785_v62 }
  0x33   : > { %v1374_v60 = vpack.c.bf16 %v574_v45, %v573_v43  ;;  %v577_v51 = vmax.f32 %v513_v44, 0.0  ;;  %v578_v0 = vmax.f32 %v514_v48, 0.0  ;;  %v516_v3 = vmul.f32 %v1840_v53, %v1788_v63 }
  0x34   : > { %1540 = vst [vmem:[%s1882_s7 + $0x20] sm:$0xff] %v1369_v47   ;;  %v1379_v4 = vpack.c.bf16 %v576_v52, %v575_v50  ;;  %v579_v56 = vmax.f32 %v515_v49, 0.0  ;;  %v517_v61 = vmul.f32 %v1840_v53, %v1793_v5  ;;  %v518_v8 = vmul.f32 %v1840_v53, %v1796_v6 }
  0x35   : > { %1541 = vst [vmem:[%s1882_s7 + $0x28] sm:$0xff] %v1374_v60   ;;  %v1384_v11 = vpack.c.bf16 %v578_v0, %v577_v51  ;;  %v580_v12 = vmax.f32 %v516_v3, 0.0  ;;  %v519_v62 = vmul.f32 %v1840_v53, %v1799_v7  ;;  %v520_v63 = vmul.f32 %v1840_v53, %v1802_v10  ;;  %v1526_v60 = vld [vmem:[%s1717_s4 + $0xa8] sm:$0xff]  }
  0x36   : > { %1542 = vst [vmem:[%s1882_s7 + $0x30] sm:$0xff] %v1379_v4   ;;  %v581_v23 = vmax.f32 %v517_v61, 0.0  ;;  %v582_v13 = vmax.f32 %v518_v8, 0.0  ;;  %v521_v24 = vmul.f32 %v1840_v53, %v1806_v15  ;;  %v522_v5 = vmul.f32 %v1840_v53, %v1810_v20  ;;  %v1527_v4 = vld [vmem:[%s1717_s4 + $0xb0] sm:$0xff]  }
  0x37   : > { %1543 = vst [vmem:[%s1882_s7 + $0x38] sm:$0xff] %v1384_v11   ;;  %v1389_v6 = vpack.c.bf16 %v580_v12, %v579_v56  ;;  %v583_v14 = vmax.f32 %v519_v62, 0.0  ;;  %v584_v16 = vmax.f32 %v520_v63, 0.0  ;;  %v523_v7 = vmul.f32 %v1840_v53, %v1813_v21 }
  0x38   : > { %v1394_v25 = vpack.c.bf16 %v582_v13, %v581_v23  ;;  %v585_v10 = vmax.f32 %v521_v24, 0.0  ;;  %v586_v26 = vmax.f32 %v522_v5, 0.0  ;;  %v524_v29 = vmul.f32 %v1840_v53, %v1816_v22 }
  0x39   : > { %1544 = vst [vmem:[%s1882_s7 + $0x40] sm:$0xff] %v1389_v6   ;;  %v1399_v15 = vpack.c.bf16 %v584_v16, %v583_v14  ;;  %v587_v30 = vmax.f32 %v523_v7, 0.0  ;;  %v525_v20 = vmul.f32 %v1840_v53, %v1823_v33  ;;  %v526_v32 = vmul.f32 %v1840_v53, %v1826_v34  ;;  %v1528_v16 = vld [vmem:[%s1717_s4 + $0xb8] sm:$0xff]  }
  0x3a   : > { %1545 = vst [vmem:[%s1882_s7 + $0x48] sm:$0xff] %v1394_v25   ;;  %v1404_v38 = vpack.c.bf16 %v586_v26, %v585_v10  ;;  %v588_v17 = vmax.f32 %v524_v29, 0.0  ;;  %v527_v21 = vmul.f32 %v1840_v53, %v1829_v35  ;;  %v528_v22 = vmul.f32 %v1840_v53, %v1832_v37 }
  0x3b   : > { %1546 = vst [vmem:[%s1882_s7 + $0x50] sm:$0xff] %v1399_v15   ;;  %v589_v18 = vmax.f32 %v525_v20, 0.0  ;;  %v590_v19 = vmax.f32 %v526_v32, 0.0  ;;  %v529_v33 = vmul.f32 %v1840_v53, %v1835_v46  ;;  %v530_v34 = vmul.f32 %v1840_v53, %v1843_v54  ;;  %v1524_v46 = vld [vmem:[%s1717_s4 + $0x98] sm:$0xff]   ;;  %v1529_v32 = vld [vmem:[%s1717_s4 + $0xc0] sm:$0xff]  }
  0x3c   : > { %1547 = vst [vmem:[%s1882_s7 + $0x58] sm:$0xff] %v1404_v38   ;;  %v1409_v27 = vpack.c.bf16 %v588_v17, %v587_v30  ;;  %v591_v28 = vmax.f32 %v527_v21, 0.0  ;;  %v592_v35 = vmax.f32 %v528_v22, 0.0  ;;  %v531_v36 = vmul.f32 %v1840_v53, %v1846_v55  ;;  %v1525_v55 = vld [vmem:[%s1717_s4 + $0xa0] sm:$0xff]  }
  0x3d   : > { %v1414_v37 = vpack.c.bf16 %v590_v19, %v589_v18  ;;  %v593_v39 = vmax.f32 %v529_v33, 0.0  ;;  %v594_v40 = vmax.f32 %v530_v34, 0.0  ;;  %v532_v41 = vmul.f32 %v1840_v53, %v1849_v57 }
  0x3e   : > { %1548 = vst [vmem:[%s1882_s7 + $0x60] sm:$0xff] %v1409_v27   ;;  %v1419_v54 = vpack.c.bf16 %v592_v35, %v591_v28  ;;  %v595_v42 = vmax.f32 %v531_v36, 0.0  ;;  %v533_v43 = vmul.f32 %v1840_v53, %v1852_v58  ;;  %v534_v45 = vmul.f32 %v1840_v53, %v1855_v59  ;;  %v1530_v27 = vld [vmem:[%s1717_s4 + $0xc8] sm:$0xff]  }
  0x3f   : > { %1549 = vst [vmem:[%s1882_s7 + $0x68] sm:$0xff] %v1414_v37   ;;  %v1424_v44 = vpack.c.bf16 %v594_v40, %v593_v39  ;;  %v596_v48 = vmax.f32 %v532_v41, 0.0  ;;  %v464_v57 = vsub.f32 %v1293_v1, %v1722_v9  ;;  %v535_v47 = vmul.f32 %v1840_v53, %v1859_v2  ;;  %v1531_v39 = vld [vmem:[%s1717_s4 + $0xd0] sm:$0xff]  }
  0x40   : > { %1550 = vst [vmem:[%s1882_s7 + $0x70] sm:$0xff] %v1419_v54   ;;  %v597_v50 = vmax.f32 %v533_v43, 0.0  ;;  %v598_v52 = vmax.f32 %v534_v45, 0.0  ;;  %v1296_v58 = vunpack.c.l.bf16 %v1524_v46  ;;  %v1297_v49 = vunpack.c.h.bf16 %v1524_v46 }
  0x41   : > { %1551 = vst [vmem:[%s1882_s7 + $0x78] sm:$0xff] %v1424_v44   ;;  %v1429_v59 = vpack.c.bf16 %v596_v48, %v595_v42  ;;  %v536_v51 = vmul.f32 %v1840_v53, %v464_v57  ;;  %v599_v0 = vmax.f32 %v535_v47, 0.0  ;;  %v1300_v3 = vunpack.c.l.bf16 %v1525_v55 }
  0x42   : > { %v1434_v31 = vpack.c.bf16 %v598_v52, %v597_v50  ;;  %v465_v1 = vsub.f32 %v1296_v58, %v1722_v9  ;;  %v466_v2 = vsub.f32 %v1297_v49, %v1722_v9  ;;  %v1301_v56 = vunpack.c.h.bf16 %v1525_v55  ;;  %v1532_v50 = vld [vmem:[%s1717_s4 + $0xd8] sm:$0xff]  }
  0x43   : > { %1552 = vst [vmem:[%s1882_s7 + $0x80] sm:$0xff] %v1429_v59   ;;  %v600_v61 = vmax.f32 %v536_v51, 0.0  ;;  %v467_v8 = vsub.f32 %v1300_v3, %v1722_v9  ;;  %v1304_v11 = vunpack.c.l.bf16 %v1526_v60  ;;  %v1305_v12 = vunpack.c.h.bf16 %v1526_v60 }
  0x44   : > { %1553 = vst [vmem:[%s1882_s7 + $0x88] sm:$0xff] %v1434_v31   ;;  %v537_v62 = vmul.f32 %v1840_v53, %v465_v1  ;;  %v538_v63 = vmul.f32 %v1840_v53, %v466_v2  ;;  %v468_v23 = vsub.f32 %v1301_v56, %v1722_v9  ;;  %v1308_v13 = vunpack.c.l.bf16 %v1527_v4  ;;  %v1533_v56 = vld [vmem:[%s1717_s4 + $0xe0] sm:$0xff]  }
  0x45   : > { %v1439_v24 = vpack.c.bf16 %v600_v61, %v599_v0  ;;  %v539_v5 = vmul.f32 %v1840_v53, %v467_v8  ;;  %v469_v6 = vsub.f32 %v1304_v11, %v1722_v9  ;;  %v470_v14 = vsub.f32 %v1305_v12, %v1722_v9 }
  0x46   : > { %v601_v7 = vmax.f32 %v537_v62, 0.0  ;;  %v602_v25 = vmax.f32 %v538_v63, 0.0  ;;  %v540_v10 = vmul.f32 %v1840_v53, %v468_v23  ;;  %v1309_v26 = vunpack.c.h.bf16 %v1527_v4 }
  0x47   : > { %1554 = vst [vmem:[%s1882_s7 + $0x90] sm:$0xff] %v1439_v24   ;;  %v603_v29 = vmax.f32 %v539_v5, 0.0  ;;  %v541_v15 = vmul.f32 %v1840_v53, %v469_v6  ;;  %v542_v30 = vmul.f32 %v1840_v53, %v470_v14  ;;  %v471_v20 = vsub.f32 %v1308_v13, %v1722_v9  ;;  %v1534_v24 = vld [vmem:[%s1717_s4 + $0xe8] sm:$0xff]  }
  0x48   : > { %v1444_v38 = vpack.c.bf16 %v602_v25, %v601_v7  ;;  %v604_v17 = vmax.f32 %v540_v10, 0.0  ;;  %v472_v21 = vsub.f32 %v1309_v26, %v1722_v9  ;;  %v1312_v22 = vunpack.c.l.bf16 %v1528_v16 }
  0x49   : > { %v605_v18 = vmax.f32 %v541_v15, 0.0  ;;  %v606_v19 = vmax.f32 %v542_v30, 0.0  ;;  %v543_v33 = vmul.f32 %v1840_v53, %v471_v20  ;;  %v1313_v34 = vunpack.c.h.bf16 %v1528_v16 }
  0x4a   : > { %1555 = vst [vmem:[%s1882_s7 + $0x98] sm:$0xff] %v1444_v38   ;;  %v1449_v28 = vpack.c.bf16 %v604_v17, %v603_v29  ;;  %v544_v35 = vmul.f32 %v1840_v53, %v472_v21  ;;  %v473_v36 = vsub.f32 %v1312_v22, %v1722_v9  ;;  %v1316_v37 = vunpack.c.l.bf16 %v1529_v32  ;;  %v1535_v29 = vld [vmem:[%s1717_s4 + $0xf0] sm:$0xff]  }
  0x4b   : > { %v1454_v40 = vpack.c.bf16 %v606_v19, %v605_v18  ;;  %v607_v41 = vmax.f32 %v543_v33, 0.0  ;;  %v474_v46 = vsub.f32 %v1313_v34, %v1722_v9  ;;  %v1317_v54 = vunpack.c.h.bf16 %v1529_v32  ;;  %v1536_v18 = vld [vmem:[%s1717_s4 + $0xf8] sm:$0xff]  }
  0x4c   : > { %1556 = vst [vmem:[%s1882_s7 + $0xa0] sm:$0xff] %v1449_v28   ;;  %v608_v42 = vmax.f32 %v544_v35, 0.0  ;;  %v545_v43 = vmul.f32 %v1840_v53, %v473_v36  ;;  %v475_v45 = vsub.f32 %v1316_v37, %v1722_v9  ;;  %v1320_v55 = vunpack.c.l.bf16 %v1530_v27 }
  0x4d   : > { %1557 = vst [vmem:[%s1882_s7 + $0xa8] sm:$0xff] %v1454_v40   ;;  %v546_v44 = vmul.f32 %v1840_v53, %v474_v46  ;;  %v476_v48 = vsub.f32 %v1317_v54, %v1722_v9  ;;  %v1321_v57 = vunpack.c.h.bf16 %v1530_v27  ;;  %v1324_v47 = vunpack.c.l.bf16 %v1531_v39 }
  0x4e   : > { %v1459_v52 = vpack.c.bf16 %v608_v42, %v607_v41  ;;  %v609_v58 = vmax.f32 %v545_v43, 0.0  ;;  %v547_v49 = vmul.f32 %v1840_v53, %v475_v45  ;;  %v477_v60 = vsub.f32 %v1320_v55, %v1722_v9 }
  0x4f   : > { %v610_v59 = vmax.f32 %v546_v44, 0.0  ;;  %v548_v51 = vmul.f32 %v1840_v53, %v476_v48  ;;  %v478_v0 = vsub.f32 %v1321_v57, %v1722_v9  ;;  %v1325_v3 = vunpack.c.h.bf16 %v1531_v39 }
  0x50   : > { %1558 = vst [vmem:[%s1882_s7 + $0xb0] sm:$0xff] %v1459_v52   ;;  %v611_v4 = vmax.f32 %v547_v49, 0.0  ;;  %v549_v31 = vmul.f32 %v1840_v53, %v477_v60  ;;  %v479_v1 = vsub.f32 %v1324_v47, %v1722_v9  ;;  %v1328_v2 = vunpack.c.l.bf16 %v1532_v50 }
  0x51   : > { %v1464_v61 = vpack.c.bf16 %v610_v59, %v609_v58  ;;  %v612_v8 = vmax.f32 %v548_v51, 0.0  ;;  %v550_v11 = vmul.f32 %v1840_v53, %v478_v0  ;;  %v480_v12 = vsub.f32 %v1325_v3, %v1722_v9 }
  0x52   : > { %v613_v62 = vmax.f32 %v549_v31, 0.0  ;;  %v551_v63 = vmul.f32 %v1840_v53, %v479_v1  ;;  %v1329_v23 = vunpack.c.h.bf16 %v1532_v50  ;;  %v481_v13 = vsub.f32 %v1328_v2, %v1722_v9 }
  0x53   : > { %1559 = vst [vmem:[%s1882_s7 + $0xb8] sm:$0xff] %v1464_v61   ;;  %v1469_v5 = vpack.c.bf16 %v612_v8, %v611_v4  ;;  %v614_v6 = vmax.f32 %v550_v11, 0.0  ;;  %v552_v14 = vmul.f32 %v1840_v53, %v480_v12  ;;  %v1332_v16 = vunpack.c.l.bf16 %v1533_v56 }
  0x54   : > { %v615_v7 = vmax.f32 %v551_v63, 0.0  ;;  %v482_v25 = vsub.f32 %v1329_v23, %v1722_v9  ;;  %v553_v10 = vmul.f32 %v1840_v53, %v481_v13  ;;  %v1333_v26 = vunpack.c.h.bf16 %v1533_v56 }
  0x55   : > { %1560 = vst [vmem:[%s1882_s7 + $0xc0] sm:$0xff] %v1469_v5   ;;  %v1474_v15 = vpack.c.bf16 %v614_v6, %v613_v62  ;;  %v616_v30 = vmax.f32 %v552_v14, 0.0  ;;  %v483_v20 = vsub.f32 %v1332_v16, %v1722_v9  ;;  %v1336_v32 = vunpack.c.l.bf16 %v1534_v24 }
  0x56   : > { %v554_v38 = vmul.f32 %v1840_v53, %v482_v25  ;;  %v617_v17 = vmax.f32 %v553_v10, 0.0  ;;  %v484_v21 = vsub.f32 %v1333_v26, %v1722_v9  ;;  %v1337_v22 = vunpack.c.h.bf16 %v1534_v24 }
  0x57   : > { %1561 = vst [vmem:[%s1882_s7 + $0xc8] sm:$0xff] %v1474_v15   ;;  %v1479_v19 = vpack.c.bf16 %v616_v30, %v615_v7  ;;  %v555_v33 = vmul.f32 %v1840_v53, %v483_v20  ;;  %v485_v34 = vsub.f32 %v1336_v32, %v1722_v9  ;;  %v1340_v27 = vunpack.c.l.bf16 %v1535_v29 }
  0x58   : > { %v618_v28 = vmax.f32 %v554_v38, 0.0  ;;  %v556_v35 = vmul.f32 %v1840_v53, %v484_v21  ;;  %v486_v36 = vsub.f32 %v1337_v22, %v1722_v9  ;;  %v1341_v37 = vunpack.c.h.bf16 %v1535_v29 }
  0x59   : > { %1562 = vst [vmem:[%s1882_s7 + $0xd0] sm:$0xff] %v1479_v19   ;;  %v619_v39 = vmax.f32 %v555_v33, 0.0  ;;  %v557_v40 = vmul.f32 %v1840_v53, %v485_v34  ;;  %v487_v41 = vsub.f32 %v1340_v27, %v1722_v9  ;;  %v1344_v46 = vunpack.c.l.bf16 %v1536_v18 }
  0x5a   : > { %v1484_v54 = vpack.c.bf16 %v618_v28, %v617_v17  ;;  %v620_v42 = vmax.f32 %v556_v35, 0.0  ;;  %v558_v43 = vmul.f32 %v1840_v53, %v486_v36  ;;  %v488_v45 = vsub.f32 %v1341_v37, %v1722_v9 }
  0x5b   : > { %v621_v55 = vmax.f32 %v557_v40, 0.0  ;;  %v559_v44 = vmul.f32 %v1840_v53, %v487_v41  ;;  %v1345_v48 = vunpack.c.h.bf16 %v1536_v18  ;;  %v489_v57 = vsub.f32 %v1344_v46, %v1722_v9 }
  0x5c   : > { %1563 = vst [vmem:[%s1882_s7 + $0xd8] sm:$0xff] %v1484_v54   ;;  %v1489_v47 = vpack.c.bf16 %v620_v42, %v619_v39  ;;  %v622_v50 = vmax.f32 %v558_v43, 0.0  ;;  %v560_v52 = vmul.f32 %v1840_v53, %v488_v45 }
  0x5d   : > { %v623_v58 = vmax.f32 %v559_v44, 0.0  ;;  %v490_v49 = vsub.f32 %v1345_v48, %v1722_v9  ;;  %v561_v60 = vmul.f32 %v1840_v53, %v489_v57 }
  0x5e   : > { %1564 = vst [vmem:[%s1882_s7 + $0xe0] sm:$0xff] %v1489_v47   ;;  %v1494_v59 = vpack.c.bf16 %v622_v50, %v621_v55  ;;  %v624_v51 = vmax.f32 %v560_v52, 0.0 }
  0x5f   : > { %v562_v0 = vmul.f32 %v1840_v53, %v490_v49  ;;  %v625_v3 = vmax.f32 %v561_v60, 0.0 }
  0x60   : > { %1565 = vst [vmem:[%s1882_s7 + $0xe8] sm:$0xff] %v1494_v59   ;;  %v1499_v4 = vpack.c.bf16 %v624_v51, %v623_v58 }
  0x61   : > { %v626_v31 = vmax.f32 %v562_v0, 0.0 }
  0x62   : > { %1566 = vst [vmem:[%s1882_s7 + $0xf0] sm:$0xff] %v1499_v4  }
  0x63   : > { %v1504_v1 = vpack.c.bf16 %v626_v31, %v625_v3 }
  0x65   : > { %1567 = vst [vmem:[%s1882_s7 + $0xf8] sm:$0xff] %v1504_v1  }
  0x66 PF: > { %s13_s16 = sadd.s32 1, %s1648_s16   ;;  %s2062_s12 = smov %s1640_s14 }
  0x67   : > { %p10_p7 = scmp.ge.s32.totalorder %s13_s16, 6   ;;  %s2063_s13 = smov %s1644_s15 }
  0x68   : > { %s2064_s14 = smov %s2067_s17  ;;  %s2065_s15 = smov %s2071_s18 }
  0x69   :  { %12 = sbr.rel (!%p10_p7) target bundleno = 3 (0x3), region = 68 }

// kernel: generator_hd_forward.55
= control target key start
LH: loop header
LB: loop body
LE: loop exit
PB: predicated region body
PF: predicated region fallthrough
CT: control target
= control target key end

     0   :  { %s2878_s15 = smov 0   ;;  %s2880_s16 = smov 0   ;;  %s3467_s0 = inlined_call_operand.vmem [shape: bf16[2,1024,256], index: 0, kind: input, shape index: {}]   ;;  %s3468_s1 = inlined_call_operand.vmem [shape: bf16[256,128], index: 1, kind: input, shape index: {}]   ;;  %s3469_s2 = inlined_call_operand.vmem [shape: bf16[2,1024,128], index: 2, kind: output, shape index: {0}]   ;;  %s3470_s3 = inlined_call_operand.vmem [shape: f32[2,1,128], index: 3, kind: output, shape index: {1}]   ;;  %s3471_s4 = inlined_call_operand.vmem [shape: f32[2,1,128], index: 4, kind: output, shape index: {2}]  }
   0x1   :  { %s2882_s17 = smov 0   ;;  %s2884_s18 = smov 0  }
   0x2   :  { %s2886_s19 = smov 0  }
   0x3 LB: > { %s33_s20 = sadd.s32 1, %s2841_s17  ;;  %s41_s21 = sadd.s32 1, %s2845_s18  ;;  %s2849_s19 = sphi %s2886_s19, %s15_s19   ;;  %s2845_s18 = sphi %s2884_s18, %s3475_s18   ;;  %s2841_s17 = sphi %s2882_s17, %s3474_s17   ;;  %s2837_s16 = sphi %s2880_s16, %s3473_s16   ;;  %s2833_s15 = sphi %s2878_s15, %s3472_s15  }
   0x4   : > { %p35_p0 = scmp.ge.s32.totalorder %s33_s20, 2  ;;  %p2213_p1 = scmp.ge.s32.totalorder %s2849_s19, 1 }
   0x5   : > { %p232_p2 = scmp.lt.s32.totalorder %s2849_s19, 5 }
   0x6   : > { %s3477_s20 = smov (%p35_p0, %s33_s20), 0  ;;  %s3479_s21 = smov (!%p35_p0, %s41_s21), %s2845_s18 }
   0x7   : > { %p233_p3 = pnand %p2213_p1, %p232_p2  ;;  %p43_p4 = scmp.ge.s32.totalorder %s3479_s21, 2 }
   0x8   : > { %v2699_v0 = vld [vmem:[%s3468_s1] sm:$0xff] (!%p233_p3)   ;;  %v2851_v1 = vmov (!%p233_p3), 0   ;;  %s2214_s24 = sshll.u32 (!%p233_p3), %s2833_s15, 6  ;;  %v2700_v2 = vld [vmem:[%s3468_s1 + $0x8] sm:$0xff] (!%p233_p3)   ;;  %p296_p5 = scmp.lt.s32.totalorder (!%p233_p3), %s2837_s16, 1  ;;  %v2701_v3 = vld [vmem:[%s3468_s1 + $0x10] sm:$0xff] (!%p233_p3)  }
   0x9   : > { %s3481_s21 = smov (%p43_p4, %s3479_s21), 0  ;;  %236 = sbr.rel (%p233_p3) target bundleno = 553 (0x229), region = 28 }
   0xa   : > { %989 = vmatprep.subr.bf16.mxu0 (!%p233_p3), %v2851_v1  ;;  %2624 = vmatprep.subr.bf16.mxu1 (!%p233_p3), %v2851_v1  ;;  %p298_p6 = scmp.lt.s32.totalorder (!%p233_p3), %s2214_s24, 127  ;;  %v2702_v4 = vld [vmem:[%s3468_s1 + $0x18] sm:$0xff] (!%p233_p3)   ;;  %v2703_v5 = vld [vmem:[%s3468_s1 + $0x20] sm:$0xff] (!%p233_p3)   ;;  %v2704_v7 = vld [vmem:[%s3468_s1 + $0x28] sm:$0xff] (!%p233_p3)   ;;  %p1406_p7 = scmp.eq.s32.totalorder (!%p233_p3), %s2833_s15, 0 }
   0xb   : > { %990 = vmatpush1.bf16.msra.mxu0 (!%p233_p3), %v2699_v0  ;;  %2640 = vmatpush1.bf16.msra.mxu1 (!%p233_p3), %v2699_v0  ;;  %v2705_v9 = vld [vmem:[%s3468_s1 + $0x30] sm:$0xff] (!%p233_p3)   ;;  %v2706_v10 = vld [vmem:[%s3468_s1 + $0x38] sm:$0xff] (!%p233_p3)   ;;  %v2707_v11 = vld [vmem:[%s3468_s1 + $0x40] sm:$0xff] (!%p233_p3)  }
   0xc   : > { %991 = vmatprep.subr.bf16.mxu0 (!%p233_p3), %v2851_v1  ;;  %2625 = vmatprep.subr.bf16.mxu1 (!%p233_p3), %v2851_v1  ;;  %v2708_v12 = vld [vmem:[%s3468_s1 + $0x48] sm:$0xff] (!%p233_p3)   ;;  %v2709_v13 = vld [vmem:[%s3468_s1 + $0x50] sm:$0xff] (!%p233_p3)   ;;  %v2710_v14 = vld [vmem:[%s3468_s1 + $0x58] sm:$0xff] (!%p233_p3)  }
   0xd   : > { %v2711_v15 = vld [vmem:[%s3468_s1 + $0x60] sm:$0xff] (!%p233_p3)   ;;  %v2712_v16 = vld [vmem:[%s3468_s1 + $0x68] sm:$0xff] (!%p233_p3)   ;;  %v2713_v17 = vld [vmem:[%s3468_s1 + $0x70] sm:$0xff] (!%p233_p3)  }
   0xe   : > { %v2714_v18 = vld [vmem:[%s3468_s1 + $0x78] sm:$0xff] (!%p233_p3)  }
   0xf   : > { %992 = vmatpush1.bf16.msra.mxu0 (!%p233_p3), %v2700_v2  ;;  %2641 = vmatpush1.bf16.msra.mxu1 (!%p233_p3), %v2700_v2 }
  0x10   : > { %s3483_s16 = smov (!%p296_p5, %s2837_s16), 1  ;;  %s3485_s24 = smov (!%p298_p6, %s2214_s24), 127  ;;  %993 = vmatprep.subr.bf16.mxu0 %v2851_v1  ;;  %2626 = vmatprep.subr.bf16.mxu1 %v2851_v1 }
  0x11   : > { %s2216_s29 = sshll.u32 %s3483_s16, 8  ;;  %s2927_s6 = scalar_lea.vmem %s3470_s3, %s3483_s16 }
  0x12   : > { %s2215_s7 = sshll.u32 %s3485_s24, 1  ;;  %s2934_s10 = scalar_lea.vmem %s3471_s4, %s3483_s16 }
  0x13   : > { %s305_s11 = sadd.s32 %s2216_s29, %s2215_s7  ;;  %s2219_s12 = sshll.u32 %s3483_s16, 7  ;;  %994 = vmatpush1.bf16.msra.mxu0 %v2701_v3  ;;  %2642 = vmatpush1.bf16.msra.mxu1 %v2701_v3 }
  0x14   : > { %s328_s13 = sadd.s32 %s2219_s12, %s3485_s24  ;;  %995 = vmatprep.subr.bf16.mxu0 %v2851_v1  ;;  %2627 = vmatprep.subr.bf16.mxu1 %v2851_v1  ;;  %s2217_s25 = sshll.u32 %s305_s11, 2 }
  0x15   : > { %s2220_s23 = sshll.u32 %s328_s13, 2  ;;  %s2952_s5 = scalar_lea.vmem %s3467_s0, %s2217_s25 }
  0x16   : > { %s2944_s28 = scalar_lea.vmem %s3469_s2, %s2220_s23  ;;  %v2717_v6 = vld [vmem:[%s2952_s5 + $0x4] ss:$8 sps:$4 sm:$0xff]   ;;  %v2715_v19 = vld [vmem:[%s2952_s5] ss:$8 sps:$4 sm:$0xff]   ;;  %v2721_v21 = vld [vmem:[%s2952_s5 + $0x14] ss:$8 sps:$4 sm:$0xff]  }
  0x17   : > { %996 = vmatpush1.bf16.msra.mxu0 %v2702_v4  ;;  %2643 = vmatpush1.bf16.msra.mxu1 %v2702_v4  ;;  %v2720_v8 = vld [vmem:[%s2952_s5 + $0x104] ss:$8 sps:$4 sm:$0xff]   ;;  %v2718_v20 = vld [vmem:[%s2952_s5 + $0x100] ss:$8 sps:$4 sm:$0xff]   ;;  %v2723_v22 = vld [vmem:[%s2952_s5 + $0x114] ss:$8 sps:$4 sm:$0xff]  }
  0x18   : > { %997 = vmatprep.subr.bf16.mxu0 %v2851_v1  ;;  %2628 = vmatprep.subr.bf16.mxu1 %v2851_v1  ;;  %v2725_v23 = vld [vmem:[%s2952_s5 + $0x10] ss:$8 sps:$4 sm:$0xff]   ;;  %v2727_v25 = vld [vmem:[%s2952_s5 + $0x24] ss:$8 sps:$4 sm:$0xff]   ;;  %v2731_v27 = vld [vmem:[%s2952_s5 + $0x20] ss:$8 sps:$4 sm:$0xff]  }
  0x19   : > { %1021 = vmatprep.mubr.bf16.mxu0 %v2717_v6  ;;  %1149 = vmatprep.mubr.bf16.mxu1 %v2720_v8  ;;  %v2726_v24 = vld [vmem:[%s2952_s5 + $0x110] ss:$8 sps:$4 sm:$0xff]   ;;  %v2729_v26 = vld [vmem:[%s2952_s5 + $0x124] ss:$8 sps:$4 sm:$0xff]   ;;  %v2732_v28 = vld [vmem:[%s2952_s5 + $0x120] ss:$8 sps:$4 sm:$0xff]  }
  0x1a   : > { %v2733_v29 = vld [vmem:[%s2952_s5 + $0x34] ss:$8 sps:$4 sm:$0xff]   ;;  %v2737_v31 = vld [vmem:[%s2952_s5 + $0x30] ss:$8 sps:$4 sm:$0xff]   ;;  %v2739_v33 = vld [vmem:[%s2952_s5 + $0x44] ss:$8 sps:$4 sm:$0xff]  }
  0x1b   : > { %998 = vmatpush1.bf16.msra.mxu0 %v2703_v5  ;;  %2644 = vmatpush1.bf16.msra.mxu1 %v2703_v5  ;;  %v2735_v30 = vld [vmem:[%s2952_s5 + $0x134] ss:$8 sps:$4 sm:$0xff]   ;;  %v2738_v32 = vld [vmem:[%s2952_s5 + $0x130] ss:$8 sps:$4 sm:$0xff]   ;;  %v2741_v34 = vld [vmem:[%s2952_s5 + $0x144] ss:$8 sps:$4 sm:$0xff]  }
  0x1c   : > { %999 = vmatprep.subr.bf16.mxu0 %v2851_v1  ;;  %2629 = vmatprep.subr.bf16.mxu1 %v2851_v1  ;;  %v2743_v35 = vld [vmem:[%s2952_s5 + $0x40] ss:$8 sps:$4 sm:$0xff]   ;;  %v2745_v37 = vld [vmem:[%s2952_s5 + $0x54] ss:$8 sps:$4 sm:$0xff]   ;;  %v2749_v39 = vld [vmem:[%s2952_s5 + $0x50] ss:$8 sps:$4 sm:$0xff]  }
  0x1d   : > { %v2744_v36 = vld [vmem:[%s2952_s5 + $0x140] ss:$8 sps:$4 sm:$0xff]   ;;  %v2747_v38 = vld [vmem:[%s2952_s5 + $0x154] ss:$8 sps:$4 sm:$0xff]   ;;  %v2750_v40 = vld [vmem:[%s2952_s5 + $0x150] ss:$8 sps:$4 sm:$0xff]  }
  0x1e   : > { %v2751_v41 = vld [vmem:[%s2952_s5 + $0x64] ss:$8 sps:$4 sm:$0xff]   ;;  %v2755_v43 = vld [vmem:[%s2952_s5 + $0x60] ss:$8 sps:$4 sm:$0xff]   ;;  %v2757_v45 = vld [vmem:[%s2952_s5 + $0x74] ss:$8 sps:$4 sm:$0xff]  }
  0x1f   : > { %1000 = vmatpush1.bf16.msra.mxu0 %v2704_v7  ;;  %2645 = vmatpush1.bf16.msra.mxu1 %v2704_v7  ;;  %v2753_v42 = vld [vmem:[%s2952_s5 + $0x164] ss:$8 sps:$4 sm:$0xff]   ;;  %v2756_v44 = vld [vmem:[%s2952_s5 + $0x160] ss:$8 sps:$4 sm:$0xff]   ;;  %v2759_v46 = vld [vmem:[%s2952_s5 + $0x174] ss:$8 sps:$4 sm:$0xff]  }
  0x20   : > { %1001 = vmatprep.subr.bf16.mxu0 %v2851_v1  ;;  %2630 = vmatprep.subr.bf16.mxu1 %v2851_v1  ;;  %v2761_v47 = vld [vmem:[%s2952_s5 + $0x70] ss:$8 sps:$4 sm:$0xff]   ;;  %v2763_v49 = vld [vmem:[%s2952_s5 + $0x84] ss:$8 sps:$4 sm:$0xff]   ;;  %v2767_v51 = vld [vmem:[%s2952_s5 + $0x80] ss:$8 sps:$4 sm:$0xff]  }
  0x21   : > { %v2762_v48 = vld [vmem:[%s2952_s5 + $0x170] ss:$8 sps:$4 sm:$0xff]   ;;  %v2765_v50 = vld [vmem:[%s2952_s5 + $0x184] ss:$8 sps:$4 sm:$0xff]   ;;  %v2768_v52 = vld [vmem:[%s2952_s5 + $0x180] ss:$8 sps:$4 sm:$0xff]  }
  0x22   : > { %v2769_v53 = vld [vmem:[%s2952_s5 + $0x94] ss:$8 sps:$4 sm:$0xff]   ;;  %v2773_v55 = vld [vmem:[%s2952_s5 + $0x90] ss:$8 sps:$4 sm:$0xff]   ;;  %v2775_v57 = vld [vmem:[%s2952_s5 + $0xa4] ss:$8 sps:$4 sm:$0xff]  }
  0x23   : > { %1002 = vmatpush1.bf16.msra.mxu0 %v2705_v9  ;;  %2646 = vmatpush1.bf16.msra.mxu1 %v2705_v9  ;;  %v2771_v54 = vld [vmem:[%s2952_s5 + $0x194] ss:$8 sps:$4 sm:$0xff]   ;;  %v2774_v56 = vld [vmem:[%s2952_s5 + $0x190] ss:$8 sps:$4 sm:$0xff]   ;;  %v2777_v58 = vld [vmem:[%s2952_s5 + $0x1a4] ss:$8 sps:$4 sm:$0xff]  }
  0x24   : > { %1003 = vmatprep.subr.bf16.mxu0 %v2851_v1  ;;  %2631 = vmatprep.subr.bf16.mxu1 %v2851_v1  ;;  %v2779_v59 = vld [vmem:[%s2952_s5 + $0xa0] ss:$8 sps:$4 sm:$0xff]   ;;  %v2781_v61 = vld [vmem:[%s2952_s5 + $0xb4] ss:$8 sps:$4 sm:$0xff]   ;;  %v2785_v63 = vld [vmem:[%s2952_s5 + $0xb0] ss:$8 sps:$4 sm:$0xff]  }
  0x25   : > { %v2780_v60 = vld [vmem:[%s2952_s5 + $0x1a0] ss:$8 sps:$4 sm:$0xff]   ;;  %v2783_v62 = vld [vmem:[%s2952_s5 + $0x1b4] ss:$8 sps:$4 sm:$0xff]   ;;  %v2786_v0 = vld [vmem:[%s2952_s5 + $0x1b0] ss:$8 sps:$4 sm:$0xff]  }
  0x26   : > { %v2789_v2 = vld [vmem:[%s2952_s5 + $0x1c4] ss:$8 sps:$4 sm:$0xff]   ;;  %v2791_v3 = vld [vmem:[%s2952_s5 + $0xc0] ss:$8 sps:$4 sm:$0xff]   ;;  %v2793_v5 = vld [vmem:[%s2952_s5 + $0xd4] ss:$8 sps:$4 sm:$0xff]  }
  0x27   : > { %1004 = vmatpush1.bf16.msra.mxu0 %v2706_v10  ;;  %2647 = vmatpush1.bf16.msra.mxu1 %v2706_v10  ;;  %v2792_v4 = vld [vmem:[%s2952_s5 + $0x1c0] ss:$8 sps:$4 sm:$0xff]   ;;  %v2795_v6 = vld [vmem:[%s2952_s5 + $0x1d4] ss:$8 sps:$4 sm:$0xff]   ;;  %v2797_v7 = vld [vmem:[%s2952_s5 + $0xd0] ss:$8 sps:$4 sm:$0xff]  }
  0x28   : > { %1005 = vmatprep.subr.bf16.mxu0 %v2851_v1  ;;  %2632 = vmatprep.subr.bf16.mxu1 %v2851_v1  ;;  %v2798_v8 = vld [vmem:[%s2952_s5 + $0x1d0] ss:$8 sps:$4 sm:$0xff]   ;;  %v2799_v9 = vld [vmem:[%s2952_s5 + $0xe4] ss:$8 sps:$4 sm:$0xff]  }
  0x29   : > { %v2801_v10 = vld [vmem:[%s2952_s5 + $0x1e4] ss:$8 sps:$4 sm:$0xff]  }
  0x2b   : > { %1006 = vmatpush1.bf16.msra.mxu0 %v2707_v11  ;;  %2648 = vmatpush1.bf16.msra.mxu1 %v2707_v11  ;;  %v2803_v11 = vld [vmem:[%s2952_s5 + $0xe0] ss:$8 sps:$4 sm:$0xff]  }
  0x2c   : > { %1007 = vmatprep.subr.bf16.mxu0 %v2851_v1  ;;  %2633 = vmatprep.subr.bf16.mxu1 %v2851_v1 }
  0x2f   : > { %1008 = vmatpush1.bf16.msra.mxu0 %v2708_v12  ;;  %2649 = vmatpush1.bf16.msra.mxu1 %v2708_v12  ;;  %v2804_v12 = vld [vmem:[%s2952_s5 + $0x1e0] ss:$8 sps:$4 sm:$0xff]  }
  0x30   : > { %1009 = vmatprep.subr.bf16.mxu0 %v2851_v1  ;;  %2634 = vmatprep.subr.bf16.mxu1 %v2851_v1 }
  0x33   : > { %1010 = vmatpush1.bf16.msra.mxu0 %v2709_v13  ;;  %2650 = vmatpush1.bf16.msra.mxu1 %v2709_v13  ;;  %v2805_v13 = vld [vmem:[%s2952_s5 + $0xf4] ss:$8 sps:$4 sm:$0xff]  }
  0x34   : > { %1011 = vmatprep.subr.bf16.mxu0 %v2851_v1  ;;  %2635 = vmatprep.subr.bf16.mxu1 %v2851_v1 }
  0x37   : > { %1012 = vmatpush1.bf16.msra.mxu0 %v2710_v14  ;;  %2651 = vmatpush1.bf16.msra.mxu1 %v2710_v14  ;;  %v2807_v14 = vld [vmem:[%s2952_s5 + $0x1f4] ss:$8 sps:$4 sm:$0xff]  }
  0x38   : > { %1013 = vmatprep.subr.bf16.mxu0 %v2851_v1  ;;  %2636 = vmatprep.subr.bf16.mxu1 %v2851_v1 }
  0x3b   : > { %1014 = vmatpush1.bf16.msra.mxu0 %v2711_v15  ;;  %2652 = vmatpush1.bf16.msra.mxu1 %v2711_v15  ;;  %v2809_v15 = vld [vmem:[%s2952_s5 + $0xf0] ss:$8 sps:$4 sm:$0xff]  }
  0x3c   : > { %1015 = vmatprep.subr.bf16.mxu0 %v2851_v1  ;;  %2637 = vmatprep.subr.bf16.mxu1 %v2851_v1 }
  0x3f   : > { %1016 = vmatpush1.bf16.msra.mxu0 %v2712_v16  ;;  %2653 = vmatpush1.bf16.msra.mxu1 %v2712_v16  ;;  %v2810_v16 = vld [vmem:[%s2952_s5 + $0x1f0] ss:$8 sps:$4 sm:$0xff]  }
  0x40   : > { %1017 = vmatprep.subr.bf16.mxu0 %v2851_v1  ;;  %2638 = vmatprep.subr.bf16.mxu1 %v2851_v1 }
  0x43   : > { %1018 = vmatpush1.bf16.msra.mxu0 %v2713_v17  ;;  %2654 = vmatpush1.bf16.msra.mxu1 %v2713_v17 }
  0x44   : > { %1019 = vmatprep.subr.bf16.mxu0 %v2851_v1  ;;  %2639 = vmatprep.subr.bf16.mxu1 %v2851_v1  ;;  %v2787_v1 = vld [vmem:[%s2952_s5 + $0xc4] ss:$8 sps:$4 sm:$0xff]  }
  0x47   : > { %1020 = vmatpush1.bf16.msra.mxu0 %v2714_v18  ;;  %2655 = vmatpush1.bf16.msra.mxu1 %v2714_v18 }
  0x4a   : > { %1022 = vmatmul.mubr.bf16.vlgmr.msra.gmra.mrb[0].mxu0 %v2715_v19  ;;  %1150 = vmatmul.mubr.bf16.vlgmr.msra.gmra.mrb[0].mxu1 %v2718_v20 }
  0x4b   : > { %1029 = vmatprep.mubr.bf16.mxu0 %v2721_v21  ;;  %1157 = vmatprep.mubr.bf16.mxu1 %v2723_v22 }
  0x52   : > { %1030 = vmatmul.mubr.bf16.gmra.mrb[4].mxu0 %v2725_v23  ;;  %1158 = vmatmul.mubr.bf16.gmra.mrb[4].mxu1 %v2726_v24 }
  0x53   : > { %1037 = vmatprep.mubr.bf16.mxu0 %v2727_v25  ;;  %1165 = vmatprep.mubr.bf16.mxu1 %v2729_v26 }
  0x5a   : > { %1038 = vmatmul.mubr.bf16.gmra.mrb[8].mxu0 %v2731_v27  ;;  %1166 = vmatmul.mubr.bf16.gmra.mrb[8].mxu1 %v2732_v28 }
  0x5b   : > { %1045 = vmatprep.mubr.bf16.mxu0 %v2733_v29  ;;  %1173 = vmatprep.mubr.bf16.mxu1 %v2735_v30 }
  0x62   : > { %1046 = vmatmul.mubr.bf16.gmra.mrb[12].mxu0 %v2737_v31  ;;  %1174 = vmatmul.mubr.bf16.gmra.mrb[12].mxu1 %v2738_v32 }
  0x63   : > { %1053 = vmatprep.mubr.bf16.mxu0 %v2739_v33  ;;  %1181 = vmatprep.mubr.bf16.mxu1 %v2741_v34 }
  0x6a   : > { %1054 = vmatmul.mubr.bf16.gmra.mrb[16].mxu0 %v2743_v35  ;;  %1182 = vmatmul.mubr.bf16.gmra.mrb[16].mxu1 %v2744_v36 }
  0x6b   : > { %1061 = vmatprep.mubr.bf16.mxu0 %v2745_v37  ;;  %1189 = vmatprep.mubr.bf16.mxu1 %v2747_v38 }
  0x72   : > { %1062 = vmatmul.mubr.bf16.gmra.mrb[20].mxu0 %v2749_v39  ;;  %1190 = vmatmul.mubr.bf16.gmra.mrb[20].mxu1 %v2750_v40 }
  0x73   : > { %1069 = vmatprep.mubr.bf16.mxu0 %v2751_v41  ;;  %1197 = vmatprep.mubr.bf16.mxu1 %v2753_v42 }
  0x7a   : > { %1070 = vmatmul.mubr.bf16.gmra.mrb[24].mxu0 %v2755_v43  ;;  %1198 = vmatmul.mubr.bf16.gmra.mrb[24].mxu1 %v2756_v44 }
  0x7b   : > { %1077 = vmatprep.mubr.bf16.mxu0 %v2757_v45  ;;  %1205 = vmatprep.mubr.bf16.mxu1 %v2759_v46 }
  0x82   : > { %1078 = vmatmul.mubr.bf16.gmra.mrb[28].mxu0 %v2761_v47  ;;  %1206 = vmatmul.mubr.bf16.gmra.mrb[28].mxu1 %v2762_v48 }
  0x83   : > { %1085 = vmatprep.mubr.bf16.mxu0 %v2763_v49  ;;  %1213 = vmatprep.mubr.bf16.mxu1 %v2765_v50 }
  0x8a   : > { %1086 = vmatmul.mubr.bf16.gmra.mrb[32].mxu0 %v2767_v51  ;;  %1214 = vmatmul.mubr.bf16.gmra.mrb[32].mxu1 %v2768_v52 }
  0x8b   : > { %1093 = vmatprep.mubr.bf16.mxu0 %v2769_v53  ;;  %1221 = vmatprep.mubr.bf16.mxu1 %v2771_v54 }
  0x92   : > { %1094 = vmatmul.mubr.bf16.gmra.mrb[36].mxu0 %v2773_v55  ;;  %1222 = vmatmul.mubr.bf16.gmra.mrb[36].mxu1 %v2774_v56 }
  0x93   : > { %1101 = vmatprep.mubr.bf16.mxu0 %v2775_v57  ;;  %1229 = vmatprep.mubr.bf16.mxu1 %v2777_v58 }
  0x9a   : > { %1102 = vmatmul.mubr.bf16.gmra.mrb[40].mxu0 %v2779_v59  ;;  %1230 = vmatmul.mubr.bf16.gmra.mrb[40].mxu1 %v2780_v60 }
  0x9b   : > { %1109 = vmatprep.mubr.bf16.mxu0 %v2781_v61  ;;  %1237 = vmatprep.mubr.bf16.mxu1 %v2783_v62 }
  0xa2   : > { %1110 = vmatmul.mubr.bf16.gmra.mrb[44].mxu0 %v2785_v63  ;;  %1238 = vmatmul.mubr.bf16.gmra.mrb[44].mxu1 %v2786_v0 }
  0xa3   : > { %1117 = vmatprep.mubr.bf16.mxu0 %v2787_v1  ;;  %1245 = vmatprep.mubr.bf16.mxu1 %v2789_v2 }
  0xaa   : > { %1118 = vmatmul.mubr.bf16.gmra.mrb[48].mxu0 %v2791_v3  ;;  %1246 = vmatmul.mubr.bf16.gmra.mrb[48].mxu1 %v2792_v4 }
  0xab   : > { %1125 = vmatprep.mubr.bf16.mxu0 %v2793_v5  ;;  %1253 = vmatprep.mubr.bf16.mxu1 %v2795_v6 }
  0xb2   : > { %1126 = vmatmul.mubr.bf16.gmra.mrb[52].mxu0 %v2797_v7  ;;  %1254 = vmatmul.mubr.bf16.gmra.mrb[52].mxu1 %v2798_v8 }
  0xb3   : > { %1133 = vmatprep.mubr.bf16.mxu0 %v2799_v9  ;;  %1261 = vmatprep.mubr.bf16.mxu1 %v2801_v10 }
  0xba   : > { %1134 = vmatmul.mubr.bf16.gmra.mrb[56].mxu0 %v2803_v11  ;;  %1262 = vmatmul.mubr.bf16.gmra.mrb[56].mxu1 %v2804_v12 }
  0xbb   : > { %1141 = vmatprep.mubr.bf16.mxu0 %v2805_v13  ;;  %1269 = vmatprep.mubr.bf16.mxu1 %v2807_v14 }
  0xc2   : > { %1142 = vmatmul.mubr.bf16.gmra.mrb[60].mxu0 %v2809_v15  ;;  %1270 = vmatmul.mubr.bf16.gmra.mrb[60].mxu1 %v2810_v16 }
 0x11d   : > { %v1023_v17 = vpop.f32.mrb[0].mxu0  ;;  %v1151_v18 = vpop.f32.mrb[0].mxu1 }
 0x11e   : > { %v1025_v19 = vpop.f32.mrb[1].mxu0  ;;  %v1153_v20 = vpop.f32.mrb[1].mxu1  ;;  %1342 = vst [vmem:[#allocation2] sm:$0xff] %v1023_v17  ;;  %1374 = vst [vmem:[#allocation2 + $0x100] sm:$0xff] %v1151_v18 }
 0x11f   : > { %v1026_v21 = vpop.f32.mrb[2].mxu0  ;;  %v1154_v22 = vpop.f32.mrb[2].mxu1 }
 0x120   : > { %v1028_v23 = vpop.f32.mrb[3].mxu0  ;;  %v1156_v24 = vpop.f32.mrb[3].mxu1  ;;  %1343 = vst [vmem:[#allocation2 + $0x8] sm:$0xff] %v1026_v21  ;;  %1375 = vst [vmem:[#allocation2 + $0x108] sm:$0xff] %v1154_v22 }
 0x125   : > { %v1031_v25 = vpop.f32.mrb[4].mxu0  ;;  %v1159_v26 = vpop.f32.mrb[4].mxu1 }
 0x126   : > { %v1033_v27 = vpop.f32.mrb[5].mxu0  ;;  %v1161_v28 = vpop.f32.mrb[5].mxu1  ;;  %1344 = vst [vmem:[#allocation2 + $0x10] sm:$0xff] %v1031_v25  ;;  %1376 = vst [vmem:[#allocation2 + $0x110] sm:$0xff] %v1159_v26 }
 0x127   : > { %v1034_v29 = vpop.f32.mrb[6].mxu0  ;;  %v1162_v30 = vpop.f32.mrb[6].mxu1 }
 0x128   : > { %v1036_v31 = vpop.f32.mrb[7].mxu0  ;;  %v1164_v32 = vpop.f32.mrb[7].mxu1  ;;  %1345 = vst [vmem:[#allocation2 + $0x18] sm:$0xff] %v1034_v29  ;;  %1377 = vst [vmem:[#allocation2 + $0x118] sm:$0xff] %v1162_v30 }
 0x12d   : > { %v1039_v33 = vpop.f32.mrb[8].mxu0  ;;  %v1167_v34 = vpop.f32.mrb[8].mxu1 }
 0x12e   : > { %v1041_v35 = vpop.f32.mrb[9].mxu0  ;;  %v1169_v36 = vpop.f32.mrb[9].mxu1  ;;  %1346 = vst [vmem:[#allocation2 + $0x20] sm:$0xff] %v1039_v33  ;;  %1378 = vst [vmem:[#allocation2 + $0x120] sm:$0xff] %v1167_v34 }
 0x12f   : > { %v1042_v37 = vpop.f32.mrb[10].mxu0  ;;  %v1170_v38 = vpop.f32.mrb[10].mxu1 }
 0x130   : > { %v1044_v39 = vpop.f32.mrb[11].mxu0  ;;  %v1172_v40 = vpop.f32.mrb[11].mxu1  ;;  %1347 = vst [vmem:[#allocation2 + $0x28] sm:$0xff] %v1042_v37  ;;  %1379 = vst [vmem:[#allocation2 + $0x128] sm:$0xff] %v1170_v38 }
 0x135   : > { %v1047_v41 = vpop.f32.mrb[12].mxu0  ;;  %v1175_v42 = vpop.f32.mrb[12].mxu1 }
 0x136   : > { %v1049_v43 = vpop.f32.mrb[13].mxu0  ;;  %v1177_v44 = vpop.f32.mrb[13].mxu1  ;;  %1348 = vst [vmem:[#allocation2 + $0x30] sm:$0xff] %v1047_v41  ;;  %1380 = vst [vmem:[#allocation2 + $0x130] sm:$0xff] %v1175_v42 }
 0x137   : > { %v1050_v45 = vpop.f32.mrb[14].mxu0  ;;  %v1178_v46 = vpop.f32.mrb[14].mxu1 }
 0x138   : > { %v1052_v47 = vpop.f32.mrb[15].mxu0  ;;  %v1180_v48 = vpop.f32.mrb[15].mxu1  ;;  %1349 = vst [vmem:[#allocation2 + $0x38] sm:$0xff] %v1050_v45  ;;  %1381 = vst [vmem:[#allocation2 + $0x138] sm:$0xff] %v1178_v46 }
 0x13d   : > { %v1055_v49 = vpop.f32.mrb[16].mxu0  ;;  %v1183_v50 = vpop.f32.mrb[16].mxu1 }
 0x13e   : > { %v1057_v51 = vpop.f32.mrb[17].mxu0  ;;  %v1185_v52 = vpop.f32.mrb[17].mxu1  ;;  %1350 = vst [vmem:[#allocation2 + $0x40] sm:$0xff] %v1055_v49  ;;  %1382 = vst [vmem:[#allocation2 + $0x140] sm:$0xff] %v1183_v50 }
 0x13f   : > { %v1058_v53 = vpop.f32.mrb[18].mxu0  ;;  %v1186_v54 = vpop.f32.mrb[18].mxu1 }
 0x140   : > { %v1060_v55 = vpop.f32.mrb[19].mxu0  ;;  %v1188_v56 = vpop.f32.mrb[19].mxu1  ;;  %1351 = vst [vmem:[#allocation2 + $0x48] sm:$0xff] %v1058_v53  ;;  %1383 = vst [vmem:[#allocation2 + $0x148] sm:$0xff] %v1186_v54 }
 0x145   : > { %v1063_v57 = vpop.f32.mrb[20].mxu0  ;;  %v1191_v58 = vpop.f32.mrb[20].mxu1 }
 0x146   : > { %v1065_v59 = vpop.f32.mrb[21].mxu0  ;;  %v1193_v60 = vpop.f32.mrb[21].mxu1  ;;  %1352 = vst [vmem:[#allocation2 + $0x50] sm:$0xff] %v1063_v57  ;;  %1384 = vst [vmem:[#allocation2 + $0x150] sm:$0xff] %v1191_v58 }
 0x147   : > { %v1066_v61 = vpop.f32.mrb[22].mxu0  ;;  %v1194_v62 = vpop.f32.mrb[22].mxu1 }
 0x148   : > { %v1068_v63 = vpop.f32.mrb[23].mxu0  ;;  %v1196_v0 = vpop.f32.mrb[23].mxu1  ;;  %1353 = vst [vmem:[#allocation2 + $0x58] sm:$0xff] %v1066_v61  ;;  %1385 = vst [vmem:[#allocation2 + $0x158] sm:$0xff] %v1194_v62 }
 0x14d   : > { %v1071_v1 = vpop.f32.mrb[24].mxu0  ;;  %v1199_v2 = vpop.f32.mrb[24].mxu1 }
 0x14e   : > { %v1073_v3 = vpop.f32.mrb[25].mxu0  ;;  %v1201_v4 = vpop.f32.mrb[25].mxu1  ;;  %1354 = vst [vmem:[#allocation2 + $0x60] sm:$0xff] %v1071_v1  ;;  %1386 = vst [vmem:[#allocation2 + $0x160] sm:$0xff] %v1199_v2 }
 0x14f   : > { %v1074_v5 = vpop.f32.mrb[26].mxu0  ;;  %v1202_v6 = vpop.f32.mrb[26].mxu1 }
 0x150   : > { %v1076_v7 = vpop.f32.mrb[27].mxu0  ;;  %v1204_v8 = vpop.f32.mrb[27].mxu1  ;;  %1355 = vst [vmem:[#allocation2 + $0x68] sm:$0xff] %v1074_v5  ;;  %1387 = vst [vmem:[#allocation2 + $0x168] sm:$0xff] %v1202_v6 }
 0x155   : > { %v1079_v9 = vpop.f32.mrb[28].mxu0  ;;  %v1207_v10 = vpop.f32.mrb[28].mxu1 }
 0x156   : > { %v1081_v11 = vpop.f32.mrb[29].mxu0  ;;  %v1209_v12 = vpop.f32.mrb[29].mxu1  ;;  %1356 = vst [vmem:[#allocation2 + $0x70] sm:$0xff] %v1079_v9  ;;  %1388 = vst [vmem:[#allocation2 + $0x170] sm:$0xff] %v1207_v10 }
 0x157   : > { %v1082_v13 = vpop.f32.mrb[30].mxu0  ;;  %v1210_v14 = vpop.f32.mrb[30].mxu1 }
 0x158   : > { %v1084_v15 = vpop.f32.mrb[31].mxu0  ;;  %v1212_v16 = vpop.f32.mrb[31].mxu1  ;;  %1357 = vst [vmem:[#allocation2 + $0x78] sm:$0xff] %v1082_v13  ;;  %1389 = vst [vmem:[#allocation2 + $0x178] sm:$0xff] %v1210_v14 }
 0x15d   : > { %v1087_v17 = vpop.f32.mrb[32].mxu0  ;;  %v1215_v18 = vpop.f32.mrb[32].mxu1 }
 0x15e   : > { %v1089_v19 = vpop.f32.mrb[33].mxu0  ;;  %v1217_v20 = vpop.f32.mrb[33].mxu1  ;;  %1358 = vst [vmem:[#allocation2 + $0x80] sm:$0xff] %v1087_v17  ;;  %1390 = vst [vmem:[#allocation2 + $0x180] sm:$0xff] %v1215_v18  ;;  %v2852_v17 = vmov (%p1406_p7), 0.0  }
 0x15f   : > { %v1090_v21 = vpop.f32.mrb[34].mxu0  ;;  %v1218_v22 = vpop.f32.mrb[34].mxu1  ;;  %1411 = vst [vmem:[%s2927_s6] sm:$0x1] (%p1406_p7), %v2852_v17  ;;  %1412 = vst [vmem:[%s2934_s10] sm:$0x1] (%p1406_p7), %v2852_v17 }
 0x160   : > { %v1092_v23 = vpop.f32.mrb[35].mxu0  ;;  %v1220_v24 = vpop.f32.mrb[35].mxu1  ;;  %1359 = vst [vmem:[#allocation2 + $0x88] sm:$0xff] %v1090_v21  ;;  %1391 = vst [vmem:[#allocation2 + $0x188] sm:$0xff] %v1218_v22 }
 0x165   : > { %v1095_v25 = vpop.f32.mrb[36].mxu0  ;;  %v1223_v26 = vpop.f32.mrb[36].mxu1 }
 0x166   : > { %v1097_v27 = vpop.f32.mrb[37].mxu0  ;;  %v1225_v28 = vpop.f32.mrb[37].mxu1  ;;  %1360 = vst [vmem:[#allocation2 + $0x90] sm:$0xff] %v1095_v25  ;;  %1392 = vst [vmem:[#allocation2 + $0x190] sm:$0xff] %v1223_v26 }
 0x167   : > { %v1098_v29 = vpop.f32.mrb[38].mxu0  ;;  %v1226_v30 = vpop.f32.mrb[38].mxu1 }
 0x168   : > { %v1100_v31 = vpop.f32.mrb[39].mxu0  ;;  %v1228_v32 = vpop.f32.mrb[39].mxu1  ;;  %1361 = vst [vmem:[#allocation2 + $0x98] sm:$0xff] %v1098_v29  ;;  %1393 = vst [vmem:[#allocation2 + $0x198] sm:$0xff] %v1226_v30 }
 0x16d   : > { %v1103_v33 = vpop.f32.mrb[40].mxu0  ;;  %v1231_v34 = vpop.f32.mrb[40].mxu1 }
 0x16e   : > { %v1105_v35 = vpop.f32.mrb[41].mxu0  ;;  %v1233_v36 = vpop.f32.mrb[41].mxu1  ;;  %1362 = vst [vmem:[#allocation2 + $0xa0] sm:$0xff] %v1103_v33  ;;  %1394 = vst [vmem:[#allocation2 + $0x1a0] sm:$0xff] %v1231_v34 }
 0x16f   : > { %v1106_v37 = vpop.f32.mrb[42].mxu0  ;;  %v1234_v38 = vpop.f32.mrb[42].mxu1 }
 0x170   : > { %v1108_v39 = vpop.f32.mrb[43].mxu0  ;;  %v1236_v40 = vpop.f32.mrb[43].mxu1  ;;  %1363 = vst [vmem:[#allocation2 + $0xa8] sm:$0xff] %v1106_v37  ;;  %1395 = vst [vmem:[#allocation2 + $0x1a8] sm:$0xff] %v1234_v38 }
 0x175   : > { %v1111_v41 = vpop.f32.mrb[44].mxu0  ;;  %v1239_v42 = vpop.f32.mrb[44].mxu1 }
 0x176   : > { %v1113_v43 = vpop.f32.mrb[45].mxu0  ;;  %v1241_v44 = vpop.f32.mrb[45].mxu1  ;;  %1364 = vst [vmem:[#allocation2 + $0xb0] sm:$0xff] %v1111_v41  ;;  %1396 = vst [vmem:[#allocation2 + $0x1b0] sm:$0xff] %v1239_v42 }
 0x177   : > { %v1114_v45 = vpop.f32.mrb[46].mxu0  ;;  %v1242_v46 = vpop.f32.mrb[46].mxu1 }
 0x178   : > { %v1116_v47 = vpop.f32.mrb[47].mxu0  ;;  %v1244_v48 = vpop.f32.mrb[47].mxu1  ;;  %1365 = vst [vmem:[#allocation2 + $0xb8] sm:$0xff] %v1114_v45  ;;  %1397 = vst [vmem:[#allocation2 + $0x1b8] sm:$0xff] %v1242_v46 }
 0x17d   : > { %v1119_v49 = vpop.f32.mrb[48].mxu0  ;;  %v1247_v50 = vpop.f32.mrb[48].mxu1 }
 0x17e   : > { %v1121_v51 = vpop.f32.mrb[49].mxu0  ;;  %v1249_v52 = vpop.f32.mrb[49].mxu1  ;;  %1366 = vst [vmem:[#allocation2 + $0xc0] sm:$0xff] %v1119_v49  ;;  %1398 = vst [vmem:[#allocation2 + $0x1c0] sm:$0xff] %v1247_v50 }
 0x17f   : > { %v1122_v53 = vpop.f32.mrb[50].mxu0  ;;  %v1250_v54 = vpop.f32.mrb[50].mxu1 }
 0x180   : > { %v1124_v55 = vpop.f32.mrb[51].mxu0  ;;  %v1252_v56 = vpop.f32.mrb[51].mxu1  ;;  %1367 = vst [vmem:[#allocation2 + $0xc8] sm:$0xff] %v1122_v53  ;;  %1399 = vst [vmem:[#allocation2 + $0x1c8] sm:$0xff] %v1250_v54 }
 0x185   : > { %v1127_v57 = vpop.f32.mrb[52].mxu0  ;;  %v1255_v58 = vpop.f32.mrb[52].mxu1 }
 0x186   : > { %v1129_v59 = vpop.f32.mrb[53].mxu0  ;;  %v1257_v60 = vpop.f32.mrb[53].mxu1  ;;  %1368 = vst [vmem:[#allocation2 + $0xd0] sm:$0xff] %v1127_v57  ;;  %1400 = vst [vmem:[#allocation2 + $0x1d0] sm:$0xff] %v1255_v58 }
 0x187   : > { %v1130_v61 = vpop.f32.mrb[54].mxu0  ;;  %v1258_v62 = vpop.f32.mrb[54].mxu1 }
 0x188   : > { %v1132_v63 = vpop.f32.mrb[55].mxu0  ;;  %v1260_v0 = vpop.f32.mrb[55].mxu1  ;;  %1369 = vst [vmem:[#allocation2 + $0xd8] sm:$0xff] %v1130_v61  ;;  %1401 = vst [vmem:[#allocation2 + $0x1d8] sm:$0xff] %v1258_v62 }
 0x18d   : > { %v1135_v1 = vpop.f32.mrb[56].mxu0  ;;  %v1263_v2 = vpop.f32.mrb[56].mxu1 }
 0x18e   : > { %v1137_v3 = vpop.f32.mrb[57].mxu0  ;;  %v1265_v4 = vpop.f32.mrb[57].mxu1  ;;  %1370 = vst [vmem:[#allocation2 + $0xe0] sm:$0xff] %v1135_v1  ;;  %1402 = vst [vmem:[#allocation2 + $0x1e0] sm:$0xff] %v1263_v2 }
 0x18f   : > { %v1138_v5 = vpop.f32.mrb[58].mxu0  ;;  %v1266_v6 = vpop.f32.mrb[58].mxu1 }
 0x190   : > { %v1140_v7 = vpop.f32.mrb[59].mxu0  ;;  %v1268_v8 = vpop.f32.mrb[59].mxu1  ;;  %1371 = vst [vmem:[#allocation2 + $0xe8] sm:$0xff] %v1138_v5  ;;  %1403 = vst [vmem:[#allocation2 + $0x1e8] sm:$0xff] %v1266_v6 }
 0x192   : > { %1410 = sbr.rel (!%p1406_p7) target bundleno = 409 (0x199), region = 36 }
 0x195   : > { %v1143_v9 = vpop.f32.mrb[60].mxu0  ;;  %v1271_v10 = vpop.f32.mrb[60].mxu1 }
 0x196   : > { %v1145_v11 = vpop.f32.mrb[61].mxu0  ;;  %v1273_v12 = vpop.f32.mrb[61].mxu1  ;;  %1372 = vst [vmem:[#allocation2 + $0xf0] sm:$0xff] %v1143_v9  ;;  %1404 = vst [vmem:[#allocation2 + $0x1f0] sm:$0xff] %v1271_v10 }
 0x197   : > { %v1146_v13 = vpop.f32.mrb[62].mxu0  ;;  %v1274_v14 = vpop.f32.mrb[62].mxu1 }
 0x198   : > { %v1148_v15 = vpop.f32.mrb[63].mxu0  ;;  %v1276_v16 = vpop.f32.mrb[63].mxu1  ;;  %1373 = vst [vmem:[#allocation2 + $0xf8] sm:$0xff] %v1146_v13  ;;  %1405 = vst [vmem:[#allocation2 + $0x1f8] sm:$0xff] %v1274_v14 }
 0x199 PF: > { %v1416_v18 = vld [vmem:[#allocation2] sm:$0xff]  ;;  %v1417_v19 = vld [vmem:[#allocation2 + $0x8] sm:$0xff]  ;;  %v1418_v20 = vld [vmem:[#allocation2 + $0x10] sm:$0xff] }
 0x19a   : > { %v2436_v21 = vpack.c.bf16 %v1417_v19, %v1416_v18  ;;  %v1801_v22 = vadd.f32 %v1417_v19, %v1416_v18  ;;  %v1873_v23 = vmul.f32 %v1416_v18, %v1416_v18  ;;  %v1874_v24 = vmul.f32 %v1417_v19, %v1417_v19  ;;  %v1419_v25 = vld [vmem:[#allocation2 + $0x18] sm:$0xff]  ;;  %v1420_v26 = vld [vmem:[#allocation2 + $0x20] sm:$0xff]  ;;  %v1421_v27 = vld [vmem:[#allocation2 + $0x28] sm:$0xff] }
 0x19b   : > { %v2441_v28 = vpack.c.bf16 %v1419_v25, %v1418_v20  ;;  %v1875_v29 = vmul.f32 %v1418_v20, %v1418_v20  ;;  %v2446_v30 = vpack.c.bf16 %v1421_v27, %v1420_v26  ;;  %v1422_v31 = vld [vmem:[#allocation2 + $0x30] sm:$0xff]  ;;  %v1876_v34 = vmul.f32 %v1419_v25, %v1419_v25  ;;  %v1423_v35 = vld [vmem:[#allocation2 + $0x38] sm:$0xff]  ;;  %v3081_v36 = vld [vmem:[#allocation2 + $0x40] sm:$0xff] }
 0x19c   : > { %2437 = vst [vmem:[%s2944_s28] sm:$0xff] %v2436_v21   ;;  %v1937_v32 = vadd.f32 %v1874_v24, %v1873_v23  ;;  %v1802_v33 = vadd.f32 %v1801_v22, %v1418_v20  ;;  %v3083_v37 = vld [vmem:[#allocation2 + $0x48] sm:$0xff]  ;;  %v2451_v38 = vpack.c.bf16 %v1423_v35, %v1422_v31  ;;  %v3089_v40 = vld [vmem:[#allocation2 + $0x50] sm:$0xff]  ;;  %v1877_v43 = vmul.f32 %v1420_v26, %v1420_v26  ;;  %v3091_v44 = vld [vmem:[#allocation2 + $0x58] sm:$0xff] }
 0x19d   : > { %2593 = vst [vmem:[%s2944_s28 + $0x8] sm:$0xff] %v2441_v28   ;;  %2594 = vst [vmem:[%s2944_s28 + $0x10] sm:$0xff] %v2446_v30   ;;  %v2456_v39 = vpack.c.bf16 %v3083_v37, %v3081_v36  ;;  %v3093_v45 = vld [vmem:[#allocation2 + $0x60] sm:$0xff]  ;;  %v3095_v46 = vld [vmem:[#allocation2 + $0x68] sm:$0xff]  ;;  %v2461_v47 = vpack.c.bf16 %v3091_v44, %v3089_v40  ;;  %v1878_v52 = vmul.f32 %v1421_v27, %v1421_v27 }
 0x19e   : > { %v1803_v41 = vadd.f32 %v1802_v33, %v1419_v25  ;;  %v1938_v42 = vadd.f32 %v1937_v32, %v1875_v29  ;;  %2595 = vst [vmem:[%s2944_s28 + $0x18] sm:$0xff] %v2451_v38   ;;  %v2466_v48 = vpack.c.bf16 %v3095_v46, %v3093_v45  ;;  %v3103_v49 = vld [vmem:[#allocation2 + $0x70] sm:$0xff]  ;;  %v3105_v53 = vld [vmem:[#allocation2 + $0x78] sm:$0xff]  ;;  %v3107_v54 = vld [vmem:[#allocation2 + $0x80] sm:$0xff]  ;;  %v1879_v61 = vmul.f32 %v1422_v31, %v1422_v31 }
 0x19f   : > { %2596 = vst [vmem:[%s2944_s28 + $0x20] sm:$0xff] %v2456_v39   ;;  %v3109_v55 = vld [vmem:[#allocation2 + $0x88] sm:$0xff]  ;;  %2597 = vst [vmem:[%s2944_s28 + $0x28] sm:$0xff] %v2461_v47   ;;  %v2471_v56 = vpack.c.bf16 %v3105_v53, %v3103_v49  ;;  %v3117_v58 = vld [vmem:[#allocation2 + $0x90] sm:$0xff]  ;;  %v1880_v6 = vmul.f32 %v1423_v35, %v1423_v35  ;;  %v1881_v15 = vmul.f32 %v3081_v36, %v3081_v36 }
 0x1a0   : > { %v1939_v50 = vadd.f32 %v1938_v42, %v1876_v34  ;;  %v1804_v51 = vadd.f32 %v1803_v41, %v1420_v26  ;;  %2598 = vst [vmem:[%s2944_s28 + $0x30] sm:$0xff] %v2466_v48   ;;  %v2476_v57 = vpack.c.bf16 %v3109_v55, %v3107_v54  ;;  %v3119_v62 = vld [vmem:[#allocation2 + $0x98] sm:$0xff]  ;;  %v3121_v63 = vld [vmem:[#allocation2 + $0xa0] sm:$0xff]  ;;  %v3123_v0 = vld [vmem:[#allocation2 + $0xa8] sm:$0xff]  ;;  %v1882_v24 = vmul.f32 %v3083_v37, %v3083_v37 }
 0x1a1   : > { %2599 = vst [vmem:[%s2944_s28 + $0x38] sm:$0xff] %v2471_v56   ;;  %v2481_v1 = vpack.c.bf16 %v3119_v62, %v3117_v58  ;;  %v2486_v2 = vpack.c.bf16 %v3123_v0, %v3121_v63  ;;  %v3131_v3 = vld [vmem:[#allocation2 + $0xb0] sm:$0xff]  ;;  %v3133_v7 = vld [vmem:[#allocation2 + $0xb8] sm:$0xff]  ;;  %v3135_v8 = vld [vmem:[#allocation2 + $0xc0] sm:$0xff]  ;;  %v1883_v33 = vmul.f32 %v3089_v40, %v3089_v40 }
 0x1a2   : > { %v1805_v59 = vadd.f32 %v1804_v51, %v1421_v27  ;;  %v1940_v60 = vadd.f32 %v1939_v50, %v1877_v43  ;;  %2600 = vst [vmem:[%s2944_s28 + $0x40] sm:$0xff] %v2476_v57   ;;  %v3137_v9 = vld [vmem:[#allocation2 + $0xc8] sm:$0xff]  ;;  %v2491_v10 = vpack.c.bf16 %v3133_v7, %v3131_v3  ;;  %v3145_v12 = vld [vmem:[#allocation2 + $0xd0] sm:$0xff]  ;;  %v3149_v16 = vld [vmem:[#allocation2 + $0xd8] sm:$0xff]  ;;  %v1884_v43 = vmul.f32 %v3091_v44, %v3091_v44 }
 0x1a3   : > { %2601 = vst [vmem:[%s2944_s28 + $0x48] sm:$0xff] %v2481_v1   ;;  %2602 = vst [vmem:[%s2944_s28 + $0x50] sm:$0xff] %v2486_v2   ;;  %v2496_v11 = vpack.c.bf16 %v3137_v9, %v3135_v8  ;;  %v3151_v17 = vld [vmem:[#allocation2 + $0xe0] sm:$0xff]  ;;  %v3153_v18 = vld [vmem:[#allocation2 + $0xe8] sm:$0xff]  ;;  %v2501_v19 = vpack.c.bf16 %v3149_v16, %v3145_v12 }
 0x1a4   : > { %v1941_v4 = vadd.f32 %v1940_v60, %v1878_v52  ;;  %v1806_v5 = vadd.f32 %v1805_v59, %v1422_v31  ;;  %2603 = vst [vmem:[%s2944_s28 + $0x58] sm:$0xff] %v2491_v10   ;;  %v2506_v20 = vpack.c.bf16 %v3153_v18, %v3151_v17  ;;  %v3161_v21 = vld [vmem:[#allocation2 + $0xf0] sm:$0xff]  ;;  %v3166_v25 = vld [vmem:[#allocation2 + $0xf8] sm:$0xff]  ;;  %v3168_v26 = vld [vmem:[#allocation2 + $0x100] sm:$0xff]  ;;  %v1885_v59 = vmul.f32 %v3093_v45, %v3093_v45 }
 0x1a5   : > { %2604 = vst [vmem:[%s2944_s28 + $0x60] sm:$0xff] %v2496_v11   ;;  %v3170_v27 = vld [vmem:[#allocation2 + $0x108] sm:$0xff]  ;;  %2605 = vst [vmem:[%s2944_s28 + $0x68] sm:$0xff] %v2501_v19   ;;  %v2511_v28 = vpack.c.bf16 %v3166_v25, %v3161_v21  ;;  %v3178_v30 = vld [vmem:[#allocation2 + $0x110] sm:$0xff]  ;;  %v1886_v10 = vmul.f32 %v3095_v46, %v3095_v46 }
 0x1a6   : > { %v1807_v13 = vadd.f32 %v1806_v5, %v1423_v35  ;;  %v1942_v14 = vadd.f32 %v1941_v4, %v1879_v61  ;;  %2606 = vst [vmem:[%s2944_s28 + $0x70] sm:$0xff] %v2506_v20   ;;  %v2516_v29 = vpack.c.bf16 %v3170_v27, %v3168_v26  ;;  %v3183_v34 = vld [vmem:[#allocation2 + $0x118] sm:$0xff]  ;;  %v3185_v35 = vld [vmem:[#allocation2 + $0x120] sm:$0xff]  ;;  %v3195_v39 = vld [vmem:[#allocation2 + $0x130] sm:$0xff] }
 0x1a7   : > { %2607 = vst [vmem:[%s2944_s28 + $0x78] sm:$0xff] %v2511_v28   ;;  %v2521_v38 = vpack.c.bf16 %v3183_v34, %v3178_v30  ;;  %v3200_v47 = vld [vmem:[#allocation2 + $0x138] sm:$0xff]  ;;  %v3202_v48 = vld [vmem:[#allocation2 + $0x140] sm:$0xff]  ;;  %v3204_v50 = vld [vmem:[#allocation2 + $0x148] sm:$0xff] }
 0x1a8   : > { %v1943_v22 = vadd.f32 %v1942_v14, %v1880_v6  ;;  %v1808_v23 = vadd.f32 %v1807_v13, %v3081_v36  ;;  %v3187_v36 = vld [vmem:[#allocation2 + $0x128] sm:$0xff]  ;;  %2608 = vst [vmem:[%s2944_s28 + $0x80] sm:$0xff] %v2516_v29   ;;  %v2531_v51 = vpack.c.bf16 %v3200_v47, %v3195_v39  ;;  %v2536_v52 = vpack.c.bf16 %v3204_v50, %v3202_v48  ;;  %v3217_v60 = vld [vmem:[#allocation2 + $0x158] sm:$0xff]  ;;  %v3219_v61 = vld [vmem:[#allocation2 + $0x160] sm:$0xff] }
 0x1a9   : > { %2609 = vst [vmem:[%s2944_s28 + $0x88] sm:$0xff] %v2521_v38   ;;  %v3221_v1 = vld [vmem:[#allocation2 + $0x168] sm:$0xff]  ;;  %v3229_v4 = vld [vmem:[#allocation2 + $0x170] sm:$0xff]  ;;  %v3234_v11 = vld [vmem:[#allocation2 + $0x178] sm:$0xff] }
 0x1aa   : > { %v1809_v31 = vadd.f32 %v1808_v23, %v3083_v37  ;;  %v1944_v32 = vadd.f32 %v1943_v22, %v1881_v15  ;;  %v2526_v37 = vpack.c.bf16 %v3187_v36, %v3185_v35  ;;  %2611 = vst [vmem:[%s2944_s28 + $0x98] sm:$0xff] %v2531_v51   ;;  %2612 = vst [vmem:[%s2944_s28 + $0xa0] sm:$0xff] %v2536_v52   ;;  %v3236_v13 = vld [vmem:[#allocation2 + $0x180] sm:$0xff]  ;;  %v3238_v14 = vld [vmem:[#allocation2 + $0x188] sm:$0xff] }
 0x1ab   : > { %v2551_v15 = vpack.c.bf16 %v3234_v11, %v3229_v4  ;;  %v2556_v19 = vpack.c.bf16 %v3238_v14, %v3236_v13  ;;  %v1887_v23 = vmul.f32 %v3103_v49, %v3103_v49  ;;  %v3253_v28 = vld [vmem:[#allocation2 + $0x1a0] sm:$0xff]  ;;  %v3255_v29 = vld [vmem:[#allocation2 + $0x1a8] sm:$0xff] }
 0x1ac   : > { %v1945_v41 = vadd.f32 %v1944_v32, %v1882_v24  ;;  %v1810_v42 = vadd.f32 %v1809_v31, %v3089_v40  ;;  %2610 = vst [vmem:[%s2944_s28 + $0x90] sm:$0xff] %v2526_v37   ;;  %v3212_v40 = vld [vmem:[#allocation2 + $0x150] sm:$0xff]  ;;  %v3251_v24 = vld [vmem:[#allocation2 + $0x198] sm:$0xff]  ;;  %v1888_v37 = vmul.f32 %v3105_v53, %v3105_v53 }
 0x1ad   : > { %v2541_v2 = vpack.c.bf16 %v3217_v60, %v3212_v40  ;;  %2615 = vst [vmem:[%s2944_s28 + $0xb8] sm:$0xff] %v2551_v15   ;;  %2616 = vst [vmem:[%s2944_s28 + $0xc0] sm:$0xff] %v2556_v19   ;;  %v3263_v32 = vld [vmem:[#allocation2 + $0x1b0] sm:$0xff]  ;;  %v1890_v19 = vmul.f32 %v3109_v55, %v3109_v55 }
 0x1ae   : > { %v1811_v56 = vadd.f32 %v1810_v42, %v3091_v44  ;;  %v1946_v57 = vadd.f32 %v1945_v41, %v1883_v33  ;;  %v2546_v44 = vpack.c.bf16 %v3221_v1, %v3219_v61  ;;  %v3268_v41 = vld [vmem:[#allocation2 + $0x1b8] sm:$0xff]  ;;  %v3270_v42 = vld [vmem:[#allocation2 + $0x1c0] sm:$0xff] }
 0x1af   : > { %2613 = vst [vmem:[%s2944_s28 + $0xa8] sm:$0xff] %v2541_v2   ;;  %v2571_v51 = vpack.c.bf16 %v3268_v41, %v3263_v32  ;;  %v3285_v2 = vld [vmem:[#allocation2 + $0x1d8] sm:$0xff] }
 0x1b0   : > { %v1947_v5 = vadd.f32 %v1946_v57, %v1884_v43  ;;  %v1812_v6 = vadd.f32 %v1811_v56, %v3093_v45  ;;  %2614 = vst [vmem:[%s2944_s28 + $0xb0] sm:$0xff] %v2546_v44   ;;  %v3246_v45 = vld [vmem:[#allocation2 + $0x190] sm:$0xff]  ;;  %v3272_v43 = vld [vmem:[#allocation2 + $0x1c8] sm:$0xff]  ;;  %v3287_v44 = vld [vmem:[#allocation2 + $0x1e0] sm:$0xff] }
 0x1b1   : > { %v2561_v31 = vpack.c.bf16 %v3251_v24, %v3246_v45  ;;  %v2576_v52 = vpack.c.bf16 %v3272_v43, %v3270_v42  ;;  %2619 = vst [vmem:[%s2944_s28 + $0xd8] sm:$0xff] %v2571_v51  }
 0x1b2   : > { %v1813_v20 = vadd.f32 %v1812_v6, %v3095_v46  ;;  %v1948_v22 = vadd.f32 %v1947_v5, %v1885_v59  ;;  %v2566_v46 = vpack.c.bf16 %v3255_v29, %v3253_v28  ;;  %v1889_v59 = vmul.f32 %v3107_v54, %v3107_v54  ;;  %v3289_v5 = vld [vmem:[#allocation2 + $0x1e8] sm:$0xff] }
 0x1b3   : > { %2617 = vst [vmem:[%s2944_s28 + $0xc8] sm:$0xff] %v2561_v31   ;;  %2620 = vst [vmem:[%s2944_s28 + $0xe0] sm:$0xff] %v2576_v52  }
 0x1b4   : > { %v1949_v33 = vadd.f32 %v1948_v22, %v1886_v10  ;;  %v1814_v38 = vadd.f32 %v1813_v20, %v3103_v49  ;;  %2618 = vst [vmem:[%s2944_s28 + $0xd0] sm:$0xff] %v2566_v46   ;;  %v3280_v49 = vld [vmem:[#allocation2 + $0x1d0] sm:$0xff]  ;;  %v3302_v22 = vld [vmem:[#allocation2 + $0x1f8] sm:$0xff] }
 0x1b5   : > { %v2581_v6 = vpack.c.bf16 %v3285_v2, %v3280_v49  ;;  %v3300_v20 = vld [vmem:[#allocation2 + $0x1f0] sm:$0xff] }
 0x1b6   : > { %v1815_v56 = vadd.f32 %v1814_v38, %v3105_v53  ;;  %v1950_v57 = vadd.f32 %v1949_v33, %v1887_v23  ;;  %v2586_v53 = vpack.c.bf16 %v3289_v5, %v3287_v44  ;;  %v2591_v23 = vpack.c.bf16 %v3302_v22, %v3300_v20 }
 0x1b7   : > { %2621 = vst [vmem:[%s2944_s28 + $0xe8] sm:$0xff] %v2581_v6   ;;  %v1891_v33 = vmul.f32 %v3117_v58, %v3117_v58 }
 0x1b8   : > { %v1951_v10 = vadd.f32 %v1950_v57, %v1888_v37  ;;  %v1816_v15 = vadd.f32 %v1815_v56, %v3107_v54  ;;  %2622 = vst [vmem:[%s2944_s28 + $0xf0] sm:$0xff] %v2586_v53   ;;  %2623 = vst [vmem:[%s2944_s28 + $0xf8] sm:$0xff] %v2591_v23   ;;  %v1892_v37 = vmul.f32 %v3119_v62, %v3119_v62 }
 0x1b9   : > { %v1893_v56 = vmul.f32 %v3121_v63, %v3121_v63 }
 0x1ba   : > { %v1817_v31 = vadd.f32 %v1816_v15, %v3109_v55  ;;  %v1952_v46 = vadd.f32 %v1951_v10, %v1889_v59  ;;  %v1894_v59 = vmul.f32 %v3123_v0, %v3123_v0 }
 0x1bc   : > { %v1953_v54 = vadd.f32 %v1952_v46, %v1890_v19  ;;  %v1818_v38 = vadd.f32 %v1817_v31, %v3117_v58  ;;  %v1895_v58 = vmul.f32 %v3131_v3, %v3131_v3 }
 0x1be   : > { %v1819_v51 = vadd.f32 %v1818_v38, %v3119_v62  ;;  %v1954_v52 = vadd.f32 %v1953_v54, %v1891_v33  ;;  %v1896_v62 = vmul.f32 %v3133_v7, %v3133_v7 }
 0x1c0   : > { %v1955_v57 = vadd.f32 %v1954_v52, %v1892_v37  ;;  %v1820_v55 = vadd.f32 %v1819_v51, %v3121_v63  ;;  %v1897_v63 = vmul.f32 %v3135_v8, %v3135_v8 }
 0x1c2   : > { %v1821_v6 = vadd.f32 %v1820_v55, %v3123_v0  ;;  %v1956_v53 = vadd.f32 %v1955_v57, %v1893_v56  ;;  %v1898_v0 = vmul.f32 %v3137_v9, %v3137_v9 }
 0x1c4   : > { %v1957_v10 = vadd.f32 %v1956_v53, %v1894_v59  ;;  %v1822_v15 = vadd.f32 %v1821_v6, %v3131_v3  ;;  %v1899_v3 = vmul.f32 %v3145_v12, %v3145_v12 }
 0x1c6   : > { %v1823_v19 = vadd.f32 %v1822_v15, %v3133_v7  ;;  %v1958_v23 = vadd.f32 %v1957_v10, %v1895_v58  ;;  %v1900_v7 = vmul.f32 %v3149_v16, %v3149_v16 }
 0x1c8   : > { %v1959_v31 = vadd.f32 %v1958_v23, %v1896_v62  ;;  %v1824_v46 = vadd.f32 %v1823_v19, %v3135_v8  ;;  %v1901_v8 = vmul.f32 %v3151_v17, %v3151_v17 }
 0x1ca   : > { %v1825_v33 = vadd.f32 %v1824_v46, %v3137_v9  ;;  %v1960_v54 = vadd.f32 %v1959_v31, %v1897_v63  ;;  %v1902_v9 = vmul.f32 %v3153_v18, %v3153_v18 }
 0x1cc   : > { %v1961_v38 = vadd.f32 %v1960_v54, %v1898_v0  ;;  %v1826_v37 = vadd.f32 %v1825_v33, %v3145_v12  ;;  %v1903_v12 = vmul.f32 %v3161_v21, %v3161_v21 }
 0x1ce   : > { %v1827_v51 = vadd.f32 %v1826_v37, %v3149_v16  ;;  %v1962_v52 = vadd.f32 %v1961_v38, %v1899_v3  ;;  %v1904_v16 = vmul.f32 %v3166_v25, %v3166_v25 }
 0x1d0   : > { %v1963_v56 = vadd.f32 %v1962_v52, %v1900_v7  ;;  %v1828_v57 = vadd.f32 %v1827_v51, %v3151_v17  ;;  %v1905_v17 = vmul.f32 %v3168_v26, %v3168_v26 }
 0x1d2   : > { %v1829_v55 = vadd.f32 %v1828_v57, %v3153_v18  ;;  %v1964_v59 = vadd.f32 %v1963_v56, %v1901_v8  ;;  %v1906_v18 = vmul.f32 %v3170_v27, %v3170_v27 }
 0x1d4   : > { %v1965_v6 = vadd.f32 %v1964_v59, %v1902_v9  ;;  %v1830_v53 = vadd.f32 %v1829_v55, %v3161_v21  ;;  %v1907_v21 = vmul.f32 %v3178_v30, %v3178_v30 }
 0x1d6   : > { %v1831_v58 = vadd.f32 %v1830_v53, %v3166_v25  ;;  %v1966_v10 = vadd.f32 %v1965_v6, %v1903_v12  ;;  %v1908_v25 = vmul.f32 %v3183_v34, %v3183_v34 }
 0x1d8   : > { %v1967_v15 = vadd.f32 %v1966_v10, %v1904_v16  ;;  %v1832_v62 = vadd.f32 %v1831_v58, %v3168_v26  ;;  %v1909_v26 = vmul.f32 %v3185_v35, %v3185_v35 }
 0x1da   : > { %v1833_v19 = vadd.f32 %v1832_v62, %v3170_v27  ;;  %v1968_v23 = vadd.f32 %v1967_v15, %v1905_v17  ;;  %v1910_v27 = vmul.f32 %v3187_v36, %v3187_v36 }
 0x1dc   : > { %v1969_v63 = vadd.f32 %v1968_v23, %v1906_v18  ;;  %v1834_v31 = vadd.f32 %v1833_v19, %v3178_v30  ;;  %v1911_v30 = vmul.f32 %v3195_v39, %v3195_v39 }
 0x1de   : > { %v1835_v46 = vadd.f32 %v1834_v31, %v3183_v34  ;;  %v1970_v0 = vadd.f32 %v1969_v63, %v1907_v21  ;;  %v1912_v34 = vmul.f32 %v3200_v47, %v3200_v47 }
 0x1e0   : > { %v1971_v33 = vadd.f32 %v1970_v0, %v1908_v25  ;;  %v1836_v54 = vadd.f32 %v1835_v46, %v3185_v35  ;;  %v1913_v35 = vmul.f32 %v3202_v48, %v3202_v48 }
 0x1e2   : > { %v1837_v3 = vadd.f32 %v1836_v54, %v3187_v36  ;;  %v1972_v38 = vadd.f32 %v1971_v33, %v1909_v26  ;;  %v1914_v36 = vmul.f32 %v3204_v50, %v3204_v50 }
 0x1e4   : > { %v1973_v37 = vadd.f32 %v1972_v38, %v1910_v27  ;;  %v1838_v7 = vadd.f32 %v1837_v3, %v3195_v39  ;;  %v1915_v39 = vmul.f32 %v3212_v40, %v3212_v40 }
 0x1e6   : > { %v1839_v51 = vadd.f32 %v1838_v7, %v3200_v47  ;;  %v1974_v52 = vadd.f32 %v1973_v37, %v1911_v30  ;;  %v1916_v47 = vmul.f32 %v3217_v60, %v3217_v60 }
 0x1e8   : > { %v1975_v8 = vadd.f32 %v1974_v52, %v1912_v34  ;;  %v1840_v56 = vadd.f32 %v1839_v51, %v3202_v48  ;;  %v1917_v48 = vmul.f32 %v3219_v61, %v3219_v61 }
 0x1ea   : > { %v1841_v57 = vadd.f32 %v1840_v56, %v3204_v50  ;;  %v1976_v9 = vadd.f32 %v1975_v8, %v1913_v35  ;;  %v1918_v50 = vmul.f32 %v3221_v1, %v3221_v1 }
 0x1ec   : > { %v1977_v55 = vadd.f32 %v1976_v9, %v1914_v36  ;;  %v1842_v59 = vadd.f32 %v1841_v57, %v3212_v40  ;;  %v1919_v40 = vmul.f32 %v3229_v4, %v3229_v4 }
 0x1ee   : > { %v1843_v12 = vadd.f32 %v1842_v59, %v3217_v60  ;;  %v1978_v6 = vadd.f32 %v1977_v55, %v1915_v39  ;;  %v1920_v60 = vmul.f32 %v3234_v11, %v3234_v11 }
 0x1f0   : > { %v1979_v53 = vadd.f32 %v1978_v6, %v1916_v47  ;;  %v1844_v16 = vadd.f32 %v1843_v12, %v3219_v61  ;;  %v1921_v61 = vmul.f32 %v3236_v13, %v3236_v13  ;;  %v1936_v47 = vmul.f32 %v3302_v22, %v3302_v22 }
 0x1f2   : > { %v1845_v58 = vadd.f32 %v1844_v16, %v3221_v1  ;;  %v1980_v10 = vadd.f32 %v1979_v53, %v1917_v48  ;;  %v1922_v1 = vmul.f32 %v3238_v14, %v3238_v14 }
 0x1f4   : > { %v1981_v17 = vadd.f32 %v1980_v10, %v1918_v50  ;;  %v1846_v15 = vadd.f32 %v1845_v58, %v3229_v4  ;;  %v1923_v4 = vmul.f32 %v3246_v45, %v3246_v45 }
 0x1f6   : > { %v1847_v62 = vadd.f32 %v1846_v15, %v3234_v11  ;;  %v1982_v18 = vadd.f32 %v1981_v17, %v1919_v40  ;;  %v1924_v11 = vmul.f32 %v3251_v24, %v3251_v24 }
 0x1f8   : > { %v1983_v19 = vadd.f32 %v1982_v18, %v1920_v60  ;;  %v1848_v23 = vadd.f32 %v1847_v62, %v3236_v13  ;;  %v1925_v13 = vmul.f32 %v3253_v28, %v3253_v28  ;;  %v1872_v62 = vld [vmem:[%s2934_s10] sm:$0x1] }
 0x1fa   : > { %v1849_v21 = vadd.f32 %v1848_v23, %v3238_v14  ;;  %v1984_v63 = vadd.f32 %v1983_v19, %v1921_v61  ;;  %v1926_v14 = vmul.f32 %v3255_v29, %v3255_v29 }
 0x1fc   : > { %v1985_v31 = vadd.f32 %v1984_v63, %v1922_v1  ;;  %v1850_v25 = vadd.f32 %v1849_v21, %v3246_v45  ;;  %v1927_v45 = vmul.f32 %v3263_v32, %v3263_v32 }
 0x1fe   : > { %v1851_v46 = vadd.f32 %v1850_v25, %v3251_v24  ;;  %v1986_v0 = vadd.f32 %v1985_v31, %v1923_v4  ;;  %v1928_v24 = vmul.f32 %v3268_v41, %v3268_v41 }
 0x200   : > { %v1987_v26 = vadd.f32 %v1986_v0, %v1924_v11  ;;  %v1852_v33 = vadd.f32 %v1851_v46, %v3253_v28  ;;  %v1929_v28 = vmul.f32 %v3270_v42, %v3270_v42 }
 0x202   : > { %v1853_v54 = vadd.f32 %v1852_v33, %v3255_v29  ;;  %v1988_v27 = vadd.f32 %v1987_v26, %v1925_v13  ;;  %v1930_v29 = vmul.f32 %v3272_v43, %v3272_v43 }
 0x204   : > { %v1989_v3 = vadd.f32 %v1988_v27, %v1926_v14  ;;  %v1854_v38 = vadd.f32 %v1853_v54, %v3263_v32  ;;  %v1931_v32 = vmul.f32 %v3280_v49, %v3280_v49 }
 0x206   : > { %v1855_v30 = vadd.f32 %v1854_v38, %v3268_v41  ;;  %v1990_v37 = vadd.f32 %v1989_v3, %v1927_v45  ;;  %v1932_v41 = vmul.f32 %v3285_v2, %v3285_v2 }
 0x208   : > { %v1991_v7 = vadd.f32 %v1990_v37, %v1928_v24  ;;  %v1856_v34 = vadd.f32 %v1855_v30, %v3270_v42  ;;  %v1933_v42 = vmul.f32 %v3287_v44, %v3287_v44 }
 0x20a   : > { %v1857_v51 = vadd.f32 %v1856_v34, %v3272_v43  ;;  %v1992_v52 = vadd.f32 %v1991_v7, %v1929_v28  ;;  %v1934_v43 = vmul.f32 %v3289_v5, %v3289_v5 }
 0x20c   : > { %v1993_v35 = vadd.f32 %v1992_v52, %v1930_v29  ;;  %v1858_v8 = vadd.f32 %v1857_v51, %v3280_v49  ;;  %v1935_v49 = vmul.f32 %v3300_v20, %v3300_v20 }
 0x20e   : > { %v1859_v56 = vadd.f32 %v1858_v8, %v3285_v2  ;;  %v1994_v36 = vadd.f32 %v1993_v35, %v1931_v32 }
 0x210   : > { %v1995_v57 = vadd.f32 %v1994_v36, %v1932_v41  ;;  %v1860_v9 = vadd.f32 %v1859_v56, %v3287_v44 }
 0x212   : > { %v1861_v39 = vadd.f32 %v1860_v9, %v3289_v5  ;;  %v1996_v55 = vadd.f32 %v1995_v57, %v1933_v42 }
 0x214   : > { %v1997_v59 = vadd.f32 %v1996_v55, %v1934_v43  ;;  %v1862_v2 = vadd.f32 %v1861_v39, %v3300_v20  ;;  %v1800_v20 = vld [vmem:[%s2927_s6] sm:$0x1] }
 0x216   : > { %v1863_v12 = vadd.f32 %v1862_v2, %v3302_v22  ;;  %v1998_v44 = vadd.f32 %v1997_v59, %v1935_v49 }
 0x218   : > { %v1864_v6 = vrot.slane %v1863_v12, 4  ;;  %v1999_v48 = vadd.f32 %v1998_v44, %v1936_v47 }
 0x21a   : > { %v1865_v53 = vadd.f32 %v1864_v6, %v1863_v12  ;;  %v2000_v5 = vrot.slane %v1999_v48, 4 }
 0x21c   : > { %v1866_v16 = vrot.slane %v1865_v53, 2  ;;  %v2001_v50 = vadd.f32 %v2000_v5, %v1999_v48 }
 0x21e   : > { %v1867_v58 = vadd.f32 %v1866_v16, %v1865_v53  ;;  %v2002_v10 = vrot.slane %v2001_v50, 2 }
 0x220   : > { %v1868_v40 = vrot.slane %v1867_v58, 1  ;;  %v2003_v17 = vadd.f32 %v2002_v10, %v2001_v50 }
 0x222   : > { %v1869_v15 = vadd.f32 %v1868_v40, %v1867_v58  ;;  %v2004_v60 = vrot.slane %v2003_v17, 1 }
 0x224   : > { %v1870_v18 = vadd.f32 %v1869_v15, %v1800_v20  ;;  %v2005_v61 = vadd.f32 %v2004_v60, %v2003_v17 }
 0x226   : > { %1871 = vst [vmem:[%s2927_s6] sm:$0x1] %v1870_v18  ;;  %v2006_v22 = vadd.f32 %v2005_v61, %v1872_v62 }
 0x228   : > { %2007 = vst [vmem:[%s2934_s10] sm:$0x1] %v2006_v22 }
 0x229 PF: > { %s15_s19 = sadd.s32 1, %s2849_s19   ;;  %s3472_s15 = smov %s2841_s17 }
 0x22a   : > { %p12_p8 = scmp.ge.s32.totalorder %s15_s19, 6   ;;  %s3473_s16 = smov %s2845_s18 }
 0x22b   : > { %s3474_s17 = smov %s3477_s20  ;;  %s3475_s18 = smov %s3481_s21 }
 0x22c   :  { %14 = sbr.rel (!%p12_p8) target bundleno = 3 (0x3), region = 97 }

// kernel: generator_hd_forward.58
= control target key start
LH: loop header
LB: loop body
LE: loop exit
PB: predicated region body
PF: predicated region fallthrough
CT: control target
= control target key end

     0   :  { %s1075_s12 = smov 0   ;;  %s1077_s13 = smov 0   ;;  %s1306_s0 = inlined_call_operand.vmem [shape: bf16[2,256,128], index: 0, kind: input, shape index: {}]   ;;  %s1307_s1 = inlined_call_operand.vmem [shape: f32[2,1,128], index: 1, kind: input, shape index: {}]   ;;  %s1308_s2 = inlined_call_operand.vmem [shape: f32[2,1,128], index: 2, kind: input, shape index: {}]   ;;  %s1309_s3 = inlined_call_operand.vmem [shape: bf16[2,256,128], index: 3, kind: output, shape index: {}]  }
   0x1   :  { %s1079_s14 = smov 0  }
   0x2 LB: > { %s32_s15 = sadd.s32 1, %s1049_s13  ;;  %p758_p0 = scmp.ge.s32.totalorder %s1053_s14, 1  ;;  %s1053_s14 = sphi %s1079_s14, %s13_s14   ;;  %s1049_s13 = sphi %s1077_s13, %s1311_s13   ;;  %s1045_s12 = sphi %s1075_s12, %s1310_s12  }
   0x3   : > { %p34_p1 = scmp.ge.s32.totalorder %s32_s15, 2  ;;  %p198_p2 = scmp.lt.s32.totalorder %s1053_s14, 3 }
   0x5   : > { %s1313_s15 = smov (%p34_p1, %s32_s15), 0  ;;  %p199_p3 = pnand %p758_p0, %p198_p2 }
   0x6   : > { %p249_p4 = scmp.lt.s32.totalorder (!%p199_p3), %s1045_s12, 1  ;;  %v358_v0 = vlaneseq (!%p199_p3) }
   0x7   : > { %202 = sbr.rel (%p199_p3) target bundleno = 64 (0x40), region = 32 }
   0x8   : > { %v1095_v1 = vshrl.u32 (!%p199_p3), %v358_v0, 7 }
   0xa   : > { %v360_v5 = vsub.s32 (!%p199_p3), 0, %v1095_v1 }
   0xe   : > { %s1315_s12 = smov (!%p249_p4, %s1045_s12), 1 }
   0xf   : > { %s797_s16 = sshll.u32 %s1315_s12, 7  ;;  %s266_s19 = scalar_lea.vmem %s1307_s1, %s1315_s12 }
  0x10   : > { %s1107_s22 = scalar_lea.vmem %s1306_s0, %s797_s16  ;;  %s272_s25 = scalar_lea.vmem %s1308_s2, %s1315_s12  ;;  %v350_v2 = vld [vmem:[%s266_s19] sm:$0x1] }
  0x11   : > { %v351_v3 = vmul.f32 0.00390625, %v350_v2  ;;  %v352_v4 = vld [vmem:[%s272_s25] sm:$0x1]  ;;  %v975_v9 = vld [vmem:[%s1107_s22 + $0x8] sm:$0xff]   ;;  %v976_v13 = vld [vmem:[%s1107_s22 + $0x10] sm:$0xff]   ;;  %s1232_s28 = scalar_lea.vmem %s1309_s3, %s797_s16 }
  0x12   : > { %v832_v6 = vld [vmem:[%s1107_s22] sm:$0xff]   ;;  %v353_v7 = vmul.f32 0.00390625, %v352_v4  ;;  %v977_v14 = vld [vmem:[%s1107_s22 + $0x18] sm:$0xff]   ;;  %v837_v18 = vunpack.c.l.bf16 %v975_v9  ;;  %v979_v19 = vld [vmem:[%s1107_s22 + $0x28] sm:$0xff]   ;;  %v838_v21 = vunpack.c.h.bf16 %v975_v9  ;;  %v841_v22 = vunpack.c.l.bf16 %v976_v13 }
  0x13   : > { %v354_v8 = vmul.f32 %v351_v3, %v351_v3  ;;  %v833_v10 = vunpack.c.l.bf16 %v832_v6  ;;  %v1118_v12 = vrot.slane %v351_v3, %v360_v5  ;;  %v978_v15 = vld [vmem:[%s1107_s22 + $0x20] sm:$0xff]   ;;  %v834_v16 = vunpack.c.h.bf16 %v832_v6  ;;  %v980_v20 = vld [vmem:[%s1107_s22 + $0x30] sm:$0xff]   ;;  %v981_v25 = vld [vmem:[%s1107_s22 + $0x38] sm:$0xff]  }
  0x14   : > { %v842_v23 = vunpack.c.h.bf16 %v976_v13  ;;  %v845_v24 = vunpack.c.l.bf16 %v977_v14  ;;  %v846_v28 = vunpack.c.h.bf16 %v977_v14  ;;  %v849_v29 = vunpack.c.l.bf16 %v978_v15  ;;  %v982_v37 = vld [vmem:[%s1107_s22 + $0x40] sm:$0xff]   ;;  %v983_v46 = vld [vmem:[%s1107_s22 + $0x48] sm:$0xff]   ;;  %v984_v47 = vld [vmem:[%s1107_s22 + $0x50] sm:$0xff]  }
  0x15   : > { %v355_v11 = vsub.f32 %v353_v7, %v354_v8  ;;  %v1127_v26 = vsub.f32 %v833_v10, %v1118_v12  ;;  %v850_v30 = vunpack.c.h.bf16 %v978_v15  ;;  %v853_v31 = vunpack.c.l.bf16 %v979_v19  ;;  %v985_v52 = vld [vmem:[%s1107_s22 + $0x58] sm:$0xff]   ;;  %v986_v53 = vld [vmem:[%s1107_s22 + $0x60] sm:$0xff]   ;;  %v987_v58 = vld [vmem:[%s1107_s22 + $0x68] sm:$0xff]  }
  0x16   : > { %v854_v32 = vunpack.c.h.bf16 %v979_v19  ;;  %v857_v33 = vunpack.c.l.bf16 %v980_v20  ;;  %v858_v34 = vunpack.c.h.bf16 %v980_v20  ;;  %v861_v35 = vunpack.c.l.bf16 %v981_v25  ;;  %v988_v63 = vld [vmem:[%s1107_s22 + $0x70] sm:$0xff]   ;;  %v989_v0 = vld [vmem:[%s1107_s22 + $0x78] sm:$0xff]  }
  0x17   : > { %v356_v17 = vmax.f32 %v355_v11, 0.0  ;;  %v862_v36 = vunpack.c.h.bf16 %v981_v25  ;;  %v364_v38 = vsub.f32 %v834_v16, %v1118_v12  ;;  %v365_v39 = vsub.f32 %v837_v18, %v1118_v12 }
  0x18   : > { %v366_v40 = vsub.f32 %v838_v21, %v1118_v12  ;;  %v367_v41 = vsub.f32 %v841_v22, %v1118_v12  ;;  %v368_v42 = vsub.f32 %v842_v23, %v1118_v12  ;;  %v369_v43 = vsub.f32 %v845_v24, %v1118_v12 }
  0x19   : > { %v395_v27 = vadd.f32 1e-05, %v356_v17  ;;  %v370_v44 = vsub.f32 %v846_v28, %v1118_v12  ;;  %v1138_v45 = vsub.f32 %v849_v29, %v1118_v12  ;;  %v1143_v48 = vsub.f32 %v850_v30, %v1118_v12 }
  0x1a   : > { %v1146_v49 = vsub.f32 %v853_v31, %v1118_v12  ;;  %v1149_v50 = vsub.f32 %v854_v32, %v1118_v12  ;;  %v865_v51 = vunpack.c.l.bf16 %v982_v37  ;;  %v1154_v54 = vsub.f32 %v857_v33, %v1118_v12 }
  0x1b   : > { %1029 = vrsqrt.f32 %v395_v27  ;;  %v1157_v55 = vsub.f32 %v858_v34, %v1118_v12  ;;  %v1160_v56 = vsub.f32 %v861_v35, %v1118_v12  ;;  %v1163_v57 = vsub.f32 %v862_v36, %v1118_v12 }
  0x1c   : > { %v866_v59 = vunpack.c.h.bf16 %v982_v37  ;;  %v869_v60 = vunpack.c.l.bf16 %v983_v46  ;;  %v870_v61 = vunpack.c.h.bf16 %v983_v46  ;;  %v873_v62 = vunpack.c.l.bf16 %v984_v47 }
  0x1d   : > { %v874_v2 = vunpack.c.h.bf16 %v984_v47  ;;  %v877_v3 = vunpack.c.l.bf16 %v985_v52  ;;  %v878_v4 = vunpack.c.h.bf16 %v985_v52  ;;  %v881_v6 = vunpack.c.l.bf16 %v986_v53 }
  0x1e   : > { %v1169_v7 = vsub.f32 %v865_v51, %v1118_v12  ;;  %v882_v8 = vunpack.c.h.bf16 %v986_v53  ;;  %v885_v9 = vunpack.c.l.bf16 %v987_v58  ;;  %v886_v10 = vunpack.c.h.bf16 %v987_v58 }
  0x1f   : > { %v889_v11 = vunpack.c.l.bf16 %v988_v63  ;;  %v890_v13 = vunpack.c.h.bf16 %v988_v63  ;;  %v893_v14 = vunpack.c.l.bf16 %v989_v0  ;;  %v894_v15 = vunpack.c.h.bf16 %v989_v0 }
  0x20   : > { %v380_v16 = vsub.f32 %v866_v59, %v1118_v12  ;;  %v1173_v17 = vsub.f32 %v869_v60, %v1118_v12  ;;  %v1176_v18 = vsub.f32 %v870_v61, %v1118_v12  ;;  %v1179_v19 = vsub.f32 %v873_v62, %v1118_v12 }
  0x21   : > { %v1182_v21 = vsub.f32 %v874_v2, %v1118_v12  ;;  %v1185_v22 = vsub.f32 %v877_v3, %v1118_v12  ;;  %v1188_v23 = vsub.f32 %v878_v4, %v1118_v12  ;;  %v1191_v24 = vsub.f32 %v881_v6, %v1118_v12 }
  0x22   : > { %v1198_v27 = vsub.f32 %v882_v8, %v1118_v12  ;;  %v1201_v28 = vsub.f32 %v885_v9, %v1118_v12  ;;  %v1204_v29 = vsub.f32 %v886_v10, %v1118_v12  ;;  %v1207_v30 = vsub.f32 %v889_v11, %v1118_v12 }
  0x23   : > { %v1210_v31 = vsub.f32 %v890_v13, %v1118_v12  ;;  %v1213_v1 = vsub.f32 %v893_v14, %v1118_v12 }
  0x25   : > { %v1030_v20 = vpop.eup %1029 }
  0x26   : > { %v1195_v25 = vrot.slane %v1030_v20, %v360_v5  ;;  %v1216_v5 = vsub.f32 %v894_v15, %v1118_v12 }
  0x28   : > { %v403_v32 = vmul.f32 %v1195_v25, %v1127_v26  ;;  %v404_v33 = vmul.f32 %v1195_v25, %v364_v38  ;;  %v405_v34 = vmul.f32 %v1195_v25, %v365_v39  ;;  %v406_v35 = vmul.f32 %v1195_v25, %v366_v40 }
  0x29   : > { %v407_v36 = vmul.f32 %v1195_v25, %v367_v41  ;;  %v408_v37 = vmul.f32 %v1195_v25, %v368_v42  ;;  %v409_v46 = vmul.f32 %v1195_v25, %v369_v43  ;;  %v410_v47 = vmul.f32 %v1195_v25, %v370_v44 }
  0x2a   : > { %v435_v51 = vmax.f32 %v403_v32, 0.0  ;;  %v436_v12 = vmax.f32 %v404_v33, 0.0  ;;  %v437_v52 = vmax.f32 %v405_v34, 0.0  ;;  %v438_v53 = vmax.f32 %v406_v35, 0.0 }
  0x2b   : > { %v439_v26 = vmax.f32 %v407_v36, 0.0  ;;  %v440_v38 = vmax.f32 %v408_v37, 0.0  ;;  %v441_v39 = vmax.f32 %v409_v46, 0.0  ;;  %v442_v40 = vmax.f32 %v410_v47, 0.0 }
  0x2c   : > { %v898_v41 = vpack.c.bf16 %v436_v12, %v435_v51  ;;  %v903_v42 = vpack.c.bf16 %v438_v53, %v437_v52  ;;  %v411_v43 = vmul.f32 %v1195_v25, %v1138_v45  ;;  %v412_v44 = vmul.f32 %v1195_v25, %v1143_v48 }
  0x2d   : > { %v908_v58 = vpack.c.bf16 %v440_v38, %v439_v26  ;;  %v913_v59 = vpack.c.bf16 %v442_v40, %v441_v39  ;;  %v413_v60 = vmul.f32 %v1195_v25, %v1146_v49  ;;  %v414_v61 = vmul.f32 %v1195_v25, %v1149_v50 }
  0x2e   : > { %899 = vst [vmem:[%s1232_s28] sm:$0xff] %v898_v41   ;;  %990 = vst [vmem:[%s1232_s28 + $0x8] sm:$0xff] %v903_v42   ;;  %v443_v62 = vmax.f32 %v411_v43, 0.0  ;;  %v444_v63 = vmax.f32 %v412_v44, 0.0  ;;  %v415_v0 = vmul.f32 %v1195_v25, %v1154_v54  ;;  %v416_v45 = vmul.f32 %v1195_v25, %v1157_v55 }
  0x2f   : > { %991 = vst [vmem:[%s1232_s28 + $0x10] sm:$0xff] %v908_v58   ;;  %992 = vst [vmem:[%s1232_s28 + $0x18] sm:$0xff] %v913_v59   ;;  %v445_v48 = vmax.f32 %v413_v60, 0.0  ;;  %v446_v2 = vmax.f32 %v414_v61, 0.0  ;;  %v417_v49 = vmul.f32 %v1195_v25, %v1160_v56  ;;  %v418_v50 = vmul.f32 %v1195_v25, %v1163_v57 }
  0x30   : > { %v918_v3 = vpack.c.bf16 %v444_v63, %v443_v62  ;;  %v447_v4 = vmax.f32 %v415_v0, 0.0  ;;  %v448_v6 = vmax.f32 %v416_v45, 0.0  ;;  %v419_v54 = vmul.f32 %v1195_v25, %v1169_v7 }
  0x31   : > { %v923_v8 = vpack.c.bf16 %v446_v2, %v445_v48  ;;  %v449_v55 = vmax.f32 %v417_v49, 0.0  ;;  %v450_v9 = vmax.f32 %v418_v50, 0.0  ;;  %v420_v10 = vmul.f32 %v1195_v25, %v380_v16 }
  0x32   : > { %993 = vst [vmem:[%s1232_s28 + $0x20] sm:$0xff] %v918_v3   ;;  %v928_v11 = vpack.c.bf16 %v448_v6, %v447_v4  ;;  %v451_v13 = vmax.f32 %v419_v54, 0.0  ;;  %v421_v56 = vmul.f32 %v1195_v25, %v1173_v17  ;;  %v422_v57 = vmul.f32 %v1195_v25, %v1176_v18 }
  0x33   : > { %994 = vst [vmem:[%s1232_s28 + $0x28] sm:$0xff] %v923_v8   ;;  %v933_v14 = vpack.c.bf16 %v450_v9, %v449_v55  ;;  %v452_v15 = vmax.f32 %v420_v10, 0.0  ;;  %v423_v7 = vmul.f32 %v1195_v25, %v1179_v19  ;;  %v424_v16 = vmul.f32 %v1195_v25, %v1182_v21 }
  0x34   : > { %995 = vst [vmem:[%s1232_s28 + $0x30] sm:$0xff] %v928_v11   ;;  %v453_v20 = vmax.f32 %v421_v56, 0.0  ;;  %v454_v32 = vmax.f32 %v422_v57, 0.0  ;;  %v425_v33 = vmul.f32 %v1195_v25, %v1185_v22  ;;  %v426_v17 = vmul.f32 %v1195_v25, %v1188_v23 }
  0x35   : > { %996 = vst [vmem:[%s1232_s28 + $0x38] sm:$0xff] %v933_v14   ;;  %v938_v18 = vpack.c.bf16 %v452_v15, %v451_v13  ;;  %v455_v34 = vmax.f32 %v423_v7, 0.0  ;;  %v456_v35 = vmax.f32 %v424_v16, 0.0  ;;  %v427_v19 = vmul.f32 %v1195_v25, %v1191_v24 }
  0x36   : > { %v943_v36 = vpack.c.bf16 %v454_v32, %v453_v20  ;;  %v457_v21 = vmax.f32 %v425_v33, 0.0  ;;  %v458_v37 = vmax.f32 %v426_v17, 0.0  ;;  %v428_v46 = vmul.f32 %v1195_v25, %v1198_v27 }
  0x37   : > { %997 = vst [vmem:[%s1232_s28 + $0x40] sm:$0xff] %v938_v18   ;;  %v948_v22 = vpack.c.bf16 %v456_v35, %v455_v34  ;;  %v459_v47 = vmax.f32 %v427_v19, 0.0  ;;  %v429_v23 = vmul.f32 %v1195_v25, %v1201_v28  ;;  %v430_v51 = vmul.f32 %v1195_v25, %v1204_v29 }
  0x38   : > { %998 = vst [vmem:[%s1232_s28 + $0x48] sm:$0xff] %v943_v36   ;;  %v953_v12 = vpack.c.bf16 %v458_v37, %v457_v21  ;;  %v460_v24 = vmax.f32 %v428_v46, 0.0  ;;  %v431_v52 = vmul.f32 %v1195_v25, %v1207_v30  ;;  %v432_v27 = vmul.f32 %v1195_v25, %v1210_v31 }
  0x39   : > { %999 = vst [vmem:[%s1232_s28 + $0x50] sm:$0xff] %v948_v22   ;;  %v461_v53 = vmax.f32 %v429_v23, 0.0  ;;  %v462_v26 = vmax.f32 %v430_v51, 0.0  ;;  %v433_v28 = vmul.f32 %v1195_v25, %v1213_v1  ;;  %v434_v29 = vmul.f32 %v1195_v25, %v1216_v5 }
  0x3a   : > { %1000 = vst [vmem:[%s1232_s28 + $0x58] sm:$0xff] %v953_v12   ;;  %v958_v38 = vpack.c.bf16 %v460_v24, %v459_v47  ;;  %v463_v39 = vmax.f32 %v431_v52, 0.0  ;;  %v464_v40 = vmax.f32 %v432_v27, 0.0 }
  0x3b   : > { %v963_v30 = vpack.c.bf16 %v462_v26, %v461_v53  ;;  %v465_v41 = vmax.f32 %v433_v28, 0.0  ;;  %v466_v42 = vmax.f32 %v434_v29, 0.0 }
  0x3c   : > { %1001 = vst [vmem:[%s1232_s28 + $0x60] sm:$0xff] %v958_v38   ;;  %v968_v31 = vpack.c.bf16 %v464_v40, %v463_v39 }
  0x3d   : > { %1002 = vst [vmem:[%s1232_s28 + $0x68] sm:$0xff] %v963_v30   ;;  %v973_v43 = vpack.c.bf16 %v466_v42, %v465_v41 }
  0x3e   : > { %1003 = vst [vmem:[%s1232_s28 + $0x70] sm:$0xff] %v968_v31  }
  0x3f   : > { %1004 = vst [vmem:[%s1232_s28 + $0x78] sm:$0xff] %v973_v43  }
  0x40 PF: > { %s13_s14 = sadd.s32 1, %s1053_s14   ;;  %s1310_s12 = smov %s1049_s13 }
  0x41   : > { %p10_p5 = scmp.ge.s32.totalorder %s13_s14, 4   ;;  %s1311_s13 = smov %s1313_s15 }
  0x43   :  { %12 = sbr.rel (!%p10_p5) target bundleno = 2 (0x2), region = 68 }

// kernel: generator_hd_forward.57
= control target key start
LH: loop header
LB: loop body
LE: loop exit
PB: predicated region body
PF: predicated region fallthrough
CT: control target
= control target key end

     0   :  { %s1714_s15 = smov 0   ;;  %s1716_s16 = smov 0   ;;  %s1916_s0 = inlined_call_operand.vmem [shape: bf16[2,256,128], index: 0, kind: input, shape index: {}]   ;;  %s1917_s1 = inlined_call_operand.vmem [shape: bf16[128,128], index: 1, kind: input, shape index: {}]   ;;  %s1918_s2 = inlined_call_operand.vmem [shape: bf16[2,256,128], index: 2, kind: output, shape index: {0}]   ;;  %s1919_s3 = inlined_call_operand.vmem [shape: f32[2,1,128], index: 3, kind: output, shape index: {1}]   ;;  %s1920_s4 = inlined_call_operand.vmem [shape: f32[2,1,128], index: 4, kind: output, shape index: {2}]  }
   0x1   :  { %s1718_s17 = smov 0  }
   0x2 LB: > { %s41_s18 = sadd.s32 1, %s1682_s16  ;;  %p1335_p0 = scmp.ge.s32.totalorder %s1686_s17, 1  ;;  %s1686_s17 = sphi %s1718_s17, %s15_s17   ;;  %s1682_s16 = sphi %s1716_s16, %s1922_s16   ;;  %s1678_s15 = sphi %s1714_s15, %s1921_s15  }
   0x3   : > { %p43_p1 = scmp.ge.s32.totalorder %s41_s18, 2  ;;  %p229_p2 = scmp.lt.s32.totalorder %s1686_s17, 3 }
   0x5   : > { %s1924_s18 = smov (%p43_p1, %s41_s18), 0  ;;  %p230_p3 = pnand %p1335_p0, %p229_p2 }
   0x6   : > { %v1640_v0 = vld [vmem:[%s1917_s1] sm:$0xff] (!%p230_p3)   ;;  %p290_p4 = scmp.lt.s32.totalorder (!%p230_p3), %s1678_s15, 1  ;;  %v1641_v1 = vld [vmem:[%s1917_s1 + $0x8] sm:$0xff] (!%p230_p3)   ;;  %v1642_v2 = vld [vmem:[%s1917_s1 + $0x10] sm:$0xff] (!%p230_p3)   ;;  %v1688_v24 = vmov (!%p230_p3), 0.0  }
   0x7   : > { %233 = sbr.rel (%p230_p3) target bundleno = 333 (0x14d), region = 28  ;;  %1551 = vmatprep.subr.bf16.mxu0 (!%p230_p3), %v1640_v0  ;;  %1599 = vmatprep.subr.bf16.mxu1 (!%p230_p3), %v1640_v0  ;;  %v1643_v3 = vld [vmem:[%s1917_s1 + $0x18] sm:$0xff] (!%p230_p3)   ;;  %v1644_v5 = vld [vmem:[%s1917_s1 + $0x20] sm:$0xff] (!%p230_p3)   ;;  %v1645_v6 = vld [vmem:[%s1917_s1 + $0x28] sm:$0xff] (!%p230_p3)  }
   0x8   : > { %1552 = vmatpush3.bf16.msra.mxu0 (!%p230_p3), %v1640_v0  ;;  %1607 = vmatpush3.bf16.msra.mxu1 (!%p230_p3), %v1640_v0  ;;  %v1646_v8 = vld [vmem:[%s1917_s1 + $0x30] sm:$0xff] (!%p230_p3)   ;;  %v1647_v9 = vld [vmem:[%s1917_s1 + $0x38] sm:$0xff] (!%p230_p3)  }
   0x9   : > { %1553 = vmatprep.subr.bf16.mxu0 (!%p230_p3), %v1641_v1  ;;  %1600 = vmatprep.subr.bf16.mxu1 (!%p230_p3), %v1641_v1 }
   0xc   : > { %1554 = vmatpush3.bf16.msra.mxu0 (!%p230_p3), %v1641_v1  ;;  %1608 = vmatpush3.bf16.msra.mxu1 (!%p230_p3), %v1641_v1 }
   0xd   : > { %1555 = vmatprep.subr.bf16.mxu0 (!%p230_p3), %v1642_v2  ;;  %1601 = vmatprep.subr.bf16.mxu1 (!%p230_p3), %v1642_v2 }
   0xe   : > { %s1926_s15 = smov (!%p290_p4, %s1678_s15), 1 }
   0xf   : > { %s1398_s25 = sshll.u32 %s1926_s15, 7  ;;  %s1786_s19 = scalar_lea.vmem %s1919_s3, %s1926_s15 }
  0x10   : > { %s1749_s28 = scalar_lea.vmem %s1916_s0, %s1398_s25  ;;  %1556 = vmatpush3.bf16.msra.mxu0 %v1642_v2  ;;  %1609 = vmatpush3.bf16.msra.mxu1 %v1642_v2  ;;  %s1792_s22 = scalar_lea.vmem %s1920_s4, %s1926_s15  ;;  %827 = vst [vmem:[%s1786_s19] sm:$0x1] %v1688_v24 }
  0x11   : > { %v1648_v4 = vld [vmem:[%s1749_s28] sm:$0xff]   ;;  %1557 = vmatprep.subr.bf16.mxu0 %v1643_v3  ;;  %1602 = vmatprep.subr.bf16.mxu1 %v1643_v3  ;;  %v1649_v10 = vld [vmem:[%s1749_s28 + $0x8] sm:$0xff]   ;;  %v1650_v12 = vld [vmem:[%s1749_s28 + $0x10] sm:$0xff]   ;;  %828 = vst [vmem:[%s1792_s22] sm:$0x1] %v1688_v24  ;;  %s1805_s26 = scalar_lea.vmem %s1918_s2, %s1398_s25 }
  0x12   : > { %1567 = vmatprep.mubr.bf16.mxu0 %v1648_v4  ;;  %v1656_v7 = vld [vmem:[%s1749_s28 + $0x40] sm:$0xff]   ;;  %v1657_v11 = vld [vmem:[%s1749_s28 + $0x48] sm:$0xff]   ;;  %v1658_v13 = vld [vmem:[%s1749_s28 + $0x50] sm:$0xff]  }
  0x13   : > { %1583 = vmatprep.mubr.bf16.mxu1 %v1656_v7  ;;  %v1651_v14 = vld [vmem:[%s1749_s28 + $0x18] sm:$0xff]   ;;  %v1652_v16 = vld [vmem:[%s1749_s28 + $0x20] sm:$0xff]   ;;  %v1653_v18 = vld [vmem:[%s1749_s28 + $0x28] sm:$0xff]  }
  0x14   : > { %1558 = vmatpush3.bf16.msra.mxu0 %v1643_v3  ;;  %1610 = vmatpush3.bf16.msra.mxu1 %v1643_v3  ;;  %v1659_v15 = vld [vmem:[%s1749_s28 + $0x58] sm:$0xff]   ;;  %v1660_v17 = vld [vmem:[%s1749_s28 + $0x60] sm:$0xff]   ;;  %v1661_v19 = vld [vmem:[%s1749_s28 + $0x68] sm:$0xff]  }
  0x15   : > { %1559 = vmatprep.subr.bf16.mxu0 %v1644_v5  ;;  %1603 = vmatprep.subr.bf16.mxu1 %v1644_v5  ;;  %v1654_v20 = vld [vmem:[%s1749_s28 + $0x30] sm:$0xff]   ;;  %v1655_v22 = vld [vmem:[%s1749_s28 + $0x38] sm:$0xff]  }
  0x16   : > { %v1662_v21 = vld [vmem:[%s1749_s28 + $0x70] sm:$0xff]   ;;  %v1663_v23 = vld [vmem:[%s1749_s28 + $0x78] sm:$0xff]  }
  0x18   : > { %1560 = vmatpush3.bf16.msra.mxu0 %v1644_v5  ;;  %1611 = vmatpush3.bf16.msra.mxu1 %v1644_v5 }
  0x19   : > { %1561 = vmatprep.subr.bf16.mxu0 %v1645_v6  ;;  %1604 = vmatprep.subr.bf16.mxu1 %v1645_v6 }
  0x1c   : > { %1562 = vmatpush3.bf16.msra.mxu0 %v1645_v6  ;;  %1612 = vmatpush3.bf16.msra.mxu1 %v1645_v6 }
  0x1d   : > { %1563 = vmatprep.subr.bf16.mxu0 %v1646_v8  ;;  %1605 = vmatprep.subr.bf16.mxu1 %v1646_v8 }
  0x20   : > { %1564 = vmatpush3.bf16.msra.mxu0 %v1646_v8  ;;  %1613 = vmatpush3.bf16.msra.mxu1 %v1646_v8 }
  0x21   : > { %1565 = vmatprep.subr.bf16.mxu0 %v1647_v9  ;;  %1606 = vmatprep.subr.bf16.mxu1 %v1647_v9 }
  0x24   : > { %1566 = vmatpush3.bf16.msra.mxu0 %v1647_v9  ;;  %1614 = vmatpush3.bf16.msra.mxu1 %v1647_v9 }
  0x27   : > { %1568 = vmatmul.mubr.bf16.vlgmr.msra.gmra.mrb[0].mxu0 %v1649_v10  ;;  %1584 = vmatmul.mubr.bf16.vlgmr.msra.gmra.mrb[0].mxu1 %v1657_v11 }
  0x28   : > { %1571 = vmatprep.mubr.bf16.mxu0 %v1650_v12  ;;  %1587 = vmatprep.mubr.bf16.mxu1 %v1658_v13 }
  0x2f   : > { %1572 = vmatmul.mubr.bf16.gmra.mrb[4].mxu0 %v1651_v14  ;;  %1588 = vmatmul.mubr.bf16.gmra.mrb[4].mxu1 %v1659_v15 }
  0x30   : > { %1575 = vmatprep.mubr.bf16.mxu0 %v1652_v16  ;;  %1591 = vmatprep.mubr.bf16.mxu1 %v1660_v17 }
  0x37   : > { %1576 = vmatmul.mubr.bf16.gmra.mrb[8].mxu0 %v1653_v18  ;;  %1592 = vmatmul.mubr.bf16.gmra.mrb[8].mxu1 %v1661_v19 }
  0x38   : > { %1579 = vmatprep.mubr.bf16.mxu0 %v1654_v20  ;;  %1595 = vmatprep.mubr.bf16.mxu1 %v1662_v21 }
  0x3f   : > { %1580 = vmatmul.mubr.bf16.gmra.mrb[12].mxu0 %v1655_v22  ;;  %1596 = vmatmul.mubr.bf16.gmra.mrb[12].mxu1 %v1663_v23 }
  0xfa   : > { %v1569_v25 = vpop.f32.mrb[0].mxu0  ;;  %v1796_v26 = vpop.f32.mrb[0].mxu1 }
  0xfb   : > { %v631_v27 = vpop.f32.mrb[1].mxu0  ;;  %v1798_v28 = vpop.f32.mrb[1].mxu1  ;;  %v1067_v40 = vmul.f32 %v1569_v25, %v1569_v25 }
  0xfc   : > { %v1570_v29 = vpop.f32.mrb[2].mxu0  ;;  %v1807_v30 = vpop.f32.mrb[2].mxu1  ;;  %v1065_v31 = vmul.f32 %v631_v27, %v631_v27 }
  0xfd   : > { %v1440_v32 = vpack.c.bf16 %v1570_v29, %v1569_v25  ;;  %v634_v33 = vpop.f32.mrb[3].mxu0  ;;  %v1480_v34 = vpack.c.bf16 %v1807_v30, %v1796_v26  ;;  %v1811_v35 = vpop.f32.mrb[3].mxu1  ;;  %v1068_v43 = vmul.f32 %v1570_v29, %v1570_v29 }
  0xfe   : > { %v1435_v36 = vpack.c.bf16 %v634_v33, %v631_v27  ;;  %v1025_v37 = vadd.f32 %v634_v33, %v631_v27  ;;  %v1066_v38 = vmul.f32 %v634_v33, %v634_v33  ;;  %v1475_v39 = vpack.c.bf16 %v1811_v35, %v1798_v28 }
  0xff   : > { %1512 = vst [vmem:[%s1805_s26 + $0x8] sm:$0xff] %v1440_v32   ;;  %1520 = vst [vmem:[%s1805_s26 + $0x48] sm:$0xff] %v1480_v34  }
 0x100   : > { %1436 = vst [vmem:[%s1805_s26] sm:$0xff] %v1435_v36   ;;  %v1026_v41 = vadd.f32 %v1569_v25, %v1025_v37  ;;  %v1097_v42 = vadd.f32 %v1066_v38, %v1065_v31  ;;  %1519 = vst [vmem:[%s1805_s26 + $0x40] sm:$0xff] %v1475_v39  }
 0x102   : > { %v1098_v44 = vadd.f32 %v1097_v42, %v1067_v40  ;;  %v1573_v45 = vpop.f32.mrb[4].mxu0  ;;  %v1027_v46 = vadd.f32 %v1570_v29, %v1026_v41  ;;  %v1819_v47 = vpop.f32.mrb[4].mxu1 }
 0x103   : > { %v647_v48 = vpop.f32.mrb[5].mxu0  ;;  %v1821_v49 = vpop.f32.mrb[5].mxu1  ;;  %v1071_v0 = vmul.f32 %v1573_v45, %v1573_v45 }
 0x104   : > { %v1028_v50 = vadd.f32 %v1027_v46, %v647_v48  ;;  %v1069_v51 = vmul.f32 %v647_v48, %v647_v48  ;;  %v1099_v52 = vadd.f32 %v1098_v44, %v1068_v43  ;;  %v1574_v53 = vpop.f32.mrb[6].mxu0  ;;  %v1823_v54 = vpop.f32.mrb[6].mxu1 }
 0x105   : > { %v1450_v55 = vpack.c.bf16 %v1574_v53, %v1573_v45  ;;  %v650_v56 = vpop.f32.mrb[7].mxu0  ;;  %v1490_v57 = vpack.c.bf16 %v1823_v54, %v1819_v47  ;;  %v1827_v58 = vpop.f32.mrb[7].mxu1  ;;  %v1072_v3 = vmul.f32 %v1574_v53, %v1574_v53 }
 0x106   : > { %v1100_v59 = vadd.f32 %v1099_v52, %v1069_v51  ;;  %v1445_v60 = vpack.c.bf16 %v650_v56, %v647_v48  ;;  %v1029_v61 = vadd.f32 %v1028_v50, %v650_v56  ;;  %v1070_v62 = vmul.f32 %v650_v56, %v650_v56 }
 0x107   : > { %1514 = vst [vmem:[%s1805_s26 + $0x18] sm:$0xff] %v1450_v55   ;;  %1522 = vst [vmem:[%s1805_s26 + $0x58] sm:$0xff] %v1490_v57   ;;  %v1485_v63 = vpack.c.bf16 %v1827_v58, %v1821_v49 }
 0x108   : > { %1513 = vst [vmem:[%s1805_s26 + $0x10] sm:$0xff] %v1445_v60   ;;  %v1030_v1 = vadd.f32 %v1573_v45, %v1029_v61  ;;  %v1101_v2 = vadd.f32 %v1100_v59, %v1070_v62  ;;  %v1081_v62 = vmul.f32 %v1798_v28, %v1798_v28 }
 0x109   : > { %1521 = vst [vmem:[%s1805_s26 + $0x50] sm:$0xff] %v1485_v63  }
 0x10a   : > { %v1102_v4 = vadd.f32 %v1101_v2, %v1071_v0  ;;  %v1577_v5 = vpop.f32.mrb[8].mxu0  ;;  %v1031_v6 = vadd.f32 %v1574_v53, %v1030_v1  ;;  %v1835_v7 = vpop.f32.mrb[8].mxu1 }
 0x10b   : > { %v663_v8 = vpop.f32.mrb[9].mxu0  ;;  %v1837_v9 = vpop.f32.mrb[9].mxu1  ;;  %v1075_v24 = vmul.f32 %v1577_v5, %v1577_v5 }
 0x10c   : > { %v1032_v10 = vadd.f32 %v1031_v6, %v663_v8  ;;  %v1073_v11 = vmul.f32 %v663_v8, %v663_v8  ;;  %v1103_v12 = vadd.f32 %v1102_v4, %v1072_v3  ;;  %v1578_v13 = vpop.f32.mrb[10].mxu0  ;;  %v1839_v14 = vpop.f32.mrb[10].mxu1  ;;  %v1082_v3 = vmul.f32 %v1811_v35, %v1811_v35 }
 0x10d   : > { %v1460_v15 = vpack.c.bf16 %v1578_v13, %v1577_v5  ;;  %v666_v16 = vpop.f32.mrb[11].mxu0  ;;  %v1500_v17 = vpack.c.bf16 %v1839_v14, %v1835_v7  ;;  %v1843_v18 = vpop.f32.mrb[11].mxu1  ;;  %v1076_v29 = vmul.f32 %v1578_v13, %v1578_v13  ;;  %v1083_v4 = vmul.f32 %v1796_v26, %v1796_v26 }
 0x10e   : > { %v1104_v19 = vadd.f32 %v1103_v12, %v1073_v11  ;;  %v1455_v20 = vpack.c.bf16 %v666_v16, %v663_v8  ;;  %v1033_v21 = vadd.f32 %v1032_v10, %v666_v16  ;;  %v1074_v22 = vmul.f32 %v666_v16, %v666_v16 }
 0x10f   : > { %1516 = vst [vmem:[%s1805_s26 + $0x28] sm:$0xff] %v1460_v15   ;;  %1524 = vst [vmem:[%s1805_s26 + $0x68] sm:$0xff] %v1500_v17   ;;  %v1495_v23 = vpack.c.bf16 %v1843_v18, %v1837_v9  ;;  %v1084_v8 = vmul.f32 %v1807_v30, %v1807_v30  ;;  %v1086_v16 = vmul.f32 %v1827_v58, %v1827_v58 }
 0x110   : > { %1515 = vst [vmem:[%s1805_s26 + $0x20] sm:$0xff] %v1455_v20   ;;  %v1034_v25 = vadd.f32 %v1577_v5, %v1033_v21  ;;  %v1105_v27 = vadd.f32 %v1104_v19, %v1074_v22 }
 0x111   : > { %1523 = vst [vmem:[%s1805_s26 + $0x60] sm:$0xff] %v1495_v23  }
 0x112   : > { %v1106_v31 = vadd.f32 %v1105_v27, %v1075_v24  ;;  %v1581_v32 = vpop.f32.mrb[12].mxu0  ;;  %v1035_v33 = vadd.f32 %v1578_v13, %v1034_v25  ;;  %v1851_v34 = vpop.f32.mrb[12].mxu1  ;;  %v1090_v25 = vmul.f32 %v1843_v18, %v1843_v18 }
 0x113   : > { %v679_v36 = vpop.f32.mrb[13].mxu0  ;;  %v743_v37 = vpop.f32.mrb[13].mxu1  ;;  %v1079_v55 = vmul.f32 %v1581_v32, %v1581_v32 }
 0x114   : > { %v1036_v38 = vadd.f32 %v1035_v33, %v679_v36  ;;  %v1077_v39 = vmul.f32 %v679_v36, %v679_v36  ;;  %v1107_v40 = vadd.f32 %v1106_v31, %v1076_v29  ;;  %v1582_v41 = vpop.f32.mrb[14].mxu0  ;;  %v1853_v42 = vpop.f32.mrb[14].mxu1 }
 0x115   : > { %v1470_v43 = vpack.c.bf16 %v1582_v41, %v1581_v32  ;;  %v682_v44 = vpop.f32.mrb[15].mxu0  ;;  %v1510_v45 = vpack.c.bf16 %v1853_v42, %v1851_v34  ;;  %v746_v46 = vpop.f32.mrb[15].mxu1  ;;  %v1080_v59 = vmul.f32 %v1582_v41, %v1582_v41 }
 0x116   : > { %v1108_v48 = vadd.f32 %v1107_v40, %v1077_v39  ;;  %v1465_v50 = vpack.c.bf16 %v682_v44, %v679_v36  ;;  %v1037_v51 = vadd.f32 %v1036_v38, %v682_v44  ;;  %v1078_v52 = vmul.f32 %v682_v44, %v682_v44 }
 0x117   : > { %1518 = vst [vmem:[%s1805_s26 + $0x38] sm:$0xff] %v1470_v43   ;;  %1526 = vst [vmem:[%s1805_s26 + $0x78] sm:$0xff] %v1510_v45   ;;  %v1505_v53 = vpack.c.bf16 %v746_v46, %v743_v37  ;;  %v1094_v40 = vmul.f32 %v746_v46, %v746_v46  ;;  %v1096_v43 = vmul.f32 %v1853_v42, %v1853_v42 }
 0x118   : > { %1517 = vst [vmem:[%s1805_s26 + $0x30] sm:$0xff] %v1465_v50   ;;  %v1038_v56 = vadd.f32 %v1581_v32, %v1037_v51  ;;  %v1109_v57 = vadd.f32 %v1108_v48, %v1078_v52 }
 0x119   : > { %1525 = vst [vmem:[%s1805_s26 + $0x70] sm:$0xff] %v1505_v53  }
 0x11a   : > { %v1110_v60 = vadd.f32 %v1109_v57, %v1079_v55  ;;  %v1039_v61 = vadd.f32 %v1582_v41, %v1038_v56  ;;  %v1024_v56 = vld [vmem:[%s1786_s19] sm:$0x1] }
 0x11c   : > { %v1040_v63 = vadd.f32 %v1039_v61, %v1798_v28  ;;  %v1111_v0 = vadd.f32 %v1110_v60, %v1080_v59  ;;  %v1085_v28 = vmul.f32 %v1821_v49, %v1821_v49  ;;  %v1064_v60 = vld [vmem:[%s1792_s22] sm:$0x1] }
 0x11e   : > { %v1112_v1 = vadd.f32 %v1111_v0, %v1081_v62  ;;  %v1041_v2 = vadd.f32 %v1040_v63, %v1811_v35 }
 0x120   : > { %v1042_v5 = vadd.f32 %v1796_v26, %v1041_v2  ;;  %v1113_v6 = vadd.f32 %v1112_v1, %v1082_v3  ;;  %v1087_v26 = vmul.f32 %v1819_v47, %v1819_v47 }
 0x122   : > { %v1114_v10 = vadd.f32 %v1113_v6, %v1083_v4  ;;  %v1043_v11 = vadd.f32 %v1807_v30, %v1042_v5  ;;  %v1088_v30 = vmul.f32 %v1823_v54, %v1823_v54 }
 0x124   : > { %v1044_v12 = vadd.f32 %v1043_v11, %v1821_v49  ;;  %v1115_v13 = vadd.f32 %v1114_v10, %v1084_v8  ;;  %v1089_v49 = vmul.f32 %v1837_v9, %v1837_v9 }
 0x126   : > { %v1116_v15 = vadd.f32 %v1115_v13, %v1085_v28  ;;  %v1045_v35 = vadd.f32 %v1044_v12, %v1827_v58 }
 0x128   : > { %v1046_v17 = vadd.f32 %v1819_v47, %v1045_v35  ;;  %v1117_v19 = vadd.f32 %v1116_v15, %v1086_v16  ;;  %v1091_v47 = vmul.f32 %v1835_v7, %v1835_v7 }
 0x12a   : > { %v1118_v20 = vadd.f32 %v1117_v19, %v1087_v26  ;;  %v1047_v21 = vadd.f32 %v1823_v54, %v1046_v17  ;;  %v1092_v54 = vmul.f32 %v1839_v14, %v1839_v14 }
 0x12c   : > { %v1048_v22 = vadd.f32 %v1047_v21, %v1837_v9  ;;  %v1119_v23 = vadd.f32 %v1118_v20, %v1088_v30  ;;  %v1093_v9 = vmul.f32 %v743_v37, %v743_v37 }
 0x12e   : > { %v1120_v24 = vadd.f32 %v1119_v23, %v1089_v49  ;;  %v1049_v58 = vadd.f32 %v1048_v22, %v1843_v18  ;;  %v1095_v18 = vmul.f32 %v1851_v34, %v1851_v34 }
 0x130   : > { %v1050_v27 = vadd.f32 %v1835_v7, %v1049_v58  ;;  %v1121_v29 = vadd.f32 %v1120_v24, %v1090_v25 }
 0x132   : > { %v1122_v31 = vadd.f32 %v1121_v29, %v1091_v47  ;;  %v1051_v32 = vadd.f32 %v1839_v14, %v1050_v27 }
 0x134   : > { %v1052_v33 = vadd.f32 %v1051_v32, %v743_v37  ;;  %v1123_v36 = vadd.f32 %v1122_v31, %v1092_v54 }
 0x136   : > { %v1124_v38 = vadd.f32 %v1123_v36, %v1093_v9  ;;  %v1053_v39 = vadd.f32 %v1052_v33, %v746_v46 }
 0x138   : > { %v1054_v41 = vadd.f32 %v1851_v34, %v1053_v39  ;;  %v1125_v7 = vadd.f32 %v1124_v38, %v1094_v40 }
 0x13a   : > { %v1055_v44 = vadd.f32 %v1853_v42, %v1054_v41  ;;  %v1126_v14 = vadd.f32 %v1125_v7, %v1095_v18 }
 0x13c   : > { %v1056_v45 = vrot.slane %v1055_v44, 4  ;;  %v1127_v37 = vadd.f32 %v1126_v14, %v1096_v43 }
 0x13e   : > { %v1057_v48 = vadd.f32 %v1056_v45, %v1055_v44  ;;  %v1128_v46 = vrot.slane %v1127_v37, 4 }
 0x140   : > { %v1058_v50 = vrot.slane %v1057_v48, 2  ;;  %v1129_v51 = vadd.f32 %v1128_v46, %v1127_v37 }
 0x142   : > { %v1059_v52 = vadd.f32 %v1058_v50, %v1057_v48  ;;  %v1130_v53 = vrot.slane %v1129_v51, 2 }
 0x144   : > { %v1060_v55 = vrot.slane %v1059_v52, 1  ;;  %v1131_v34 = vadd.f32 %v1130_v53, %v1129_v51 }
 0x146   : > { %v1061_v57 = vadd.f32 %v1060_v55, %v1059_v52  ;;  %v1132_v59 = vrot.slane %v1131_v34, 1 }
 0x148   : > { %v1062_v61 = vadd.f32 %v1061_v57, %v1024_v56  ;;  %v1133_v62 = vadd.f32 %v1132_v59, %v1131_v34 }
 0x14a   : > { %1063 = vst [vmem:[%s1786_s19] sm:$0x1] %v1062_v61  ;;  %v1134_v42 = vadd.f32 %v1133_v62, %v1064_v60 }
 0x14c   : > { %1135 = vst [vmem:[%s1792_s22] sm:$0x1] %v1134_v42 }
 0x14d PF: > { %s15_s17 = sadd.s32 1, %s1686_s17   ;;  %s1921_s15 = smov %s1682_s16 }
 0x14e   : > { %p12_p5 = scmp.ge.s32.totalorder %s15_s17, 4   ;;  %s1922_s16 = smov %s1924_s18 }
 0x150   :  { %14 = sbr.rel (!%p12_p5) target bundleno = 2 (0x2), region = 97 }

// kernel: generator_hd_forward.59
= control target key start
LH: loop header
LB: loop body
LE: loop exit
PB: predicated region body
PF: predicated region fallthrough
CT: control target
= control target key end

     0   :  { %s1153_s15 = smov 0   ;;  %s1155_s16 = smov 0   ;;  %s1272_s0 = inlined_call_operand.vmem [shape: bf16[2,64,256], index: 0, kind: input, shape index: {}]   ;;  %s1273_s1 = inlined_call_operand.vmem [shape: bf16[256,128], index: 1, kind: input, shape index: {}]   ;;  %s1274_s2 = inlined_call_operand.vmem [shape: bf16[2,64,128], index: 2, kind: output, shape index: {0}]   ;;  %s1275_s3 = inlined_call_operand.vmem [shape: f32[2,1,128], index: 3, kind: output, shape index: {1}]   ;;  %s1276_s4 = inlined_call_operand.vmem [shape: f32[2,1,128], index: 4, kind: output, shape index: {2}]  }
   0x1   :  { %s1157_s17 = smov 0  }
   0x2 LB: > { %s41_s18 = sadd.s32 1, %s1121_s16  ;;  %p922_p0 = scmp.ge.s32.totalorder %s1125_s17, 1  ;;  %s1125_s17 = sphi %s1157_s17, %s15_s17   ;;  %s1121_s16 = sphi %s1155_s16, %s1278_s16   ;;  %s1117_s15 = sphi %s1153_s15, %s1277_s15  }
   0x3   : > { %p43_p1 = scmp.ge.s32.totalorder %s41_s18, 2  ;;  %p232_p2 = scmp.lt.s32.totalorder %s1125_s17, 3 }
   0x5   : > { %s1280_s18 = smov (%p43_p1, %s41_s18), 0  ;;  %p233_p3 = pnand %p922_p0, %p232_p2 }
   0x6   : > { %v1075_v0 = vld [vmem:[%s1273_s1 + $0x40] sm:$0xff] (!%p233_p3)   ;;  %v1077_v2 = vld [vmem:[%s1273_s1 + $0x48] sm:$0xff] (!%p233_p3)   ;;  %p296_p4 = scmp.lt.s32.totalorder (!%p233_p3), %s1117_s15, 1  ;;  %v1079_v4 = vld [vmem:[%s1273_s1 + $0x50] sm:$0xff] (!%p233_p3)   ;;  %v1127_v24 = vmov (!%p233_p3), 0.0  }
   0x7   : > { %236 = sbr.rel (%p233_p3) target bundleno = 291 (0x123), region = 28  ;;  %v1076_v1 = vld [vmem:[%s1273_s1] sm:$0xff] (!%p233_p3)   ;;  %994 = vmatprep.subr.bf16.mxu0 (!%p233_p3), %v1075_v0  ;;  %1034 = vmatprep.subr.bf16.mxu1 (!%p233_p3), %v1075_v0  ;;  %v1078_v3 = vld [vmem:[%s1273_s1 + $0x8] sm:$0xff] (!%p233_p3)   ;;  %v1080_v5 = vld [vmem:[%s1273_s1 + $0x10] sm:$0xff] (!%p233_p3)  }
   0x8   : > { %995 = vmatpush3.bf16.msra.mxu0 (!%p233_p3), %v1076_v1  ;;  %1042 = vmatpush3.bf16.msra.mxu1 (!%p233_p3), %v1076_v1  ;;  %v1081_v6 = vld [vmem:[%s1273_s1 + $0x58] sm:$0xff] (!%p233_p3)   ;;  %v1083_v8 = vld [vmem:[%s1273_s1 + $0x60] sm:$0xff] (!%p233_p3)   ;;  %v1085_v10 = vld [vmem:[%s1273_s1 + $0x68] sm:$0xff] (!%p233_p3)  }
   0x9   : > { %996 = vmatprep.subr.bf16.mxu0 (!%p233_p3), %v1077_v2  ;;  %1035 = vmatprep.subr.bf16.mxu1 (!%p233_p3), %v1077_v2  ;;  %v1082_v7 = vld [vmem:[%s1273_s1 + $0x18] sm:$0xff] (!%p233_p3)   ;;  %v1084_v9 = vld [vmem:[%s1273_s1 + $0x20] sm:$0xff] (!%p233_p3)   ;;  %v1086_v13 = vld [vmem:[%s1273_s1 + $0x28] sm:$0xff] (!%p233_p3)  }
   0xa   : > { %v1087_v14 = vld [vmem:[%s1273_s1 + $0x70] sm:$0xff] (!%p233_p3)   ;;  %v1089_v16 = vld [vmem:[%s1273_s1 + $0x78] sm:$0xff] (!%p233_p3)  }
   0xb   : > { %v1088_v15 = vld [vmem:[%s1273_s1 + $0x30] sm:$0xff] (!%p233_p3)   ;;  %v1090_v17 = vld [vmem:[%s1273_s1 + $0x38] sm:$0xff] (!%p233_p3)  }
   0xc   : > { %997 = vmatpush3.bf16.msra.mxu0 (!%p233_p3), %v1078_v3  ;;  %1043 = vmatpush3.bf16.msra.mxu1 (!%p233_p3), %v1078_v3 }
   0xd   : > { %998 = vmatprep.subr.bf16.mxu0 (!%p233_p3), %v1079_v4  ;;  %1036 = vmatprep.subr.bf16.mxu1 (!%p233_p3), %v1079_v4 }
   0xe   : > { %s1282_s15 = smov (!%p296_p4, %s1117_s15), 1 }
   0xf   : > { %s961_s9 = sshll.u32 %s1282_s15, 6  ;;  %s1245_s12 = scalar_lea.vmem %s1276_s4, %s1282_s15 }
  0x10   : > { %999 = vmatpush3.bf16.msra.mxu0 %v1080_v5  ;;  %1044 = vmatpush3.bf16.msra.mxu1 %v1080_v5  ;;  %s1204_s14 = scalar_lea.vmem %s1272_s0, %s961_s9  ;;  %s1239_s9 = scalar_lea.vmem %s1275_s3, %s1282_s15  ;;  %628 = vst [vmem:[%s1245_s12] sm:$0x1] %v1127_v24 }
  0x11   : > { %1000 = vmatprep.subr.bf16.mxu0 %v1081_v6  ;;  %1037 = vmatprep.subr.bf16.mxu1 %v1081_v6  ;;  %v1093_v11 = vld [vmem:[%s1204_s14 + $0x4] ss:$8 sps:$4 sm:$0xff]   ;;  %v1091_v18 = vld [vmem:[%s1204_s14] ss:$8 sps:$4 sm:$0xff]   ;;  %v1097_v20 = vld [vmem:[%s1204_s14 + $0x14] ss:$8 sps:$4 sm:$0xff]  }
  0x12   : > { %v1096_v12 = vld [vmem:[%s1204_s14 + $0x24] ss:$8 sps:$4 sm:$0xff]   ;;  %573 = vmatprep.mubr.bf16.mxu0 %v1093_v11  ;;  %v1094_v19 = vld [vmem:[%s1204_s14 + $0x20] ss:$8 sps:$4 sm:$0xff]   ;;  %v1100_v21 = vld [vmem:[%s1204_s14 + $0x34] ss:$8 sps:$4 sm:$0xff]  }
  0x13   : > { %589 = vmatprep.mubr.bf16.mxu1 %v1096_v12  ;;  %v1099_v22 = vld [vmem:[%s1204_s14 + $0x10] ss:$8 sps:$4 sm:$0xff]   ;;  %627 = vst [vmem:[%s1239_s9] sm:$0x1] %v1127_v24  ;;  %s962_s13 = sshll.u32 %s1282_s15, 5 }
  0x14   : > { %1001 = vmatpush3.bf16.msra.mxu0 %v1082_v7  ;;  %1045 = vmatpush3.bf16.msra.mxu1 %v1082_v7  ;;  %v1102_v23 = vld [vmem:[%s1204_s14 + $0x30] ss:$8 sps:$4 sm:$0xff]   ;;  %s1253_s20 = scalar_lea.vmem %s1274_s2, %s962_s13 }
  0x15   : > { %1002 = vmatprep.subr.bf16.mxu0 %v1083_v8  ;;  %1038 = vmatprep.subr.bf16.mxu1 %v1083_v8 }
  0x18   : > { %1003 = vmatpush3.bf16.msra.mxu0 %v1084_v9  ;;  %1046 = vmatpush3.bf16.msra.mxu1 %v1084_v9 }
  0x19   : > { %1004 = vmatprep.subr.bf16.mxu0 %v1085_v10  ;;  %1039 = vmatprep.subr.bf16.mxu1 %v1085_v10 }
  0x1c   : > { %1005 = vmatpush3.bf16.msra.mxu0 %v1086_v13  ;;  %1047 = vmatpush3.bf16.msra.mxu1 %v1086_v13 }
  0x1d   : > { %1006 = vmatprep.subr.bf16.mxu0 %v1087_v14  ;;  %1040 = vmatprep.subr.bf16.mxu1 %v1087_v14 }
  0x20   : > { %1007 = vmatpush3.bf16.msra.mxu0 %v1088_v15  ;;  %1048 = vmatpush3.bf16.msra.mxu1 %v1088_v15 }
  0x21   : > { %1008 = vmatprep.subr.bf16.mxu0 %v1089_v16  ;;  %1041 = vmatprep.subr.bf16.mxu1 %v1089_v16 }
  0x24   : > { %1009 = vmatpush3.bf16.msra.mxu0 %v1090_v17  ;;  %1049 = vmatpush3.bf16.msra.mxu1 %v1090_v17 }
  0x27   : > { %574 = vmatmul.mubr.bf16.vlgmr.msra.gmra.mrb[0].mxu0 %v1091_v18  ;;  %590 = vmatmul.mubr.bf16.vlgmr.msra.gmra.mrb[0].mxu1 %v1094_v19 }
  0x28   : > { %581 = vmatprep.mubr.bf16.mxu0 %v1097_v20  ;;  %597 = vmatprep.mubr.bf16.mxu1 %v1100_v21  ;;  %v680_v20 = vld [vmem:[%s1239_s9] sm:$0x1] }
  0x2f   : > { %582 = vmatmul.mubr.bf16.gmra.mrb[4].mxu0 %v1099_v22  ;;  %598 = vmatmul.mubr.bf16.gmra.mrb[4].mxu1 %v1102_v23  ;;  %v696_v23 = vld [vmem:[%s1245_s12] sm:$0x1] }
  0xfa   : > { %v1010_v25 = vpop.f32.mrb[0].mxu0  ;;  %v1022_v26 = vpop.f32.mrb[0].mxu1 }
  0xfb   : > { %v1011_v27 = vpop.f32.mrb[1].mxu0  ;;  %v1023_v28 = vpop.f32.mrb[1].mxu1 }
  0xfc   : > { %v1012_v29 = vadd.f32 %v1011_v27, %v1010_v25  ;;  %v1013_v30 = vpop.f32.mrb[2].mxu0  ;;  %v1024_v31 = vadd.f32 %v1023_v28, %v1022_v26  ;;  %v1025_v32 = vpop.f32.mrb[2].mxu1 }
  0xfd   : > { %v1014_v33 = vpop.f32.mrb[3].mxu0  ;;  %v1026_v34 = vpop.f32.mrb[3].mxu1 }
  0xfe   : > { %v1015_v35 = vadd.f32 %v1014_v33, %v1013_v30  ;;  %v1027_v36 = vadd.f32 %v1026_v34, %v1025_v32  ;;  %v697_v37 = vmul.f32 %v1012_v29, %v1012_v29  ;;  %v701_v62 = vmul.f32 %v1024_v31, %v1024_v31 }
 0x100   : > { %v974_v38 = vpack.c.bf16 %v1015_v35, %v1012_v29  ;;  %v681_v39 = vadd.f32 %v1015_v35, %v1012_v29  ;;  %v698_v40 = vmul.f32 %v1015_v35, %v1015_v35  ;;  %v984_v41 = vpack.c.bf16 %v1027_v36, %v1024_v31 }
 0x101   : > { %v702_v1 = vmul.f32 %v1027_v36, %v1027_v36 }
 0x102   : > { %975 = vst [vmem:[%s1253_s20] sm:$0xff] %v974_v38   ;;  %v705_v42 = vadd.f32 %v698_v40, %v697_v37  ;;  %v1016_v43 = vpop.f32.mrb[4].mxu0  ;;  %992 = vst [vmem:[%s1253_s20 + $0x10] sm:$0xff] %v984_v41   ;;  %v1028_v44 = vpop.f32.mrb[4].mxu1 }
 0x103   : > { %v1017_v45 = vpop.f32.mrb[5].mxu0  ;;  %v1029_v46 = vpop.f32.mrb[5].mxu1 }
 0x104   : > { %v1018_v47 = vadd.f32 %v1017_v45, %v1016_v43  ;;  %v1019_v48 = vpop.f32.mrb[6].mxu0  ;;  %v1030_v49 = vadd.f32 %v1029_v46, %v1028_v44  ;;  %v1031_v50 = vpop.f32.mrb[6].mxu1 }
 0x105   : > { %v1020_v51 = vpop.f32.mrb[7].mxu0  ;;  %v1032_v52 = vpop.f32.mrb[7].mxu1 }
 0x106   : > { %v682_v53 = vadd.f32 %v1018_v47, %v681_v39  ;;  %v699_v54 = vmul.f32 %v1018_v47, %v1018_v47  ;;  %v1021_v55 = vadd.f32 %v1020_v51, %v1019_v48  ;;  %v1033_v56 = vadd.f32 %v1032_v52, %v1031_v50 }
 0x107   : > { %v703_v4 = vmul.f32 %v1030_v49, %v1030_v49 }
 0x108   : > { %v706_v57 = vadd.f32 %v705_v42, %v699_v54  ;;  %v979_v58 = vpack.c.bf16 %v1021_v55, %v1018_v47  ;;  %v683_v59 = vadd.f32 %v1021_v55, %v682_v53  ;;  %v700_v60 = vmul.f32 %v1021_v55, %v1021_v55 }
 0x109   : > { %v989_v61 = vpack.c.bf16 %v1033_v56, %v1030_v49  ;;  %v704_v9 = vmul.f32 %v1033_v56, %v1033_v56 }
 0x10a   : > { %991 = vst [vmem:[%s1253_s20 + $0x8] sm:$0xff] %v979_v58   ;;  %v684_v63 = vadd.f32 %v1024_v31, %v683_v59  ;;  %v707_v0 = vadd.f32 %v706_v57, %v700_v60 }
 0x10b   : > { %993 = vst [vmem:[%s1253_s20 + $0x18] sm:$0xff] %v989_v61  }
 0x10c   : > { %v708_v2 = vadd.f32 %v707_v0, %v701_v62  ;;  %v685_v3 = vadd.f32 %v1027_v36, %v684_v63 }
 0x10e   : > { %v686_v5 = vadd.f32 %v1030_v49, %v685_v3  ;;  %v709_v6 = vadd.f32 %v708_v2, %v702_v1 }
 0x110   : > { %v710_v7 = vadd.f32 %v709_v6, %v703_v4  ;;  %v687_v8 = vadd.f32 %v1033_v56, %v686_v5 }
 0x112   : > { %v688_v10 = vrot.slane %v687_v8, 4  ;;  %v711_v11 = vadd.f32 %v710_v7, %v704_v9 }
 0x114   : > { %v689_v12 = vadd.f32 %v688_v10, %v687_v8  ;;  %v712_v13 = vrot.slane %v711_v11, 4 }
 0x116   : > { %v690_v14 = vrot.slane %v689_v12, 2  ;;  %v713_v15 = vadd.f32 %v712_v13, %v711_v11 }
 0x118   : > { %v691_v16 = vadd.f32 %v690_v14, %v689_v12  ;;  %v714_v17 = vrot.slane %v713_v15, 2 }
 0x11a   : > { %v692_v18 = vrot.slane %v691_v16, 1  ;;  %v715_v19 = vadd.f32 %v714_v17, %v713_v15 }
 0x11c   : > { %v693_v21 = vadd.f32 %v692_v18, %v691_v16  ;;  %v716_v22 = vrot.slane %v715_v19, 1 }
 0x11e   : > { %v694_v24 = vadd.f32 %v693_v21, %v680_v20  ;;  %v717_v25 = vadd.f32 %v716_v22, %v715_v19 }
 0x120   : > { %695 = vst [vmem:[%s1239_s9] sm:$0x1] %v694_v24  ;;  %v718_v26 = vadd.f32 %v717_v25, %v696_v23 }
 0x122   : > { %719 = vst [vmem:[%s1245_s12] sm:$0x1] %v718_v26 }
 0x123 PF: > { %s15_s17 = sadd.s32 1, %s1125_s17   ;;  %s1277_s15 = smov %s1121_s16 }
 0x124   : > { %p12_p5 = scmp.ge.s32.totalorder %s15_s17, 4   ;;  %s1278_s16 = smov %s1280_s18 }
 0x126   :  { %14 = sbr.rel (!%p12_p5) target bundleno = 2 (0x2), region = 97 }

// kernel: generator_hd_forward.60
= control target key start
LH: loop header
LB: loop body
LE: loop exit
PB: predicated region body
PF: predicated region fallthrough
CT: control target
= control target key end

     0   :  { %s655_s12 = smov 0   ;;  %s657_s13 = smov 0   ;;  %s703_s0 = inlined_call_operand.vmem [shape: bf16[2,64,128], index: 0, kind: input, shape index: {}]   ;;  %s704_s1 = inlined_call_operand.vmem [shape: f32[2,1,128], index: 1, kind: input, shape index: {}]   ;;  %s705_s2 = inlined_call_operand.vmem [shape: f32[2,1,128], index: 2, kind: input, shape index: {}]   ;;  %s706_s3 = inlined_call_operand.vmem [shape: bf16[2,64,128], index: 3, kind: output, shape index: {}]  }
   0x1   :  { %s659_s14 = smov 0  }
   0x2 LB: > { %s32_s15 = sadd.s32 1, %s629_s13  ;;  %p518_p0 = scmp.ge.s32.totalorder %s633_s14, 1  ;;  %s633_s14 = sphi %s659_s14, %s13_s14   ;;  %s629_s13 = sphi %s657_s13, %s708_s13   ;;  %s625_s12 = sphi %s655_s12, %s707_s12  }
   0x3   : > { %p34_p1 = scmp.ge.s32.totalorder %s32_s15, 2  ;;  %p198_p2 = scmp.lt.s32.totalorder %s633_s14, 3 }
   0x5   : > { %s710_s15 = smov (%p34_p1, %s32_s15), 0  ;;  %p199_p3 = pnand %p518_p0, %p198_p2 }
   0x6   : > { %p249_p4 = scmp.lt.s32.totalorder (!%p199_p3), %s625_s12, 1  ;;  %v310_v5 = vlaneseq (!%p199_p3) }
   0x7   : > { %202 = sbr.rel (%p199_p3) target bundleno = 48 (0x30), region = 32 }
   0x8   : > { %v311_v8 = vshrl.u32 (!%p199_p3), %v310_v5, 7 }
   0xa   : > { %v312_v11 = vsub.s32 (!%p199_p3), 0, %v311_v8 }
   0xe   : > { %s712_s12 = smov (!%p249_p4, %s625_s12), 1 }
   0xf   : > { %s266_s18 = scalar_lea.vmem %s704_s1, %s712_s12  ;;  %s272_s21 = scalar_lea.vmem %s705_s2, %s712_s12 }
  0x10   : > { %v302_v0 = vld [vmem:[%s266_s18] sm:$0x1]  ;;  %s533_s22 = sshll.u32 %s712_s12, 5 }
  0x11   : > { %v303_v1 = vmul.f32 0.015625, %v302_v0  ;;  %v304_v2 = vld [vmem:[%s272_s21] sm:$0x1]  ;;  %s259_s25 = scalar_lea.vmem %s703_s0, %s533_s22  ;;  %s284_s28 = scalar_lea.vmem %s706_s3, %s533_s22 }
  0x12   : > { %v305_v3 = vmul.f32 0.015625, %v304_v2  ;;  %v544_v10 = vld [vmem:[%s259_s25] sm:$0xff]   ;;  %v579_v12 = vld [vmem:[%s259_s25 + $0x8] sm:$0xff]   ;;  %v580_v13 = vld [vmem:[%s259_s25 + $0x10] sm:$0xff]  }
  0x13   : > { %v306_v4 = vmul.f32 %v303_v1, %v303_v1  ;;  %v581_v14 = vld [vmem:[%s259_s25 + $0x18] sm:$0xff]   ;;  %v545_v15 = vunpack.c.l.bf16 %v544_v10  ;;  %v546_v16 = vunpack.c.h.bf16 %v544_v10  ;;  %v313_v17 = vrot.slane %v303_v1, %v312_v11 }
  0x14   : > { %v549_v18 = vunpack.c.l.bf16 %v579_v12  ;;  %v550_v19 = vunpack.c.h.bf16 %v579_v12  ;;  %v553_v20 = vunpack.c.l.bf16 %v580_v13  ;;  %v554_v21 = vunpack.c.h.bf16 %v580_v13 }
  0x15   : > { %v307_v6 = vsub.f32 %v305_v3, %v306_v4  ;;  %v557_v22 = vunpack.c.l.bf16 %v581_v14  ;;  %v558_v23 = vunpack.c.h.bf16 %v581_v14  ;;  %v315_v24 = vsub.f32 %v545_v15, %v313_v17 }
  0x16   : > { %v316_v25 = vsub.f32 %v546_v16, %v313_v17  ;;  %v317_v26 = vsub.f32 %v549_v18, %v313_v17  ;;  %v318_v27 = vsub.f32 %v550_v19, %v313_v17  ;;  %v319_v29 = vsub.f32 %v553_v20, %v313_v17 }
  0x17   : > { %v308_v7 = vmax.f32 %v307_v6, 0.0  ;;  %v320_v30 = vsub.f32 %v554_v21, %v313_v17  ;;  %v321_v31 = vsub.f32 %v557_v22, %v313_v17  ;;  %v322_v32 = vsub.f32 %v558_v23, %v313_v17 }
  0x19   : > { %v323_v9 = vadd.f32 1e-05, %v308_v7 }
  0x1b   : > { %609 = vrsqrt.f32 %v323_v9 }
  0x25   : > { %v610_v28 = vpop.eup %609 }
  0x26   : > { %v329_v33 = vrot.slane %v610_v28, %v312_v11 }
  0x28   : > { %v331_v34 = vmul.f32 %v329_v33, %v315_v24  ;;  %v332_v35 = vmul.f32 %v329_v33, %v316_v25  ;;  %v333_v36 = vmul.f32 %v329_v33, %v317_v26  ;;  %v334_v37 = vmul.f32 %v329_v33, %v318_v27 }
  0x29   : > { %v335_v38 = vmul.f32 %v329_v33, %v319_v29  ;;  %v336_v39 = vmul.f32 %v329_v33, %v320_v30  ;;  %v337_v40 = vmul.f32 %v329_v33, %v321_v31  ;;  %v338_v41 = vmul.f32 %v329_v33, %v322_v32 }
  0x2a   : > { %v339_v42 = vmax.f32 %v331_v34, 0.0  ;;  %v340_v43 = vmax.f32 %v332_v35, 0.0  ;;  %v341_v44 = vmax.f32 %v333_v36, 0.0  ;;  %v342_v45 = vmax.f32 %v334_v37, 0.0 }
  0x2b   : > { %v343_v46 = vmax.f32 %v335_v38, 0.0  ;;  %v344_v47 = vmax.f32 %v336_v39, 0.0  ;;  %v345_v48 = vmax.f32 %v337_v40, 0.0  ;;  %v346_v49 = vmax.f32 %v338_v41, 0.0 }
  0x2c   : > { %v562_v50 = vpack.c.bf16 %v340_v43, %v339_v42  ;;  %v567_v51 = vpack.c.bf16 %v342_v45, %v341_v44 }
  0x2d   : > { %v572_v52 = vpack.c.bf16 %v344_v47, %v343_v46  ;;  %v577_v53 = vpack.c.bf16 %v346_v49, %v345_v48 }
  0x2e   : > { %563 = vst [vmem:[%s284_s28] sm:$0xff] %v562_v50   ;;  %582 = vst [vmem:[%s284_s28 + $0x8] sm:$0xff] %v567_v51  }
  0x2f   : > { %583 = vst [vmem:[%s284_s28 + $0x10] sm:$0xff] %v572_v52   ;;  %584 = vst [vmem:[%s284_s28 + $0x18] sm:$0xff] %v577_v53  }
  0x30 PF: > { %s13_s14 = sadd.s32 1, %s633_s14   ;;  %s707_s12 = smov %s629_s13 }
  0x31   : > { %p10_p5 = scmp.ge.s32.totalorder %s13_s14, 4   ;;  %s708_s13 = smov %s710_s15 }
  0x33   :  { %12 = sbr.rel (!%p10_p5) target bundleno = 2 (0x2), region = 68 }

// kernel: generator_hd_forward.62
= control target key start
LH: loop header
LB: loop body
LE: loop exit
PB: predicated region body
PF: predicated region fallthrough
CT: control target
= control target key end

     0   :  { %s550_s12 = smov 0   ;;  %s552_s13 = smov 0   ;;  %s594_s0 = inlined_call_operand.vmem [shape: bf16[2,16,128], index: 0, kind: input, shape index: {}]   ;;  %s595_s1 = inlined_call_operand.vmem [shape: f32[2,1,128], index: 1, kind: input, shape index: {}]   ;;  %s596_s2 = inlined_call_operand.vmem [shape: f32[2,1,128], index: 2, kind: input, shape index: {}]   ;;  %s597_s3 = inlined_call_operand.vmem [shape: bf16[2,16,128], index: 3, kind: output, shape index: {}]  }
   0x1   :  { %s554_s14 = smov 0  }
   0x2 LB: > { %s32_s15 = sadd.s32 1, %s524_s13  ;;  %p458_p0 = scmp.ge.s32.totalorder %s528_s14, 1  ;;  %s528_s14 = sphi %s554_s14, %s13_s14   ;;  %s524_s13 = sphi %s552_s13, %s599_s13   ;;  %s520_s12 = sphi %s550_s12, %s598_s12  }
   0x3   : > { %p34_p1 = scmp.ge.s32.totalorder %s32_s15, 2  ;;  %p198_p2 = scmp.lt.s32.totalorder %s528_s14, 3 }
   0x5   : > { %s601_s15 = smov (%p34_p1, %s32_s15), 0  ;;  %p199_p3 = pnand %p458_p0, %p198_p2 }
   0x6   : > { %p249_p4 = scmp.lt.s32.totalorder (!%p199_p3), %s520_s12, 1  ;;  %v298_v5 = vlaneseq (!%p199_p3) }
   0x7   : > { %202 = sbr.rel (%p199_p3) target bundleno = 47 (0x2f), region = 32 }
   0x8   : > { %v299_v8 = vshrl.u32 (!%p199_p3), %v298_v5, 7 }
   0xa   : > { %v300_v10 = vsub.s32 (!%p199_p3), 0, %v299_v8 }
   0xe   : > { %s603_s12 = smov (!%p249_p4, %s520_s12), 1 }
   0xf   : > { %s266_s18 = scalar_lea.vmem %s595_s1, %s603_s12  ;;  %s272_s21 = scalar_lea.vmem %s596_s2, %s603_s12 }
  0x10   : > { %v290_v0 = vld [vmem:[%s266_s18] sm:$0x1]  ;;  %s467_s22 = sshll.u32 %s603_s12, 3 }
  0x11   : > { %v291_v1 = vmul.f32 0.0625, %v290_v0  ;;  %v292_v2 = vld [vmem:[%s272_s21] sm:$0x1]  ;;  %s259_s25 = scalar_lea.vmem %s594_s0, %s467_s22  ;;  %s284_s28 = scalar_lea.vmem %s597_s3, %s467_s22 }
  0x12   : > { %v293_v3 = vmul.f32 0.0625, %v292_v2  ;;  %v472_v11 = vld [vmem:[%s259_s25] sm:$0xff]  }
  0x13   : > { %v294_v4 = vmul.f32 %v291_v1, %v291_v1  ;;  %v473_v12 = vunpack.c.l.bf16 %v472_v11  ;;  %v474_v13 = vunpack.c.h.bf16 %v472_v11  ;;  %v301_v14 = vrot.slane %v291_v1, %v300_v10 }
  0x15   : > { %v295_v6 = vsub.f32 %v293_v3, %v294_v4  ;;  %v303_v15 = vsub.f32 %v473_v12, %v301_v14  ;;  %v304_v16 = vsub.f32 %v474_v13, %v301_v14 }
  0x17   : > { %v296_v7 = vmax.f32 %v295_v6, 0.0 }
  0x19   : > { %v305_v9 = vadd.f32 1e-05, %v296_v7 }
  0x1b   : > { %504 = vrsqrt.f32 %v305_v9 }
  0x25   : > { %v505_v17 = vpop.eup %504 }
  0x26   : > { %v311_v18 = vrot.slane %v505_v17, %v300_v10 }
  0x28   : > { %v313_v19 = vmul.f32 %v311_v18, %v303_v15  ;;  %v314_v20 = vmul.f32 %v311_v18, %v304_v16 }
  0x2a   : > { %v315_v21 = vmax.f32 %v313_v19, 0.0  ;;  %v316_v22 = vmax.f32 %v314_v20, 0.0 }
  0x2c   : > { %v478_v23 = vpack.c.bf16 %v316_v22, %v315_v21 }
  0x2e   : > { %479 = vst [vmem:[%s284_s28] sm:$0xff] %v478_v23  }
  0x2f PF: > { %s13_s14 = sadd.s32 1, %s528_s14   ;;  %s598_s12 = smov %s524_s13 }
  0x30   : > { %p10_p5 = scmp.ge.s32.totalorder %s13_s14, 4   ;;  %s599_s13 = smov %s601_s15 }
  0x32   :  { %12 = sbr.rel (!%p10_p5) target bundleno = 2 (0x2), region = 68 }

// kernel: generator_hd_forward.61
= control target key start
LH: loop header
LB: loop body
LE: loop exit
PB: predicated region body
PF: predicated region fallthrough
CT: control target
= control target key end

     0   :  { %s951_s15 = smov 0   ;;  %s953_s16 = smov 0   ;;  %s1081_s0 = inlined_call_operand.vmem [shape: bf16[2,16,384], index: 0, kind: input, shape index: {}]   ;;  %s1082_s1 = inlined_call_operand.vmem [shape: bf16[384,128], index: 1, kind: input, shape index: {}]   ;;  %s1083_s2 = inlined_call_operand.vmem [shape: bf16[2,16,128], index: 2, kind: output, shape index: {0}]   ;;  %s1084_s3 = inlined_call_operand.vmem [shape: f32[2,1,128], index: 3, kind: output, shape index: {1}]   ;;  %s1085_s4 = inlined_call_operand.vmem [shape: f32[2,1,128], index: 4, kind: output, shape index: {2}]  }
   0x1   :  { %s955_s17 = smov 0   ;;  %s957_s18 = smov 0  }
   0x2   :  { %s959_s19 = smov 0   ;;  %s961_s20 = smov 0  }
   0x3   :  { %s963_s21 = smov 0  }
   0x4 LB: > { %s30_s22 = sadd.s32 1, %s912_s19  ;;  %s41_s23 = sadd.s32 1, %s916_s20  ;;  %s920_s21 = sphi %s963_s21, %s15_s21   ;;  %s916_s20 = sphi %s961_s20, %s1091_s20   ;;  %s912_s19 = sphi %s959_s19, %s1090_s19   ;;  %s908_s18 = sphi %s957_s18, %s1089_s18   ;;  %s904_s17 = sphi %s955_s17, %s1088_s17   ;;  %s900_s16 = sphi %s953_s16, %s1087_s16   ;;  %s896_s15 = sphi %s951_s15, %s1086_s15  }
   0x5   : > { %p31_p0 = scmp.ge.s32.totalorder %s30_s22, 3  ;;  %p59_p1 = scmp.ne.s32.totalorder %s900_s16, %s896_s15 }
   0x6   : > { %p60_p2 = scmp.eq.s32.totalorder %s920_s21, 0  ;;  %s52_s27 = sadd.s32 1, %s900_s16 }
   0x7   : > { %s1093_s22 = smov (%p31_p0, %s30_s22), 0  ;;  %s1095_s23 = smov (!%p31_p0, %s41_s23), %s916_s20 }
   0x8   : > { %p61_p3 = por %p60_p2, %p59_p1  ;;  %p43_p4 = scmp.ge.s32.totalorder %s1095_s23, 2 }
   0x9   : > { %s48_s24 = ssub.s32 %s912_s19, %s1093_s22  ;;  %p733_p6 = scmp.ge.s32.totalorder %s920_s21, 6 }
   0xa   : > { %s1097_s23 = smov (%p43_p4, %s1095_s23), 0 }
   0xb   : > { %s45_s25 = ssub.s32 %s916_s20, %s1097_s23  ;;  %199 = sbr.rel (%p733_p6) target bundleno = 26 (0x1a), region = 16 }
   0xc   : > { %s49_s26 = sor.u32 %s48_s24, %s45_s25 }
   0xd   : > { %p50_p5 = scmp.eq.s32.totalorder %s49_s26, 0 }
   0xf   : > { %s1002_s28 = scalar_select %p50_p5, %s900_s16, %s52_s27  }
  0x12   : > { %202 = sbr.rel (!%p61_p3) target bundleno = 26 (0x1a), region = 20  ;;  %s204_s29 = sand.u32 (%p61_p3), 1, %s900_s16  }
  0x13   : > { %s796_s30 = smul.u32 (%p61_p3), 6, %s916_s20  ;;  %s734_s5 = sshll.u32 (%p61_p3), %s204_s29, 3 }
  0x14   : > { %s206_s11 = scalar_lea.vmem (%p61_p3), [#allocation3], %s734_s5 }
  0x15   : > { %s211_s6 = sadd.s32 (%p61_p3), %s912_s19, %s796_s30 }
  0x16   : > { %s735_s7 = sshll.u32 (%p61_p3), %s211_s6, 2 }
  0x17   : > { %s213_s10 = scalar_lea.vmem (%p61_p3), %s1081_s0, %s735_s7 }
  0x18   : > { %v229_v0 = vld [vmem:[%s213_s10] sm:$0xf] (%p61_p3)  ;;  %v231_v1 = vld [vmem:[%s213_s10 + $0xc] sm:$0xf] (%p61_p3) }
  0x19   : > { %230 = vst [vmem:[%s206_s11] sm:$0xf] %v229_v0  ;;  %232 = vst [vmem:[%s206_s11 + $0x4] sm:$0xf] %v231_v1 }
  0x1a PF: > { %p736_p7 = scmp.ge.s32.totalorder %s920_s21, 1  ;;  %p270_p8 = scmp.lt.s32.totalorder %s920_s21, 7 }
  0x1c   : > { %p271_p9 = pnand %p736_p7, %p270_p8 }
  0x1d   : > { %s277_s12 = sand.u32 (!%p271_p9), 1, %s896_s15   ;;  %s738_s13 = sshll.u32 (!%p271_p9), %s904_s17, 4 }
  0x1e   : > { %274 = sbr.rel (%p271_p9) target bundleno = 324 (0x144), region = 65  ;;  %s1015_s14 = sshll.u32 (!%p271_p9), %s277_s12, 3 }
  0x1f   : > { %p331_p10 = scmp.lt.s32.totalorder (!%p271_p9), %s738_s13, 47  ;;  %p340_p11 = scmp.lt.s32.totalorder (!%p271_p9), %s908_s18, 1 }
  0x20   : > { %s279_s12 = scalar_lea.vmem (!%p271_p9), [#allocation3], %s1015_s14  ;;  %p742_p12 = scmp.ne.s32.totalorder (!%p271_p9), %s904_s17, 0 }
  0x25   : > { %s1099_s13 = smov (!%p331_p10, %s738_s13), 47  ;;  %s1101_s18 = smov (!%p340_p11, %s908_s18), 1 }
  0x26   : > { %s739_s24 = sshll.u32 %s1099_s13, 2  ;;  %s758_s29 = sshll.u32 %s1101_s18, 3  ;;  %v922_v2 = vmov (!%p742_p12), 0.0  }
  0x27   : > { %s1022_s27 = scalar_lea.vmem %s1082_s1, %s739_s24  ;;  %s1027_s6 = scalar_lea.vmem %s1083_s2, %s758_s29  ;;  %369 = vst [vmem:[#allocation2] sm:$0xff] (!%p742_p12), %v922_v2  ;;  %370 = vst [vmem:[#allocation2 + $0x8] sm:$0xff] (!%p742_p12), %v922_v2 }
  0x28   : > { %s1032_s8 = scalar_lea.vmem %s1084_s3, %s1101_s18  ;;  %s1037_s11 = scalar_lea.vmem %s1085_s4, %s1101_s18 }
  0x29   : > { %368 = sbr.rel (%p742_p12) target bundleno = 48 (0x30), region = 73 }
  0x30 PF: > { %v857_v3 = vld [vmem:[%s1022_s27] sm:$0xff]   ;;  %v923_v4 = vmov 0.0   ;;  %v858_v5 = vld [vmem:[%s1022_s27 + $0x8] sm:$0xff]   ;;  %vm924_vm0 = vmmov 0   ;;  %v859_v6 = vld [vmem:[%s1022_s27 + $0x10] sm:$0xff]   ;;  %p490_p13 = scmp.eq.s32.totalorder %s904_s17, 2 }
  0x31   : > { %776 = vmatprep.subr.bf16.mxu0 %v923_v4  ;;  %792 = vmatprep.mubr.msk.bf16.mxu0 %vm924_vm0, %v923_v4  ;;  %v860_v7 = vld [vmem:[%s1022_s27 + $0x18] sm:$0xff]   ;;  %v861_v8 = vld [vmem:[%s1022_s27 + $0x20] sm:$0xff]   ;;  %v862_v9 = vld [vmem:[%s1022_s27 + $0x28] sm:$0xff]   ;;  %v925_v21 = vmov (%p490_p13), 0.0  }
  0x32   : > { %777 = vmatpush3.bf16.msra.mxu0 %v857_v3  ;;  %v863_v10 = vld [vmem:[%s1022_s27 + $0x30] sm:$0xff]   ;;  %v864_v11 = vld [vmem:[%s1022_s27 + $0x38] sm:$0xff]   ;;  %v371_v13 = vld [vmem:[#allocation2] sm:$0xff]  ;;  %496 = vst [vmem:[%s1032_s8] sm:$0x1] (%p490_p13), %v925_v21 }
  0x33   : > { %778 = vmatprep.subr.bf16.mxu0 %v923_v4  ;;  %v865_v12 = vld [vmem:[%s279_s12] sm:$0xff]   ;;  %v372_v15 = vld [vmem:[#allocation2 + $0x8] sm:$0xff]  ;;  %497 = vst [vmem:[%s1037_s11] sm:$0x1] (%p490_p13), %v925_v21 }
  0x36   : > { %779 = vmatpush3.bf16.msra.mxu0 %v858_v5 }
  0x37   : > { %780 = vmatprep.subr.bf16.mxu0 %v923_v4 }
  0x3a   : > { %781 = vmatpush3.bf16.msra.mxu0 %v859_v6 }
  0x3b   : > { %782 = vmatprep.subr.bf16.mxu0 %v923_v4 }
  0x3e   : > { %783 = vmatpush3.bf16.msra.mxu0 %v860_v7 }
  0x3f   : > { %784 = vmatprep.subr.bf16.mxu0 %v923_v4 }
  0x42   : > { %785 = vmatpush3.bf16.msra.mxu0 %v861_v8 }
  0x43   : > { %786 = vmatprep.subr.bf16.mxu0 %v923_v4 }
  0x46   : > { %787 = vmatpush3.bf16.msra.mxu0 %v862_v9 }
  0x47   : > { %788 = vmatprep.subr.bf16.mxu0 %v923_v4 }
  0x4a   : > { %789 = vmatpush3.bf16.msra.mxu0 %v863_v10 }
  0x4b   : > { %790 = vmatprep.subr.bf16.mxu0 %v923_v4 }
  0x4e   : > { %791 = vmatpush3.bf16.msra.mxu0 %v864_v11 }
  0x51   : > { %793 = vmatmul.mubr.bf16.vlgmr.msra.gmra.mrb[0].mxu0 %v865_v12 }
 0x123   : > { %495 = sbr.rel (!%p490_p13) target bundleno = 298 (0x12a), region = 77 }
 0x124   : > { %v479_v14 = vpop.f32.mrb[0].mxu0 }
 0x125   : > { %v486_v16 = vadd.f32 %v479_v14, %v371_v13  ;;  %v794_v17 = vpop.f32.mrb[1].mxu0 }
 0x126   : > { %v482_v18 = vpop.f32.mrb[2].mxu0 }
 0x127   : > { %488 = vst [vmem:[#allocation2] sm:$0xff] %v486_v16  ;;  %v487_v19 = vadd.f32 %v482_v18, %v372_v15  ;;  %v795_v20 = vpop.f32.mrb[3].mxu0 }
 0x129   : > { %489 = vst [vmem:[#allocation2 + $0x8] sm:$0xff] %v487_v19 }
 0x12a PF: > { %p753_p0 = scmp.ne.s32.totalorder %s904_s17, 2 }
 0x12b   : > { %v513_v38 = vld [vmem:[%s1032_s8] sm:$0x1] (!%p753_p0) }
 0x12c   : > { %500 = sbr.rel (%p753_p0) target bundleno = 324 (0x144), region = 81  ;;  %v523_v41 = vld [vmem:[%s1037_s11] sm:$0x1] (!%p753_p0) }
 0x12e   : > { %v501_v22 = vld [vmem:[#allocation2] sm:$0xff] (!%p753_p0) }
 0x12f   : > { %v524_v26 = vmul.f32 (!%p753_p0), %v501_v22, %v501_v22 }
 0x130   : > { %v502_v23 = vld [vmem:[#allocation2 + $0x8] sm:$0xff] (!%p753_p0) }
 0x131   : > { %v765_v24 = vpack.c.bf16 (!%p753_p0), %v502_v23, %v501_v22  ;;  %v514_v25 = vadd.f32 (!%p753_p0), %v502_v23, %v501_v22  ;;  %v525_v27 = vmul.f32 (!%p753_p0), %v502_v23, %v502_v23 }
 0x133   : > { %766 = vst [vmem:[%s1027_s6] sm:$0xff] %v765_v24   ;;  %v515_v28 = vrot.slane %v514_v25, 4  ;;  %v526_v29 = vadd.f32 %v525_v27, %v524_v26 }
 0x135   : > { %v516_v30 = vadd.f32 %v515_v28, %v514_v25  ;;  %v527_v31 = vrot.slane %v526_v29, 4 }
 0x137   : > { %v517_v32 = vrot.slane %v516_v30, 2  ;;  %v528_v33 = vadd.f32 %v527_v31, %v526_v29 }
 0x139   : > { %v518_v34 = vadd.f32 %v517_v32, %v516_v30  ;;  %v529_v35 = vrot.slane %v528_v33, 2 }
 0x13b   : > { %v519_v36 = vrot.slane %v518_v34, 1  ;;  %v530_v37 = vadd.f32 %v529_v35, %v528_v33 }
 0x13d   : > { %v520_v39 = vadd.f32 %v519_v36, %v518_v34  ;;  %v531_v40 = vrot.slane %v530_v37, 1 }
 0x13f   : > { %v521_v42 = vadd.f32 %v520_v39, %v513_v38  ;;  %v532_v43 = vadd.f32 %v531_v40, %v530_v37 }
 0x141   : > { %522 = vst [vmem:[%s1032_s8] sm:$0x1] %v521_v42  ;;  %v533_v44 = vadd.f32 %v532_v43, %v523_v41 }
 0x143   : > { %534 = vst [vmem:[%s1037_s11] sm:$0x1] %v533_v44 }
 0x144 PF: > { %s15_s21 = sadd.s32 1, %s920_s21   ;;  %s1086_s15 = smov %s900_s16 }
 0x145   : > { %p12_p1 = scmp.ge.s32.totalorder %s15_s21, 8   ;;  %s1087_s16 = smov %s1002_s28 }
 0x146   : > { %s1088_s17 = smov %s912_s19  ;;  %s1089_s18 = smov %s916_s20 }
 0x147   : > { %s1090_s19 = smov %s1093_s22  ;;  %s1091_s20 = smov %s1097_s23 }
 0x148   :  { %14 = sbr.rel (!%p12_p1) target bundleno = 4 (0x4), region = 143 }

// kernel: generator_hd_forward.64
= control target key start
LH: loop header
LB: loop body
LE: loop exit
PB: predicated region body
PF: predicated region fallthrough
CT: control target
= control target key end

     0   :  { %s550_s12 = smov 0   ;;  %s552_s13 = smov 0   ;;  %s594_s0 = inlined_call_operand.vmem [shape: bf16[2,16,128], index: 0, kind: input, shape index: {}]   ;;  %s595_s1 = inlined_call_operand.vmem [shape: f32[2,1,128], index: 1, kind: input, shape index: {}]   ;;  %s596_s2 = inlined_call_operand.vmem [shape: f32[2,1,128], index: 2, kind: input, shape index: {}]   ;;  %s597_s3 = inlined_call_operand.vmem [shape: bf16[2,16,128], index: 3, kind: output, shape index: {}]  }
   0x1   :  { %s554_s14 = smov 0  }
   0x2 LB: > { %s32_s15 = sadd.s32 1, %s524_s13  ;;  %p458_p0 = scmp.ge.s32.totalorder %s528_s14, 1  ;;  %s528_s14 = sphi %s554_s14, %s13_s14   ;;  %s524_s13 = sphi %s552_s13, %s599_s13   ;;  %s520_s12 = sphi %s550_s12, %s598_s12  }
   0x3   : > { %p34_p1 = scmp.ge.s32.totalorder %s32_s15, 2  ;;  %p198_p2 = scmp.lt.s32.totalorder %s528_s14, 3 }
   0x5   : > { %s601_s15 = smov (%p34_p1, %s32_s15), 0  ;;  %p199_p3 = pnand %p458_p0, %p198_p2 }
   0x6   : > { %p249_p4 = scmp.lt.s32.totalorder (!%p199_p3), %s520_s12, 1  ;;  %v298_v5 = vlaneseq (!%p199_p3) }
   0x7   : > { %202 = sbr.rel (%p199_p3) target bundleno = 47 (0x2f), region = 32 }
   0x8   : > { %v299_v8 = vshrl.u32 (!%p199_p3), %v298_v5, 7 }
   0xa   : > { %v300_v10 = vsub.s32 (!%p199_p3), 0, %v299_v8 }
   0xe   : > { %s603_s12 = smov (!%p249_p4, %s520_s12), 1 }
   0xf   : > { %s266_s18 = scalar_lea.vmem %s595_s1, %s603_s12  ;;  %s272_s21 = scalar_lea.vmem %s596_s2, %s603_s12 }
  0x10   : > { %v290_v0 = vld [vmem:[%s266_s18] sm:$0x1]  ;;  %s467_s22 = sshll.u32 %s603_s12, 3 }
  0x11   : > { %v291_v1 = vmul.f32 0.25, %v290_v0  ;;  %v292_v2 = vld [vmem:[%s272_s21] sm:$0x1]  ;;  %s259_s25 = scalar_lea.vmem %s594_s0, %s467_s22  ;;  %s284_s28 = scalar_lea.vmem %s597_s3, %s467_s22 }
  0x12   : > { %v293_v3 = vmul.f32 0.25, %v292_v2  ;;  %v472_v11 = vld [vmem:[%s259_s25] sm:$0xff]  }
  0x13   : > { %v294_v4 = vmul.f32 %v291_v1, %v291_v1  ;;  %v473_v12 = vunpack.c.l.bf16 %v472_v11  ;;  %v474_v13 = vunpack.c.h.bf16 %v472_v11  ;;  %v301_v14 = vrot.slane %v291_v1, %v300_v10 }
  0x15   : > { %v295_v6 = vsub.f32 %v293_v3, %v294_v4  ;;  %v303_v15 = vsub.f32 %v473_v12, %v301_v14  ;;  %v304_v16 = vsub.f32 %v474_v13, %v301_v14 }
  0x17   : > { %v296_v7 = vmax.f32 %v295_v6, 0.0 }
  0x19   : > { %v305_v9 = vadd.f32 1e-05, %v296_v7 }
  0x1b   : > { %504 = vrsqrt.f32 %v305_v9 }
  0x25   : > { %v505_v17 = vpop.eup %504 }
  0x26   : > { %v311_v18 = vrot.slane %v505_v17, %v300_v10 }
  0x28   : > { %v313_v19 = vmul.f32 %v311_v18, %v303_v15  ;;  %v314_v20 = vmul.f32 %v311_v18, %v304_v16 }
  0x2a   : > { %v315_v21 = vmax.f32 %v313_v19, 0.0  ;;  %v316_v22 = vmax.f32 %v314_v20, 0.0 }
  0x2c   : > { %v478_v23 = vpack.c.bf16 %v316_v22, %v315_v21 }
  0x2e   : > { %479 = vst [vmem:[%s284_s28] sm:$0xff] %v478_v23  }
  0x2f PF: > { %s13_s14 = sadd.s32 1, %s528_s14   ;;  %s598_s12 = smov %s524_s13 }
  0x30   : > { %p10_p5 = scmp.ge.s32.totalorder %s13_s14, 4   ;;  %s599_s13 = smov %s601_s15 }
  0x32   :  { %12 = sbr.rel (!%p10_p5) target bundleno = 2 (0x2), region = 68 }

// kernel: generator_hd_forward.63
= control target key start
LH: loop header
LB: loop body
LE: loop exit
PB: predicated region body
PF: predicated region fallthrough
CT: control target
= control target key end

     0   :  { %s951_s15 = smov 0   ;;  %s953_s16 = smov 0   ;;  %s1081_s0 = inlined_call_operand.vmem [shape: bf16[2,16,640], index: 0, kind: input, shape index: {}]   ;;  %s1082_s1 = inlined_call_operand.vmem [shape: bf16[640,128], index: 1, kind: input, shape index: {}]   ;;  %s1083_s2 = inlined_call_operand.vmem [shape: bf16[2,16,128], index: 2, kind: output, shape index: {0}]   ;;  %s1084_s3 = inlined_call_operand.vmem [shape: f32[2,1,128], index: 3, kind: output, shape index: {1}]   ;;  %s1085_s4 = inlined_call_operand.vmem [shape: f32[2,1,128], index: 4, kind: output, shape index: {2}]  }
   0x1   :  { %s955_s17 = smov 0   ;;  %s957_s18 = smov 0  }
   0x2   :  { %s959_s19 = smov 0   ;;  %s961_s20 = smov 0  }
   0x3   :  { %s963_s21 = smov 0  }
   0x4 LB: > { %s30_s22 = sadd.s32 1, %s912_s19  ;;  %s41_s23 = sadd.s32 1, %s916_s20  ;;  %s920_s21 = sphi %s963_s21, %s15_s21   ;;  %s916_s20 = sphi %s961_s20, %s1091_s20   ;;  %s912_s19 = sphi %s959_s19, %s1090_s19   ;;  %s908_s18 = sphi %s957_s18, %s1089_s18   ;;  %s904_s17 = sphi %s955_s17, %s1088_s17   ;;  %s900_s16 = sphi %s953_s16, %s1087_s16   ;;  %s896_s15 = sphi %s951_s15, %s1086_s15  }
   0x5   : > { %p31_p0 = scmp.ge.s32.totalorder %s30_s22, 5  ;;  %p59_p1 = scmp.ne.s32.totalorder %s900_s16, %s896_s15 }
   0x6   : > { %p60_p2 = scmp.eq.s32.totalorder %s920_s21, 0  ;;  %s52_s27 = sadd.s32 1, %s900_s16 }
   0x7   : > { %s1093_s22 = smov (%p31_p0, %s30_s22), 0  ;;  %s1095_s23 = smov (!%p31_p0, %s41_s23), %s916_s20 }
   0x8   : > { %p61_p3 = por %p60_p2, %p59_p1  ;;  %p43_p4 = scmp.ge.s32.totalorder %s1095_s23, 2 }
   0x9   : > { %s48_s24 = ssub.s32 %s912_s19, %s1093_s22  ;;  %p733_p6 = scmp.ge.s32.totalorder %s920_s21, 10 }
   0xa   : > { %s1097_s23 = smov (%p43_p4, %s1095_s23), 0 }
   0xb   : > { %s45_s25 = ssub.s32 %s916_s20, %s1097_s23  ;;  %199 = sbr.rel (%p733_p6) target bundleno = 26 (0x1a), region = 16 }
   0xc   : > { %s49_s26 = sor.u32 %s48_s24, %s45_s25 }
   0xd   : > { %p50_p5 = scmp.eq.s32.totalorder %s49_s26, 0 }
   0xf   : > { %s1002_s28 = scalar_select %p50_p5, %s900_s16, %s52_s27  }
  0x12   : > { %202 = sbr.rel (!%p61_p3) target bundleno = 26 (0x1a), region = 20  ;;  %s204_s29 = sand.u32 (%p61_p3), 1, %s900_s16  }
  0x13   : > { %s796_s30 = smul.u32 (%p61_p3), 10, %s916_s20  ;;  %s734_s5 = sshll.u32 (%p61_p3), %s204_s29, 3 }
  0x14   : > { %s206_s11 = scalar_lea.vmem (%p61_p3), [#allocation3], %s734_s5 }
  0x15   : > { %s211_s6 = sadd.s32 (%p61_p3), %s912_s19, %s796_s30 }
  0x16   : > { %s735_s7 = sshll.u32 (%p61_p3), %s211_s6, 2 }
  0x17   : > { %s213_s10 = scalar_lea.vmem (%p61_p3), %s1081_s0, %s735_s7 }
  0x18   : > { %v229_v0 = vld [vmem:[%s213_s10] sm:$0xf] (%p61_p3)  ;;  %v231_v1 = vld [vmem:[%s213_s10 + $0x14] sm:$0xf] (%p61_p3) }
  0x19   : > { %230 = vst [vmem:[%s206_s11] sm:$0xf] %v229_v0  ;;  %232 = vst [vmem:[%s206_s11 + $0x4] sm:$0xf] %v231_v1 }
  0x1a PF: > { %p736_p7 = scmp.ge.s32.totalorder %s920_s21, 1  ;;  %p270_p8 = scmp.lt.s32.totalorder %s920_s21, 11 }
  0x1c   : > { %p271_p9 = pnand %p736_p7, %p270_p8 }
  0x1d   : > { %s277_s12 = sand.u32 (!%p271_p9), 1, %s896_s15   ;;  %s738_s13 = sshll.u32 (!%p271_p9), %s904_s17, 4 }
  0x1e   : > { %274 = sbr.rel (%p271_p9) target bundleno = 324 (0x144), region = 65  ;;  %s1015_s14 = sshll.u32 (!%p271_p9), %s277_s12, 3 }
  0x1f   : > { %p331_p10 = scmp.lt.s32.totalorder (!%p271_p9), %s738_s13, 79  ;;  %p340_p11 = scmp.lt.s32.totalorder (!%p271_p9), %s908_s18, 1 }
  0x20   : > { %s279_s12 = scalar_lea.vmem (!%p271_p9), [#allocation3], %s1015_s14  ;;  %p742_p12 = scmp.ne.s32.totalorder (!%p271_p9), %s904_s17, 0 }
  0x25   : > { %s1099_s13 = smov (!%p331_p10, %s738_s13), 79  ;;  %s1101_s18 = smov (!%p340_p11, %s908_s18), 1 }
  0x26   : > { %s739_s24 = sshll.u32 %s1099_s13, 2  ;;  %s758_s29 = sshll.u32 %s1101_s18, 3  ;;  %v922_v2 = vmov (!%p742_p12), 0.0  }
  0x27   : > { %s1022_s27 = scalar_lea.vmem %s1082_s1, %s739_s24  ;;  %s1027_s6 = scalar_lea.vmem %s1083_s2, %s758_s29  ;;  %369 = vst [vmem:[#allocation2] sm:$0xff] (!%p742_p12), %v922_v2  ;;  %370 = vst [vmem:[#allocation2 + $0x8] sm:$0xff] (!%p742_p12), %v922_v2 }
  0x28   : > { %s1032_s8 = scalar_lea.vmem %s1084_s3, %s1101_s18  ;;  %s1037_s11 = scalar_lea.vmem %s1085_s4, %s1101_s18 }
  0x29   : > { %368 = sbr.rel (%p742_p12) target bundleno = 48 (0x30), region = 73 }
  0x30 PF: > { %v857_v3 = vld [vmem:[%s1022_s27] sm:$0xff]   ;;  %v923_v4 = vmov 0.0   ;;  %v858_v5 = vld [vmem:[%s1022_s27 + $0x8] sm:$0xff]   ;;  %vm924_vm0 = vmmov 0   ;;  %v859_v6 = vld [vmem:[%s1022_s27 + $0x10] sm:$0xff]   ;;  %p490_p13 = scmp.eq.s32.totalorder %s904_s17, 4 }
  0x31   : > { %776 = vmatprep.subr.bf16.mxu0 %v923_v4  ;;  %792 = vmatprep.mubr.msk.bf16.mxu0 %vm924_vm0, %v923_v4  ;;  %v860_v7 = vld [vmem:[%s1022_s27 + $0x18] sm:$0xff]   ;;  %v861_v8 = vld [vmem:[%s1022_s27 + $0x20] sm:$0xff]   ;;  %v862_v9 = vld [vmem:[%s1022_s27 + $0x28] sm:$0xff]   ;;  %v925_v21 = vmov (%p490_p13), 0.0  }
  0x32   : > { %777 = vmatpush3.bf16.msra.mxu0 %v857_v3  ;;  %v863_v10 = vld [vmem:[%s1022_s27 + $0x30] sm:$0xff]   ;;  %v864_v11 = vld [vmem:[%s1022_s27 + $0x38] sm:$0xff]   ;;  %v371_v13 = vld [vmem:[#allocation2] sm:$0xff]  ;;  %496 = vst [vmem:[%s1032_s8] sm:$0x1] (%p490_p13), %v925_v21 }
  0x33   : > { %778 = vmatprep.subr.bf16.mxu0 %v923_v4  ;;  %v865_v12 = vld [vmem:[%s279_s12] sm:$0xff]   ;;  %v372_v15 = vld [vmem:[#allocation2 + $0x8] sm:$0xff]  ;;  %497 = vst [vmem:[%s1037_s11] sm:$0x1] (%p490_p13), %v925_v21 }
  0x36   : > { %779 = vmatpush3.bf16.msra.mxu0 %v858_v5 }
  0x37   : > { %780 = vmatprep.subr.bf16.mxu0 %v923_v4 }
  0x3a   : > { %781 = vmatpush3.bf16.msra.mxu0 %v859_v6 }
  0x3b   : > { %782 = vmatprep.subr.bf16.mxu0 %v923_v4 }
  0x3e   : > { %783 = vmatpush3.bf16.msra.mxu0 %v860_v7 }
  0x3f   : > { %784 = vmatprep.subr.bf16.mxu0 %v923_v4 }
  0x42   : > { %785 = vmatpush3.bf16.msra.mxu0 %v861_v8 }
  0x43   : > { %786 = vmatprep.subr.bf16.mxu0 %v923_v4 }
  0x46   : > { %787 = vmatpush3.bf16.msra.mxu0 %v862_v9 }
  0x47   : > { %788 = vmatprep.subr.bf16.mxu0 %v923_v4 }
  0x4a   : > { %789 = vmatpush3.bf16.msra.mxu0 %v863_v10 }
  0x4b   : > { %790 = vmatprep.subr.bf16.mxu0 %v923_v4 }
  0x4e   : > { %791 = vmatpush3.bf16.msra.mxu0 %v864_v11 }
  0x51   : > { %793 = vmatmul.mubr.bf16.vlgmr.msra.gmra.mrb[0].mxu0 %v865_v12 }
 0x123   : > { %495 = sbr.rel (!%p490_p13) target bundleno = 298 (0x12a), region = 77 }
 0x124   : > { %v479_v14 = vpop.f32.mrb[0].mxu0 }
 0x125   : > { %v486_v16 = vadd.f32 %v479_v14, %v371_v13  ;;  %v794_v17 = vpop.f32.mrb[1].mxu0 }
 0x126   : > { %v482_v18 = vpop.f32.mrb[2].mxu0 }
 0x127   : > { %488 = vst [vmem:[#allocation2] sm:$0xff] %v486_v16  ;;  %v487_v19 = vadd.f32 %v482_v18, %v372_v15  ;;  %v795_v20 = vpop.f32.mrb[3].mxu0 }
 0x129   : > { %489 = vst [vmem:[#allocation2 + $0x8] sm:$0xff] %v487_v19 }
 0x12a PF: > { %p753_p0 = scmp.ne.s32.totalorder %s904_s17, 4 }
 0x12b   : > { %v513_v38 = vld [vmem:[%s1032_s8] sm:$0x1] (!%p753_p0) }
 0x12c   : > { %500 = sbr.rel (%p753_p0) target bundleno = 324 (0x144), region = 81  ;;  %v523_v41 = vld [vmem:[%s1037_s11] sm:$0x1] (!%p753_p0) }
 0x12e   : > { %v501_v22 = vld [vmem:[#allocation2] sm:$0xff] (!%p753_p0) }
 0x12f   : > { %v524_v26 = vmul.f32 (!%p753_p0), %v501_v22, %v501_v22 }
 0x130   : > { %v502_v23 = vld [vmem:[#allocation2 + $0x8] sm:$0xff] (!%p753_p0) }
 0x131   : > { %v765_v24 = vpack.c.bf16 (!%p753_p0), %v502_v23, %v501_v22  ;;  %v514_v25 = vadd.f32 (!%p753_p0), %v502_v23, %v501_v22  ;;  %v525_v27 = vmul.f32 (!%p753_p0), %v502_v23, %v502_v23 }
 0x133   : > { %766 = vst [vmem:[%s1027_s6] sm:$0xff] %v765_v24   ;;  %v515_v28 = vrot.slane %v514_v25, 4  ;;  %v526_v29 = vadd.f32 %v525_v27, %v524_v26 }
 0x135   : > { %v516_v30 = vadd.f32 %v515_v28, %v514_v25  ;;  %v527_v31 = vrot.slane %v526_v29, 4 }
 0x137   : > { %v517_v32 = vrot.slane %v516_v30, 2  ;;  %v528_v33 = vadd.f32 %v527_v31, %v526_v29 }
 0x139   : > { %v518_v34 = vadd.f32 %v517_v32, %v516_v30  ;;  %v529_v35 = vrot.slane %v528_v33, 2 }
 0x13b   : > { %v519_v36 = vrot.slane %v518_v34, 1  ;;  %v530_v37 = vadd.f32 %v529_v35, %v528_v33 }
 0x13d   : > { %v520_v39 = vadd.f32 %v519_v36, %v518_v34  ;;  %v531_v40 = vrot.slane %v530_v37, 1 }
 0x13f   : > { %v521_v42 = vadd.f32 %v520_v39, %v513_v38  ;;  %v532_v43 = vadd.f32 %v531_v40, %v530_v37 }
 0x141   : > { %522 = vst [vmem:[%s1032_s8] sm:$0x1] %v521_v42  ;;  %v533_v44 = vadd.f32 %v532_v43, %v523_v41 }
 0x143   : > { %534 = vst [vmem:[%s1037_s11] sm:$0x1] %v533_v44 }
 0x144 PF: > { %s15_s21 = sadd.s32 1, %s920_s21   ;;  %s1086_s15 = smov %s900_s16 }
 0x145   : > { %p12_p1 = scmp.ge.s32.totalorder %s15_s21, 12   ;;  %s1087_s16 = smov %s1002_s28 }
 0x146   : > { %s1088_s17 = smov %s912_s19  ;;  %s1089_s18 = smov %s916_s20 }
 0x147   : > { %s1090_s19 = smov %s1093_s22  ;;  %s1091_s20 = smov %s1097_s23 }
 0x148   :  { %14 = sbr.rel (!%p12_p1) target bundleno = 4 (0x4), region = 143 }

// kernel: generator_hd_forward.68
= control target key start
LH: loop header
LB: loop body
LE: loop exit
PB: predicated region body
PF: predicated region fallthrough
CT: control target
= control target key end

     0   :  { %s661_s15 = smov 0   ;;  %s663_s16 = smov 0   ;;  %s703_s0 = inlined_call_operand.vmem [shape: bf16[2,16,128], index: 0, kind: input, shape index: {}]   ;;  %s704_s1 = inlined_call_operand.vmem [shape: f32[2,1,128], index: 1, kind: input, shape index: {}]   ;;  %s705_s2 = inlined_call_operand.vmem [shape: f32[2,1,128], index: 2, kind: input, shape index: {}]   ;;  %s706_s3 = inlined_call_operand.vmem [shape: bf16[2,16,128], index: 3, kind: input, shape index: {}]   ;;  %s707_s4 = inlined_call_operand.vmem [shape: bf16[2,16,128], index: 4, kind: output, shape index: {}]  }
   0x1   :  { %s665_s17 = smov 0  }
   0x2 LB: > { %s33_s18 = sadd.s32 1, %s630_s16  ;;  %p557_p0 = scmp.ge.s32.totalorder %s634_s17, 1  ;;  %s634_s17 = sphi %s665_s17, %s14_s17   ;;  %s630_s16 = sphi %s663_s16, %s709_s16   ;;  %s626_s15 = sphi %s661_s15, %s708_s15  }
   0x3   : > { %p35_p1 = scmp.ge.s32.totalorder %s33_s18, 2  ;;  %p245_p2 = scmp.lt.s32.totalorder %s634_s17, 3 }
   0x5   : > { %s711_s18 = smov (%p35_p1, %s33_s18), 0  ;;  %p246_p3 = pnand %p557_p0, %p245_p2 }
   0x6   : > { %p310_p4 = scmp.lt.s32.totalorder (!%p246_p3), %s626_s15, 1  ;;  %v372_v5 = vlaneseq (!%p246_p3) }
   0x7   : > { %249 = sbr.rel (%p246_p3) target bundleno = 47 (0x2f), region = 36 }
   0x8   : > { %v373_v8 = vshrl.u32 (!%p246_p3), %v372_v5, 7 }
   0xa   : > { %v374_v10 = vsub.s32 (!%p246_p3), 0, %v373_v8 }
   0xe   : > { %s713_s15 = smov (!%p310_p4, %s626_s15), 1 }
   0xf   : > { %s327_s21 = scalar_lea.vmem %s704_s1, %s713_s15  ;;  %s333_s24 = scalar_lea.vmem %s705_s2, %s713_s15 }
  0x10   : > { %v364_v0 = vld [vmem:[%s327_s21] sm:$0x1]  ;;  %s568_s25 = sshll.u32 %s713_s15, 3 }
  0x11   : > { %v365_v1 = vmul.f32 0.25, %v364_v0  ;;  %v366_v2 = vld [vmem:[%s333_s24] sm:$0x1]  ;;  %s320_s28 = scalar_lea.vmem %s703_s0, %s568_s25  ;;  %s345_s5 = scalar_lea.vmem %s706_s3, %s568_s25 }
  0x12   : > { %v367_v3 = vmul.f32 0.25, %v366_v2  ;;  %v574_v11 = vld [vmem:[%s320_s28] sm:$0xff]   ;;  %s358_s8 = scalar_lea.vmem %s707_s4, %s568_s25 }
  0x13   : > { %v368_v4 = vmul.f32 %v365_v1, %v365_v1  ;;  %v575_v12 = vunpack.c.l.bf16 %v574_v11  ;;  %v576_v13 = vunpack.c.h.bf16 %v574_v11  ;;  %v375_v14 = vrot.slane %v365_v1, %v374_v10  ;;  %v578_v15 = vld [vmem:[%s345_s5] sm:$0xff]  }
  0x14   : > { %v579_v20 = vunpack.c.l.bf16 %v578_v15  ;;  %v580_v21 = vunpack.c.h.bf16 %v578_v15 }
  0x15   : > { %v369_v6 = vsub.f32 %v367_v3, %v368_v4  ;;  %v377_v16 = vsub.f32 %v575_v12, %v375_v14  ;;  %v378_v17 = vsub.f32 %v576_v13, %v375_v14 }
  0x17   : > { %v370_v7 = vmax.f32 %v369_v6, 0.0 }
  0x19   : > { %v379_v9 = vadd.f32 1e-05, %v370_v7 }
  0x1b   : > { %610 = vrsqrt.f32 %v379_v9 }
  0x25   : > { %v611_v18 = vpop.eup %610 }
  0x26   : > { %v385_v19 = vrot.slane %v611_v18, %v374_v10 }
  0x28   : > { %v387_v22 = vmul.f32 %v385_v19, %v377_v16  ;;  %v388_v23 = vmul.f32 %v385_v19, %v378_v17 }
  0x2a   : > { %v393_v24 = vadd.f32 %v579_v20, %v387_v22  ;;  %v394_v25 = vadd.f32 %v580_v21, %v388_v23 }
  0x2c   : > { %v584_v26 = vpack.c.bf16 %v394_v25, %v393_v24 }
  0x2e   : > { %585 = vst [vmem:[%s358_s8] sm:$0xff] %v584_v26  }
  0x2f PF: > { %s14_s17 = sadd.s32 1, %s634_s17   ;;  %s708_s15 = smov %s630_s16 }
  0x30   : > { %p11_p5 = scmp.ge.s32.totalorder %s14_s17, 4   ;;  %s709_s16 = smov %s711_s18 }
  0x32   :  { %13 = sbr.rel (!%p11_p5) target bundleno = 2 (0x2), region = 75 }

// kernel: generator_hd_forward.65
= control target key start
LH: loop header
LB: loop body
LE: loop exit
PB: predicated region body
PF: predicated region fallthrough
CT: control target
= control target key end

     0   :  { %s951_s15 = smov 0   ;;  %s953_s16 = smov 0   ;;  %s1081_s0 = inlined_call_operand.vmem [shape: bf16[2,16,1152], index: 0, kind: input, shape index: {}]   ;;  %s1082_s1 = inlined_call_operand.vmem [shape: bf16[1152,128], index: 1, kind: input, shape index: {}]   ;;  %s1083_s2 = inlined_call_operand.vmem [shape: bf16[2,16,128], index: 2, kind: output, shape index: {0}]   ;;  %s1084_s3 = inlined_call_operand.vmem [shape: f32[2,1,128], index: 3, kind: output, shape index: {1}]   ;;  %s1085_s4 = inlined_call_operand.vmem [shape: f32[2,1,128], index: 4, kind: output, shape index: {2}]  }
   0x1   :  { %s955_s17 = smov 0   ;;  %s957_s18 = smov 0  }
   0x2   :  { %s959_s19 = smov 0   ;;  %s961_s20 = smov 0  }
   0x3   :  { %s963_s21 = smov 0  }
   0x4 LB: > { %s30_s22 = sadd.s32 1, %s912_s19  ;;  %s41_s23 = sadd.s32 1, %s916_s20  ;;  %s920_s21 = sphi %s963_s21, %s15_s21   ;;  %s916_s20 = sphi %s961_s20, %s1091_s20   ;;  %s912_s19 = sphi %s959_s19, %s1090_s19   ;;  %s908_s18 = sphi %s957_s18, %s1089_s18   ;;  %s904_s17 = sphi %s955_s17, %s1088_s17   ;;  %s900_s16 = sphi %s953_s16, %s1087_s16   ;;  %s896_s15 = sphi %s951_s15, %s1086_s15  }
   0x5   : > { %p31_p0 = scmp.ge.s32.totalorder %s30_s22, 9  ;;  %p59_p1 = scmp.ne.s32.totalorder %s900_s16, %s896_s15 }
   0x6   : > { %p60_p2 = scmp.eq.s32.totalorder %s920_s21, 0  ;;  %s52_s27 = sadd.s32 1, %s900_s16 }
   0x7   : > { %s1093_s22 = smov (%p31_p0, %s30_s22), 0  ;;  %s1095_s23 = smov (!%p31_p0, %s41_s23), %s916_s20 }
   0x8   : > { %p61_p3 = por %p60_p2, %p59_p1  ;;  %p43_p4 = scmp.ge.s32.totalorder %s1095_s23, 2 }
   0x9   : > { %s48_s24 = ssub.s32 %s912_s19, %s1093_s22  ;;  %p733_p6 = scmp.ge.s32.totalorder %s920_s21, 18 }
   0xa   : > { %s1097_s23 = smov (%p43_p4, %s1095_s23), 0 }
   0xb   : > { %s45_s25 = ssub.s32 %s916_s20, %s1097_s23  ;;  %199 = sbr.rel (%p733_p6) target bundleno = 26 (0x1a), region = 16 }
   0xc   : > { %s49_s26 = sor.u32 %s48_s24, %s45_s25 }
   0xd   : > { %p50_p5 = scmp.eq.s32.totalorder %s49_s26, 0 }
   0xf   : > { %s1002_s28 = scalar_select %p50_p5, %s900_s16, %s52_s27  }
  0x12   : > { %202 = sbr.rel (!%p61_p3) target bundleno = 26 (0x1a), region = 20  ;;  %s204_s29 = sand.u32 (%p61_p3), 1, %s900_s16  }
  0x13   : > { %s796_s30 = smul.u32 (%p61_p3), 18, %s916_s20  ;;  %s734_s5 = sshll.u32 (%p61_p3), %s204_s29, 3 }
  0x14   : > { %s206_s11 = scalar_lea.vmem (%p61_p3), [#allocation3], %s734_s5 }
  0x15   : > { %s211_s6 = sadd.s32 (%p61_p3), %s912_s19, %s796_s30 }
  0x16   : > { %s735_s7 = sshll.u32 (%p61_p3), %s211_s6, 2 }
  0x17   : > { %s213_s10 = scalar_lea.vmem (%p61_p3), %s1081_s0, %s735_s7 }
  0x18   : > { %v229_v0 = vld [vmem:[%s213_s10] sm:$0xf] (%p61_p3)  ;;  %v231_v1 = vld [vmem:[%s213_s10 + $0x24] sm:$0xf] (%p61_p3) }
  0x19   : > { %230 = vst [vmem:[%s206_s11] sm:$0xf] %v229_v0  ;;  %232 = vst [vmem:[%s206_s11 + $0x4] sm:$0xf] %v231_v1 }
  0x1a PF: > { %p736_p7 = scmp.ge.s32.totalorder %s920_s21, 1  ;;  %p270_p8 = scmp.lt.s32.totalorder %s920_s21, 19 }
  0x1c   : > { %p271_p9 = pnand %p736_p7, %p270_p8 }
  0x1d   : > { %s277_s12 = sand.u32 (!%p271_p9), 1, %s896_s15   ;;  %s738_s13 = sshll.u32 (!%p271_p9), %s904_s17, 4 }
  0x1e   : > { %274 = sbr.rel (%p271_p9) target bundleno = 324 (0x144), region = 65  ;;  %s1015_s14 = sshll.u32 (!%p271_p9), %s277_s12, 3 }
  0x1f   : > { %p331_p10 = scmp.lt.s32.totalorder (!%p271_p9), %s738_s13, 143  ;;  %p340_p11 = scmp.lt.s32.totalorder (!%p271_p9), %s908_s18, 1 }
  0x20   : > { %s279_s12 = scalar_lea.vmem (!%p271_p9), [#allocation3], %s1015_s14  ;;  %p742_p12 = scmp.ne.s32.totalorder (!%p271_p9), %s904_s17, 0 }
  0x25   : > { %s1099_s13 = smov (!%p331_p10, %s738_s13), 143  ;;  %s1101_s18 = smov (!%p340_p11, %s908_s18), 1 }
  0x26   : > { %s739_s24 = sshll.u32 %s1099_s13, 2  ;;  %s758_s29 = sshll.u32 %s1101_s18, 3  ;;  %v922_v2 = vmov (!%p742_p12), 0.0  }
  0x27   : > { %s1022_s27 = scalar_lea.vmem %s1082_s1, %s739_s24  ;;  %s1027_s6 = scalar_lea.vmem %s1083_s2, %s758_s29  ;;  %369 = vst [vmem:[#allocation2] sm:$0xff] (!%p742_p12), %v922_v2  ;;  %370 = vst [vmem:[#allocation2 + $0x8] sm:$0xff] (!%p742_p12), %v922_v2 }
  0x28   : > { %s1032_s8 = scalar_lea.vmem %s1084_s3, %s1101_s18  ;;  %s1037_s11 = scalar_lea.vmem %s1085_s4, %s1101_s18 }
  0x29   : > { %368 = sbr.rel (%p742_p12) target bundleno = 48 (0x30), region = 73 }
  0x30 PF: > { %v857_v3 = vld [vmem:[%s1022_s27] sm:$0xff]   ;;  %v923_v4 = vmov 0.0   ;;  %v858_v5 = vld [vmem:[%s1022_s27 + $0x8] sm:$0xff]   ;;  %vm924_vm0 = vmmov 0   ;;  %v859_v6 = vld [vmem:[%s1022_s27 + $0x10] sm:$0xff]   ;;  %p490_p13 = scmp.eq.s32.totalorder %s904_s17, 8 }
  0x31   : > { %776 = vmatprep.subr.bf16.mxu0 %v923_v4  ;;  %792 = vmatprep.mubr.msk.bf16.mxu0 %vm924_vm0, %v923_v4  ;;  %v860_v7 = vld [vmem:[%s1022_s27 + $0x18] sm:$0xff]   ;;  %v861_v8 = vld [vmem:[%s1022_s27 + $0x20] sm:$0xff]   ;;  %v862_v9 = vld [vmem:[%s1022_s27 + $0x28] sm:$0xff]   ;;  %v925_v21 = vmov (%p490_p13), 0.0  }
  0x32   : > { %777 = vmatpush3.bf16.msra.mxu0 %v857_v3  ;;  %v863_v10 = vld [vmem:[%s1022_s27 + $0x30] sm:$0xff]   ;;  %v864_v11 = vld [vmem:[%s1022_s27 + $0x38] sm:$0xff]   ;;  %v371_v13 = vld [vmem:[#allocation2] sm:$0xff]  ;;  %496 = vst [vmem:[%s1032_s8] sm:$0x1] (%p490_p13), %v925_v21 }
  0x33   : > { %778 = vmatprep.subr.bf16.mxu0 %v923_v4  ;;  %v865_v12 = vld [vmem:[%s279_s12] sm:$0xff]   ;;  %v372_v15 = vld [vmem:[#allocation2 + $0x8] sm:$0xff]  ;;  %497 = vst [vmem:[%s1037_s11] sm:$0x1] (%p490_p13), %v925_v21 }
  0x36   : > { %779 = vmatpush3.bf16.msra.mxu0 %v858_v5 }
  0x37   : > { %780 = vmatprep.subr.bf16.mxu0 %v923_v4 }
  0x3a   : > { %781 = vmatpush3.bf16.msra.mxu0 %v859_v6 }
  0x3b   : > { %782 = vmatprep.subr.bf16.mxu0 %v923_v4 }
  0x3e   : > { %783 = vmatpush3.bf16.msra.mxu0 %v860_v7 }
  0x3f   : > { %784 = vmatprep.subr.bf16.mxu0 %v923_v4 }
  0x42   : > { %785 = vmatpush3.bf16.msra.mxu0 %v861_v8 }
  0x43   : > { %786 = vmatprep.subr.bf16.mxu0 %v923_v4 }
  0x46   : > { %787 = vmatpush3.bf16.msra.mxu0 %v862_v9 }
  0x47   : > { %788 = vmatprep.subr.bf16.mxu0 %v923_v4 }
  0x4a   : > { %789 = vmatpush3.bf16.msra.mxu0 %v863_v10 }
  0x4b   : > { %790 = vmatprep.subr.bf16.mxu0 %v923_v4 }
  0x4e   : > { %791 = vmatpush3.bf16.msra.mxu0 %v864_v11 }
  0x51   : > { %793 = vmatmul.mubr.bf16.vlgmr.msra.gmra.mrb[0].mxu0 %v865_v12 }
 0x123   : > { %495 = sbr.rel (!%p490_p13) target bundleno = 298 (0x12a), region = 77 }
 0x124   : > { %v479_v14 = vpop.f32.mrb[0].mxu0 }
 0x125   : > { %v486_v16 = vadd.f32 %v479_v14, %v371_v13  ;;  %v794_v17 = vpop.f32.mrb[1].mxu0 }
 0x126   : > { %v482_v18 = vpop.f32.mrb[2].mxu0 }
 0x127   : > { %488 = vst [vmem:[#allocation2] sm:$0xff] %v486_v16  ;;  %v487_v19 = vadd.f32 %v482_v18, %v372_v15  ;;  %v795_v20 = vpop.f32.mrb[3].mxu0 }
 0x129   : > { %489 = vst [vmem:[#allocation2 + $0x8] sm:$0xff] %v487_v19 }
 0x12a PF: > { %p753_p0 = scmp.ne.s32.totalorder %s904_s17, 8 }
 0x12b   : > { %v513_v38 = vld [vmem:[%s1032_s8] sm:$0x1] (!%p753_p0) }
 0x12c   : > { %500 = sbr.rel (%p753_p0) target bundleno = 324 (0x144), region = 81  ;;  %v523_v41 = vld [vmem:[%s1037_s11] sm:$0x1] (!%p753_p0) }
 0x12e   : > { %v501_v22 = vld [vmem:[#allocation2] sm:$0xff] (!%p753_p0) }
 0x12f   : > { %v524_v26 = vmul.f32 (!%p753_p0), %v501_v22, %v501_v22 }
 0x130   : > { %v502_v23 = vld [vmem:[#allocation2 + $0x8] sm:$0xff] (!%p753_p0) }
 0x131   : > { %v765_v24 = vpack.c.bf16 (!%p753_p0), %v502_v23, %v501_v22  ;;  %v514_v25 = vadd.f32 (!%p753_p0), %v502_v23, %v501_v22  ;;  %v525_v27 = vmul.f32 (!%p753_p0), %v502_v23, %v502_v23 }
 0x133   : > { %766 = vst [vmem:[%s1027_s6] sm:$0xff] %v765_v24   ;;  %v515_v28 = vrot.slane %v514_v25, 4  ;;  %v526_v29 = vadd.f32 %v525_v27, %v524_v26 }
 0x135   : > { %v516_v30 = vadd.f32 %v515_v28, %v514_v25  ;;  %v527_v31 = vrot.slane %v526_v29, 4 }
 0x137   : > { %v517_v32 = vrot.slane %v516_v30, 2  ;;  %v528_v33 = vadd.f32 %v527_v31, %v526_v29 }
 0x139   : > { %v518_v34 = vadd.f32 %v517_v32, %v516_v30  ;;  %v529_v35 = vrot.slane %v528_v33, 2 }
 0x13b   : > { %v519_v36 = vrot.slane %v518_v34, 1  ;;  %v530_v37 = vadd.f32 %v529_v35, %v528_v33 }
 0x13d   : > { %v520_v39 = vadd.f32 %v519_v36, %v518_v34  ;;  %v531_v40 = vrot.slane %v530_v37, 1 }
 0x13f   : > { %v521_v42 = vadd.f32 %v520_v39, %v513_v38  ;;  %v532_v43 = vadd.f32 %v531_v40, %v530_v37 }
 0x141   : > { %522 = vst [vmem:[%s1032_s8] sm:$0x1] %v521_v42  ;;  %v533_v44 = vadd.f32 %v532_v43, %v523_v41 }
 0x143   : > { %534 = vst [vmem:[%s1037_s11] sm:$0x1] %v533_v44 }
 0x144 PF: > { %s15_s21 = sadd.s32 1, %s920_s21   ;;  %s1086_s15 = smov %s900_s16 }
 0x145   : > { %p12_p1 = scmp.ge.s32.totalorder %s15_s21, 20   ;;  %s1087_s16 = smov %s1002_s28 }
 0x146   : > { %s1088_s17 = smov %s912_s19  ;;  %s1089_s18 = smov %s916_s20 }
 0x147   : > { %s1090_s19 = smov %s1093_s22  ;;  %s1091_s20 = smov %s1097_s23 }
 0x148   :  { %14 = sbr.rel (!%p12_p1) target bundleno = 4 (0x4), region = 143 }

// kernel: generator_hd_forward.102
= control target key start
LH: loop header
LB: loop body
LE: loop exit
PB: predicated region body
PF: predicated region fallthrough
CT: control target
= control target key end

     0   :  { %s612_s12 = smov 0   ;;  %s614_s13 = smov 0   ;;  %s659_s0 = inlined_call_operand.vmem [shape: bf16[2,16,256], index: 0, kind: input, shape index: {}]   ;;  %s660_s1 = inlined_call_operand.vmem [shape: f32[2,1,256], index: 1, kind: input, shape index: {}]   ;;  %s661_s2 = inlined_call_operand.vmem [shape: f32[2,1,256], index: 2, kind: input, shape index: {}]   ;;  %s662_s3 = inlined_call_operand.vmem [shape: bf16[2,16,256], index: 3, kind: output, shape index: {}]  }
   0x1   :  { %s616_s14 = smov 0  }
   0x2 LB: > { %s32_s15 = sadd.s32 1, %s586_s13  ;;  %p527_p0 = scmp.ge.s32.totalorder %s590_s14, 1  ;;  %s590_s14 = sphi %s616_s14, %s13_s14   ;;  %s586_s13 = sphi %s614_s13, %s664_s13   ;;  %s582_s12 = sphi %s612_s12, %s663_s12  }
   0x3   : > { %p34_p1 = scmp.ge.s32.totalorder %s32_s15, 2  ;;  %p207_p2 = scmp.lt.s32.totalorder %s590_s14, 3 }
   0x5   : > { %s666_s15 = smov (%p34_p1, %s32_s15), 0  ;;  %p208_p3 = pnand %p527_p0, %p207_p2 }
   0x6   : > { %p267_p4 = scmp.lt.s32.totalorder (!%p208_p3), %s582_s12, 1  ;;  %v329_v5 = vlaneseq (!%p208_p3) }
   0x7   : > { %211 = sbr.rel (%p208_p3) target bundleno = 48 (0x30), region = 32 }
   0x8   : > { %v330_v8 = vshrl.u32 (!%p208_p3), %v329_v5, 7 }
   0xa   : > { %v331_v11 = vsub.s32 (!%p208_p3), 0, %v330_v8  ;;  %v335_v12 = vsub.s32 (!%p208_p3), 1, %v330_v8 }
   0xe   : > { %s668_s12 = smov (!%p267_p4, %s582_s12), 1 }
   0xf   : > { %s530_s16 = sshll.u32 %s668_s12, 1  ;;  %s538_s23 = sshll.u32 %s668_s12, 4 }
  0x10   : > { %s288_s19 = scalar_lea.vmem %s660_s1, %s530_s16  ;;  %s297_s22 = scalar_lea.vmem %s661_s2, %s530_s16 }
  0x11   : > { %v321_v0 = vld [vmem:[%s288_s19] sm:$0x3]  ;;  %s278_s26 = scalar_lea.vmem %s659_s0, %s538_s23  ;;  %s312_s29 = scalar_lea.vmem %s662_s3, %s538_s23 }
  0x12   : > { %v323_v1 = vld [vmem:[%s297_s22] sm:$0x3]  ;;  %v322_v2 = vmul.f32 0.0625, %v321_v0  ;;  %v316_v13 = vld [vmem:[%s278_s26 + $0x8] sm:$0xff] }
  0x13   : > { %v324_v3 = vmul.f32 0.0625, %v323_v1  ;;  %v315_v10 = vld [vmem:[%s278_s26] sm:$0xff]  ;;  %v319_v16 = vunpack.c.l.bf16 %v316_v13  ;;  %v320_v17 = vunpack.c.h.bf16 %v316_v13 }
  0x14   : > { %v325_v4 = vmul.f32 %v322_v2, %v322_v2  ;;  %v317_v14 = vunpack.c.l.bf16 %v315_v10  ;;  %v318_v15 = vunpack.c.h.bf16 %v315_v10  ;;  %v332_v18 = vrot.slane %v322_v2, %v331_v11 }
  0x15   : > { %v336_v19 = vrot.slane %v322_v2, %v335_v12 }
  0x16   : > { %v326_v6 = vsub.f32 %v324_v3, %v325_v4  ;;  %v339_v20 = vsub.f32 %v317_v14, %v332_v18  ;;  %v341_v22 = vsub.f32 %v319_v16, %v332_v18 }
  0x17   : > { %v340_v21 = vsub.f32 %v318_v15, %v336_v19  ;;  %v342_v23 = vsub.f32 %v320_v17, %v336_v19 }
  0x18   : > { %v327_v7 = vmax.f32 %v326_v6, 0.0 }
  0x1a   : > { %v343_v9 = vadd.f32 1e-05, %v327_v7 }
  0x1c   : > { %566 = vrsqrt.f32 %v343_v9 }
  0x26   : > { %v567_v24 = vpop.eup %566 }
  0x27   : > { %v349_v25 = vrot.slane %v567_v24, %v331_v11  ;;  %v353_v26 = vrot.slane %v567_v24, %v335_v12 }
  0x29   : > { %v356_v27 = vmul.f32 %v349_v25, %v339_v20  ;;  %v357_v28 = vmul.f32 %v353_v26, %v340_v21  ;;  %v358_v29 = vmul.f32 %v349_v25, %v341_v22  ;;  %v359_v30 = vmul.f32 %v353_v26, %v342_v23 }
  0x2b   : > { %v360_v31 = vmax.f32 %v356_v27, 0.0  ;;  %v361_v32 = vmax.f32 %v357_v28, 0.0  ;;  %v362_v33 = vmax.f32 %v358_v29, 0.0  ;;  %v363_v34 = vmax.f32 %v359_v30, 0.0 }
  0x2d   : > { %v540_v35 = vpack.c.bf16 %v361_v32, %v360_v31  ;;  %v541_v36 = vpack.c.bf16 %v363_v34, %v362_v33 }
  0x2f   : > { %376 = vst [vmem:[%s312_s29] sm:$0xff] %v540_v35  ;;  %377 = vst [vmem:[%s312_s29 + $0x8] sm:$0xff] %v541_v36 }
  0x30 PF: > { %s13_s14 = sadd.s32 1, %s590_s14   ;;  %s663_s12 = smov %s586_s13 }
  0x31   : > { %p10_p5 = scmp.ge.s32.totalorder %s13_s14, 4   ;;  %s664_s13 = smov %s666_s15 }
  0x33   :  { %12 = sbr.rel (!%p10_p5) target bundleno = 2 (0x2), region = 68 }

// kernel: generator_hd_forward.101
= control target key start
LH: loop header
LB: loop body
LE: loop exit
PB: predicated region body
PF: predicated region fallthrough
CT: control target
= control target key end

     0   :  { %s1489_s15 = smov 0   ;;  %s1491_s16 = smov 0   ;;  %s1755_s0 = inlined_call_operand.vmem [shape: bf16[2,16,512], index: 0, kind: input, shape index: {}]   ;;  %s1756_s1 = inlined_call_operand.vmem [shape: bf16[512,256], index: 1, kind: input, shape index: {}]   ;;  %s1757_s2 = inlined_call_operand.vmem [shape: bf16[2,16,256], index: 2, kind: output, shape index: {0}]   ;;  %s1758_s3 = inlined_call_operand.vmem [shape: f32[2,1,256], index: 3, kind: output, shape index: {1}]   ;;  %s1759_s4 = inlined_call_operand.vmem [shape: f32[2,1,256], index: 4, kind: output, shape index: {2}]  }
   0x1   :  { %s1493_s17 = smov 0  }
   0x2 LB: > { %s41_s18 = sadd.s32 1, %s1456_s16  ;;  %p1223_p0 = scmp.ge.s32.totalorder %s1460_s17, 1  ;;  %s1460_s17 = sphi %s1493_s17, %s15_s17   ;;  %s1456_s16 = sphi %s1491_s16, %s1763_s16   ;;  %s1452_s15 = sphi %s1489_s15, %s1762_s15  }
   0x3   : > { %p43_p1 = scmp.ge.s32.totalorder %s41_s18, 2  ;;  %p235_p2 = scmp.lt.s32.totalorder %s1460_s17, 3 }
   0x5   : > { %s1765_s18 = smov (%p43_p1, %s41_s18), 0  ;;  %p236_p3 = pnand %p1223_p0, %p235_p2 }
   0x6   : > { %v1336_v0 = vld [vmem:[%s1756_s1 + $0x4] ss:$8 sps:$4 sm:$0xff] (!%p236_p3)   ;;  %p307_p4 = scmp.lt.s32.totalorder (!%p236_p3), %s1452_s15, 1  ;;  %v886_v1 = vlaneseq (!%p236_p3)  ;;  %v1340_v3 = vld [vmem:[%s1756_s1] ss:$8 sps:$4 sm:$0xff] (!%p236_p3)   ;;  %v1462_v14 = vmov (!%p236_p3), 0.0  }
   0x7   : > { %239 = sbr.rel (%p236_p3) target bundleno = 314 (0x13a), region = 28  ;;  %v1338_v2 = vld [vmem:[%s1756_s1 + $0x104] ss:$8 sps:$4 sm:$0xff] (!%p236_p3)   ;;  %787 = vmatprep.subr.bf16.mxu1 (!%p236_p3), %v1336_v0  ;;  %v1341_v4 = vld [vmem:[%s1756_s1 + $0x100] ss:$8 sps:$4 sm:$0xff] (!%p236_p3)  }
   0x8   : > { %830 = vmatprep.subr.bf16.mxu0 (!%p236_p3), %v1338_v2  ;;  %v1342_v5 = vld [vmem:[%s1756_s1 + $0x14] ss:$8 sps:$4 sm:$0xff] (!%p236_p3)   ;;  %788 = vmatpush1.bf16.msra.mxu1 (!%p236_p3), %v1340_v3  ;;  %v1346_v7 = vld [vmem:[%s1756_s1 + $0x10] ss:$8 sps:$4 sm:$0xff] (!%p236_p3)   ;;  %vm1531_vm0 = vcmp.lt.s32.totalorder (!%p236_p3), %v886_v1, 256 }
   0x9   : > { %831 = vmatpush1.bf16.msra.mxu0 (!%p236_p3), %v1341_v4  ;;  %v1344_v6 = vld [vmem:[%s1756_s1 + $0x114] ss:$8 sps:$4 sm:$0xff] (!%p236_p3)   ;;  %789 = vmatprep.subr.bf16.mxu1 (!%p236_p3), %v1342_v5  ;;  %v1347_v9 = vld [vmem:[%s1756_s1 + $0x110] ss:$8 sps:$4 sm:$0xff] (!%p236_p3)   ;;  %v1348_v10 = vld [vmem:[%s1756_s1 + $0x24] ss:$8 sps:$4 sm:$0xff] (!%p236_p3)  }
   0xa   : > { %832 = vmatprep.subr.bf16.mxu0 (!%p236_p3), %v1344_v6  ;;  %v1350_v11 = vld [vmem:[%s1756_s1 + $0x124] ss:$8 sps:$4 sm:$0xff] (!%p236_p3)   ;;  %v1352_v12 = vld [vmem:[%s1756_s1 + $0x20] ss:$8 sps:$4 sm:$0xff] (!%p236_p3)   ;;  %v1354_v15 = vld [vmem:[%s1756_s1 + $0x34] ss:$8 sps:$4 sm:$0xff] (!%p236_p3)  }
   0xb   : > { %v1353_v13 = vld [vmem:[%s1756_s1 + $0x120] ss:$8 sps:$4 sm:$0xff] (!%p236_p3)   ;;  %v1356_v16 = vld [vmem:[%s1756_s1 + $0x134] ss:$8 sps:$4 sm:$0xff] (!%p236_p3)   ;;  %v1358_v17 = vld [vmem:[%s1756_s1 + $0x30] ss:$8 sps:$4 sm:$0xff] (!%p236_p3)  }
   0xc   : > { %790 = vmatpush1.bf16.msra.mxu1 (!%p236_p3), %v1346_v7  ;;  %v1359_v18 = vld [vmem:[%s1756_s1 + $0x130] ss:$8 sps:$4 sm:$0xff] (!%p236_p3)   ;;  %v1360_v19 = vld [vmem:[%s1756_s1 + $0x44] ss:$8 sps:$4 sm:$0xff] (!%p236_p3)   ;;  %v1364_v21 = vld [vmem:[%s1756_s1 + $0x40] ss:$8 sps:$4 sm:$0xff] (!%p236_p3)  }
   0xd   : > { %833 = vmatpush1.bf16.msra.mxu0 (!%p236_p3), %v1347_v9  ;;  %791 = vmatprep.subr.bf16.mxu1 (!%p236_p3), %v1348_v10  ;;  %v1362_v20 = vld [vmem:[%s1756_s1 + $0x144] ss:$8 sps:$4 sm:$0xff] (!%p236_p3)   ;;  %v1365_v22 = vld [vmem:[%s1756_s1 + $0x140] ss:$8 sps:$4 sm:$0xff] (!%p236_p3)   ;;  %v1366_v23 = vld [vmem:[%s1756_s1 + $0x54] ss:$8 sps:$4 sm:$0xff] (!%p236_p3)  }
   0xe   : > { %s1767_s15 = smov (!%p307_p4, %s1452_s15), 1  ;;  %834 = vmatprep.subr.bf16.mxu0 %v1350_v11  ;;  %v1368_v24 = vld [vmem:[%s1756_s1 + $0x154] ss:$8 sps:$4 sm:$0xff]   ;;  %v1370_v25 = vld [vmem:[%s1756_s1 + $0x50] ss:$8 sps:$4 sm:$0xff]  }
   0xf   : > { %s1228_s9 = sshll.u32 %s1767_s15, 1  ;;  %v1371_v26 = vld [vmem:[%s1756_s1 + $0x150] ss:$8 sps:$4 sm:$0xff]   ;;  %v1372_v27 = vld [vmem:[%s1756_s1 + $0x64] ss:$8 sps:$4 sm:$0xff]   ;;  %s1302_s28 = sshll.u32 %s1767_s15, 5 }
  0x10   : > { %s1545_s14 = scalar_lea.vmem %s1758_s3, %s1228_s9  ;;  %s1550_s21 = scalar_lea.vmem %s1759_s4, %s1228_s9  ;;  %792 = vmatpush1.bf16.msra.mxu1 %v1352_v12  ;;  %v1374_v28 = vld [vmem:[%s1756_s1 + $0x164] ss:$8 sps:$4 sm:$0xff]   ;;  %v1376_v29 = vld [vmem:[%s1756_s1 + $0x60] ss:$8 sps:$4 sm:$0xff]   ;;  %v1378_v31 = vld [vmem:[%s1756_s1 + $0x74] ss:$8 sps:$4 sm:$0xff]  }
  0x11   : > { %890 = vst.msk [vmem:[%s1545_s14] sm:$0x3] %vm1531_vm0, %v1462_v14  ;;  %891 = vst.msk [vmem:[%s1550_s21] sm:$0x3] %vm1531_vm0, %v1462_v14  ;;  %835 = vmatpush1.bf16.msra.mxu0 %v1353_v13  ;;  %793 = vmatprep.subr.bf16.mxu1 %v1354_v15  ;;  %v1377_v30 = vld [vmem:[%s1756_s1 + $0x160] ss:$8 sps:$4 sm:$0xff]   ;;  %s1670_s11 = scalar_lea.vmem %s1755_s0, %s1302_s28 }
  0x12   : > { %836 = vmatprep.subr.bf16.mxu0 %v1356_v16  ;;  %v1380_v32 = vld [vmem:[%s1756_s1 + $0x174] ss:$8 sps:$4 sm:$0xff]   ;;  %v1382_v33 = vld [vmem:[%s1756_s1 + $0x70] ss:$8 sps:$4 sm:$0xff]   ;;  %v1384_v35 = vld [vmem:[%s1756_s1 + $0x84] ss:$8 sps:$4 sm:$0xff]  }
  0x13   : > { %v1383_v34 = vld [vmem:[%s1756_s1 + $0x170] ss:$8 sps:$4 sm:$0xff]   ;;  %v1386_v36 = vld [vmem:[%s1756_s1 + $0x184] ss:$8 sps:$4 sm:$0xff]   ;;  %v1388_v37 = vld [vmem:[%s1756_s1 + $0x80] ss:$8 sps:$4 sm:$0xff]  }
  0x14   : > { %794 = vmatpush1.bf16.msra.mxu1 %v1358_v17  ;;  %v1389_v38 = vld [vmem:[%s1756_s1 + $0x180] ss:$8 sps:$4 sm:$0xff]   ;;  %v1390_v39 = vld [vmem:[%s1756_s1 + $0x94] ss:$8 sps:$4 sm:$0xff]   ;;  %v1394_v41 = vld [vmem:[%s1756_s1 + $0x90] ss:$8 sps:$4 sm:$0xff]  }
  0x15   : > { %837 = vmatpush1.bf16.msra.mxu0 %v1359_v18  ;;  %795 = vmatprep.subr.bf16.mxu1 %v1360_v19  ;;  %v1392_v40 = vld [vmem:[%s1756_s1 + $0x194] ss:$8 sps:$4 sm:$0xff]   ;;  %v1395_v42 = vld [vmem:[%s1756_s1 + $0x190] ss:$8 sps:$4 sm:$0xff]   ;;  %v1396_v43 = vld [vmem:[%s1756_s1 + $0xa4] ss:$8 sps:$4 sm:$0xff]  }
  0x16   : > { %838 = vmatprep.subr.bf16.mxu0 %v1362_v20  ;;  %v1398_v44 = vld [vmem:[%s1756_s1 + $0x1a4] ss:$8 sps:$4 sm:$0xff]   ;;  %v1400_v45 = vld [vmem:[%s1756_s1 + $0xa0] ss:$8 sps:$4 sm:$0xff]   ;;  %v1402_v47 = vld [vmem:[%s1756_s1 + $0xb4] ss:$8 sps:$4 sm:$0xff]  }
  0x17   : > { %v1401_v46 = vld [vmem:[%s1756_s1 + $0x1a0] ss:$8 sps:$4 sm:$0xff]   ;;  %v1404_v48 = vld [vmem:[%s1756_s1 + $0x1b4] ss:$8 sps:$4 sm:$0xff]   ;;  %v1406_v49 = vld [vmem:[%s1756_s1 + $0xb0] ss:$8 sps:$4 sm:$0xff]  }
  0x18   : > { %796 = vmatpush1.bf16.msra.mxu1 %v1364_v21  ;;  %v1434_v50 = vld [vmem:[%s1670_s11 + $0x4] ss:$16 sps:$4 sm:$0xff]   ;;  %v1407_v51 = vld [vmem:[%s1756_s1 + $0x1b0] ss:$8 sps:$4 sm:$0xff]   ;;  %v1437_v54 = vld [vmem:[%s1670_s11 + $0xc] ss:$16 sps:$4 sm:$0xff]  }
  0x19   : > { %839 = vmatpush1.bf16.msra.mxu0 %v1365_v22  ;;  %797 = vmatprep.subr.bf16.mxu1 %v1366_v23  ;;  %v1408_v52 = vld [vmem:[%s1756_s1 + $0xc4] ss:$8 sps:$4 sm:$0xff]   ;;  %v1412_v55 = vld [vmem:[%s1756_s1 + $0xc0] ss:$8 sps:$4 sm:$0xff]   ;;  %v1414_v57 = vld [vmem:[%s1756_s1 + $0xd4] ss:$8 sps:$4 sm:$0xff]  }
  0x1a   : > { %840 = vmatprep.subr.bf16.mxu0 %v1368_v24  ;;  %v1410_v53 = vld [vmem:[%s1756_s1 + $0x1c4] ss:$8 sps:$4 sm:$0xff]   ;;  %819 = vmatprep.mubr.bf16.mxu1 %v1434_v50  ;;  %v1413_v56 = vld [vmem:[%s1756_s1 + $0x1c0] ss:$8 sps:$4 sm:$0xff]   ;;  %v1416_v58 = vld [vmem:[%s1756_s1 + $0x1d4] ss:$8 sps:$4 sm:$0xff]  }
  0x1b   : > { %862 = vmatprep.mubr.bf16.mxu0 %v1437_v54  ;;  %v1418_v59 = vld [vmem:[%s1756_s1 + $0xd0] ss:$8 sps:$4 sm:$0xff]   ;;  %v1420_v61 = vld [vmem:[%s1756_s1 + $0xe4] ss:$8 sps:$4 sm:$0xff]   ;;  %v1424_v63 = vld [vmem:[%s1756_s1 + $0xe0] ss:$8 sps:$4 sm:$0xff]  }
  0x1c   : > { %798 = vmatpush1.bf16.msra.mxu1 %v1370_v25  ;;  %v1419_v60 = vld [vmem:[%s1756_s1 + $0x1d0] ss:$8 sps:$4 sm:$0xff]   ;;  %v1422_v62 = vld [vmem:[%s1756_s1 + $0x1e4] ss:$8 sps:$4 sm:$0xff]   ;;  %v1425_v0 = vld [vmem:[%s1756_s1 + $0x1e0] ss:$8 sps:$4 sm:$0xff]  }
  0x1d   : > { %841 = vmatpush1.bf16.msra.mxu0 %v1371_v26  ;;  %799 = vmatprep.subr.bf16.mxu1 %v1372_v27  ;;  %v1426_v2 = vld [vmem:[%s1756_s1 + $0xf4] ss:$8 sps:$4 sm:$0xff]   ;;  %v1430_v4 = vld [vmem:[%s1756_s1 + $0xf0] ss:$8 sps:$4 sm:$0xff]   ;;  %s1303_s12 = sshll.u32 %s1767_s15, 4 }
  0x1e   : > { %842 = vmatprep.subr.bf16.mxu0 %v1374_v28  ;;  %v1428_v3 = vld [vmem:[%s1756_s1 + $0x1f4] ss:$8 sps:$4 sm:$0xff]   ;;  %v1431_v5 = vld [vmem:[%s1756_s1 + $0x1f0] ss:$8 sps:$4 sm:$0xff]   ;;  %s346_s20 = scalar_lea.vmem %s1757_s2, %s1303_s12 }
  0x1f   : > { %v1432_v6 = vld [vmem:[%s1670_s11] ss:$16 sps:$4 sm:$0xff]   ;;  %v1435_v7 = vld [vmem:[%s1670_s11 + $0x8] ss:$16 sps:$4 sm:$0xff]  }
  0x20   : > { %800 = vmatpush1.bf16.msra.mxu1 %v1376_v29 }
  0x21   : > { %843 = vmatpush1.bf16.msra.mxu0 %v1377_v30  ;;  %801 = vmatprep.subr.bf16.mxu1 %v1378_v31 }
  0x22   : > { %844 = vmatprep.subr.bf16.mxu0 %v1380_v32 }
  0x24   : > { %802 = vmatpush1.bf16.msra.mxu1 %v1382_v33 }
  0x25   : > { %845 = vmatpush1.bf16.msra.mxu0 %v1383_v34  ;;  %803 = vmatprep.subr.bf16.mxu1 %v1384_v35 }
  0x26   : > { %846 = vmatprep.subr.bf16.mxu0 %v1386_v36  ;;  %v1463_v36 = vmov 1966171168  }
  0x28   : > { %804 = vmatpush1.bf16.msra.mxu1 %v1388_v37  ;;  %v932_v37 = vunpack.c.l.s4 %v1463_v36 }
  0x29   : > { %847 = vmatpush1.bf16.msra.mxu0 %v1389_v38  ;;  %805 = vmatprep.subr.bf16.mxu1 %v1390_v39 }
  0x2a   : > { %848 = vmatprep.subr.bf16.mxu0 %v1392_v40 }
  0x2c   : > { %806 = vmatpush1.bf16.msra.mxu1 %v1394_v41 }
  0x2d   : > { %849 = vmatpush1.bf16.msra.mxu0 %v1395_v42  ;;  %807 = vmatprep.subr.bf16.mxu1 %v1396_v43 }
  0x2e   : > { %850 = vmatprep.subr.bf16.mxu0 %v1398_v44 }
  0x30   : > { %808 = vmatpush1.bf16.msra.mxu1 %v1400_v45 }
  0x31   : > { %851 = vmatpush1.bf16.msra.mxu0 %v1401_v46  ;;  %809 = vmatprep.subr.bf16.mxu1 %v1402_v47  ;;  %v933_v46 = vunpack.c.0.s8 %v932_v37  ;;  %v935_v47 = vshrl.u32 %v886_v1, 7  ;;  %v913_v1 = vld [vmem:[%s1545_s14] sm:$0x3] }
  0x32   : > { %852 = vmatprep.subr.bf16.mxu0 %v1404_v48 }
  0x34   : > { %810 = vmatpush1.bf16.msra.mxu1 %v1406_v49 }
  0x35   : > { %853 = vmatpush1.bf16.msra.mxu0 %v1407_v51  ;;  %811 = vmatprep.subr.bf16.mxu1 %v1408_v52 }
  0x36   : > { %854 = vmatprep.subr.bf16.mxu0 %v1410_v53 }
  0x38   : > { %812 = vmatpush1.bf16.msra.mxu1 %v1412_v55 }
  0x39   : > { %855 = vmatpush1.bf16.msra.mxu0 %v1413_v56  ;;  %813 = vmatprep.subr.bf16.mxu1 %v1414_v57  ;;  %v936_v56 = vsub.s32 %v933_v46, %v935_v47 }
  0x3a   : > { %856 = vmatprep.subr.bf16.mxu0 %v1416_v58 }
  0x3c   : > { %814 = vmatpush1.bf16.msra.mxu1 %v1418_v59 }
  0x3d   : > { %857 = vmatpush1.bf16.msra.mxu0 %v1419_v60  ;;  %815 = vmatprep.subr.bf16.mxu1 %v1420_v61 }
  0x3e   : > { %858 = vmatprep.subr.bf16.mxu0 %v1422_v62 }
  0x40   : > { %816 = vmatpush1.bf16.msra.mxu1 %v1424_v63 }
  0x41   : > { %859 = vmatpush1.bf16.msra.mxu0 %v1425_v0  ;;  %817 = vmatprep.subr.bf16.mxu1 %v1426_v2  ;;  %v952_v2 = vld [vmem:[%s1550_s21] sm:$0x3] }
  0x42   : > { %860 = vmatprep.subr.bf16.mxu0 %v1428_v3 }
  0x44   : > { %818 = vmatpush1.bf16.msra.mxu1 %v1430_v4 }
  0x45   : > { %861 = vmatpush1.bf16.msra.mxu0 %v1431_v5 }
  0x47   : > { %820 = vmatmul.mubr.bf16.vlgmr.msra.gmra.mrb[0].mxu1 %v1432_v6 }
  0x48   : > { %863 = vmatmul.mubr.bf16.vlgmr.msra.gmra.mrb[0].mxu0 %v1435_v7 }
 0x11a   : > { %v821_v9 = vpop.f32.mrb[0].mxu1 }
 0x11b   : > { %v864_v10 = vpop.f32.mrb[0].mxu0  ;;  %v823_v12 = vpop.f32.mrb[1].mxu1 }
 0x11c   : > { %v865_v11 = vadd.f32 %v864_v10, %v821_v9  ;;  %v866_v13 = vpop.f32.mrb[1].mxu0  ;;  %v825_v15 = vpop.f32.mrb[2].mxu1 }
 0x11d   : > { %v867_v14 = vadd.f32 %v866_v13, %v823_v12  ;;  %v868_v16 = vpop.f32.mrb[2].mxu0  ;;  %v827_v18 = vpop.f32.mrb[3].mxu1 }
 0x11e   : > { %v869_v17 = vadd.f32 %v868_v16, %v825_v15  ;;  %v870_v19 = vpop.f32.mrb[3].mxu0  ;;  %v953_v22 = vmul.f32 %v865_v11, %v865_v11 }
 0x11f   : > { %v1304_v20 = vpack.c.bf16 %v867_v14, %v865_v11  ;;  %v871_v21 = vadd.f32 %v870_v19, %v827_v18  ;;  %v954_v25 = vmul.f32 %v867_v14, %v867_v14 }
 0x120   : > { %v914_v23 = vadd.f32 %v869_v17, %v865_v11  ;;  %v955_v24 = vmul.f32 %v869_v17, %v869_v17 }
 0x121   : > { %911 = vst [vmem:[%s346_s20] sm:$0xff] %v1304_v20  ;;  %v1305_v26 = vpack.c.bf16 %v871_v21, %v869_v17  ;;  %v921_v27 = vadd.f32 %v871_v21, %v867_v14  ;;  %v956_v28 = vmul.f32 %v871_v21, %v871_v21 }
 0x122   : > { %v915_v29 = vrot.slane %v914_v23, 4  ;;  %v957_v30 = vadd.f32 %v955_v24, %v953_v22 }
 0x123   : > { %912 = vst [vmem:[%s346_s20 + $0x8] sm:$0xff] %v1305_v26  ;;  %v922_v31 = vrot.slane %v921_v27, 4  ;;  %v964_v32 = vadd.f32 %v956_v28, %v954_v25 }
 0x124   : > { %v916_v33 = vadd.f32 %v915_v29, %v914_v23  ;;  %v958_v34 = vrot.slane %v957_v30, 4 }
 0x125   : > { %v923_v35 = vadd.f32 %v922_v31, %v921_v27  ;;  %v965_v38 = vrot.slane %v964_v32, 4 }
 0x126   : > { %v917_v39 = vrot.slane %v916_v33, 2  ;;  %v959_v40 = vadd.f32 %v958_v34, %v957_v30 }
 0x127   : > { %v924_v41 = vrot.slane %v923_v35, 2  ;;  %v966_v42 = vadd.f32 %v965_v38, %v964_v32 }
 0x128   : > { %v918_v43 = vadd.f32 %v917_v39, %v916_v33  ;;  %v960_v44 = vrot.slane %v959_v40, 2 }
 0x129   : > { %v925_v45 = vadd.f32 %v924_v41, %v923_v35  ;;  %v967_v48 = vrot.slane %v966_v42, 2 }
 0x12a   : > { %v919_v49 = vrot.slane %v918_v43, 1  ;;  %v961_v50 = vadd.f32 %v960_v44, %v959_v40 }
 0x12b   : > { %v926_v51 = vrot.slane %v925_v45, 1  ;;  %v968_v52 = vadd.f32 %v967_v48, %v966_v42 }
 0x12c   : > { %v920_v53 = vadd.f32 %v919_v49, %v918_v43  ;;  %v962_v54 = vrot.slane %v961_v50, 1 }
 0x12d   : > { %v927_v55 = vadd.f32 %v926_v51, %v925_v45  ;;  %v969_v57 = vrot.slane %v968_v52, 1 }
 0x12e   : > { %v963_v58 = vadd.f32 %v962_v54, %v961_v50 }
 0x12f   : > { %v930_v59 = vcombine.low %v920_v53, %v927_v55  ;;  %v970_v60 = vadd.f32 %v969_v57, %v968_v52 }
 0x131   : > { %v937_v61 = vrot.slane %v930_v59, %v936_v56  ;;  %v973_v62 = vcombine.low %v963_v58, %v970_v60 }
 0x133   : > { %v944_v63 = vrot.slane %v937_v61, %v936_v56  ;;  %v980_v0 = vrot.slane %v973_v62, %v936_v56 }
 0x135   : > { %v946_v3 = vadd.f32 %v944_v63, %v913_v1  ;;  %v987_v4 = vrot.slane %v980_v0, %v936_v56 }
 0x137   : > { %951 = vst.msk [vmem:[%s1545_s14] sm:$0x3] %vm1531_vm0, %v946_v3  ;;  %v989_v5 = vadd.f32 %v987_v4, %v952_v2 }
 0x139   : > { %990 = vst.msk [vmem:[%s1550_s21] sm:$0x3] %vm1531_vm0, %v989_v5 }
 0x13a PF: > { %s15_s17 = sadd.s32 1, %s1460_s17   ;;  %s1762_s15 = smov %s1456_s16 }
 0x13b   : > { %p12_p5 = scmp.ge.s32.totalorder %s15_s17, 4   ;;  %s1763_s16 = smov %s1765_s18 }
 0x13d   :  { %14 = sbr.rel (!%p12_p5) target bundleno = 2 (0x2), region = 97 }

// kernel: generator_hd_forward.103
= control target key start
LH: loop header
LB: loop body
LE: loop exit
PB: predicated region body
PF: predicated region fallthrough
CT: control target
= control target key end

     0   :  { %s936_s15 = smov 0   ;;  %s938_s16 = smov 0   ;;  %s1039_s0 = inlined_call_operand.vmem [shape: bf16[2,16,256], index: 0, kind: input, shape index: {}]   ;;  %s1040_s1 = inlined_call_operand.vmem [shape: bf16[256,128], index: 1, kind: input, shape index: {}]   ;;  %s1041_s2 = inlined_call_operand.vmem [shape: bf16[2,16,128], index: 2, kind: output, shape index: {0}]   ;;  %s1042_s3 = inlined_call_operand.vmem [shape: f32[2,1,128], index: 3, kind: output, shape index: {1}]   ;;  %s1043_s4 = inlined_call_operand.vmem [shape: f32[2,1,128], index: 4, kind: output, shape index: {2}]  }
   0x1   :  { %s940_s17 = smov 0  }
   0x2 LB: > { %s41_s18 = sadd.s32 1, %s904_s16  ;;  %p784_p0 = scmp.ge.s32.totalorder %s908_s17, 1  ;;  %s908_s17 = sphi %s940_s17, %s15_s17   ;;  %s904_s16 = sphi %s938_s16, %s1045_s16   ;;  %s900_s15 = sphi %s936_s15, %s1044_s15  }
   0x3   : > { %p43_p1 = scmp.ge.s32.totalorder %s41_s18, 2  ;;  %p232_p2 = scmp.lt.s32.totalorder %s908_s17, 3 }
   0x5   : > { %s1047_s18 = smov (%p43_p1, %s41_s18), 0  ;;  %p233_p3 = pnand %p784_p0, %p232_p2 }
   0x6   : > { %v867_v0 = vld [vmem:[%s1040_s1 + $0x40] sm:$0xff] (!%p233_p3)   ;;  %v869_v2 = vld [vmem:[%s1040_s1 + $0x48] sm:$0xff] (!%p233_p3)   ;;  %p296_p4 = scmp.lt.s32.totalorder (!%p233_p3), %s900_s15, 1  ;;  %v871_v4 = vld [vmem:[%s1040_s1 + $0x50] sm:$0xff] (!%p233_p3)   ;;  %v910_v18 = vmov (!%p233_p3), 0.0  }
   0x7   : > { %236 = sbr.rel (%p233_p3) target bundleno = 275 (0x113), region = 28  ;;  %v868_v1 = vld [vmem:[%s1040_s1] sm:$0xff] (!%p233_p3)   ;;  %820 = vmatprep.subr.bf16.mxu0 (!%p233_p3), %v867_v0  ;;  %v870_v3 = vld [vmem:[%s1040_s1 + $0x8] sm:$0xff] (!%p233_p3)   ;;  %v872_v5 = vld [vmem:[%s1040_s1 + $0x10] sm:$0xff] (!%p233_p3)  }
   0x8   : > { %821 = vmatpush3.bf16.msra.mxu0 (!%p233_p3), %v868_v1  ;;  %v873_v6 = vld [vmem:[%s1040_s1 + $0x58] sm:$0xff] (!%p233_p3)   ;;  %v875_v8 = vld [vmem:[%s1040_s1 + $0x60] sm:$0xff] (!%p233_p3)   ;;  %v877_v10 = vld [vmem:[%s1040_s1 + $0x68] sm:$0xff] (!%p233_p3)  }
   0x9   : > { %822 = vmatprep.subr.bf16.mxu0 (!%p233_p3), %v869_v2  ;;  %v874_v7 = vld [vmem:[%s1040_s1 + $0x18] sm:$0xff] (!%p233_p3)   ;;  %v876_v9 = vld [vmem:[%s1040_s1 + $0x20] sm:$0xff] (!%p233_p3)   ;;  %v878_v12 = vld [vmem:[%s1040_s1 + $0x28] sm:$0xff] (!%p233_p3)  }
   0xa   : > { %v879_v13 = vld [vmem:[%s1040_s1 + $0x70] sm:$0xff] (!%p233_p3)   ;;  %v881_v15 = vld [vmem:[%s1040_s1 + $0x78] sm:$0xff] (!%p233_p3)  }
   0xb   : > { %v880_v14 = vld [vmem:[%s1040_s1 + $0x30] sm:$0xff] (!%p233_p3)   ;;  %v882_v16 = vld [vmem:[%s1040_s1 + $0x38] sm:$0xff] (!%p233_p3)  }
   0xc   : > { %823 = vmatpush3.bf16.msra.mxu0 (!%p233_p3), %v870_v3 }
   0xd   : > { %824 = vmatprep.subr.bf16.mxu0 (!%p233_p3), %v871_v4 }
   0xe   : > { %s1049_s15 = smov (!%p296_p4, %s900_s15), 1 }
   0xf   : > { %s811_s9 = sshll.u32 %s1049_s15, 4  ;;  %s1018_s12 = scalar_lea.vmem %s1043_s4, %s1049_s15 }
  0x10   : > { %825 = vmatpush3.bf16.msra.mxu0 %v872_v5  ;;  %s307_s14 = scalar_lea.vmem %s1039_s0, %s811_s9  ;;  %s1012_s9 = scalar_lea.vmem %s1042_s3, %s1049_s15  ;;  %544 = vst [vmem:[%s1018_s12] sm:$0x1] %v910_v18 }
  0x11   : > { %826 = vmatprep.subr.bf16.mxu0 %v873_v6  ;;  %v885_v11 = vld [vmem:[%s307_s14 + $0x4] ss:$8 sps:$4 sm:$0xff]   ;;  %v883_v17 = vld [vmem:[%s307_s14] ss:$8 sps:$4 sm:$0xff]   ;;  %543 = vst [vmem:[%s1012_s9] sm:$0x1] %v910_v18  ;;  %s812_s13 = sshll.u32 %s1049_s15, 3 }
  0x12   : > { %525 = vmatprep.mubr.bf16.mxu0 %v885_v11  ;;  %s330_s20 = scalar_lea.vmem %s1041_s2, %s812_s13 }
  0x14   : > { %827 = vmatpush3.bf16.msra.mxu0 %v874_v7 }
  0x15   : > { %828 = vmatprep.subr.bf16.mxu0 %v875_v8 }
  0x17   : > { %v570_v42 = vld [vmem:[%s1018_s12] sm:$0x1] }
  0x18   : > { %829 = vmatpush3.bf16.msra.mxu0 %v876_v9  ;;  %v560_v39 = vld [vmem:[%s1012_s9] sm:$0x1] }
  0x19   : > { %830 = vmatprep.subr.bf16.mxu0 %v877_v10 }
  0x1c   : > { %831 = vmatpush3.bf16.msra.mxu0 %v878_v12 }
  0x1d   : > { %832 = vmatprep.subr.bf16.mxu0 %v879_v13 }
  0x20   : > { %833 = vmatpush3.bf16.msra.mxu0 %v880_v14 }
  0x21   : > { %834 = vmatprep.subr.bf16.mxu0 %v881_v15 }
  0x24   : > { %835 = vmatpush3.bf16.msra.mxu0 %v882_v16 }
  0x27   : > { %526 = vmatmul.mubr.bf16.vlgmr.msra.gmra.mrb[0].mxu0 %v883_v17 }
  0xfa   : > { %v836_v19 = vpop.f32.mrb[0].mxu0 }
  0xfb   : > { %v837_v20 = vpop.f32.mrb[1].mxu0 }
  0xfc   : > { %v838_v21 = vadd.f32 %v837_v20, %v836_v19  ;;  %v839_v22 = vpop.f32.mrb[2].mxu0 }
  0xfd   : > { %v840_v23 = vpop.f32.mrb[3].mxu0 }
  0xfe   : > { %v841_v24 = vadd.f32 %v840_v23, %v839_v22  ;;  %v571_v25 = vmul.f32 %v838_v21, %v838_v21 }
 0x100   : > { %v818_v26 = vpack.c.bf16 %v841_v24, %v838_v21  ;;  %v561_v27 = vadd.f32 %v841_v24, %v838_v21  ;;  %v572_v28 = vmul.f32 %v841_v24, %v841_v24 }
 0x102   : > { %819 = vst [vmem:[%s330_s20] sm:$0xff] %v818_v26   ;;  %v562_v29 = vrot.slane %v561_v27, 4  ;;  %v573_v30 = vadd.f32 %v572_v28, %v571_v25 }
 0x104   : > { %v563_v31 = vadd.f32 %v562_v29, %v561_v27  ;;  %v574_v32 = vrot.slane %v573_v30, 4 }
 0x106   : > { %v564_v33 = vrot.slane %v563_v31, 2  ;;  %v575_v34 = vadd.f32 %v574_v32, %v573_v30 }
 0x108   : > { %v565_v35 = vadd.f32 %v564_v33, %v563_v31  ;;  %v576_v36 = vrot.slane %v575_v34, 2 }
 0x10a   : > { %v566_v37 = vrot.slane %v565_v35, 1  ;;  %v577_v38 = vadd.f32 %v576_v36, %v575_v34 }
 0x10c   : > { %v567_v40 = vadd.f32 %v566_v37, %v565_v35  ;;  %v578_v41 = vrot.slane %v577_v38, 1 }
 0x10e   : > { %v568_v43 = vadd.f32 %v567_v40, %v560_v39  ;;  %v579_v44 = vadd.f32 %v578_v41, %v577_v38 }
 0x110   : > { %569 = vst [vmem:[%s1012_s9] sm:$0x1] %v568_v43  ;;  %v580_v45 = vadd.f32 %v579_v44, %v570_v42 }
 0x112   : > { %581 = vst [vmem:[%s1018_s12] sm:$0x1] %v580_v45 }
 0x113 PF: > { %s15_s17 = sadd.s32 1, %s908_s17   ;;  %s1044_s15 = smov %s904_s16 }
 0x114   : > { %p12_p5 = scmp.ge.s32.totalorder %s15_s17, 4   ;;  %s1045_s16 = smov %s1047_s18 }
 0x116   :  { %14 = sbr.rel (!%p12_p5) target bundleno = 2 (0x2), region = 97 }

// kernel: generator_hd_forward.104
= control target key start
LH: loop header
LB: loop body
LE: loop exit
PB: predicated region body
PF: predicated region fallthrough
CT: control target
= control target key end

     0   :  { %s550_s12 = smov 0   ;;  %s552_s13 = smov 0   ;;  %s594_s0 = inlined_call_operand.vmem [shape: bf16[2,16,128], index: 0, kind: input, shape index: {}]   ;;  %s595_s1 = inlined_call_operand.vmem [shape: f32[2,1,128], index: 1, kind: input, shape index: {}]   ;;  %s596_s2 = inlined_call_operand.vmem [shape: f32[2,1,128], index: 2, kind: input, shape index: {}]   ;;  %s597_s3 = inlined_call_operand.vmem [shape: bf16[2,16,128], index: 3, kind: output, shape index: {}]  }
   0x1   :  { %s554_s14 = smov 0  }
   0x2 LB: > { %s32_s15 = sadd.s32 1, %s524_s13  ;;  %p458_p0 = scmp.ge.s32.totalorder %s528_s14, 1  ;;  %s528_s14 = sphi %s554_s14, %s13_s14   ;;  %s524_s13 = sphi %s552_s13, %s599_s13   ;;  %s520_s12 = sphi %s550_s12, %s598_s12  }
   0x3   : > { %p34_p1 = scmp.ge.s32.totalorder %s32_s15, 2  ;;  %p198_p2 = scmp.lt.s32.totalorder %s528_s14, 3 }
   0x5   : > { %s601_s15 = smov (%p34_p1, %s32_s15), 0  ;;  %p199_p3 = pnand %p458_p0, %p198_p2 }
   0x6   : > { %p249_p4 = scmp.lt.s32.totalorder (!%p199_p3), %s520_s12, 1  ;;  %v298_v5 = vlaneseq (!%p199_p3) }
   0x7   : > { %202 = sbr.rel (%p199_p3) target bundleno = 47 (0x2f), region = 32 }
   0x8   : > { %v299_v8 = vshrl.u32 (!%p199_p3), %v298_v5, 7 }
   0xa   : > { %v300_v10 = vsub.s32 (!%p199_p3), 0, %v299_v8 }
   0xe   : > { %s603_s12 = smov (!%p249_p4, %s520_s12), 1 }
   0xf   : > { %s266_s18 = scalar_lea.vmem %s595_s1, %s603_s12  ;;  %s272_s21 = scalar_lea.vmem %s596_s2, %s603_s12 }
  0x10   : > { %v290_v0 = vld [vmem:[%s266_s18] sm:$0x1]  ;;  %s467_s22 = sshll.u32 %s603_s12, 3 }
  0x11   : > { %v291_v1 = vmul.f32 0.015625, %v290_v0  ;;  %v292_v2 = vld [vmem:[%s272_s21] sm:$0x1]  ;;  %s259_s25 = scalar_lea.vmem %s594_s0, %s467_s22  ;;  %s284_s28 = scalar_lea.vmem %s597_s3, %s467_s22 }
  0x12   : > { %v293_v3 = vmul.f32 0.015625, %v292_v2  ;;  %v472_v11 = vld [vmem:[%s259_s25] sm:$0xff]  }
  0x13   : > { %v294_v4 = vmul.f32 %v291_v1, %v291_v1  ;;  %v473_v12 = vunpack.c.l.bf16 %v472_v11  ;;  %v474_v13 = vunpack.c.h.bf16 %v472_v11  ;;  %v301_v14 = vrot.slane %v291_v1, %v300_v10 }
  0x15   : > { %v295_v6 = vsub.f32 %v293_v3, %v294_v4  ;;  %v303_v15 = vsub.f32 %v473_v12, %v301_v14  ;;  %v304_v16 = vsub.f32 %v474_v13, %v301_v14 }
  0x17   : > { %v296_v7 = vmax.f32 %v295_v6, 0.0 }
  0x19   : > { %v305_v9 = vadd.f32 1e-05, %v296_v7 }
  0x1b   : > { %504 = vrsqrt.f32 %v305_v9 }
  0x25   : > { %v505_v17 = vpop.eup %504 }
  0x26   : > { %v311_v18 = vrot.slane %v505_v17, %v300_v10 }
  0x28   : > { %v313_v19 = vmul.f32 %v311_v18, %v303_v15  ;;  %v314_v20 = vmul.f32 %v311_v18, %v304_v16 }
  0x2a   : > { %v315_v21 = vmax.f32 %v313_v19, 0.0  ;;  %v316_v22 = vmax.f32 %v314_v20, 0.0 }
  0x2c   : > { %v478_v23 = vpack.c.bf16 %v316_v22, %v315_v21 }
  0x2e   : > { %479 = vst [vmem:[%s284_s28] sm:$0xff] %v478_v23  }
  0x2f PF: > { %s13_s14 = sadd.s32 1, %s528_s14   ;;  %s598_s12 = smov %s524_s13 }
  0x30   : > { %p10_p5 = scmp.ge.s32.totalorder %s13_s14, 4   ;;  %s599_s13 = smov %s601_s15 }
  0x32   :  { %12 = sbr.rel (!%p10_p5) target bundleno = 2 (0x2), region = 68 }

// kernel: generator_hd_forward.106
= control target key start
LH: loop header
LB: loop body
LE: loop exit
PB: predicated region body
PF: predicated region fallthrough
CT: control target
= control target key end

     0   :  { %s655_s12 = smov 0   ;;  %s657_s13 = smov 0   ;;  %s703_s0 = inlined_call_operand.vmem [shape: bf16[2,64,128], index: 0, kind: input, shape index: {}]   ;;  %s704_s1 = inlined_call_operand.vmem [shape: f32[2,1,128], index: 1, kind: input, shape index: {}]   ;;  %s705_s2 = inlined_call_operand.vmem [shape: f32[2,1,128], index: 2, kind: input, shape index: {}]   ;;  %s706_s3 = inlined_call_operand.vmem [shape: bf16[2,64,128], index: 3, kind: output, shape index: {}]  }
   0x1   :  { %s659_s14 = smov 0  }
   0x2 LB: > { %s32_s15 = sadd.s32 1, %s629_s13  ;;  %p518_p0 = scmp.ge.s32.totalorder %s633_s14, 1  ;;  %s633_s14 = sphi %s659_s14, %s13_s14   ;;  %s629_s13 = sphi %s657_s13, %s708_s13   ;;  %s625_s12 = sphi %s655_s12, %s707_s12  }
   0x3   : > { %p34_p1 = scmp.ge.s32.totalorder %s32_s15, 2  ;;  %p198_p2 = scmp.lt.s32.totalorder %s633_s14, 3 }
   0x5   : > { %s710_s15 = smov (%p34_p1, %s32_s15), 0  ;;  %p199_p3 = pnand %p518_p0, %p198_p2 }
   0x6   : > { %p249_p4 = scmp.lt.s32.totalorder (!%p199_p3), %s625_s12, 1  ;;  %v310_v5 = vlaneseq (!%p199_p3) }
   0x7   : > { %202 = sbr.rel (%p199_p3) target bundleno = 48 (0x30), region = 32 }
   0x8   : > { %v311_v8 = vshrl.u32 (!%p199_p3), %v310_v5, 7 }
   0xa   : > { %v312_v11 = vsub.s32 (!%p199_p3), 0, %v311_v8 }
   0xe   : > { %s712_s12 = smov (!%p249_p4, %s625_s12), 1 }
   0xf   : > { %s266_s18 = scalar_lea.vmem %s704_s1, %s712_s12  ;;  %s272_s21 = scalar_lea.vmem %s705_s2, %s712_s12 }
  0x10   : > { %v302_v0 = vld [vmem:[%s266_s18] sm:$0x1]  ;;  %s533_s22 = sshll.u32 %s712_s12, 5 }
  0x11   : > { %v303_v1 = vmul.f32 0.00390625, %v302_v0  ;;  %v304_v2 = vld [vmem:[%s272_s21] sm:$0x1]  ;;  %s259_s25 = scalar_lea.vmem %s703_s0, %s533_s22  ;;  %s284_s28 = scalar_lea.vmem %s706_s3, %s533_s22 }
  0x12   : > { %v305_v3 = vmul.f32 0.00390625, %v304_v2  ;;  %v544_v10 = vld [vmem:[%s259_s25] sm:$0xff]   ;;  %v579_v12 = vld [vmem:[%s259_s25 + $0x8] sm:$0xff]   ;;  %v580_v13 = vld [vmem:[%s259_s25 + $0x10] sm:$0xff]  }
  0x13   : > { %v306_v4 = vmul.f32 %v303_v1, %v303_v1  ;;  %v581_v14 = vld [vmem:[%s259_s25 + $0x18] sm:$0xff]   ;;  %v545_v15 = vunpack.c.l.bf16 %v544_v10  ;;  %v546_v16 = vunpack.c.h.bf16 %v544_v10  ;;  %v313_v17 = vrot.slane %v303_v1, %v312_v11 }
  0x14   : > { %v549_v18 = vunpack.c.l.bf16 %v579_v12  ;;  %v550_v19 = vunpack.c.h.bf16 %v579_v12  ;;  %v553_v20 = vunpack.c.l.bf16 %v580_v13  ;;  %v554_v21 = vunpack.c.h.bf16 %v580_v13 }
  0x15   : > { %v307_v6 = vsub.f32 %v305_v3, %v306_v4  ;;  %v557_v22 = vunpack.c.l.bf16 %v581_v14  ;;  %v558_v23 = vunpack.c.h.bf16 %v581_v14  ;;  %v315_v24 = vsub.f32 %v545_v15, %v313_v17 }
  0x16   : > { %v316_v25 = vsub.f32 %v546_v16, %v313_v17  ;;  %v317_v26 = vsub.f32 %v549_v18, %v313_v17  ;;  %v318_v27 = vsub.f32 %v550_v19, %v313_v17  ;;  %v319_v29 = vsub.f32 %v553_v20, %v313_v17 }
  0x17   : > { %v308_v7 = vmax.f32 %v307_v6, 0.0  ;;  %v320_v30 = vsub.f32 %v554_v21, %v313_v17  ;;  %v321_v31 = vsub.f32 %v557_v22, %v313_v17  ;;  %v322_v32 = vsub.f32 %v558_v23, %v313_v17 }
  0x19   : > { %v323_v9 = vadd.f32 1e-05, %v308_v7 }
  0x1b   : > { %609 = vrsqrt.f32 %v323_v9 }
  0x25   : > { %v610_v28 = vpop.eup %609 }
  0x26   : > { %v329_v33 = vrot.slane %v610_v28, %v312_v11 }
  0x28   : > { %v331_v34 = vmul.f32 %v329_v33, %v315_v24  ;;  %v332_v35 = vmul.f32 %v329_v33, %v316_v25  ;;  %v333_v36 = vmul.f32 %v329_v33, %v317_v26  ;;  %v334_v37 = vmul.f32 %v329_v33, %v318_v27 }
  0x29   : > { %v335_v38 = vmul.f32 %v329_v33, %v319_v29  ;;  %v336_v39 = vmul.f32 %v329_v33, %v320_v30  ;;  %v337_v40 = vmul.f32 %v329_v33, %v321_v31  ;;  %v338_v41 = vmul.f32 %v329_v33, %v322_v32 }
  0x2a   : > { %v339_v42 = vmax.f32 %v331_v34, 0.0  ;;  %v340_v43 = vmax.f32 %v332_v35, 0.0  ;;  %v341_v44 = vmax.f32 %v333_v36, 0.0  ;;  %v342_v45 = vmax.f32 %v334_v37, 0.0 }
  0x2b   : > { %v343_v46 = vmax.f32 %v335_v38, 0.0  ;;  %v344_v47 = vmax.f32 %v336_v39, 0.0  ;;  %v345_v48 = vmax.f32 %v337_v40, 0.0  ;;  %v346_v49 = vmax.f32 %v338_v41, 0.0 }
  0x2c   : > { %v562_v50 = vpack.c.bf16 %v340_v43, %v339_v42  ;;  %v567_v51 = vpack.c.bf16 %v342_v45, %v341_v44 }
  0x2d   : > { %v572_v52 = vpack.c.bf16 %v344_v47, %v343_v46  ;;  %v577_v53 = vpack.c.bf16 %v346_v49, %v345_v48 }
  0x2e   : > { %563 = vst [vmem:[%s284_s28] sm:$0xff] %v562_v50   ;;  %582 = vst [vmem:[%s284_s28 + $0x8] sm:$0xff] %v567_v51  }
  0x2f   : > { %583 = vst [vmem:[%s284_s28 + $0x10] sm:$0xff] %v572_v52   ;;  %584 = vst [vmem:[%s284_s28 + $0x18] sm:$0xff] %v577_v53  }
  0x30 PF: > { %s13_s14 = sadd.s32 1, %s633_s14   ;;  %s707_s12 = smov %s629_s13 }
  0x31   : > { %p10_p5 = scmp.ge.s32.totalorder %s13_s14, 4   ;;  %s708_s13 = smov %s710_s15 }
  0x33   :  { %12 = sbr.rel (!%p10_p5) target bundleno = 2 (0x2), region = 68 }

// kernel: generator_hd_forward.105
= control target key start
LH: loop header
LB: loop body
LE: loop exit
PB: predicated region body
PF: predicated region fallthrough
CT: control target
= control target key end

     0   :  { %s1030_s15 = smov 0   ;;  %s1032_s16 = smov 0   ;;  %s1118_s0 = inlined_call_operand.vmem [shape: bf16[2,64,128], index: 0, kind: input, shape index: {}]   ;;  %s1119_s1 = inlined_call_operand.vmem [shape: bf16[128,128], index: 1, kind: input, shape index: {}]   ;;  %s1120_s2 = inlined_call_operand.vmem [shape: bf16[2,64,128], index: 2, kind: output, shape index: {0}]   ;;  %s1121_s3 = inlined_call_operand.vmem [shape: f32[2,1,128], index: 3, kind: output, shape index: {1}]   ;;  %s1122_s4 = inlined_call_operand.vmem [shape: f32[2,1,128], index: 4, kind: output, shape index: {2}]  }
   0x1   :  { %s1034_s17 = smov 0  }
   0x2 LB: > { %s41_s18 = sadd.s32 1, %s998_s16  ;;  %p831_p0 = scmp.ge.s32.totalorder %s1002_s17, 1  ;;  %s1002_s17 = sphi %s1034_s17, %s15_s17   ;;  %s998_s16 = sphi %s1032_s16, %s1124_s16   ;;  %s994_s15 = sphi %s1030_s15, %s1123_s15  }
   0x3   : > { %p43_p1 = scmp.ge.s32.totalorder %s41_s18, 2  ;;  %p229_p2 = scmp.lt.s32.totalorder %s1002_s17, 3 }
   0x5   : > { %s1126_s18 = smov (%p43_p1, %s41_s18), 0  ;;  %p230_p3 = pnand %p831_p0, %p229_p2 }
   0x6   : > { %v968_v0 = vld [vmem:[%s1119_s1] sm:$0xff] (!%p230_p3)   ;;  %p290_p4 = scmp.lt.s32.totalorder (!%p230_p3), %s994_s15, 1  ;;  %v969_v1 = vld [vmem:[%s1119_s1 + $0x8] sm:$0xff] (!%p230_p3)   ;;  %v970_v2 = vld [vmem:[%s1119_s1 + $0x10] sm:$0xff] (!%p230_p3)   ;;  %v1004_v12 = vmov (!%p230_p3), 0.0  }
   0x7   : > { %233 = sbr.rel (%p230_p3) target bundleno = 285 (0x11d), region = 28  ;;  %903 = vmatprep.subr.bf16.mxu0 (!%p230_p3), %v968_v0  ;;  %927 = vmatprep.subr.bf16.mxu1 (!%p230_p3), %v968_v0  ;;  %v971_v3 = vld [vmem:[%s1119_s1 + $0x18] sm:$0xff] (!%p230_p3)   ;;  %v972_v6 = vld [vmem:[%s1119_s1 + $0x20] sm:$0xff] (!%p230_p3)   ;;  %v973_v7 = vld [vmem:[%s1119_s1 + $0x28] sm:$0xff] (!%p230_p3)  }
   0x8   : > { %904 = vmatpush3.bf16.msra.mxu0 (!%p230_p3), %v968_v0  ;;  %935 = vmatpush3.bf16.msra.mxu1 (!%p230_p3), %v968_v0  ;;  %v974_v8 = vld [vmem:[%s1119_s1 + $0x30] sm:$0xff] (!%p230_p3)   ;;  %v975_v9 = vld [vmem:[%s1119_s1 + $0x38] sm:$0xff] (!%p230_p3)  }
   0x9   : > { %905 = vmatprep.subr.bf16.mxu0 (!%p230_p3), %v969_v1  ;;  %928 = vmatprep.subr.bf16.mxu1 (!%p230_p3), %v969_v1 }
   0xc   : > { %906 = vmatpush3.bf16.msra.mxu0 (!%p230_p3), %v969_v1  ;;  %936 = vmatpush3.bf16.msra.mxu1 (!%p230_p3), %v969_v1 }
   0xd   : > { %907 = vmatprep.subr.bf16.mxu0 (!%p230_p3), %v970_v2  ;;  %929 = vmatprep.subr.bf16.mxu1 (!%p230_p3), %v970_v2 }
   0xe   : > { %s1128_s15 = smov (!%p290_p4, %s994_s15), 1 }
   0xf   : > { %s858_s25 = sshll.u32 %s1128_s15, 5  ;;  %s1090_s19 = scalar_lea.vmem %s1121_s3, %s1128_s15 }
  0x10   : > { %s1065_s28 = scalar_lea.vmem %s1118_s0, %s858_s25  ;;  %908 = vmatpush3.bf16.msra.mxu0 %v970_v2  ;;  %937 = vmatpush3.bf16.msra.mxu1 %v970_v2  ;;  %s1096_s22 = scalar_lea.vmem %s1122_s4, %s1128_s15  ;;  %539 = vst [vmem:[%s1090_s19] sm:$0x1] %v1004_v12 }
  0x11   : > { %v976_v4 = vld [vmem:[%s1065_s28] sm:$0xff]   ;;  %v978_v5 = vld [vmem:[%s1065_s28 + $0x10] sm:$0xff]   ;;  %909 = vmatprep.subr.bf16.mxu0 %v971_v3  ;;  %930 = vmatprep.subr.bf16.mxu1 %v971_v3  ;;  %v977_v10 = vld [vmem:[%s1065_s28 + $0x8] sm:$0xff]   ;;  %540 = vst [vmem:[%s1096_s22] sm:$0x1] %v1004_v12  ;;  %s322_s26 = scalar_lea.vmem %s1120_s2, %s858_s25 }
  0x12   : > { %919 = vmatprep.mubr.bf16.mxu0 %v976_v4  ;;  %923 = vmatprep.mubr.bf16.mxu1 %v978_v5  ;;  %v979_v11 = vld [vmem:[%s1065_s28 + $0x18] sm:$0xff]  }
  0x14   : > { %910 = vmatpush3.bf16.msra.mxu0 %v971_v3  ;;  %938 = vmatpush3.bf16.msra.mxu1 %v971_v3 }
  0x15   : > { %911 = vmatprep.subr.bf16.mxu0 %v972_v6  ;;  %931 = vmatprep.subr.bf16.mxu1 %v972_v6 }
  0x17   : > { %v592_v56 = vld [vmem:[%s1090_s19] sm:$0x1] }
  0x18   : > { %912 = vmatpush3.bf16.msra.mxu0 %v972_v6  ;;  %939 = vmatpush3.bf16.msra.mxu1 %v972_v6  ;;  %v608_v59 = vld [vmem:[%s1096_s22] sm:$0x1] }
  0x19   : > { %913 = vmatprep.subr.bf16.mxu0 %v973_v7  ;;  %932 = vmatprep.subr.bf16.mxu1 %v973_v7 }
  0x1c   : > { %914 = vmatpush3.bf16.msra.mxu0 %v973_v7  ;;  %940 = vmatpush3.bf16.msra.mxu1 %v973_v7 }
  0x1d   : > { %915 = vmatprep.subr.bf16.mxu0 %v974_v8  ;;  %933 = vmatprep.subr.bf16.mxu1 %v974_v8 }
  0x20   : > { %916 = vmatpush3.bf16.msra.mxu0 %v974_v8  ;;  %941 = vmatpush3.bf16.msra.mxu1 %v974_v8 }
  0x21   : > { %917 = vmatprep.subr.bf16.mxu0 %v975_v9  ;;  %934 = vmatprep.subr.bf16.mxu1 %v975_v9 }
  0x24   : > { %918 = vmatpush3.bf16.msra.mxu0 %v975_v9  ;;  %942 = vmatpush3.bf16.msra.mxu1 %v975_v9 }
  0x27   : > { %920 = vmatmul.mubr.bf16.vlgmr.msra.gmra.mrb[0].mxu0 %v977_v10  ;;  %924 = vmatmul.mubr.bf16.vlgmr.msra.gmra.mrb[0].mxu1 %v979_v11 }
  0xfa   : > { %v921_v13 = vpop.f32.mrb[0].mxu0  ;;  %v925_v14 = vpop.f32.mrb[0].mxu1 }
  0xfb   : > { %v487_v15 = vpop.f32.mrb[1].mxu0  ;;  %v503_v16 = vpop.f32.mrb[1].mxu1  ;;  %v611_v28 = vmul.f32 %v921_v13, %v921_v13  ;;  %v615_v40 = vmul.f32 %v925_v14, %v925_v14 }
  0xfc   : > { %v922_v17 = vpop.f32.mrb[2].mxu0  ;;  %v926_v18 = vpop.f32.mrb[2].mxu1  ;;  %v609_v19 = vmul.f32 %v487_v15, %v487_v15  ;;  %v613_v34 = vmul.f32 %v503_v16, %v503_v16 }
  0xfd   : > { %v876_v20 = vpack.c.bf16 %v922_v17, %v921_v13  ;;  %v490_v21 = vpop.f32.mrb[3].mxu0  ;;  %v886_v22 = vpack.c.bf16 %v926_v18, %v925_v14  ;;  %v506_v23 = vpop.f32.mrb[3].mxu1  ;;  %v612_v31 = vmul.f32 %v922_v17, %v922_v17  ;;  %v616_v43 = vmul.f32 %v926_v18, %v926_v18 }
  0xfe   : > { %v871_v24 = vpack.c.bf16 %v490_v21, %v487_v15  ;;  %v593_v25 = vadd.f32 %v490_v21, %v487_v15  ;;  %v610_v26 = vmul.f32 %v490_v21, %v490_v21  ;;  %v881_v27 = vpack.c.bf16 %v506_v23, %v503_v16 }
  0xff   : > { %888 = vst [vmem:[%s322_s26 + $0x8] sm:$0xff] %v876_v20   ;;  %890 = vst [vmem:[%s322_s26 + $0x18] sm:$0xff] %v886_v22   ;;  %v614_v39 = vmul.f32 %v506_v23, %v506_v23 }
 0x100   : > { %872 = vst [vmem:[%s322_s26] sm:$0xff] %v871_v24   ;;  %v594_v29 = vadd.f32 %v921_v13, %v593_v25  ;;  %v617_v30 = vadd.f32 %v610_v26, %v609_v19  ;;  %889 = vst [vmem:[%s322_s26 + $0x10] sm:$0xff] %v881_v27  }
 0x102   : > { %v618_v32 = vadd.f32 %v617_v30, %v611_v28  ;;  %v595_v33 = vadd.f32 %v922_v17, %v594_v29 }
 0x104   : > { %v596_v35 = vadd.f32 %v595_v33, %v503_v16  ;;  %v619_v36 = vadd.f32 %v618_v32, %v612_v31 }
 0x106   : > { %v620_v37 = vadd.f32 %v619_v36, %v613_v34  ;;  %v597_v38 = vadd.f32 %v596_v35, %v506_v23 }
 0x108   : > { %v598_v41 = vadd.f32 %v925_v14, %v597_v38  ;;  %v621_v42 = vadd.f32 %v620_v37, %v614_v39 }
 0x10a   : > { %v599_v44 = vadd.f32 %v926_v18, %v598_v41  ;;  %v622_v45 = vadd.f32 %v621_v42, %v615_v40 }
 0x10c   : > { %v600_v46 = vrot.slane %v599_v44, 4  ;;  %v623_v47 = vadd.f32 %v622_v45, %v616_v43 }
 0x10e   : > { %v601_v48 = vadd.f32 %v600_v46, %v599_v44  ;;  %v624_v49 = vrot.slane %v623_v47, 4 }
 0x110   : > { %v602_v50 = vrot.slane %v601_v48, 2  ;;  %v625_v51 = vadd.f32 %v624_v49, %v623_v47 }
 0x112   : > { %v603_v52 = vadd.f32 %v602_v50, %v601_v48  ;;  %v626_v53 = vrot.slane %v625_v51, 2 }
 0x114   : > { %v604_v54 = vrot.slane %v603_v52, 1  ;;  %v627_v55 = vadd.f32 %v626_v53, %v625_v51 }
 0x116   : > { %v605_v57 = vadd.f32 %v604_v54, %v603_v52  ;;  %v628_v58 = vrot.slane %v627_v55, 1 }
 0x118   : > { %v606_v60 = vadd.f32 %v605_v57, %v592_v56  ;;  %v629_v61 = vadd.f32 %v628_v58, %v627_v55 }
 0x11a   : > { %607 = vst [vmem:[%s1090_s19] sm:$0x1] %v606_v60  ;;  %v630_v62 = vadd.f32 %v629_v61, %v608_v59 }
 0x11c   : > { %631 = vst [vmem:[%s1096_s22] sm:$0x1] %v630_v62 }
 0x11d PF: > { %s15_s17 = sadd.s32 1, %s1002_s17   ;;  %s1123_s15 = smov %s998_s16 }
 0x11e   : > { %p12_p5 = scmp.ge.s32.totalorder %s15_s17, 4   ;;  %s1124_s16 = smov %s1126_s18 }
 0x120   :  { %14 = sbr.rel (!%p12_p5) target bundleno = 2 (0x2), region = 97 }

// kernel: generator_hd_forward.108
= control target key start
LH: loop header
LB: loop body
LE: loop exit
PB: predicated region body
PF: predicated region fallthrough
CT: control target
= control target key end

     0   :  { %s1075_s12 = smov 0   ;;  %s1077_s13 = smov 0   ;;  %s1306_s0 = inlined_call_operand.vmem [shape: bf16[2,256,128], index: 0, kind: input, shape index: {}]   ;;  %s1307_s1 = inlined_call_operand.vmem [shape: f32[2,1,128], index: 1, kind: input, shape index: {}]   ;;  %s1308_s2 = inlined_call_operand.vmem [shape: f32[2,1,128], index: 2, kind: input, shape index: {}]   ;;  %s1309_s3 = inlined_call_operand.vmem [shape: bf16[2,256,128], index: 3, kind: output, shape index: {}]  }
   0x1   :  { %s1079_s14 = smov 0  }
   0x2 LB: > { %s32_s15 = sadd.s32 1, %s1049_s13  ;;  %p758_p0 = scmp.ge.s32.totalorder %s1053_s14, 1  ;;  %s1053_s14 = sphi %s1079_s14, %s13_s14   ;;  %s1049_s13 = sphi %s1077_s13, %s1311_s13   ;;  %s1045_s12 = sphi %s1075_s12, %s1310_s12  }
   0x3   : > { %p34_p1 = scmp.ge.s32.totalorder %s32_s15, 2  ;;  %p198_p2 = scmp.lt.s32.totalorder %s1053_s14, 3 }
   0x5   : > { %s1313_s15 = smov (%p34_p1, %s32_s15), 0  ;;  %p199_p3 = pnand %p758_p0, %p198_p2 }
   0x6   : > { %p249_p4 = scmp.lt.s32.totalorder (!%p199_p3), %s1045_s12, 1  ;;  %v358_v0 = vlaneseq (!%p199_p3) }
   0x7   : > { %202 = sbr.rel (%p199_p3) target bundleno = 64 (0x40), region = 32 }
   0x8   : > { %v1095_v1 = vshrl.u32 (!%p199_p3), %v358_v0, 7 }
   0xa   : > { %v360_v5 = vsub.s32 (!%p199_p3), 0, %v1095_v1 }
   0xe   : > { %s1315_s12 = smov (!%p249_p4, %s1045_s12), 1 }
   0xf   : > { %s797_s16 = sshll.u32 %s1315_s12, 7  ;;  %s266_s19 = scalar_lea.vmem %s1307_s1, %s1315_s12 }
  0x10   : > { %s1107_s22 = scalar_lea.vmem %s1306_s0, %s797_s16  ;;  %s272_s25 = scalar_lea.vmem %s1308_s2, %s1315_s12  ;;  %v350_v2 = vld [vmem:[%s266_s19] sm:$0x1] }
  0x11   : > { %v351_v3 = vmul.f32 0.0009765625, %v350_v2  ;;  %v352_v4 = vld [vmem:[%s272_s25] sm:$0x1]  ;;  %v975_v9 = vld [vmem:[%s1107_s22 + $0x8] sm:$0xff]   ;;  %v976_v13 = vld [vmem:[%s1107_s22 + $0x10] sm:$0xff]   ;;  %s1232_s28 = scalar_lea.vmem %s1309_s3, %s797_s16 }
  0x12   : > { %v832_v6 = vld [vmem:[%s1107_s22] sm:$0xff]   ;;  %v353_v7 = vmul.f32 0.0009765625, %v352_v4  ;;  %v977_v14 = vld [vmem:[%s1107_s22 + $0x18] sm:$0xff]   ;;  %v837_v18 = vunpack.c.l.bf16 %v975_v9  ;;  %v979_v19 = vld [vmem:[%s1107_s22 + $0x28] sm:$0xff]   ;;  %v838_v21 = vunpack.c.h.bf16 %v975_v9  ;;  %v841_v22 = vunpack.c.l.bf16 %v976_v13 }
  0x13   : > { %v354_v8 = vmul.f32 %v351_v3, %v351_v3  ;;  %v833_v10 = vunpack.c.l.bf16 %v832_v6  ;;  %v1118_v12 = vrot.slane %v351_v3, %v360_v5  ;;  %v978_v15 = vld [vmem:[%s1107_s22 + $0x20] sm:$0xff]   ;;  %v834_v16 = vunpack.c.h.bf16 %v832_v6  ;;  %v980_v20 = vld [vmem:[%s1107_s22 + $0x30] sm:$0xff]   ;;  %v981_v25 = vld [vmem:[%s1107_s22 + $0x38] sm:$0xff]  }
  0x14   : > { %v842_v23 = vunpack.c.h.bf16 %v976_v13  ;;  %v845_v24 = vunpack.c.l.bf16 %v977_v14  ;;  %v846_v28 = vunpack.c.h.bf16 %v977_v14  ;;  %v849_v29 = vunpack.c.l.bf16 %v978_v15  ;;  %v982_v37 = vld [vmem:[%s1107_s22 + $0x40] sm:$0xff]   ;;  %v983_v46 = vld [vmem:[%s1107_s22 + $0x48] sm:$0xff]   ;;  %v984_v47 = vld [vmem:[%s1107_s22 + $0x50] sm:$0xff]  }
  0x15   : > { %v355_v11 = vsub.f32 %v353_v7, %v354_v8  ;;  %v1127_v26 = vsub.f32 %v833_v10, %v1118_v12  ;;  %v850_v30 = vunpack.c.h.bf16 %v978_v15  ;;  %v853_v31 = vunpack.c.l.bf16 %v979_v19  ;;  %v985_v52 = vld [vmem:[%s1107_s22 + $0x58] sm:$0xff]   ;;  %v986_v53 = vld [vmem:[%s1107_s22 + $0x60] sm:$0xff]   ;;  %v987_v58 = vld [vmem:[%s1107_s22 + $0x68] sm:$0xff]  }
  0x16   : > { %v854_v32 = vunpack.c.h.bf16 %v979_v19  ;;  %v857_v33 = vunpack.c.l.bf16 %v980_v20  ;;  %v858_v34 = vunpack.c.h.bf16 %v980_v20  ;;  %v861_v35 = vunpack.c.l.bf16 %v981_v25  ;;  %v988_v63 = vld [vmem:[%s1107_s22 + $0x70] sm:$0xff]   ;;  %v989_v0 = vld [vmem:[%s1107_s22 + $0x78] sm:$0xff]  }
  0x17   : > { %v356_v17 = vmax.f32 %v355_v11, 0.0  ;;  %v862_v36 = vunpack.c.h.bf16 %v981_v25  ;;  %v364_v38 = vsub.f32 %v834_v16, %v1118_v12  ;;  %v365_v39 = vsub.f32 %v837_v18, %v1118_v12 }
  0x18   : > { %v366_v40 = vsub.f32 %v838_v21, %v1118_v12  ;;  %v367_v41 = vsub.f32 %v841_v22, %v1118_v12  ;;  %v368_v42 = vsub.f32 %v842_v23, %v1118_v12  ;;  %v369_v43 = vsub.f32 %v845_v24, %v1118_v12 }
  0x19   : > { %v395_v27 = vadd.f32 1e-05, %v356_v17  ;;  %v370_v44 = vsub.f32 %v846_v28, %v1118_v12  ;;  %v1138_v45 = vsub.f32 %v849_v29, %v1118_v12  ;;  %v1143_v48 = vsub.f32 %v850_v30, %v1118_v12 }
  0x1a   : > { %v1146_v49 = vsub.f32 %v853_v31, %v1118_v12  ;;  %v1149_v50 = vsub.f32 %v854_v32, %v1118_v12  ;;  %v865_v51 = vunpack.c.l.bf16 %v982_v37  ;;  %v1154_v54 = vsub.f32 %v857_v33, %v1118_v12 }
  0x1b   : > { %1029 = vrsqrt.f32 %v395_v27  ;;  %v1157_v55 = vsub.f32 %v858_v34, %v1118_v12  ;;  %v1160_v56 = vsub.f32 %v861_v35, %v1118_v12  ;;  %v1163_v57 = vsub.f32 %v862_v36, %v1118_v12 }
  0x1c   : > { %v866_v59 = vunpack.c.h.bf16 %v982_v37  ;;  %v869_v60 = vunpack.c.l.bf16 %v983_v46  ;;  %v870_v61 = vunpack.c.h.bf16 %v983_v46  ;;  %v873_v62 = vunpack.c.l.bf16 %v984_v47 }
  0x1d   : > { %v874_v2 = vunpack.c.h.bf16 %v984_v47  ;;  %v877_v3 = vunpack.c.l.bf16 %v985_v52  ;;  %v878_v4 = vunpack.c.h.bf16 %v985_v52  ;;  %v881_v6 = vunpack.c.l.bf16 %v986_v53 }
  0x1e   : > { %v1169_v7 = vsub.f32 %v865_v51, %v1118_v12  ;;  %v882_v8 = vunpack.c.h.bf16 %v986_v53  ;;  %v885_v9 = vunpack.c.l.bf16 %v987_v58  ;;  %v886_v10 = vunpack.c.h.bf16 %v987_v58 }
  0x1f   : > { %v889_v11 = vunpack.c.l.bf16 %v988_v63  ;;  %v890_v13 = vunpack.c.h.bf16 %v988_v63  ;;  %v893_v14 = vunpack.c.l.bf16 %v989_v0  ;;  %v894_v15 = vunpack.c.h.bf16 %v989_v0 }
  0x20   : > { %v380_v16 = vsub.f32 %v866_v59, %v1118_v12  ;;  %v1173_v17 = vsub.f32 %v869_v60, %v1118_v12  ;;  %v1176_v18 = vsub.f32 %v870_v61, %v1118_v12  ;;  %v1179_v19 = vsub.f32 %v873_v62, %v1118_v12 }
  0x21   : > { %v1182_v21 = vsub.f32 %v874_v2, %v1118_v12  ;;  %v1185_v22 = vsub.f32 %v877_v3, %v1118_v12  ;;  %v1188_v23 = vsub.f32 %v878_v4, %v1118_v12  ;;  %v1191_v24 = vsub.f32 %v881_v6, %v1118_v12 }
  0x22   : > { %v1198_v27 = vsub.f32 %v882_v8, %v1118_v12  ;;  %v1201_v28 = vsub.f32 %v885_v9, %v1118_v12  ;;  %v1204_v29 = vsub.f32 %v886_v10, %v1118_v12  ;;  %v1207_v30 = vsub.f32 %v889_v11, %v1118_v12 }
  0x23   : > { %v1210_v31 = vsub.f32 %v890_v13, %v1118_v12  ;;  %v1213_v1 = vsub.f32 %v893_v14, %v1118_v12 }
  0x25   : > { %v1030_v20 = vpop.eup %1029 }
  0x26   : > { %v1195_v25 = vrot.slane %v1030_v20, %v360_v5  ;;  %v1216_v5 = vsub.f32 %v894_v15, %v1118_v12 }
  0x28   : > { %v403_v32 = vmul.f32 %v1195_v25, %v1127_v26  ;;  %v404_v33 = vmul.f32 %v1195_v25, %v364_v38  ;;  %v405_v34 = vmul.f32 %v1195_v25, %v365_v39  ;;  %v406_v35 = vmul.f32 %v1195_v25, %v366_v40 }
  0x29   : > { %v407_v36 = vmul.f32 %v1195_v25, %v367_v41  ;;  %v408_v37 = vmul.f32 %v1195_v25, %v368_v42  ;;  %v409_v46 = vmul.f32 %v1195_v25, %v369_v43  ;;  %v410_v47 = vmul.f32 %v1195_v25, %v370_v44 }
  0x2a   : > { %v435_v51 = vmax.f32 %v403_v32, 0.0  ;;  %v436_v12 = vmax.f32 %v404_v33, 0.0  ;;  %v437_v52 = vmax.f32 %v405_v34, 0.0  ;;  %v438_v53 = vmax.f32 %v406_v35, 0.0 }
  0x2b   : > { %v439_v26 = vmax.f32 %v407_v36, 0.0  ;;  %v440_v38 = vmax.f32 %v408_v37, 0.0  ;;  %v441_v39 = vmax.f32 %v409_v46, 0.0  ;;  %v442_v40 = vmax.f32 %v410_v47, 0.0 }
  0x2c   : > { %v898_v41 = vpack.c.bf16 %v436_v12, %v435_v51  ;;  %v903_v42 = vpack.c.bf16 %v438_v53, %v437_v52  ;;  %v411_v43 = vmul.f32 %v1195_v25, %v1138_v45  ;;  %v412_v44 = vmul.f32 %v1195_v25, %v1143_v48 }
  0x2d   : > { %v908_v58 = vpack.c.bf16 %v440_v38, %v439_v26  ;;  %v913_v59 = vpack.c.bf16 %v442_v40, %v441_v39  ;;  %v413_v60 = vmul.f32 %v1195_v25, %v1146_v49  ;;  %v414_v61 = vmul.f32 %v1195_v25, %v1149_v50 }
  0x2e   : > { %899 = vst [vmem:[%s1232_s28] sm:$0xff] %v898_v41   ;;  %990 = vst [vmem:[%s1232_s28 + $0x8] sm:$0xff] %v903_v42   ;;  %v443_v62 = vmax.f32 %v411_v43, 0.0  ;;  %v444_v63 = vmax.f32 %v412_v44, 0.0  ;;  %v415_v0 = vmul.f32 %v1195_v25, %v1154_v54  ;;  %v416_v45 = vmul.f32 %v1195_v25, %v1157_v55 }
  0x2f   : > { %991 = vst [vmem:[%s1232_s28 + $0x10] sm:$0xff] %v908_v58   ;;  %992 = vst [vmem:[%s1232_s28 + $0x18] sm:$0xff] %v913_v59   ;;  %v445_v48 = vmax.f32 %v413_v60, 0.0  ;;  %v446_v2 = vmax.f32 %v414_v61, 0.0  ;;  %v417_v49 = vmul.f32 %v1195_v25, %v1160_v56  ;;  %v418_v50 = vmul.f32 %v1195_v25, %v1163_v57 }
  0x30   : > { %v918_v3 = vpack.c.bf16 %v444_v63, %v443_v62  ;;  %v447_v4 = vmax.f32 %v415_v0, 0.0  ;;  %v448_v6 = vmax.f32 %v416_v45, 0.0  ;;  %v419_v54 = vmul.f32 %v1195_v25, %v1169_v7 }
  0x31   : > { %v923_v8 = vpack.c.bf16 %v446_v2, %v445_v48  ;;  %v449_v55 = vmax.f32 %v417_v49, 0.0  ;;  %v450_v9 = vmax.f32 %v418_v50, 0.0  ;;  %v420_v10 = vmul.f32 %v1195_v25, %v380_v16 }
  0x32   : > { %993 = vst [vmem:[%s1232_s28 + $0x20] sm:$0xff] %v918_v3   ;;  %v928_v11 = vpack.c.bf16 %v448_v6, %v447_v4  ;;  %v451_v13 = vmax.f32 %v419_v54, 0.0  ;;  %v421_v56 = vmul.f32 %v1195_v25, %v1173_v17  ;;  %v422_v57 = vmul.f32 %v1195_v25, %v1176_v18 }
  0x33   : > { %994 = vst [vmem:[%s1232_s28 + $0x28] sm:$0xff] %v923_v8   ;;  %v933_v14 = vpack.c.bf16 %v450_v9, %v449_v55  ;;  %v452_v15 = vmax.f32 %v420_v10, 0.0  ;;  %v423_v7 = vmul.f32 %v1195_v25, %v1179_v19  ;;  %v424_v16 = vmul.f32 %v1195_v25, %v1182_v21 }
  0x34   : > { %995 = vst [vmem:[%s1232_s28 + $0x30] sm:$0xff] %v928_v11   ;;  %v453_v20 = vmax.f32 %v421_v56, 0.0  ;;  %v454_v32 = vmax.f32 %v422_v57, 0.0  ;;  %v425_v33 = vmul.f32 %v1195_v25, %v1185_v22  ;;  %v426_v17 = vmul.f32 %v1195_v25, %v1188_v23 }
  0x35   : > { %996 = vst [vmem:[%s1232_s28 + $0x38] sm:$0xff] %v933_v14   ;;  %v938_v18 = vpack.c.bf16 %v452_v15, %v451_v13  ;;  %v455_v34 = vmax.f32 %v423_v7, 0.0  ;;  %v456_v35 = vmax.f32 %v424_v16, 0.0  ;;  %v427_v19 = vmul.f32 %v1195_v25, %v1191_v24 }
  0x36   : > { %v943_v36 = vpack.c.bf16 %v454_v32, %v453_v20  ;;  %v457_v21 = vmax.f32 %v425_v33, 0.0  ;;  %v458_v37 = vmax.f32 %v426_v17, 0.0  ;;  %v428_v46 = vmul.f32 %v1195_v25, %v1198_v27 }
  0x37   : > { %997 = vst [vmem:[%s1232_s28 + $0x40] sm:$0xff] %v938_v18   ;;  %v948_v22 = vpack.c.bf16 %v456_v35, %v455_v34  ;;  %v459_v47 = vmax.f32 %v427_v19, 0.0  ;;  %v429_v23 = vmul.f32 %v1195_v25, %v1201_v28  ;;  %v430_v51 = vmul.f32 %v1195_v25, %v1204_v29 }
  0x38   : > { %998 = vst [vmem:[%s1232_s28 + $0x48] sm:$0xff] %v943_v36   ;;  %v953_v12 = vpack.c.bf16 %v458_v37, %v457_v21  ;;  %v460_v24 = vmax.f32 %v428_v46, 0.0  ;;  %v431_v52 = vmul.f32 %v1195_v25, %v1207_v30  ;;  %v432_v27 = vmul.f32 %v1195_v25, %v1210_v31 }
  0x39   : > { %999 = vst [vmem:[%s1232_s28 + $0x50] sm:$0xff] %v948_v22   ;;  %v461_v53 = vmax.f32 %v429_v23, 0.0  ;;  %v462_v26 = vmax.f32 %v430_v51, 0.0  ;;  %v433_v28 = vmul.f32 %v1195_v25, %v1213_v1  ;;  %v434_v29 = vmul.f32 %v1195_v25, %v1216_v5 }
  0x3a   : > { %1000 = vst [vmem:[%s1232_s28 + $0x58] sm:$0xff] %v953_v12   ;;  %v958_v38 = vpack.c.bf16 %v460_v24, %v459_v47  ;;  %v463_v39 = vmax.f32 %v431_v52, 0.0  ;;  %v464_v40 = vmax.f32 %v432_v27, 0.0 }
  0x3b   : > { %v963_v30 = vpack.c.bf16 %v462_v26, %v461_v53  ;;  %v465_v41 = vmax.f32 %v433_v28, 0.0  ;;  %v466_v42 = vmax.f32 %v434_v29, 0.0 }
  0x3c   : > { %1001 = vst [vmem:[%s1232_s28 + $0x60] sm:$0xff] %v958_v38   ;;  %v968_v31 = vpack.c.bf16 %v464_v40, %v463_v39 }
  0x3d   : > { %1002 = vst [vmem:[%s1232_s28 + $0x68] sm:$0xff] %v963_v30   ;;  %v973_v43 = vpack.c.bf16 %v466_v42, %v465_v41 }
  0x3e   : > { %1003 = vst [vmem:[%s1232_s28 + $0x70] sm:$0xff] %v968_v31  }
  0x3f   : > { %1004 = vst [vmem:[%s1232_s28 + $0x78] sm:$0xff] %v973_v43  }
  0x40 PF: > { %s13_s14 = sadd.s32 1, %s1053_s14   ;;  %s1310_s12 = smov %s1049_s13 }
  0x41   : > { %p10_p5 = scmp.ge.s32.totalorder %s13_s14, 4   ;;  %s1311_s13 = smov %s1313_s15 }
  0x43   :  { %12 = sbr.rel (!%p10_p5) target bundleno = 2 (0x2), region = 68 }

// kernel: generator_hd_forward.109
= control target key start
LH: loop header
LB: loop body
LE: loop exit
PB: predicated region body
PF: predicated region fallthrough
CT: control target
= control target key end

     0   :  { %s3008_s12 = smov 0   ;;  %s3010_s13 = smov 0   ;;  %s3467_s0 = inlined_call_operand.vmem [shape: bf16[2,1024,512], index: 0, kind: input, shape index: {}]   ;;  %s3468_s1 = inlined_call_operand.vmem [shape: bf16[512,128], index: 1, kind: input, shape index: {}]   ;;  %s3469_s2 = inlined_call_operand.vmem [shape: f32[1,128], index: 2, kind: input, shape index: {}]   ;;  %s3470_s3 = inlined_call_operand.vmem [shape: f32[2,1024,128], index: 3, kind: output, shape index: {}]  }
   0x1   :  { %s3012_s14 = smov 0   ;;  %s3014_s15 = smov 0  }
   0x2   :  { %s3016_s16 = smov 0  }
   0x3 LB: > { %s31_s17 = sadd.s32 1, %s2977_s14  ;;  %s39_s18 = sadd.s32 1, %s2981_s15  ;;  %s2985_s16 = sphi %s3016_s16, %s13_s16   ;;  %s2981_s15 = sphi %s3014_s15, %s3474_s15   ;;  %s2977_s14 = sphi %s3012_s14, %s3473_s14   ;;  %s2973_s13 = sphi %s3010_s13, %s3472_s13   ;;  %s2969_s12 = sphi %s3008_s12, %s3471_s12  }
   0x4   : > { %p33_p0 = scmp.ge.s32.totalorder %s31_s17, 2  ;;  %p2511_p1 = scmp.ge.s32.totalorder %s2985_s16, 1 }
   0x5   : > { %p206_p2 = scmp.lt.s32.totalorder %s2985_s16, 5 }
   0x6   : > { %s3476_s17 = smov (%p33_p0, %s31_s17), 0  ;;  %s3478_s18 = smov (!%p33_p0, %s39_s18), %s2981_s15 }
   0x7   : > { %p207_p3 = pnand %p2511_p1, %p206_p2  ;;  %p41_p4 = scmp.ge.s32.totalorder %s3478_s18, 2 }
   0x8   : > { %v2723_v0 = vld [vmem:[%s3468_s1] sm:$0xff] (!%p207_p3)   ;;  %v2987_v1 = vmov (!%p207_p3), 0   ;;  %v2725_v3 = vld [vmem:[%s3468_s1 + $0x8] sm:$0xff] (!%p207_p3)   ;;  %v2727_v5 = vld [vmem:[%s3468_s1 + $0x10] sm:$0xff] (!%p207_p3)   ;;  %s2512_s6 = sshll.u32 (!%p207_p3), %s2969_s12, 6  ;;  %p259_p5 = scmp.lt.s32.totalorder (!%p207_p3), %s2973_s13, 1 }
   0x9   : > { %s3480_s18 = smov (%p41_p4, %s3478_s18), 0  ;;  %210 = sbr.rel (%p207_p3) target bundleno = 541 (0x21d), region = 32 }
   0xa   : > { %1455 = vmatprep.subr.bf16.mxu0 (!%p207_p3), %v2987_v1  ;;  %1744 = vmatprep.subr.bf16.mxu1 (!%p207_p3), %v2987_v1  ;;  %v2724_v2 = vld [vmem:[%s3468_s1 + $0x80] sm:$0xff] (!%p207_p3)   ;;  %v2726_v4 = vld [vmem:[%s3468_s1 + $0x88] sm:$0xff] (!%p207_p3)   ;;  %v2728_v6 = vld [vmem:[%s3468_s1 + $0x90] sm:$0xff] (!%p207_p3)   ;;  %p261_p6 = scmp.lt.s32.totalorder (!%p207_p3), %s2512_s6, 127 }
   0xb   : > { %1456 = vmatpush1.bf16.msra.mxu0 (!%p207_p3), %v2723_v0  ;;  %1745 = vmatpush1.bf16.msra.mxu1 (!%p207_p3), %v2724_v2  ;;  %v2729_v7 = vld [vmem:[%s3468_s1 + $0x18] sm:$0xff] (!%p207_p3)   ;;  %v2731_v9 = vld [vmem:[%s3468_s1 + $0x20] sm:$0xff] (!%p207_p3)   ;;  %v2733_v11 = vld [vmem:[%s3468_s1 + $0x28] sm:$0xff] (!%p207_p3)  }
   0xc   : > { %1457 = vmatprep.subr.bf16.mxu0 (!%p207_p3), %v2987_v1  ;;  %1746 = vmatprep.subr.bf16.mxu1 (!%p207_p3), %v2987_v1  ;;  %v2730_v8 = vld [vmem:[%s3468_s1 + $0x98] sm:$0xff] (!%p207_p3)   ;;  %v2732_v10 = vld [vmem:[%s3468_s1 + $0xa0] sm:$0xff] (!%p207_p3)   ;;  %v2734_v12 = vld [vmem:[%s3468_s1 + $0xa8] sm:$0xff] (!%p207_p3)  }
   0xd   : > { %v2735_v13 = vld [vmem:[%s3468_s1 + $0x30] sm:$0xff] (!%p207_p3)   ;;  %v2737_v15 = vld [vmem:[%s3468_s1 + $0x38] sm:$0xff] (!%p207_p3)   ;;  %v2739_v17 = vld [vmem:[%s3468_s1 + $0x40] sm:$0xff] (!%p207_p3)  }
   0xe   : > { %v2736_v14 = vld [vmem:[%s3468_s1 + $0xb0] sm:$0xff] (!%p207_p3)   ;;  %v2738_v16 = vld [vmem:[%s3468_s1 + $0xb8] sm:$0xff] (!%p207_p3)   ;;  %v2740_v18 = vld [vmem:[%s3468_s1 + $0xc0] sm:$0xff] (!%p207_p3)  }
   0xf   : > { %1458 = vmatpush1.bf16.msra.mxu0 (!%p207_p3), %v2725_v3  ;;  %1747 = vmatpush1.bf16.msra.mxu1 (!%p207_p3), %v2726_v4  ;;  %v2741_v20 = vld [vmem:[%s3468_s1 + $0x48] sm:$0xff] (!%p207_p3)   ;;  %v2743_v23 = vld [vmem:[%s3468_s1 + $0x50] sm:$0xff] (!%p207_p3)   ;;  %v2745_v25 = vld [vmem:[%s3468_s1 + $0x58] sm:$0xff] (!%p207_p3)  }
  0x10   : > { %1459 = vmatprep.subr.bf16.mxu0 %v2987_v1  ;;  %1748 = vmatprep.subr.bf16.mxu1 %v2987_v1  ;;  %s3482_s13 = smov (!%p259_p5, %s2973_s13), 1  ;;  %s3484_s6 = smov (!%p261_p6, %s2512_s6), 127  ;;  %v2742_v22 = vld [vmem:[%s3468_s1 + $0xc8] sm:$0xff]   ;;  %v2744_v24 = vld [vmem:[%s3468_s1 + $0xd0] sm:$0xff]   ;;  %v2746_v26 = vld [vmem:[%s3468_s1 + $0xd8] sm:$0xff]  }
  0x11   : > { %s2513_s23 = sshll.u32 %s3484_s6, 2  ;;  %s2514_s24 = sshll.u32 %s3482_s13, 9  ;;  %v2747_v27 = vld [vmem:[%s3468_s1 + $0x60] sm:$0xff]   ;;  %v2749_v29 = vld [vmem:[%s3468_s1 + $0x68] sm:$0xff]   ;;  %v2751_v31 = vld [vmem:[%s3468_s1 + $0x70] sm:$0xff]  }
  0x12   : > { %s268_s29 = sadd.s32 %s2514_s24, %s2513_s23  ;;  %v2748_v28 = vld [vmem:[%s3468_s1 + $0xe0] sm:$0xff]   ;;  %v2750_v30 = vld [vmem:[%s3468_s1 + $0xe8] sm:$0xff]   ;;  %v2752_v32 = vld [vmem:[%s3468_s1 + $0xf0] sm:$0xff]   ;;  %s2517_s4 = sshll.u32 %s3482_s13, 7 }
  0x13   : > { %1460 = vmatpush1.bf16.msra.mxu0 %v2727_v5  ;;  %1749 = vmatpush1.bf16.msra.mxu1 %v2728_v6  ;;  %s2515_s8 = sshll.u32 %s268_s29, 2  ;;  %v2753_v33 = vld [vmem:[%s3468_s1 + $0x78] sm:$0xff]   ;;  %s294_s5 = sadd.s32 %s2517_s4, %s3484_s6 }
  0x14   : > { %1461 = vmatprep.subr.bf16.mxu0 %v2987_v1  ;;  %1750 = vmatprep.subr.bf16.mxu1 %v2987_v1  ;;  %s3121_s19 = scalar_lea.vmem %s3467_s0, %s2515_s8  ;;  %v2754_v34 = vld [vmem:[%s3468_s1 + $0xf8] sm:$0xff]   ;;  %s2518_s7 = sshll.u32 %s294_s5, 3 }
  0x15   : > { %v2757_v19 = vld [vmem:[%s3121_s19 + $0x4] ss:$16 sps:$4 sm:$0xff]   ;;  %v2760_v21 = vld [vmem:[%s3121_s19 + $0xc] ss:$16 sps:$4 sm:$0xff]   ;;  %v2755_v35 = vld [vmem:[%s3121_s19] ss:$16 sps:$4 sm:$0xff]   ;;  %s3307_s10 = scalar_lea.vmem %s3470_s3, %s2518_s7 }
  0x16   : > { %1487 = vmatprep.mubr.bf16.mxu0 %v2757_v19  ;;  %1776 = vmatprep.mubr.bf16.mxu1 %v2760_v21  ;;  %v2758_v36 = vld [vmem:[%s3121_s19 + $0x8] ss:$16 sps:$4 sm:$0xff]   ;;  %v2761_v37 = vld [vmem:[%s3121_s19 + $0x24] ss:$16 sps:$4 sm:$0xff]   ;;  %v2763_v38 = vld [vmem:[%s3121_s19 + $0x2c] ss:$16 sps:$4 sm:$0xff]  }
  0x17   : > { %1462 = vmatpush1.bf16.msra.mxu0 %v2729_v7  ;;  %1751 = vmatpush1.bf16.msra.mxu1 %v2730_v8  ;;  %v2765_v39 = vld [vmem:[%s3121_s19 + $0x20] ss:$16 sps:$4 sm:$0xff]   ;;  %v2766_v40 = vld [vmem:[%s3121_s19 + $0x28] ss:$16 sps:$4 sm:$0xff]   ;;  %v2767_v41 = vld [vmem:[%s3121_s19 + $0x44] ss:$16 sps:$4 sm:$0xff]  }
  0x18   : > { %1463 = vmatprep.subr.bf16.mxu0 %v2987_v1  ;;  %1752 = vmatprep.subr.bf16.mxu1 %v2987_v1  ;;  %v2769_v42 = vld [vmem:[%s3121_s19 + $0x4c] ss:$16 sps:$4 sm:$0xff]   ;;  %v2771_v43 = vld [vmem:[%s3121_s19 + $0x40] ss:$16 sps:$4 sm:$0xff]   ;;  %v2772_v44 = vld [vmem:[%s3121_s19 + $0x48] ss:$16 sps:$4 sm:$0xff]  }
  0x19   : > { %v2773_v45 = vld [vmem:[%s3121_s19 + $0x64] ss:$16 sps:$4 sm:$0xff]   ;;  %v2775_v46 = vld [vmem:[%s3121_s19 + $0x6c] ss:$16 sps:$4 sm:$0xff]   ;;  %v2777_v47 = vld [vmem:[%s3121_s19 + $0x60] ss:$16 sps:$4 sm:$0xff]  }
  0x1a   : > { %v2778_v48 = vld [vmem:[%s3121_s19 + $0x68] ss:$16 sps:$4 sm:$0xff]   ;;  %v2779_v49 = vld [vmem:[%s3121_s19 + $0x84] ss:$16 sps:$4 sm:$0xff]   ;;  %v2781_v50 = vld [vmem:[%s3121_s19 + $0x8c] ss:$16 sps:$4 sm:$0xff]  }
  0x1b   : > { %1464 = vmatpush1.bf16.msra.mxu0 %v2731_v9  ;;  %1753 = vmatpush1.bf16.msra.mxu1 %v2732_v10  ;;  %v2783_v51 = vld [vmem:[%s3121_s19 + $0x80] ss:$16 sps:$4 sm:$0xff]   ;;  %v2784_v52 = vld [vmem:[%s3121_s19 + $0x88] ss:$16 sps:$4 sm:$0xff]   ;;  %v2785_v53 = vld [vmem:[%s3121_s19 + $0xa4] ss:$16 sps:$4 sm:$0xff]  }
  0x1c   : > { %1465 = vmatprep.subr.bf16.mxu0 %v2987_v1  ;;  %1754 = vmatprep.subr.bf16.mxu1 %v2987_v1  ;;  %v2787_v54 = vld [vmem:[%s3121_s19 + $0xac] ss:$16 sps:$4 sm:$0xff]   ;;  %v2789_v55 = vld [vmem:[%s3121_s19 + $0xa0] ss:$16 sps:$4 sm:$0xff]   ;;  %v2790_v56 = vld [vmem:[%s3121_s19 + $0xa8] ss:$16 sps:$4 sm:$0xff]  }
  0x1d   : > { %v2791_v57 = vld [vmem:[%s3121_s19 + $0xc4] ss:$16 sps:$4 sm:$0xff]   ;;  %v2793_v58 = vld [vmem:[%s3121_s19 + $0xcc] ss:$16 sps:$4 sm:$0xff]   ;;  %v2795_v59 = vld [vmem:[%s3121_s19 + $0xc0] ss:$16 sps:$4 sm:$0xff]  }
  0x1e   : > { %v2796_v60 = vld [vmem:[%s3121_s19 + $0xc8] ss:$16 sps:$4 sm:$0xff]   ;;  %v2797_v61 = vld [vmem:[%s3121_s19 + $0xe4] ss:$16 sps:$4 sm:$0xff]   ;;  %v2799_v62 = vld [vmem:[%s3121_s19 + $0xec] ss:$16 sps:$4 sm:$0xff]  }
  0x1f   : > { %1466 = vmatpush1.bf16.msra.mxu0 %v2733_v11  ;;  %1755 = vmatpush1.bf16.msra.mxu1 %v2734_v12  ;;  %v2801_v63 = vld [vmem:[%s3121_s19 + $0xe0] ss:$16 sps:$4 sm:$0xff]   ;;  %v2802_v0 = vld [vmem:[%s3121_s19 + $0xe8] ss:$16 sps:$4 sm:$0xff]   ;;  %v2805_v2 = vld [vmem:[%s3121_s19 + $0x10c] ss:$16 sps:$4 sm:$0xff]  }
  0x20   : > { %1467 = vmatprep.subr.bf16.mxu0 %v2987_v1  ;;  %1756 = vmatprep.subr.bf16.mxu1 %v2987_v1  ;;  %v2807_v3 = vld [vmem:[%s3121_s19 + $0x100] ss:$16 sps:$4 sm:$0xff]   ;;  %v2808_v4 = vld [vmem:[%s3121_s19 + $0x108] ss:$16 sps:$4 sm:$0xff]   ;;  %v2809_v5 = vld [vmem:[%s3121_s19 + $0x124] ss:$16 sps:$4 sm:$0xff]  }
  0x21   : > { %v2811_v6 = vld [vmem:[%s3121_s19 + $0x12c] ss:$16 sps:$4 sm:$0xff]   ;;  %v2813_v7 = vld [vmem:[%s3121_s19 + $0x120] ss:$16 sps:$4 sm:$0xff]   ;;  %v2814_v8 = vld [vmem:[%s3121_s19 + $0x128] ss:$16 sps:$4 sm:$0xff]  }
  0x22   : > { %v2815_v9 = vld [vmem:[%s3121_s19 + $0x144] ss:$16 sps:$4 sm:$0xff]   ;;  %v2817_v10 = vld [vmem:[%s3121_s19 + $0x14c] ss:$16 sps:$4 sm:$0xff]   ;;  %v2819_v11 = vld [vmem:[%s3121_s19 + $0x140] ss:$16 sps:$4 sm:$0xff]  }
  0x23   : > { %1468 = vmatpush1.bf16.msra.mxu0 %v2735_v13  ;;  %1757 = vmatpush1.bf16.msra.mxu1 %v2736_v14  ;;  %v2820_v12 = vld [vmem:[%s3121_s19 + $0x148] ss:$16 sps:$4 sm:$0xff]   ;;  %v2821_v13 = vld [vmem:[%s3121_s19 + $0x164] ss:$16 sps:$4 sm:$0xff]   ;;  %v2823_v14 = vld [vmem:[%s3121_s19 + $0x16c] ss:$16 sps:$4 sm:$0xff]  }
  0x24   : > { %1469 = vmatprep.subr.bf16.mxu0 %v2987_v1  ;;  %1758 = vmatprep.subr.bf16.mxu1 %v2987_v1  ;;  %v2831_v19 = vld [vmem:[%s3121_s19 + $0x180] ss:$16 sps:$4 sm:$0xff]   ;;  %v2833_v21 = vld [vmem:[%s3121_s19 + $0x1a4] ss:$16 sps:$4 sm:$0xff]  }
  0x27   : > { %1470 = vmatpush1.bf16.msra.mxu0 %v2737_v15  ;;  %1759 = vmatpush1.bf16.msra.mxu1 %v2738_v16  ;;  %v2825_v15 = vld [vmem:[%s3121_s19 + $0x160] ss:$16 sps:$4 sm:$0xff]   ;;  %v2826_v16 = vld [vmem:[%s3121_s19 + $0x168] ss:$16 sps:$4 sm:$0xff]  }
  0x28   : > { %1471 = vmatprep.subr.bf16.mxu0 %v2987_v1  ;;  %1760 = vmatprep.subr.bf16.mxu1 %v2987_v1 }
  0x2b   : > { %1472 = vmatpush1.bf16.msra.mxu0 %v2739_v17  ;;  %1761 = vmatpush1.bf16.msra.mxu1 %v2740_v18  ;;  %v2827_v17 = vld [vmem:[%s3121_s19 + $0x184] ss:$16 sps:$4 sm:$0xff]   ;;  %v2829_v18 = vld [vmem:[%s3121_s19 + $0x18c] ss:$16 sps:$4 sm:$0xff]  }
  0x2c   : > { %1473 = vmatprep.subr.bf16.mxu0 %v2987_v1  ;;  %1762 = vmatprep.subr.bf16.mxu1 %v2987_v1 }
  0x2f   : > { %1474 = vmatpush1.bf16.msra.mxu0 %v2741_v20  ;;  %1763 = vmatpush1.bf16.msra.mxu1 %v2742_v22  ;;  %v2832_v20 = vld [vmem:[%s3121_s19 + $0x188] ss:$16 sps:$4 sm:$0xff]   ;;  %v2835_v22 = vld [vmem:[%s3121_s19 + $0x1ac] ss:$16 sps:$4 sm:$0xff]  }
  0x30   : > { %1475 = vmatprep.subr.bf16.mxu0 %v2987_v1  ;;  %1764 = vmatprep.subr.bf16.mxu1 %v2987_v1 }
  0x33   : > { %1476 = vmatpush1.bf16.msra.mxu0 %v2743_v23  ;;  %1765 = vmatpush1.bf16.msra.mxu1 %v2744_v24  ;;  %v2837_v23 = vld [vmem:[%s3121_s19 + $0x1a0] ss:$16 sps:$4 sm:$0xff]   ;;  %v2838_v24 = vld [vmem:[%s3121_s19 + $0x1a8] ss:$16 sps:$4 sm:$0xff]  }
  0x34   : > { %1477 = vmatprep.subr.bf16.mxu0 %v2987_v1  ;;  %1766 = vmatprep.subr.bf16.mxu1 %v2987_v1 }
  0x37   : > { %1478 = vmatpush1.bf16.msra.mxu0 %v2745_v25  ;;  %1767 = vmatpush1.bf16.msra.mxu1 %v2746_v26  ;;  %v2839_v25 = vld [vmem:[%s3121_s19 + $0x1c4] ss:$16 sps:$4 sm:$0xff]   ;;  %v2841_v26 = vld [vmem:[%s3121_s19 + $0x1cc] ss:$16 sps:$4 sm:$0xff]  }
  0x38   : > { %1479 = vmatprep.subr.bf16.mxu0 %v2987_v1  ;;  %1768 = vmatprep.subr.bf16.mxu1 %v2987_v1 }
  0x3b   : > { %1480 = vmatpush1.bf16.msra.mxu0 %v2747_v27  ;;  %1769 = vmatpush1.bf16.msra.mxu1 %v2748_v28  ;;  %v2843_v27 = vld [vmem:[%s3121_s19 + $0x1c0] ss:$16 sps:$4 sm:$0xff]   ;;  %v2844_v28 = vld [vmem:[%s3121_s19 + $0x1c8] ss:$16 sps:$4 sm:$0xff]  }
  0x3c   : > { %1481 = vmatprep.subr.bf16.mxu0 %v2987_v1  ;;  %1770 = vmatprep.subr.bf16.mxu1 %v2987_v1 }
  0x3f   : > { %1482 = vmatpush1.bf16.msra.mxu0 %v2749_v29  ;;  %1771 = vmatpush1.bf16.msra.mxu1 %v2750_v30  ;;  %v2845_v29 = vld [vmem:[%s3121_s19 + $0x1e4] ss:$16 sps:$4 sm:$0xff]   ;;  %v2847_v30 = vld [vmem:[%s3121_s19 + $0x1ec] ss:$16 sps:$4 sm:$0xff]  }
  0x40   : > { %1483 = vmatprep.subr.bf16.mxu0 %v2987_v1  ;;  %1772 = vmatprep.subr.bf16.mxu1 %v2987_v1 }
  0x43   : > { %1484 = vmatpush1.bf16.msra.mxu0 %v2751_v31  ;;  %1773 = vmatpush1.bf16.msra.mxu1 %v2752_v32  ;;  %v2849_v31 = vld [vmem:[%s3121_s19 + $0x1e0] ss:$16 sps:$4 sm:$0xff]   ;;  %v2850_v32 = vld [vmem:[%s3121_s19 + $0x1e8] ss:$16 sps:$4 sm:$0xff]  }
  0x44   : > { %1485 = vmatprep.subr.bf16.mxu0 %v2987_v1  ;;  %1774 = vmatprep.subr.bf16.mxu1 %v2987_v1  ;;  %v2803_v1 = vld [vmem:[%s3121_s19 + $0x104] ss:$16 sps:$4 sm:$0xff]  }
  0x47   : > { %1486 = vmatpush1.bf16.msra.mxu0 %v2753_v33  ;;  %1775 = vmatpush1.bf16.msra.mxu1 %v2754_v34  ;;  %v2851_v33 = vld [vmem:[%s3121_s19 + $0x204] ss:$16 sps:$4 sm:$0xff]   ;;  %v2853_v34 = vld [vmem:[%s3121_s19 + $0x20c] ss:$16 sps:$4 sm:$0xff]  }
  0x4a   : > { %1488 = vmatmul.mubr.bf16.vlgmr.msra.gmra.mrb[0].mxu0 %v2755_v35  ;;  %1777 = vmatmul.mubr.bf16.vlgmr.msra.gmra.mrb[0].mxu1 %v2758_v36  ;;  %v2855_v35 = vld [vmem:[%s3121_s19 + $0x200] ss:$16 sps:$4 sm:$0xff]   ;;  %v2856_v36 = vld [vmem:[%s3121_s19 + $0x208] ss:$16 sps:$4 sm:$0xff]  }
  0x4b   : > { %1495 = vmatprep.mubr.bf16.mxu0 %v2761_v37  ;;  %1784 = vmatprep.mubr.bf16.mxu1 %v2763_v38  ;;  %v2857_v37 = vld [vmem:[%s3121_s19 + $0x224] ss:$16 sps:$4 sm:$0xff]   ;;  %v2859_v38 = vld [vmem:[%s3121_s19 + $0x22c] ss:$16 sps:$4 sm:$0xff]  }
  0x52   : > { %1496 = vmatmul.mubr.bf16.gmra.mrb[4].mxu0 %v2765_v39  ;;  %1785 = vmatmul.mubr.bf16.gmra.mrb[4].mxu1 %v2766_v40  ;;  %v2861_v39 = vld [vmem:[%s3121_s19 + $0x220] ss:$16 sps:$4 sm:$0xff]   ;;  %v2862_v40 = vld [vmem:[%s3121_s19 + $0x228] ss:$16 sps:$4 sm:$0xff]  }
  0x53   : > { %1503 = vmatprep.mubr.bf16.mxu0 %v2767_v41  ;;  %1792 = vmatprep.mubr.bf16.mxu1 %v2769_v42  ;;  %v2863_v41 = vld [vmem:[%s3121_s19 + $0x244] ss:$16 sps:$4 sm:$0xff]   ;;  %v2865_v42 = vld [vmem:[%s3121_s19 + $0x24c] ss:$16 sps:$4 sm:$0xff]  }
  0x5a   : > { %1504 = vmatmul.mubr.bf16.gmra.mrb[8].mxu0 %v2771_v43  ;;  %1793 = vmatmul.mubr.bf16.gmra.mrb[8].mxu1 %v2772_v44  ;;  %v2867_v43 = vld [vmem:[%s3121_s19 + $0x240] ss:$16 sps:$4 sm:$0xff]   ;;  %v2868_v44 = vld [vmem:[%s3121_s19 + $0x248] ss:$16 sps:$4 sm:$0xff]  }
  0x5b   : > { %1511 = vmatprep.mubr.bf16.mxu0 %v2773_v45  ;;  %1800 = vmatprep.mubr.bf16.mxu1 %v2775_v46  ;;  %v2869_v45 = vld [vmem:[%s3121_s19 + $0x264] ss:$16 sps:$4 sm:$0xff]   ;;  %v2871_v46 = vld [vmem:[%s3121_s19 + $0x26c] ss:$16 sps:$4 sm:$0xff]  }
  0x62   : > { %1512 = vmatmul.mubr.bf16.gmra.mrb[12].mxu0 %v2777_v47  ;;  %1801 = vmatmul.mubr.bf16.gmra.mrb[12].mxu1 %v2778_v48  ;;  %v2873_v47 = vld [vmem:[%s3121_s19 + $0x260] ss:$16 sps:$4 sm:$0xff]   ;;  %v2874_v48 = vld [vmem:[%s3121_s19 + $0x268] ss:$16 sps:$4 sm:$0xff]  }
  0x63   : > { %1519 = vmatprep.mubr.bf16.mxu0 %v2779_v49  ;;  %1808 = vmatprep.mubr.bf16.mxu1 %v2781_v50  ;;  %v2875_v49 = vld [vmem:[%s3121_s19 + $0x284] ss:$16 sps:$4 sm:$0xff]   ;;  %v2877_v50 = vld [vmem:[%s3121_s19 + $0x28c] ss:$16 sps:$4 sm:$0xff]  }
  0x6a   : > { %1520 = vmatmul.mubr.bf16.gmra.mrb[16].mxu0 %v2783_v51  ;;  %1809 = vmatmul.mubr.bf16.gmra.mrb[16].mxu1 %v2784_v52  ;;  %v2879_v51 = vld [vmem:[%s3121_s19 + $0x280] ss:$16 sps:$4 sm:$0xff]   ;;  %v2880_v52 = vld [vmem:[%s3121_s19 + $0x288] ss:$16 sps:$4 sm:$0xff]  }
  0x6b   : > { %1527 = vmatprep.mubr.bf16.mxu0 %v2785_v53  ;;  %1816 = vmatprep.mubr.bf16.mxu1 %v2787_v54  ;;  %v2881_v53 = vld [vmem:[%s3121_s19 + $0x2a4] ss:$16 sps:$4 sm:$0xff]   ;;  %v2883_v54 = vld [vmem:[%s3121_s19 + $0x2ac] ss:$16 sps:$4 sm:$0xff]  }
  0x72   : > { %1528 = vmatmul.mubr.bf16.gmra.mrb[20].mxu0 %v2789_v55  ;;  %1817 = vmatmul.mubr.bf16.gmra.mrb[20].mxu1 %v2790_v56  ;;  %v2885_v55 = vld [vmem:[%s3121_s19 + $0x2a0] ss:$16 sps:$4 sm:$0xff]   ;;  %v2886_v56 = vld [vmem:[%s3121_s19 + $0x2a8] ss:$16 sps:$4 sm:$0xff]  }
  0x73   : > { %1535 = vmatprep.mubr.bf16.mxu0 %v2791_v57  ;;  %1824 = vmatprep.mubr.bf16.mxu1 %v2793_v58  ;;  %v2887_v57 = vld [vmem:[%s3121_s19 + $0x2c4] ss:$16 sps:$4 sm:$0xff]   ;;  %v2889_v58 = vld [vmem:[%s3121_s19 + $0x2cc] ss:$16 sps:$4 sm:$0xff]  }
  0x7a   : > { %1536 = vmatmul.mubr.bf16.gmra.mrb[24].mxu0 %v2795_v59  ;;  %1825 = vmatmul.mubr.bf16.gmra.mrb[24].mxu1 %v2796_v60  ;;  %v2891_v59 = vld [vmem:[%s3121_s19 + $0x2c0] ss:$16 sps:$4 sm:$0xff]   ;;  %v2892_v60 = vld [vmem:[%s3121_s19 + $0x2c8] ss:$16 sps:$4 sm:$0xff]  }
  0x7b   : > { %1543 = vmatprep.mubr.bf16.mxu0 %v2797_v61  ;;  %1832 = vmatprep.mubr.bf16.mxu1 %v2799_v62  ;;  %v2893_v61 = vld [vmem:[%s3121_s19 + $0x2e4] ss:$16 sps:$4 sm:$0xff]   ;;  %v2895_v62 = vld [vmem:[%s3121_s19 + $0x2ec] ss:$16 sps:$4 sm:$0xff]  }
  0x82   : > { %1544 = vmatmul.mubr.bf16.gmra.mrb[28].mxu0 %v2801_v63  ;;  %1833 = vmatmul.mubr.bf16.gmra.mrb[28].mxu1 %v2802_v0  ;;  %v2897_v63 = vld [vmem:[%s3121_s19 + $0x2e0] ss:$16 sps:$4 sm:$0xff]   ;;  %v2898_v0 = vld [vmem:[%s3121_s19 + $0x2e8] ss:$16 sps:$4 sm:$0xff]  }
  0x83   : > { %1551 = vmatprep.mubr.bf16.mxu0 %v2803_v1  ;;  %1840 = vmatprep.mubr.bf16.mxu1 %v2805_v2  ;;  %v2899_v1 = vld [vmem:[%s3121_s19 + $0x304] ss:$16 sps:$4 sm:$0xff]   ;;  %v2901_v2 = vld [vmem:[%s3121_s19 + $0x30c] ss:$16 sps:$4 sm:$0xff]  }
  0x8a   : > { %1552 = vmatmul.mubr.bf16.gmra.mrb[32].mxu0 %v2807_v3  ;;  %1841 = vmatmul.mubr.bf16.gmra.mrb[32].mxu1 %v2808_v4  ;;  %v2903_v3 = vld [vmem:[%s3121_s19 + $0x300] ss:$16 sps:$4 sm:$0xff]   ;;  %v2904_v4 = vld [vmem:[%s3121_s19 + $0x308] ss:$16 sps:$4 sm:$0xff]  }
  0x8b   : > { %1559 = vmatprep.mubr.bf16.mxu0 %v2809_v5  ;;  %1848 = vmatprep.mubr.bf16.mxu1 %v2811_v6  ;;  %v2905_v5 = vld [vmem:[%s3121_s19 + $0x324] ss:$16 sps:$4 sm:$0xff]   ;;  %v2907_v6 = vld [vmem:[%s3121_s19 + $0x32c] ss:$16 sps:$4 sm:$0xff]  }
  0x92   : > { %1560 = vmatmul.mubr.bf16.gmra.mrb[36].mxu0 %v2813_v7  ;;  %1849 = vmatmul.mubr.bf16.gmra.mrb[36].mxu1 %v2814_v8  ;;  %v2909_v7 = vld [vmem:[%s3121_s19 + $0x320] ss:$16 sps:$4 sm:$0xff]   ;;  %v2910_v8 = vld [vmem:[%s3121_s19 + $0x328] ss:$16 sps:$4 sm:$0xff]  }
  0x93   : > { %1567 = vmatprep.mubr.bf16.mxu0 %v2815_v9  ;;  %1856 = vmatprep.mubr.bf16.mxu1 %v2817_v10  ;;  %v2911_v9 = vld [vmem:[%s3121_s19 + $0x344] ss:$16 sps:$4 sm:$0xff]   ;;  %v2913_v10 = vld [vmem:[%s3121_s19 + $0x34c] ss:$16 sps:$4 sm:$0xff]  }
  0x9a   : > { %1568 = vmatmul.mubr.bf16.gmra.mrb[40].mxu0 %v2819_v11  ;;  %1857 = vmatmul.mubr.bf16.gmra.mrb[40].mxu1 %v2820_v12  ;;  %v2915_v11 = vld [vmem:[%s3121_s19 + $0x340] ss:$16 sps:$4 sm:$0xff]   ;;  %v2916_v12 = vld [vmem:[%s3121_s19 + $0x348] ss:$16 sps:$4 sm:$0xff]  }
  0x9b   : > { %1575 = vmatprep.mubr.bf16.mxu0 %v2821_v13  ;;  %1864 = vmatprep.mubr.bf16.mxu1 %v2823_v14  ;;  %v2917_v13 = vld [vmem:[%s3121_s19 + $0x364] ss:$16 sps:$4 sm:$0xff]   ;;  %v2919_v14 = vld [vmem:[%s3121_s19 + $0x36c] ss:$16 sps:$4 sm:$0xff]  }
  0xa2   : > { %1576 = vmatmul.mubr.bf16.gmra.mrb[44].mxu0 %v2825_v15  ;;  %1865 = vmatmul.mubr.bf16.gmra.mrb[44].mxu1 %v2826_v16 }
  0xa3   : > { %1583 = vmatprep.mubr.bf16.mxu0 %v2827_v17  ;;  %1872 = vmatprep.mubr.bf16.mxu1 %v2829_v18  ;;  %v3299_v17 = vld [vmem:[%s3469_s2] ss:$0 sm:$0xff] }
  0xaa   : > { %1584 = vmatmul.mubr.bf16.gmra.mrb[48].mxu0 %v2831_v19  ;;  %1873 = vmatmul.mubr.bf16.gmra.mrb[48].mxu1 %v2832_v20  ;;  %v2921_v19 = vld [vmem:[%s3121_s19 + $0x360] ss:$16 sps:$4 sm:$0xff]  }
  0xab   : > { %1591 = vmatprep.mubr.bf16.mxu0 %v2833_v21  ;;  %1880 = vmatprep.mubr.bf16.mxu1 %v2835_v22 }
  0xb2   : > { %1592 = vmatmul.mubr.bf16.gmra.mrb[52].mxu0 %v2837_v23  ;;  %1881 = vmatmul.mubr.bf16.gmra.mrb[52].mxu1 %v2838_v24  ;;  %v2922_v23 = vld [vmem:[%s3121_s19 + $0x368] ss:$16 sps:$4 sm:$0xff]   ;;  %v2923_v24 = vld [vmem:[%s3121_s19 + $0x384] ss:$16 sps:$4 sm:$0xff]  }
  0xb3   : > { %1599 = vmatprep.mubr.bf16.mxu0 %v2839_v25  ;;  %1888 = vmatprep.mubr.bf16.mxu1 %v2841_v26 }
  0xba   : > { %1600 = vmatmul.mubr.bf16.gmra.mrb[56].mxu0 %v2843_v27  ;;  %1889 = vmatmul.mubr.bf16.gmra.mrb[56].mxu1 %v2844_v28  ;;  %v2925_v27 = vld [vmem:[%s3121_s19 + $0x38c] ss:$16 sps:$4 sm:$0xff]  }
  0xbb   : > { %1607 = vmatprep.mubr.bf16.mxu0 %v2845_v29  ;;  %1896 = vmatprep.mubr.bf16.mxu1 %v2847_v30 }
  0xc2   : > { %1608 = vmatmul.mubr.bf16.gmra.mrb[60].mxu0 %v2849_v31  ;;  %1897 = vmatmul.mubr.bf16.gmra.mrb[60].mxu1 %v2850_v32 }
  0xc3   : > { %1615 = vmatprep.mubr.bf16.mxu0 %v2851_v33  ;;  %1904 = vmatprep.mubr.bf16.mxu1 %v2853_v34 }
  0xca   : > { %1616 = vmatmul.mubr.bf16.gmra.mrb[64].mxu0 %v2855_v35  ;;  %1905 = vmatmul.mubr.bf16.gmra.mrb[64].mxu1 %v2856_v36  ;;  %v2927_v35 = vld [vmem:[%s3121_s19 + $0x380] ss:$16 sps:$4 sm:$0xff]  }
  0xcb   : > { %1623 = vmatprep.mubr.bf16.mxu0 %v2857_v37  ;;  %1912 = vmatprep.mubr.bf16.mxu1 %v2859_v38 }
  0xd2   : > { %1624 = vmatmul.mubr.bf16.gmra.mrb[68].mxu0 %v2861_v39  ;;  %1913 = vmatmul.mubr.bf16.gmra.mrb[68].mxu1 %v2862_v40  ;;  %v2928_v39 = vld [vmem:[%s3121_s19 + $0x388] ss:$16 sps:$4 sm:$0xff]   ;;  %v2929_v40 = vld [vmem:[%s3121_s19 + $0x3a4] ss:$16 sps:$4 sm:$0xff]  }
  0xd3   : > { %1631 = vmatprep.mubr.bf16.mxu0 %v2863_v41  ;;  %1920 = vmatprep.mubr.bf16.mxu1 %v2865_v42 }
  0xda   : > { %1632 = vmatmul.mubr.bf16.gmra.mrb[72].mxu0 %v2867_v43  ;;  %1921 = vmatmul.mubr.bf16.gmra.mrb[72].mxu1 %v2868_v44  ;;  %v2931_v43 = vld [vmem:[%s3121_s19 + $0x3ac] ss:$16 sps:$4 sm:$0xff]  }
  0xdb   : > { %1639 = vmatprep.mubr.bf16.mxu0 %v2869_v45  ;;  %1928 = vmatprep.mubr.bf16.mxu1 %v2871_v46 }
  0xe2   : > { %1640 = vmatmul.mubr.bf16.gmra.mrb[76].mxu0 %v2873_v47  ;;  %1929 = vmatmul.mubr.bf16.gmra.mrb[76].mxu1 %v2874_v48 }
  0xe3   : > { %1647 = vmatprep.mubr.bf16.mxu0 %v2875_v49  ;;  %1936 = vmatprep.mubr.bf16.mxu1 %v2877_v50 }
  0xea   : > { %1648 = vmatmul.mubr.bf16.gmra.mrb[80].mxu0 %v2879_v51  ;;  %1937 = vmatmul.mubr.bf16.gmra.mrb[80].mxu1 %v2880_v52  ;;  %v2933_v51 = vld [vmem:[%s3121_s19 + $0x3a0] ss:$16 sps:$4 sm:$0xff]  }
  0xeb   : > { %1655 = vmatprep.mubr.bf16.mxu0 %v2881_v53  ;;  %1944 = vmatprep.mubr.bf16.mxu1 %v2883_v54 }
  0xf2   : > { %1656 = vmatmul.mubr.bf16.gmra.mrb[84].mxu0 %v2885_v55  ;;  %1945 = vmatmul.mubr.bf16.gmra.mrb[84].mxu1 %v2886_v56  ;;  %v2934_v55 = vld [vmem:[%s3121_s19 + $0x3a8] ss:$16 sps:$4 sm:$0xff]   ;;  %v2935_v56 = vld [vmem:[%s3121_s19 + $0x3c4] ss:$16 sps:$4 sm:$0xff]  }
  0xf3   : > { %1663 = vmatprep.mubr.bf16.mxu0 %v2887_v57  ;;  %1952 = vmatprep.mubr.bf16.mxu1 %v2889_v58 }
  0xfa   : > { %1664 = vmatmul.mubr.bf16.gmra.mrb[88].mxu0 %v2891_v59  ;;  %1953 = vmatmul.mubr.bf16.gmra.mrb[88].mxu1 %v2892_v60  ;;  %v2937_v59 = vld [vmem:[%s3121_s19 + $0x3cc] ss:$16 sps:$4 sm:$0xff]  }
  0xfb   : > { %1671 = vmatprep.mubr.bf16.mxu0 %v2893_v61  ;;  %1960 = vmatprep.mubr.bf16.mxu1 %v2895_v62 }
 0x102   : > { %1672 = vmatmul.mubr.bf16.gmra.mrb[92].mxu0 %v2897_v63  ;;  %1961 = vmatmul.mubr.bf16.gmra.mrb[92].mxu1 %v2898_v0 }
 0x103   : > { %1679 = vmatprep.mubr.bf16.mxu0 %v2899_v1  ;;  %1968 = vmatprep.mubr.bf16.mxu1 %v2901_v2 }
 0x10a   : > { %1680 = vmatmul.mubr.bf16.gmra.mrb[96].mxu0 %v2903_v3  ;;  %1969 = vmatmul.mubr.bf16.gmra.mrb[96].mxu1 %v2904_v4  ;;  %v2939_v3 = vld [vmem:[%s3121_s19 + $0x3c0] ss:$16 sps:$4 sm:$0xff]  }
 0x10b   : > { %1687 = vmatprep.mubr.bf16.mxu0 %v2905_v5  ;;  %1976 = vmatprep.mubr.bf16.mxu1 %v2907_v6 }
 0x112   : > { %1688 = vmatmul.mubr.bf16.gmra.mrb[100].mxu0 %v2909_v7  ;;  %1977 = vmatmul.mubr.bf16.gmra.mrb[100].mxu1 %v2910_v8  ;;  %v2940_v7 = vld [vmem:[%s3121_s19 + $0x3c8] ss:$16 sps:$4 sm:$0xff]   ;;  %v2941_v8 = vld [vmem:[%s3121_s19 + $0x3e4] ss:$16 sps:$4 sm:$0xff]  }
 0x113   : > { %1695 = vmatprep.mubr.bf16.mxu0 %v2911_v9  ;;  %1984 = vmatprep.mubr.bf16.mxu1 %v2913_v10 }
 0x11a   : > { %1696 = vmatmul.mubr.bf16.gmra.mrb[104].mxu0 %v2915_v11  ;;  %1985 = vmatmul.mubr.bf16.gmra.mrb[104].mxu1 %v2916_v12  ;;  %v2943_v11 = vld [vmem:[%s3121_s19 + $0x3ec] ss:$16 sps:$4 sm:$0xff]  }
 0x11b   : > { %1703 = vmatprep.mubr.bf16.mxu0 %v2917_v13  ;;  %1992 = vmatprep.mubr.bf16.mxu1 %v2919_v14 }
 0x11d   : > { %v1489_v15 = vpop.f32.mrb[0].mxu0  ;;  %v1778_v16 = vpop.f32.mrb[0].mxu1 }
 0x11e   : > { %v1491_v18 = vpop.f32.mrb[1].mxu0  ;;  %v1779_v20 = vadd.f32 %v1778_v16, %v1489_v15  ;;  %v1780_v21 = vpop.f32.mrb[1].mxu1 }
 0x11f   : > { %v1492_v22 = vpop.f32.mrb[2].mxu0  ;;  %v1781_v25 = vpop.f32.mrb[2].mxu1 }
 0x120   : > { %v1494_v26 = vpop.f32.mrb[3].mxu0  ;;  %v2235_v28 = vadd.f32 %v3299_v17, %v1779_v20  ;;  %v1782_v29 = vadd.f32 %v1781_v25, %v1492_v22  ;;  %v1783_v30 = vpop.f32.mrb[3].mxu1  ;;  %v2945_v20 = vld [vmem:[%s3121_s19 + $0x3e0] ss:$16 sps:$4 sm:$0xff]  }
 0x122   : > { %1704 = vmatmul.mubr.bf16.gmra.mrb[108].mxu0 %v2921_v19  ;;  %2299 = vst [vmem:[%s3307_s10] sm:$0xff] %v2235_v28  ;;  %v2236_v31 = vadd.f32 %v3299_v17, %v1782_v29  ;;  %1993 = vmatmul.mubr.bf16.gmra.mrb[108].mxu1 %v2922_v23 }
 0x123   : > { %1711 = vmatprep.mubr.bf16.mxu0 %v2923_v24  ;;  %2000 = vmatprep.mubr.bf16.mxu1 %v2925_v27  ;;  %v2946_v24 = vld [vmem:[%s3121_s19 + $0x3e8] ss:$16 sps:$4 sm:$0xff]  }
 0x124   : > { %2300 = vst [vmem:[%s3307_s10 + $0x8] sm:$0xff] %v2236_v31 }
 0x125   : > { %v1497_v32 = vpop.f32.mrb[4].mxu0  ;;  %v1786_v33 = vpop.f32.mrb[4].mxu1 }
 0x126   : > { %v1499_v34 = vpop.f32.mrb[5].mxu0  ;;  %v1787_v36 = vadd.f32 %v1786_v33, %v1497_v32  ;;  %v1788_v37 = vpop.f32.mrb[5].mxu1 }
 0x127   : > { %v1500_v38 = vpop.f32.mrb[6].mxu0  ;;  %v1789_v41 = vpop.f32.mrb[6].mxu1 }
 0x128   : > { %v1502_v42 = vpop.f32.mrb[7].mxu0  ;;  %v2237_v44 = vadd.f32 %v3299_v17, %v1787_v36  ;;  %v1790_v45 = vadd.f32 %v1789_v41, %v1500_v38  ;;  %v1791_v46 = vpop.f32.mrb[7].mxu1 }
 0x12a   : > { %1712 = vmatmul.mubr.bf16.gmra.mrb[112].mxu0 %v2927_v35  ;;  %2301 = vst [vmem:[%s3307_s10 + $0x10] sm:$0xff] %v2237_v44  ;;  %v2238_v47 = vadd.f32 %v3299_v17, %v1790_v45  ;;  %2001 = vmatmul.mubr.bf16.gmra.mrb[112].mxu1 %v2928_v39 }
 0x12b   : > { %1719 = vmatprep.mubr.bf16.mxu0 %v2929_v40  ;;  %2008 = vmatprep.mubr.bf16.mxu1 %v2931_v43 }
 0x12c   : > { %2302 = vst [vmem:[%s3307_s10 + $0x18] sm:$0xff] %v2238_v47 }
 0x12d   : > { %v1505_v48 = vpop.f32.mrb[8].mxu0  ;;  %v1794_v49 = vpop.f32.mrb[8].mxu1 }
 0x12e   : > { %v1507_v50 = vpop.f32.mrb[9].mxu0  ;;  %v1795_v52 = vadd.f32 %v1794_v49, %v1505_v48  ;;  %v1796_v53 = vpop.f32.mrb[9].mxu1 }
 0x12f   : > { %v1508_v54 = vpop.f32.mrb[10].mxu0  ;;  %v1797_v57 = vpop.f32.mrb[10].mxu1 }
 0x130   : > { %v1510_v58 = vpop.f32.mrb[11].mxu0  ;;  %v2239_v60 = vadd.f32 %v3299_v17, %v1795_v52  ;;  %v1798_v61 = vadd.f32 %v1797_v57, %v1508_v54  ;;  %v1799_v62 = vpop.f32.mrb[11].mxu1 }
 0x132   : > { %1720 = vmatmul.mubr.bf16.gmra.mrb[116].mxu0 %v2933_v51  ;;  %2303 = vst [vmem:[%s3307_s10 + $0x20] sm:$0xff] %v2239_v60  ;;  %v2240_v63 = vadd.f32 %v3299_v17, %v1798_v61  ;;  %2009 = vmatmul.mubr.bf16.gmra.mrb[116].mxu1 %v2934_v55 }
 0x133   : > { %1727 = vmatprep.mubr.bf16.mxu0 %v2935_v56  ;;  %2016 = vmatprep.mubr.bf16.mxu1 %v2937_v59 }
 0x134   : > { %2304 = vst [vmem:[%s3307_s10 + $0x28] sm:$0xff] %v2240_v63 }
 0x135   : > { %v1513_v0 = vpop.f32.mrb[12].mxu0  ;;  %v1802_v1 = vpop.f32.mrb[12].mxu1 }
 0x136   : > { %v1515_v2 = vpop.f32.mrb[13].mxu0  ;;  %v1803_v4 = vadd.f32 %v1802_v1, %v1513_v0  ;;  %v1804_v5 = vpop.f32.mrb[13].mxu1 }
 0x137   : > { %v1516_v6 = vpop.f32.mrb[14].mxu0  ;;  %v1805_v9 = vpop.f32.mrb[14].mxu1 }
 0x138   : > { %v1518_v10 = vpop.f32.mrb[15].mxu0  ;;  %v2241_v12 = vadd.f32 %v3299_v17, %v1803_v4  ;;  %v1806_v13 = vadd.f32 %v1805_v9, %v1516_v6  ;;  %v1807_v14 = vpop.f32.mrb[15].mxu1 }
 0x13a   : > { %1728 = vmatmul.mubr.bf16.gmra.mrb[120].mxu0 %v2939_v3  ;;  %2305 = vst [vmem:[%s3307_s10 + $0x30] sm:$0xff] %v2241_v12  ;;  %v2242_v15 = vadd.f32 %v3299_v17, %v1806_v13  ;;  %2017 = vmatmul.mubr.bf16.gmra.mrb[120].mxu1 %v2940_v7 }
 0x13b   : > { %1735 = vmatprep.mubr.bf16.mxu0 %v2941_v8  ;;  %2024 = vmatprep.mubr.bf16.mxu1 %v2943_v11 }
 0x13c   : > { %2306 = vst [vmem:[%s3307_s10 + $0x38] sm:$0xff] %v2242_v15 }
 0x13d   : > { %v1521_v16 = vpop.f32.mrb[16].mxu0  ;;  %v1810_v18 = vpop.f32.mrb[16].mxu1 }
 0x13e   : > { %v1523_v19 = vpop.f32.mrb[17].mxu0  ;;  %v1811_v21 = vadd.f32 %v1810_v18, %v1521_v16  ;;  %v1812_v22 = vpop.f32.mrb[17].mxu1 }
 0x13f   : > { %v1524_v23 = vpop.f32.mrb[18].mxu0  ;;  %v1813_v25 = vpop.f32.mrb[18].mxu1 }
 0x140   : > { %v1526_v26 = vpop.f32.mrb[19].mxu0  ;;  %v2243_v27 = vadd.f32 %v3299_v17, %v1811_v21  ;;  %v1814_v28 = vadd.f32 %v1813_v25, %v1524_v23  ;;  %v1815_v29 = vpop.f32.mrb[19].mxu1 }
 0x142   : > { %1736 = vmatmul.mubr.bf16.gmra.mrb[124].mxu0 %v2945_v20  ;;  %2307 = vst [vmem:[%s3307_s10 + $0x40] sm:$0xff] %v2243_v27  ;;  %v2244_v30 = vadd.f32 %v3299_v17, %v1814_v28  ;;  %2025 = vmatmul.mubr.bf16.gmra.mrb[124].mxu1 %v2946_v24 }
 0x144   : > { %2308 = vst [vmem:[%s3307_s10 + $0x48] sm:$0xff] %v2244_v30 }
 0x145   : > { %v1529_v31 = vpop.f32.mrb[20].mxu0  ;;  %v1818_v32 = vpop.f32.mrb[20].mxu1 }
 0x146   : > { %v1531_v33 = vpop.f32.mrb[21].mxu0  ;;  %v1819_v34 = vadd.f32 %v1818_v32, %v1529_v31  ;;  %v1820_v35 = vpop.f32.mrb[21].mxu1 }
 0x147   : > { %v1532_v36 = vpop.f32.mrb[22].mxu0  ;;  %v1821_v37 = vpop.f32.mrb[22].mxu1 }
 0x148   : > { %v1534_v38 = vpop.f32.mrb[23].mxu0  ;;  %v2245_v39 = vadd.f32 %v3299_v17, %v1819_v34  ;;  %v1822_v40 = vadd.f32 %v1821_v37, %v1532_v36  ;;  %v1823_v41 = vpop.f32.mrb[23].mxu1 }
 0x14a   : > { %2309 = vst [vmem:[%s3307_s10 + $0x50] sm:$0xff] %v2245_v39  ;;  %v2246_v42 = vadd.f32 %v3299_v17, %v1822_v40 }
 0x14c   : > { %2310 = vst [vmem:[%s3307_s10 + $0x58] sm:$0xff] %v2246_v42 }
 0x14d   : > { %v1537_v43 = vpop.f32.mrb[24].mxu0  ;;  %v1826_v44 = vpop.f32.mrb[24].mxu1 }
 0x14e   : > { %v1539_v45 = vpop.f32.mrb[25].mxu0  ;;  %v1827_v46 = vadd.f32 %v1826_v44, %v1537_v43  ;;  %v1828_v47 = vpop.f32.mrb[25].mxu1 }
 0x14f   : > { %v1540_v48 = vpop.f32.mrb[26].mxu0  ;;  %v1829_v49 = vpop.f32.mrb[26].mxu1 }
 0x150   : > { %v1542_v50 = vpop.f32.mrb[27].mxu0  ;;  %v2247_v51 = vadd.f32 %v3299_v17, %v1827_v46  ;;  %v1830_v52 = vadd.f32 %v1829_v49, %v1540_v48  ;;  %v1831_v53 = vpop.f32.mrb[27].mxu1 }
 0x152   : > { %2311 = vst [vmem:[%s3307_s10 + $0x60] sm:$0xff] %v2247_v51  ;;  %v2248_v54 = vadd.f32 %v3299_v17, %v1830_v52 }
 0x154   : > { %2312 = vst [vmem:[%s3307_s10 + $0x68] sm:$0xff] %v2248_v54 }
 0x155   : > { %v1545_v55 = vpop.f32.mrb[28].mxu0  ;;  %v1834_v56 = vpop.f32.mrb[28].mxu1 }
 0x156   : > { %v1547_v57 = vpop.f32.mrb[29].mxu0  ;;  %v1835_v58 = vadd.f32 %v1834_v56, %v1545_v55  ;;  %v1836_v59 = vpop.f32.mrb[29].mxu1 }
 0x157   : > { %v1548_v60 = vpop.f32.mrb[30].mxu0  ;;  %v1837_v61 = vpop.f32.mrb[30].mxu1 }
 0x158   : > { %v1550_v62 = vpop.f32.mrb[31].mxu0  ;;  %v2249_v63 = vadd.f32 %v3299_v17, %v1835_v58  ;;  %v1838_v0 = vadd.f32 %v1837_v61, %v1548_v60  ;;  %v1839_v1 = vpop.f32.mrb[31].mxu1 }
 0x15a   : > { %2313 = vst [vmem:[%s3307_s10 + $0x70] sm:$0xff] %v2249_v63  ;;  %v2250_v2 = vadd.f32 %v3299_v17, %v1838_v0 }
 0x15c   : > { %2314 = vst [vmem:[%s3307_s10 + $0x78] sm:$0xff] %v2250_v2 }
 0x15d   : > { %v1553_v3 = vpop.f32.mrb[32].mxu0  ;;  %v1842_v4 = vpop.f32.mrb[32].mxu1 }
 0x15e   : > { %v1555_v5 = vpop.f32.mrb[33].mxu0  ;;  %v1843_v6 = vadd.f32 %v1842_v4, %v1553_v3  ;;  %v1844_v7 = vpop.f32.mrb[33].mxu1 }
 0x15f   : > { %v1556_v8 = vpop.f32.mrb[34].mxu0  ;;  %v1845_v9 = vpop.f32.mrb[34].mxu1 }
 0x160   : > { %v1558_v10 = vpop.f32.mrb[35].mxu0  ;;  %v2251_v11 = vadd.f32 %v3299_v17, %v1843_v6  ;;  %v1846_v12 = vadd.f32 %v1845_v9, %v1556_v8  ;;  %v1847_v13 = vpop.f32.mrb[35].mxu1 }
 0x162   : > { %2315 = vst [vmem:[%s3307_s10 + $0x80] sm:$0xff] %v2251_v11  ;;  %v2252_v14 = vadd.f32 %v3299_v17, %v1846_v12 }
 0x164   : > { %2316 = vst [vmem:[%s3307_s10 + $0x88] sm:$0xff] %v2252_v14 }
 0x165   : > { %v1561_v15 = vpop.f32.mrb[36].mxu0  ;;  %v1850_v16 = vpop.f32.mrb[36].mxu1 }
 0x166   : > { %v1563_v18 = vpop.f32.mrb[37].mxu0  ;;  %v1851_v19 = vadd.f32 %v1850_v16, %v1561_v15  ;;  %v1852_v20 = vpop.f32.mrb[37].mxu1 }
 0x167   : > { %v1564_v21 = vpop.f32.mrb[38].mxu0  ;;  %v1853_v22 = vpop.f32.mrb[38].mxu1 }
 0x168   : > { %v1566_v23 = vpop.f32.mrb[39].mxu0  ;;  %v2253_v24 = vadd.f32 %v3299_v17, %v1851_v19  ;;  %v1854_v25 = vadd.f32 %v1853_v22, %v1564_v21  ;;  %v1855_v26 = vpop.f32.mrb[39].mxu1 }
 0x16a   : > { %2317 = vst [vmem:[%s3307_s10 + $0x90] sm:$0xff] %v2253_v24  ;;  %v2254_v27 = vadd.f32 %v3299_v17, %v1854_v25 }
 0x16c   : > { %2318 = vst [vmem:[%s3307_s10 + $0x98] sm:$0xff] %v2254_v27 }
 0x16d   : > { %v1569_v28 = vpop.f32.mrb[40].mxu0  ;;  %v1858_v29 = vpop.f32.mrb[40].mxu1 }
 0x16e   : > { %v1571_v30 = vpop.f32.mrb[41].mxu0  ;;  %v1859_v31 = vadd.f32 %v1858_v29, %v1569_v28  ;;  %v1860_v32 = vpop.f32.mrb[41].mxu1 }
 0x16f   : > { %v1572_v33 = vpop.f32.mrb[42].mxu0  ;;  %v1861_v34 = vpop.f32.mrb[42].mxu1 }
 0x170   : > { %v1574_v35 = vpop.f32.mrb[43].mxu0  ;;  %v2255_v36 = vadd.f32 %v3299_v17, %v1859_v31  ;;  %v1862_v37 = vadd.f32 %v1861_v34, %v1572_v33  ;;  %v1863_v38 = vpop.f32.mrb[43].mxu1 }
 0x172   : > { %2319 = vst [vmem:[%s3307_s10 + $0xa0] sm:$0xff] %v2255_v36  ;;  %v2256_v39 = vadd.f32 %v3299_v17, %v1862_v37 }
 0x174   : > { %2320 = vst [vmem:[%s3307_s10 + $0xa8] sm:$0xff] %v2256_v39 }
 0x175   : > { %v1577_v40 = vpop.f32.mrb[44].mxu0  ;;  %v1866_v41 = vpop.f32.mrb[44].mxu1 }
 0x176   : > { %v1579_v42 = vpop.f32.mrb[45].mxu0  ;;  %v1867_v43 = vadd.f32 %v1866_v41, %v1577_v40  ;;  %v1868_v44 = vpop.f32.mrb[45].mxu1 }
 0x177   : > { %v1580_v45 = vpop.f32.mrb[46].mxu0  ;;  %v1869_v46 = vpop.f32.mrb[46].mxu1 }
 0x178   : > { %v1582_v47 = vpop.f32.mrb[47].mxu0  ;;  %v2257_v48 = vadd.f32 %v3299_v17, %v1867_v43  ;;  %v1870_v49 = vadd.f32 %v1869_v46, %v1580_v45  ;;  %v1871_v50 = vpop.f32.mrb[47].mxu1 }
 0x17a   : > { %2321 = vst [vmem:[%s3307_s10 + $0xb0] sm:$0xff] %v2257_v48  ;;  %v2258_v51 = vadd.f32 %v3299_v17, %v1870_v49 }
 0x17c   : > { %2322 = vst [vmem:[%s3307_s10 + $0xb8] sm:$0xff] %v2258_v51 }
 0x17d   : > { %v1585_v52 = vpop.f32.mrb[48].mxu0  ;;  %v1874_v53 = vpop.f32.mrb[48].mxu1 }
 0x17e   : > { %v1587_v54 = vpop.f32.mrb[49].mxu0  ;;  %v1875_v55 = vadd.f32 %v1874_v53, %v1585_v52  ;;  %v1876_v56 = vpop.f32.mrb[49].mxu1 }
 0x17f   : > { %v1588_v57 = vpop.f32.mrb[50].mxu0  ;;  %v1877_v58 = vpop.f32.mrb[50].mxu1 }
 0x180   : > { %v1590_v59 = vpop.f32.mrb[51].mxu0  ;;  %v2259_v60 = vadd.f32 %v3299_v17, %v1875_v55  ;;  %v1878_v61 = vadd.f32 %v1877_v58, %v1588_v57  ;;  %v1879_v62 = vpop.f32.mrb[51].mxu1 }
 0x182   : > { %2323 = vst [vmem:[%s3307_s10 + $0xc0] sm:$0xff] %v2259_v60  ;;  %v2260_v63 = vadd.f32 %v3299_v17, %v1878_v61 }
 0x184   : > { %2324 = vst [vmem:[%s3307_s10 + $0xc8] sm:$0xff] %v2260_v63 }
 0x185   : > { %v1593_v0 = vpop.f32.mrb[52].mxu0  ;;  %v1882_v1 = vpop.f32.mrb[52].mxu1 }
 0x186   : > { %v1595_v2 = vpop.f32.mrb[53].mxu0  ;;  %v1883_v3 = vadd.f32 %v1882_v1, %v1593_v0  ;;  %v1884_v4 = vpop.f32.mrb[53].mxu1 }
 0x187   : > { %v1596_v5 = vpop.f32.mrb[54].mxu0  ;;  %v1885_v6 = vpop.f32.mrb[54].mxu1 }
 0x188   : > { %v1598_v7 = vpop.f32.mrb[55].mxu0  ;;  %v2261_v8 = vadd.f32 %v3299_v17, %v1883_v3  ;;  %v1886_v9 = vadd.f32 %v1885_v6, %v1596_v5  ;;  %v1887_v10 = vpop.f32.mrb[55].mxu1 }
 0x18a   : > { %2325 = vst [vmem:[%s3307_s10 + $0xd0] sm:$0xff] %v2261_v8  ;;  %v2262_v11 = vadd.f32 %v3299_v17, %v1886_v9 }
 0x18c   : > { %2326 = vst [vmem:[%s3307_s10 + $0xd8] sm:$0xff] %v2262_v11 }
 0x18d   : > { %v1601_v12 = vpop.f32.mrb[56].mxu0  ;;  %v1890_v13 = vpop.f32.mrb[56].mxu1 }
 0x18e   : > { %v1603_v14 = vpop.f32.mrb[57].mxu0  ;;  %v1891_v15 = vadd.f32 %v1890_v13, %v1601_v12  ;;  %v1892_v16 = vpop.f32.mrb[57].mxu1 }
 0x18f   : > { %v1604_v18 = vpop.f32.mrb[58].mxu0  ;;  %v1893_v19 = vpop.f32.mrb[58].mxu1 }
 0x190   : > { %v1606_v20 = vpop.f32.mrb[59].mxu0  ;;  %v2263_v21 = vadd.f32 %v3299_v17, %v1891_v15  ;;  %v1894_v22 = vadd.f32 %v1893_v19, %v1604_v18  ;;  %v1895_v23 = vpop.f32.mrb[59].mxu1 }
 0x192   : > { %2327 = vst [vmem:[%s3307_s10 + $0xe0] sm:$0xff] %v2263_v21  ;;  %v2264_v24 = vadd.f32 %v3299_v17, %v1894_v22 }
 0x194   : > { %2328 = vst [vmem:[%s3307_s10 + $0xe8] sm:$0xff] %v2264_v24 }
 0x195   : > { %v1609_v25 = vpop.f32.mrb[60].mxu0  ;;  %v1898_v26 = vpop.f32.mrb[60].mxu1 }
 0x196   : > { %v1611_v27 = vpop.f32.mrb[61].mxu0  ;;  %v1899_v28 = vadd.f32 %v1898_v26, %v1609_v25  ;;  %v1900_v29 = vpop.f32.mrb[61].mxu1 }
 0x197   : > { %v1612_v30 = vpop.f32.mrb[62].mxu0  ;;  %v1901_v31 = vpop.f32.mrb[62].mxu1 }
 0x198   : > { %v1614_v32 = vpop.f32.mrb[63].mxu0  ;;  %v2265_v33 = vadd.f32 %v3299_v17, %v1899_v28  ;;  %v1902_v34 = vadd.f32 %v1901_v31, %v1612_v30  ;;  %v1903_v35 = vpop.f32.mrb[63].mxu1 }
 0x19a   : > { %2329 = vst [vmem:[%s3307_s10 + $0xf0] sm:$0xff] %v2265_v33  ;;  %v2266_v36 = vadd.f32 %v3299_v17, %v1902_v34 }
 0x19c   : > { %2330 = vst [vmem:[%s3307_s10 + $0xf8] sm:$0xff] %v2266_v36 }
 0x19d   : > { %v1617_v37 = vpop.f32.mrb[64].mxu0  ;;  %v1906_v38 = vpop.f32.mrb[64].mxu1 }
 0x19e   : > { %v1619_v39 = vpop.f32.mrb[65].mxu0  ;;  %v1907_v40 = vadd.f32 %v1906_v38, %v1617_v37  ;;  %v1908_v41 = vpop.f32.mrb[65].mxu1 }
 0x19f   : > { %v1620_v42 = vpop.f32.mrb[66].mxu0  ;;  %v1909_v43 = vpop.f32.mrb[66].mxu1 }
 0x1a0   : > { %v1622_v44 = vpop.f32.mrb[67].mxu0  ;;  %v2267_v45 = vadd.f32 %v3299_v17, %v1907_v40  ;;  %v1910_v46 = vadd.f32 %v1909_v43, %v1620_v42  ;;  %v1911_v47 = vpop.f32.mrb[67].mxu1 }
 0x1a2   : > { %2331 = vst [vmem:[%s3307_s10 + $0x100] sm:$0xff] %v2267_v45  ;;  %v2268_v48 = vadd.f32 %v3299_v17, %v1910_v46 }
 0x1a4   : > { %2332 = vst [vmem:[%s3307_s10 + $0x108] sm:$0xff] %v2268_v48 }
 0x1a5   : > { %v1625_v49 = vpop.f32.mrb[68].mxu0  ;;  %v1914_v50 = vpop.f32.mrb[68].mxu1 }
 0x1a6   : > { %v1627_v51 = vpop.f32.mrb[69].mxu0  ;;  %v1915_v52 = vadd.f32 %v1914_v50, %v1625_v49  ;;  %v1916_v53 = vpop.f32.mrb[69].mxu1 }
 0x1a7   : > { %v1628_v54 = vpop.f32.mrb[70].mxu0  ;;  %v1917_v55 = vpop.f32.mrb[70].mxu1 }
 0x1a8   : > { %v1630_v56 = vpop.f32.mrb[71].mxu0  ;;  %v2269_v57 = vadd.f32 %v3299_v17, %v1915_v52  ;;  %v1918_v58 = vadd.f32 %v1917_v55, %v1628_v54  ;;  %v1919_v59 = vpop.f32.mrb[71].mxu1 }
 0x1aa   : > { %2333 = vst [vmem:[%s3307_s10 + $0x110] sm:$0xff] %v2269_v57  ;;  %v2270_v60 = vadd.f32 %v3299_v17, %v1918_v58 }
 0x1ac   : > { %2334 = vst [vmem:[%s3307_s10 + $0x118] sm:$0xff] %v2270_v60 }
 0x1ad   : > { %v1633_v61 = vpop.f32.mrb[72].mxu0  ;;  %v1922_v62 = vpop.f32.mrb[72].mxu1 }
 0x1ae   : > { %v1635_v63 = vpop.f32.mrb[73].mxu0  ;;  %v1923_v0 = vadd.f32 %v1922_v62, %v1633_v61  ;;  %v1924_v1 = vpop.f32.mrb[73].mxu1 }
 0x1af   : > { %v1636_v2 = vpop.f32.mrb[74].mxu0  ;;  %v1925_v3 = vpop.f32.mrb[74].mxu1 }
 0x1b0   : > { %v1638_v4 = vpop.f32.mrb[75].mxu0  ;;  %v2271_v5 = vadd.f32 %v3299_v17, %v1923_v0  ;;  %v1926_v6 = vadd.f32 %v1925_v3, %v1636_v2  ;;  %v1927_v7 = vpop.f32.mrb[75].mxu1 }
 0x1b2   : > { %2335 = vst [vmem:[%s3307_s10 + $0x120] sm:$0xff] %v2271_v5  ;;  %v2272_v8 = vadd.f32 %v3299_v17, %v1926_v6 }
 0x1b4   : > { %2336 = vst [vmem:[%s3307_s10 + $0x128] sm:$0xff] %v2272_v8 }
 0x1b5   : > { %v1641_v9 = vpop.f32.mrb[76].mxu0  ;;  %v1930_v10 = vpop.f32.mrb[76].mxu1 }
 0x1b6   : > { %v1643_v11 = vpop.f32.mrb[77].mxu0  ;;  %v1931_v12 = vadd.f32 %v1930_v10, %v1641_v9  ;;  %v1932_v13 = vpop.f32.mrb[77].mxu1 }
 0x1b7   : > { %v1644_v14 = vpop.f32.mrb[78].mxu0  ;;  %v1933_v15 = vpop.f32.mrb[78].mxu1 }
 0x1b8   : > { %v1646_v16 = vpop.f32.mrb[79].mxu0  ;;  %v2273_v18 = vadd.f32 %v3299_v17, %v1931_v12  ;;  %v1934_v19 = vadd.f32 %v1933_v15, %v1644_v14  ;;  %v1935_v20 = vpop.f32.mrb[79].mxu1 }
 0x1ba   : > { %2337 = vst [vmem:[%s3307_s10 + $0x130] sm:$0xff] %v2273_v18  ;;  %v2274_v21 = vadd.f32 %v3299_v17, %v1934_v19 }
 0x1bc   : > { %2338 = vst [vmem:[%s3307_s10 + $0x138] sm:$0xff] %v2274_v21 }
 0x1bd   : > { %v1649_v22 = vpop.f32.mrb[80].mxu0  ;;  %v1938_v23 = vpop.f32.mrb[80].mxu1 }
 0x1be   : > { %v1651_v24 = vpop.f32.mrb[81].mxu0  ;;  %v1939_v25 = vadd.f32 %v1938_v23, %v1649_v22  ;;  %v1940_v26 = vpop.f32.mrb[81].mxu1 }
 0x1bf   : > { %v1652_v27 = vpop.f32.mrb[82].mxu0  ;;  %v1941_v28 = vpop.f32.mrb[82].mxu1 }
 0x1c0   : > { %v1654_v29 = vpop.f32.mrb[83].mxu0  ;;  %v2275_v30 = vadd.f32 %v3299_v17, %v1939_v25  ;;  %v1942_v31 = vadd.f32 %v1941_v28, %v1652_v27  ;;  %v1943_v32 = vpop.f32.mrb[83].mxu1 }
 0x1c2   : > { %2339 = vst [vmem:[%s3307_s10 + $0x140] sm:$0xff] %v2275_v30  ;;  %v2276_v33 = vadd.f32 %v3299_v17, %v1942_v31 }
 0x1c4   : > { %2340 = vst [vmem:[%s3307_s10 + $0x148] sm:$0xff] %v2276_v33 }
 0x1c5   : > { %v1657_v34 = vpop.f32.mrb[84].mxu0  ;;  %v1946_v35 = vpop.f32.mrb[84].mxu1 }
 0x1c6   : > { %v1659_v36 = vpop.f32.mrb[85].mxu0  ;;  %v1947_v37 = vadd.f32 %v1946_v35, %v1657_v34  ;;  %v1948_v38 = vpop.f32.mrb[85].mxu1 }
 0x1c7   : > { %v1660_v39 = vpop.f32.mrb[86].mxu0  ;;  %v1949_v40 = vpop.f32.mrb[86].mxu1 }
 0x1c8   : > { %v1662_v41 = vpop.f32.mrb[87].mxu0  ;;  %v2277_v42 = vadd.f32 %v3299_v17, %v1947_v37  ;;  %v1950_v43 = vadd.f32 %v1949_v40, %v1660_v39  ;;  %v1951_v44 = vpop.f32.mrb[87].mxu1 }
 0x1ca   : > { %2341 = vst [vmem:[%s3307_s10 + $0x150] sm:$0xff] %v2277_v42  ;;  %v2278_v45 = vadd.f32 %v3299_v17, %v1950_v43 }
 0x1cc   : > { %2342 = vst [vmem:[%s3307_s10 + $0x158] sm:$0xff] %v2278_v45 }
 0x1cd   : > { %v1665_v46 = vpop.f32.mrb[88].mxu0  ;;  %v1954_v47 = vpop.f32.mrb[88].mxu1 }
 0x1ce   : > { %v1667_v48 = vpop.f32.mrb[89].mxu0  ;;  %v1955_v49 = vadd.f32 %v1954_v47, %v1665_v46  ;;  %v1956_v50 = vpop.f32.mrb[89].mxu1 }
 0x1cf   : > { %v1668_v51 = vpop.f32.mrb[90].mxu0  ;;  %v1957_v52 = vpop.f32.mrb[90].mxu1 }
 0x1d0   : > { %v1670_v53 = vpop.f32.mrb[91].mxu0  ;;  %v2279_v54 = vadd.f32 %v3299_v17, %v1955_v49  ;;  %v1958_v55 = vadd.f32 %v1957_v52, %v1668_v51  ;;  %v1959_v56 = vpop.f32.mrb[91].mxu1 }
 0x1d2   : > { %2343 = vst [vmem:[%s3307_s10 + $0x160] sm:$0xff] %v2279_v54  ;;  %v2280_v57 = vadd.f32 %v3299_v17, %v1958_v55 }
 0x1d4   : > { %2344 = vst [vmem:[%s3307_s10 + $0x168] sm:$0xff] %v2280_v57 }
 0x1d5   : > { %v1673_v58 = vpop.f32.mrb[92].mxu0  ;;  %v1962_v59 = vpop.f32.mrb[92].mxu1 }
 0x1d6   : > { %v1675_v60 = vpop.f32.mrb[93].mxu0  ;;  %v1963_v61 = vadd.f32 %v1962_v59, %v1673_v58  ;;  %v1964_v62 = vpop.f32.mrb[93].mxu1 }
 0x1d7   : > { %v1676_v63 = vpop.f32.mrb[94].mxu0  ;;  %v1965_v0 = vpop.f32.mrb[94].mxu1 }
 0x1d8   : > { %v1678_v1 = vpop.f32.mrb[95].mxu0  ;;  %v2281_v2 = vadd.f32 %v3299_v17, %v1963_v61  ;;  %v1966_v3 = vadd.f32 %v1965_v0, %v1676_v63  ;;  %v1967_v4 = vpop.f32.mrb[95].mxu1 }
 0x1da   : > { %2345 = vst [vmem:[%s3307_s10 + $0x170] sm:$0xff] %v2281_v2  ;;  %v2282_v5 = vadd.f32 %v3299_v17, %v1966_v3 }
 0x1dc   : > { %2346 = vst [vmem:[%s3307_s10 + $0x178] sm:$0xff] %v2282_v5 }
 0x1dd   : > { %v1681_v6 = vpop.f32.mrb[96].mxu0  ;;  %v1970_v7 = vpop.f32.mrb[96].mxu1 }
 0x1de   : > { %v1683_v8 = vpop.f32.mrb[97].mxu0  ;;  %v1971_v9 = vadd.f32 %v1970_v7, %v1681_v6  ;;  %v1972_v10 = vpop.f32.mrb[97].mxu1 }
 0x1df   : > { %v1684_v11 = vpop.f32.mrb[98].mxu0  ;;  %v1973_v12 = vpop.f32.mrb[98].mxu1 }
 0x1e0   : > { %v1686_v13 = vpop.f32.mrb[99].mxu0  ;;  %v2283_v14 = vadd.f32 %v3299_v17, %v1971_v9  ;;  %v1974_v15 = vadd.f32 %v1973_v12, %v1684_v11  ;;  %v1975_v16 = vpop.f32.mrb[99].mxu1 }
 0x1e2   : > { %2347 = vst [vmem:[%s3307_s10 + $0x180] sm:$0xff] %v2283_v14  ;;  %v2284_v18 = vadd.f32 %v3299_v17, %v1974_v15 }
 0x1e4   : > { %2348 = vst [vmem:[%s3307_s10 + $0x188] sm:$0xff] %v2284_v18 }
 0x1e5   : > { %v1689_v19 = vpop.f32.mrb[100].mxu0  ;;  %v1978_v20 = vpop.f32.mrb[100].mxu1 }
 0x1e6   : > { %v1691_v21 = vpop.f32.mrb[101].mxu0  ;;  %v1979_v22 = vadd.f32 %v1978_v20, %v1689_v19  ;;  %v1980_v23 = vpop.f32.mrb[101].mxu1 }
 0x1e7   : > { %v1692_v24 = vpop.f32.mrb[102].mxu0  ;;  %v1981_v25 = vpop.f32.mrb[102].mxu1 }
 0x1e8   : > { %v1694_v26 = vpop.f32.mrb[103].mxu0  ;;  %v2285_v27 = vadd.f32 %v3299_v17, %v1979_v22  ;;  %v1982_v28 = vadd.f32 %v1981_v25, %v1692_v24  ;;  %v1983_v29 = vpop.f32.mrb[103].mxu1 }
 0x1ea   : > { %2349 = vst [vmem:[%s3307_s10 + $0x190] sm:$0xff] %v2285_v27  ;;  %v2286_v30 = vadd.f32 %v3299_v17, %v1982_v28 }
 0x1ec   : > { %2350 = vst [vmem:[%s3307_s10 + $0x198] sm:$0xff] %v2286_v30 }
 0x1ed   : > { %v1697_v31 = vpop.f32.mrb[104].mxu0  ;;  %v1986_v32 = vpop.f32.mrb[104].mxu1 }
 0x1ee   : > { %v1699_v33 = vpop.f32.mrb[105].mxu0  ;;  %v1987_v34 = vadd.f32 %v1986_v32, %v1697_v31  ;;  %v1988_v35 = vpop.f32.mrb[105].mxu1 }
 0x1ef   : > { %v1700_v36 = vpop.f32.mrb[106].mxu0  ;;  %v1989_v37 = vpop.f32.mrb[106].mxu1 }
 0x1f0   : > { %v1702_v38 = vpop.f32.mrb[107].mxu0  ;;  %v2287_v39 = vadd.f32 %v3299_v17, %v1987_v34  ;;  %v1990_v40 = vadd.f32 %v1989_v37, %v1700_v36  ;;  %v1991_v41 = vpop.f32.mrb[107].mxu1 }
 0x1f2   : > { %2351 = vst [vmem:[%s3307_s10 + $0x1a0] sm:$0xff] %v2287_v39  ;;  %v2288_v42 = vadd.f32 %v3299_v17, %v1990_v40 }
 0x1f4   : > { %2352 = vst [vmem:[%s3307_s10 + $0x1a8] sm:$0xff] %v2288_v42 }
 0x1f5   : > { %v1705_v43 = vpop.f32.mrb[108].mxu0  ;;  %v1994_v44 = vpop.f32.mrb[108].mxu1 }
 0x1f6   : > { %v1707_v45 = vpop.f32.mrb[109].mxu0  ;;  %v1995_v46 = vadd.f32 %v1994_v44, %v1705_v43  ;;  %v1996_v47 = vpop.f32.mrb[109].mxu1 }
 0x1f7   : > { %v1708_v48 = vpop.f32.mrb[110].mxu0  ;;  %v1997_v49 = vpop.f32.mrb[110].mxu1 }
 0x1f8   : > { %v1710_v50 = vpop.f32.mrb[111].mxu0  ;;  %v2289_v51 = vadd.f32 %v3299_v17, %v1995_v46  ;;  %v1998_v52 = vadd.f32 %v1997_v49, %v1708_v48  ;;  %v1999_v53 = vpop.f32.mrb[111].mxu1 }
 0x1fa   : > { %2353 = vst [vmem:[%s3307_s10 + $0x1b0] sm:$0xff] %v2289_v51  ;;  %v2290_v54 = vadd.f32 %v3299_v17, %v1998_v52 }
 0x1fc   : > { %2354 = vst [vmem:[%s3307_s10 + $0x1b8] sm:$0xff] %v2290_v54 }
 0x1fd   : > { %v1713_v55 = vpop.f32.mrb[112].mxu0  ;;  %v2002_v56 = vpop.f32.mrb[112].mxu1 }
 0x1fe   : > { %v1715_v57 = vpop.f32.mrb[113].mxu0  ;;  %v2003_v58 = vadd.f32 %v2002_v56, %v1713_v55  ;;  %v2004_v59 = vpop.f32.mrb[113].mxu1 }
 0x1ff   : > { %v1716_v60 = vpop.f32.mrb[114].mxu0  ;;  %v2005_v61 = vpop.f32.mrb[114].mxu1 }
 0x200   : > { %v1718_v62 = vpop.f32.mrb[115].mxu0  ;;  %v2291_v63 = vadd.f32 %v3299_v17, %v2003_v58  ;;  %v2006_v0 = vadd.f32 %v2005_v61, %v1716_v60  ;;  %v2007_v1 = vpop.f32.mrb[115].mxu1 }
 0x202   : > { %2355 = vst [vmem:[%s3307_s10 + $0x1c0] sm:$0xff] %v2291_v63  ;;  %v2292_v2 = vadd.f32 %v3299_v17, %v2006_v0 }
 0x204   : > { %2356 = vst [vmem:[%s3307_s10 + $0x1c8] sm:$0xff] %v2292_v2 }
 0x205   : > { %v1721_v3 = vpop.f32.mrb[116].mxu0  ;;  %v2010_v4 = vpop.f32.mrb[116].mxu1 }
 0x206   : > { %v1723_v5 = vpop.f32.mrb[117].mxu0  ;;  %v2011_v6 = vadd.f32 %v2010_v4, %v1721_v3  ;;  %v2012_v7 = vpop.f32.mrb[117].mxu1 }
 0x207   : > { %v1724_v8 = vpop.f32.mrb[118].mxu0  ;;  %v2013_v9 = vpop.f32.mrb[118].mxu1 }
 0x208   : > { %v1726_v10 = vpop.f32.mrb[119].mxu0  ;;  %v2293_v11 = vadd.f32 %v3299_v17, %v2011_v6  ;;  %v2014_v12 = vadd.f32 %v2013_v9, %v1724_v8  ;;  %v2015_v13 = vpop.f32.mrb[119].mxu1 }
 0x20a   : > { %2357 = vst [vmem:[%s3307_s10 + $0x1d0] sm:$0xff] %v2293_v11  ;;  %v2294_v14 = vadd.f32 %v3299_v17, %v2014_v12 }
 0x20c   : > { %2358 = vst [vmem:[%s3307_s10 + $0x1d8] sm:$0xff] %v2294_v14 }
 0x20d   : > { %v1729_v15 = vpop.f32.mrb[120].mxu0  ;;  %v2018_v16 = vpop.f32.mrb[120].mxu1 }
 0x20e   : > { %v1731_v18 = vpop.f32.mrb[121].mxu0  ;;  %v2019_v19 = vadd.f32 %v2018_v16, %v1729_v15  ;;  %v2020_v20 = vpop.f32.mrb[121].mxu1 }
 0x20f   : > { %v1732_v21 = vpop.f32.mrb[122].mxu0  ;;  %v2021_v22 = vpop.f32.mrb[122].mxu1 }
 0x210   : > { %v1734_v23 = vpop.f32.mrb[123].mxu0  ;;  %v2295_v24 = vadd.f32 %v3299_v17, %v2019_v19  ;;  %v2022_v25 = vadd.f32 %v2021_v22, %v1732_v21  ;;  %v2023_v26 = vpop.f32.mrb[123].mxu1 }
 0x212   : > { %2359 = vst [vmem:[%s3307_s10 + $0x1e0] sm:$0xff] %v2295_v24  ;;  %v2296_v27 = vadd.f32 %v3299_v17, %v2022_v25 }
 0x214   : > { %2360 = vst [vmem:[%s3307_s10 + $0x1e8] sm:$0xff] %v2296_v27 }
 0x215   : > { %v1737_v28 = vpop.f32.mrb[124].mxu0  ;;  %v2026_v29 = vpop.f32.mrb[124].mxu1 }
 0x216   : > { %v1739_v30 = vpop.f32.mrb[125].mxu0  ;;  %v2027_v31 = vadd.f32 %v2026_v29, %v1737_v28  ;;  %v2028_v32 = vpop.f32.mrb[125].mxu1 }
 0x217   : > { %v1740_v33 = vpop.f32.mrb[126].mxu0  ;;  %v2029_v34 = vpop.f32.mrb[126].mxu1 }
 0x218   : > { %v1742_v35 = vpop.f32.mrb[127].mxu0  ;;  %v2297_v36 = vadd.f32 %v3299_v17, %v2027_v31  ;;  %v2030_v37 = vadd.f32 %v2029_v34, %v1740_v33  ;;  %v2031_v38 = vpop.f32.mrb[127].mxu1 }
 0x21a   : > { %2361 = vst [vmem:[%s3307_s10 + $0x1f0] sm:$0xff] %v2297_v36  ;;  %v2298_v39 = vadd.f32 %v3299_v17, %v2030_v37 }
 0x21c   : > { %2362 = vst [vmem:[%s3307_s10 + $0x1f8] sm:$0xff] %v2298_v39 }
 0x21d PF: > { %s13_s16 = sadd.s32 1, %s2985_s16   ;;  %s3471_s12 = smov %s2977_s14 }
 0x21e   : > { %p10_p7 = scmp.ge.s32.totalorder %s13_s16, 6   ;;  %s3472_s13 = smov %s2981_s15 }
 0x21f   : > { %s3473_s14 = smov %s3476_s17  ;;  %s3474_s15 = smov %s3480_s18 }
 0x220   :  { %12 = sbr.rel (!%p10_p7) target bundleno = 3 (0x3), region = 76 }

</bundles_post_ra>
